<compile_context>
chip_gen: v7x
topology: tpu7x:2x2x1
jax: 0.10.0
libtpu: 0.0.40
codegen_flags: <defaults>
</compile_context>

<pallas_src>
import functools

import jax
import jax.numpy as jnp
from jax.experimental import pallas as pl
from jax.experimental.pallas import tpu as pltpu

EMBEDDING_DIM = 4
HIDDEN = 48
NUM_LAYERS = 4
NUM_DIRS = 2
OUTPUT_DIM = 3755
LANE = 128
GATE_WIDTH = 3 * LANE                                  # gate blocks [r | z | n], 128 lanes each;
                                                       # fwd dir in lanes [0,48), bwd in [48,96) of a block
OUT_PAD = ((OUTPUT_DIM + LANE - 1) // LANE) * LANE     # 3840 = 30 * 128
NEG_BIG = -1e30                                        # bias for padded logit columns


# ----------------------------------------------------------------------------
# Fused kernel: 4 BiGRU layers + fc1 + log_softmax, fully unrolled over time.
# ----------------------------------------------------------------------------
def _gru_model_kernel(lens_ref, x_ref, w_ih0_ref, w_ih_ref, w_hh_ref,
                      b_ih_ref, b_hh_ref, fc_w_hbm, fc_b_ref,
                      out_ref, gi_scr, act_scr, fc_w_vmem, fc_sem, *, T):
    H = HIDDEN
    Bp = lens_ref.shape[0]                             # batch padded to a sublane multiple (8)

    # Prefetch the bf16 fc1 weight HBM -> VMEM; the DMA overlaps the whole recurrence.
    fc_copy = pltpu.make_async_copy(fc_w_hbm, fc_w_vmem, fc_sem)
    fc_copy.start()

    lens = lens_ref[...]                               # (Bp, 1) int32

    # Hoisted lane masks (built exactly once, reused by every layer/step).
    lane_gw = jax.lax.broadcasted_iota(jnp.int32, (Bp, GATE_WIDTH), 1)
    fwd_gate_lanes = (lane_gw & (LANE - 1)) < H        # fwd sub-lanes of every gate block
    is_fwd_half = fwd_gate_lanes[:, 0:LANE]            # lanes [0,48) fwd / [48,96) bwd in the state
    # Per-step validity for the packed fwd|bwd state: step s advances forward time s
    # and backward time T-1-s.  pack_padded semantics: invalid steps do not update h.
    step_masks = []
    for s_ in range(T):
        thr = jnp.where(is_fwd_half, jnp.int32(s_), jnp.int32(T - 1 - s_))
        step_masks.append(lens > thr)                  # (Bp, 128) bool

    h = None
    for layer in range(NUM_LAYERS):
        # ---- Input projection hoisted out of the recurrence: ONE matmul per layer
        #      covering both directions and all T timesteps, written to VMEM scratch.
        if layer == 0:
            gi_scr[...] = (jnp.dot(x_ref[...], w_ih0_ref[...],
                                   preferred_element_type=jnp.float32)
                           + b_ih_ref[0])
        else:
            gi_scr[...] = (jnp.dot(act_scr[:, 0:2 * H], w_ih_ref[layer - 1],
                                   preferred_element_type=jnp.float32)
                           + b_ih_ref[layer])

        w_hh = w_hh_ref[layer]                         # (96, 384), block-diagonal over dirs
        b_hh = b_hh_ref[layer]                         # (1, 384)
        # TODO(perf): w_hh could be staged in the MXU across all T steps via
        # pltpu.matmul_push_rhs/matmul_acc_lhs/matmul_pop; relying on Mosaic hoisting here.

        # ---- Serial recurrence; both directions share one vreg-wide state:
        #      h[:, 0:48] = forward hidden, h[:, 48:96] = backward hidden, rest pad (stays 0).
        h = jnp.zeros((Bp, LANE), jnp.float32)
        for s_ in range(T):
            tf, tb = s_, T - 1 - s_
            gi_f = gi_scr[tf * Bp:(tf + 1) * Bp, :]    # (Bp, 384) fwd-time gates
            gi_b = gi_scr[tb * Bp:(tb + 1) * Bp, :]    # (Bp, 384) bwd-time gates
            gi = jnp.where(fwd_gate_lanes, gi_f, gi_b)                 # VPU select, no lane moves
            gh = jnp.dot(h[:, 0:2 * H], w_hh,
                         preferred_element_type=jnp.float32) + b_hh    # ONE matmul / step
            rz = jax.nn.sigmoid(gi[:, 0:2 * LANE] + gh[:, 0:2 * LANE])
            r = rz[:, 0:LANE]
            z = rz[:, LANE:2 * LANE]
            n = jnp.tanh(gi[:, 2 * LANE:] + r * gh[:, 2 * LANE:])
            h_new = (1.0 - z) * n + z * h
            h = jnp.where(step_masks[s_], h_new, h)    # padded steps keep previous hidden
            if layer < NUM_LAYERS - 1:
                # Layer output feeding layer+1: fwd hidden belongs to time tf, bwd to time tb.
                act_scr[tf * Bp:(tf + 1) * Bp, 0:H] = h[:, 0:H]
                act_scr[tb * Bp:(tb + 1) * Bp, H:2 * H] = h[:, H:2 * H]

    # ---- fc1 + log_softmax.  h already holds concat([h_n[-2], h_n[-1]]) in lanes 0..95.
    fc_copy.wait()
    logits = (jnp.dot(h[:, 0:2 * H].astype(jnp.bfloat16), fc_w_vmem[...],
                      preferred_element_type=jnp.float32)
              + fc_b_ref[...])                         # (Bp, OUT_PAD); padded cols ~ -1e30
    m = jnp.max(logits, axis=-1, keepdims=True)
    shifted = logits - m
    lse = jnp.log(jnp.sum(jnp.exp(shifted), axis=-1, keepdims=True))
    out_ref[...] = shifted - lse                       # lane-dense, full-sublane store


def _full_spec(shape):
    return pl.BlockSpec(shape, lambda i, n=len(shape): (0,) * n)


@jax.jit
def gru_model_forward(x_btd, x_len, params):
    B, T, D = x_btd.shape
    Bp = ((B + 7) // 8) * 8                            # pad batch to a sublane multiple

    # Time-major layout: row t*Bp + b holds x[b, t, :].  Padded batch rows get len=0,
    # so they never update the hidden state.
    x_pad = jnp.pad(x_btd.astype(jnp.float32), ((0, Bp - B), (0, 0), (0, 0)))
    x_tm = jnp.transpose(x_pad, (1, 0, 2)).reshape(T * Bp, D)
    lens = jnp.pad(x_len.astype(jnp.int32).reshape(B, 1), ((0, Bp - B), (0, 0)))

    kernel = functools.partial(_gru_model_kernel, T=T)
    out = pl.pallas_call(
        kernel,
        grid=(1,),
        in_specs=[
            _full_spec((Bp, 1)),                       # lens
            _full_spec((T * Bp, D)),                   # x, time-major
            _full_spec(params["w_ih0"].shape),         # (D, 384)
            _full_spec(params["w_ih"].shape),          # (3, 96, 384)
            _full_spec(params["w_hh"].shape),          # (4, 96, 384)
            _full_spec(params["b_ih"].shape),          # (4, 1, 384)
            _full_spec(params["b_hh"].shape),          # (4, 1, 384)
            pl.BlockSpec(memory_space=pl.ANY),         # fc_w stays in HBM; kernel DMAs it
            _full_spec(params["fc_b"].shape),          # (1, 3840)
        ],
        out_specs=_full_spec((Bp, OUT_PAD)),
        out_shape=jax.ShapeDtypeStruct((Bp, OUT_PAD), jnp.float32),
        scratch_shapes=[
            pltpu.VMEM((T * Bp, GATE_WIDTH), jnp.float32),    # per-layer input-gate preacts
            pltpu.VMEM((T * Bp, LANE), jnp.float32),          # per-layer output activations
            pltpu.VMEM((2 * HIDDEN, OUT_PAD), jnp.bfloat16),  # fc1 weight landing buffer
            pltpu.SemaphoreType.DMA,                          # fc1-weight DMA completion
        ],
        compiler_params=pltpu.CompilerParams(dimension_semantics=("arbitrary",)),
    )(lens, x_tm, params["w_ih0"], params["w_ih"], params["w_hh"],
      params["b_ih"], params["b_hh"], params["fc_w"], params["fc_b"])
    return out[:B, :OUTPUT_DIM]                        # crop batch + lane padding


# ----------------------------------------------------------------------------
# Parameter init (deterministic, PyTorch-style uniform(-1/sqrt(H), 1/sqrt(H))),
# repacked into the kernel's combined-direction gate layout.
# ----------------------------------------------------------------------------
def _pack_ih(w_f, w_b):
    """PyTorch (3H, in) input weights (fwd, bwd) -> (in, 384): gate blocks [r|z|n] of
    128 lanes, forward dir in lanes [0,48) and backward in [48,96) of each block."""
    H = HIDDEN
    out = jnp.zeros((w_f.shape[1], GATE_WIDTH), jnp.float32)
    for g in range(3):
        out = out.at[:, g * LANE:g * LANE + H].set(w_f[g * H:(g + 1) * H, :].T)
        out = out.at[:, g * LANE + H:g * LANE + 2 * H].set(w_b[g * H:(g + 1) * H, :].T)
    return out


def _pack_hh(w_f, w_b):
    """PyTorch (3H, H) recurrent weights -> block-diagonal (2H, 384): rows [0,48)=h_fwd
    feed only forward gate lanes, rows [48,96)=h_bwd feed only backward gate lanes."""
    H = HIDDEN
    out = jnp.zeros((2 * H, GATE_WIDTH), jnp.float32)
    for g in range(3):
        out = out.at[0:H, g * LANE:g * LANE + H].set(w_f[g * H:(g + 1) * H, :].T)
        out = out.at[H:2 * H, g * LANE + H:g * LANE + 2 * H].set(w_b[g * H:(g + 1) * H, :].T)
    return out


def _pack_bias(b_f, b_b):
    H = HIDDEN
    out = jnp.zeros((1, GATE_WIDTH), jnp.float32)
    for g in range(3):
        out = out.at[0, g * LANE:g * LANE + H].set(b_f[g * H:(g + 1) * H])
        out = out.at[0, g * LANE + H:g * LANE + 2 * H].set(b_b[g * H:(g + 1) * H])
    return out


def init_params(key):
    H = HIDDEN
    k = 1.0 / (H ** 0.5)
    keys = jax.random.split(key, NUM_LAYERS * NUM_DIRS * 4 + 2)
    ki = 0
    w_ih0 = None
    w_ih, w_hh, b_ih, b_hh = [], [], [], []
    for layer in range(NUM_LAYERS):
        in_dim = EMBEDDING_DIM if layer == 0 else NUM_DIRS * H
        raw = []
        for _d in range(NUM_DIRS):
            wi = jax.random.uniform(keys[ki], (3 * H, in_dim), minval=-k, maxval=k); ki += 1
            wh = jax.random.uniform(keys[ki], (3 * H, H), minval=-k, maxval=k); ki += 1
            bi = jax.random.uniform(keys[ki], (3 * H,), minval=-k, maxval=k); ki += 1
            bh = jax.random.uniform(keys[ki], (3 * H,), minval=-k, maxval=k); ki += 1
            raw.append((wi, wh, bi, bh))
        (wif, whf, bif, bhf), (wib, whb, bib, bhb) = raw
        packed_ih = _pack_ih(wif, wib)
        if layer == 0:
            w_ih0 = packed_ih                          # (D, 384)
        else:
            w_ih.append(packed_ih)                     # (96, 384)
        w_hh.append(_pack_hh(whf, whb))                # (96, 384)
        b_ih.append(_pack_bias(bif, bib))              # (1, 384)
        b_hh.append(_pack_bias(bhf, bhb))              # (1, 384)

    kb = 1.0 / ((NUM_DIRS * H) ** 0.5)
    fc_w_pt = jax.random.uniform(keys[ki], (OUTPUT_DIM, NUM_DIRS * H), minval=-kb, maxval=kb); ki += 1
    fc_b_pt = jax.random.uniform(keys[ki], (OUTPUT_DIM,), minval=-kb, maxval=kb)
    # bf16 fc1 weight (halves the dominant HBM transfer), columns padded to 3840.
    fc_w = jnp.zeros((NUM_DIRS * H, OUT_PAD), jnp.float32)
    fc_w = fc_w.at[:, :OUTPUT_DIM].set(fc_w_pt.T).astype(jnp.bfloat16)
    # Padded logit columns get a huge negative bias so they vanish from log_softmax.
    fc_b = jnp.full((1, OUT_PAD), NEG_BIG, jnp.float32)
    fc_b = fc_b.at[0, :OUTPUT_DIM].set(fc_b_pt)
    return {
        "w_ih0": w_ih0,                  # (D, 384)          layer-0 input weights (both dirs)
        "w_ih": jnp.stack(w_ih),         # (3, 96, 384)      layers 1..3 input weights
        "w_hh": jnp.stack(w_hh),         # (4, 96, 384)      recurrent weights (block-diag)
        "b_ih": jnp.stack(b_ih),         # (4, 1, 384)
        "b_hh": jnp.stack(b_hh),         # (4, 1, 384)
        "fc_w": fc_w,                    # (96, 3840) bf16   stays in HBM; DMA'd in-kernel
        "fc_b": fc_b,                    # (1, 3840)  f32
    }


if __name__ == "__main__":
    key = jax.random.PRNGKey(0)
    k_param, k_x = jax.random.split(key)

    B, T = 2, 8
    x = jax.random.normal(k_x, (B, T, EMBEDDING_DIM), dtype=jnp.float32)
    # pack_padded_sequence(enforce_sorted=True) uses descending lengths; masking does
    # not require it, but keep the same convention (all lens <= T).
    x_len = jnp.array([8, 5], dtype=jnp.int32)

    params = init_params(k_param)
    out = gru_model_forward(x, x_len, params)
    out = jax.block_until_ready(out)

    assert out.shape == (B, OUTPUT_DIM)
    assert bool(jnp.all(jnp.isfinite(out)))
    print("KERNEL_OK")
</pallas_src>

<mosaic_0001>
module attributes {stable_mosaic.version = 11 : i64} {
  func.func @_gru_model_kernel(%arg0: i32, %arg1: memref<8x1xi32, #tpu.memory_space<vmem>>, %arg2: memref<64x4xf32, #tpu.memory_space<vmem>>, %arg3: memref<4x384xf32, #tpu.memory_space<vmem>>, %arg4: memref<3x96x384xf32, #tpu.memory_space<vmem>>, %arg5: memref<4x96x384xf32, #tpu.memory_space<vmem>>, %arg6: memref<4x1x384xf32, #tpu.memory_space<vmem>>, %arg7: memref<4x1x384xf32, #tpu.memory_space<vmem>>, %arg8: memref<96x3840xbf16, #tpu.memory_space<any>>, %arg9: memref<1x3840xf32, #tpu.memory_space<vmem>>, %arg10: memref<8x3840xf32, #tpu.memory_space<vmem>>, %arg11: memref<64x384xf32, #tpu.memory_space<vmem>>, %arg12: memref<64x128xf32, #tpu.memory_space<vmem>>, %arg13: memref<96x3840xbf16, #tpu.memory_space<vmem>>, %arg14: memref<!tpu.dma_semaphore, #tpu.memory_space<semaphore_mem>>) attributes {dimension_semantics = [#tpu.dimension_semantics<arbitrary>], iteration_bounds = array<i64: 1>, scalar_prefetch = 0 : i64, scratch_operands = 4 : i64, tpu.core_type = #tpu.core_type<tc>, window_params = [{pipeline_mode = #tpu.pipeline_mode<synchronous>, transform_indices = @transform_0, window_bounds = array<i64: 8, 1>}, {pipeline_mode = #tpu.pipeline_mode<synchronous>, transform_indices = @transform_1, window_bounds = array<i64: 64, 4>}, {pipeline_mode = #tpu.pipeline_mode<synchronous>, transform_indices = @transform_2, window_bounds = array<i64: 4, 384>}, {pipeline_mode = #tpu.pipeline_mode<synchronous>, transform_indices = @transform_3, window_bounds = array<i64: 3, 96, 384>}, {pipeline_mode = #tpu.pipeline_mode<synchronous>, transform_indices = @transform_4, window_bounds = array<i64: 4, 96, 384>}, {pipeline_mode = #tpu.pipeline_mode<synchronous>, transform_indices = @transform_5, window_bounds = array<i64: 4, 1, 384>}, {pipeline_mode = #tpu.pipeline_mode<synchronous>, transform_indices = @transform_6, window_bounds = array<i64: 4, 1, 384>}, {}, {pipeline_mode = #tpu.pipeline_mode<synchronous>, transform_indices = @transform_8, window_bounds = array<i64: 1, 3840>}, {pipeline_mode = #tpu.pipeline_mode<synchronous>, transform_indices = @transform_9, window_bounds = array<i64: 8, 3840>}]} {
    tpu.enqueue_dma source(%arg8 : memref<96x3840xbf16, #tpu.memory_space<any>>) target(%arg13 : memref<96x3840xbf16, #tpu.memory_space<vmem>>) target_semaphore(%arg14 : memref<!tpu.dma_semaphore, #tpu.memory_space<semaphore_mem>>)
    %c0 = arith.constant 0 : index
    %c0_0 = arith.constant 0 : index
    %0 = vector.load %arg1[%c0, %c0_0] : memref<8x1xi32, #tpu.memory_space<vmem>>, vector<8x1xi32>
    %1 = tpu.iota {dimensions = array<i32: 1>} : vector<8x384xi32>
    %c127_i32 = arith.constant 127 : i32
    %2 = vector.broadcast %c127_i32 : i32 to vector<8x384xi32>
    %3 = arith.andi %1, %2 : vector<8x384xi32>
    %c48_i32 = arith.constant 48 : i32
    %4 = vector.broadcast %c48_i32 : i32 to vector<8x384xi32>
    %5 = arith.cmpi slt, %3, %4 : vector<8x384xi32>
    %6 = vector.extract_strided_slice %5 {offsets = [0, 0], sizes = [8, 128], strides = [1, 1]} : vector<8x384xi1> to vector<8x128xi1>
    %c0_i32 = arith.constant 0 : i32
    %c7_i32 = arith.constant 7 : i32
    %7 = vector.broadcast %c0_i32 : i32 to vector<8x128xi32>
    %8 = vector.broadcast %c7_i32 : i32 to vector<8x128xi32>
    %9 = arith.select %6, %7, %8 : vector<8x128xi1>, vector<8x128xi32>
    %10 = vector.broadcast %0 : vector<8x1xi32> to vector<8x128xi32>
    %11 = arith.cmpi sgt, %10, %9 : vector<8x128xi32>
    %c1_i32 = arith.constant 1 : i32
    %c6_i32 = arith.constant 6 : i32
    %12 = vector.broadcast %c1_i32 : i32 to vector<8x128xi32>
    %13 = vector.broadcast %c6_i32 : i32 to vector<8x128xi32>
    %14 = arith.select %6, %12, %13 : vector<8x128xi1>, vector<8x128xi32>
    %15 = vector.broadcast %0 : vector<8x1xi32> to vector<8x128xi32>
    %16 = arith.cmpi sgt, %15, %14 : vector<8x128xi32>
    %c2_i32 = arith.constant 2 : i32
    %c5_i32 = arith.constant 5 : i32
    %17 = vector.broadcast %c2_i32 : i32 to vector<8x128xi32>
    %18 = vector.broadcast %c5_i32 : i32 to vector<8x128xi32>
    %19 = arith.select %6, %17, %18 : vector<8x128xi1>, vector<8x128xi32>
    %20 = vector.broadcast %0 : vector<8x1xi32> to vector<8x128xi32>
    %21 = arith.cmpi sgt, %20, %19 : vector<8x128xi32>
    %c3_i32 = arith.constant 3 : i32
    %c4_i32 = arith.constant 4 : i32
    %22 = vector.broadcast %c3_i32 : i32 to vector<8x128xi32>
    %23 = vector.broadcast %c4_i32 : i32 to vector<8x128xi32>
    %24 = arith.select %6, %22, %23 : vector<8x128xi1>, vector<8x128xi32>
    %25 = vector.broadcast %0 : vector<8x1xi32> to vector<8x128xi32>
    %26 = arith.cmpi sgt, %25, %24 : vector<8x128xi32>
    %c4_i32_1 = arith.constant 4 : i32
    %c3_i32_2 = arith.constant 3 : i32
    %27 = vector.broadcast %c4_i32_1 : i32 to vector<8x128xi32>
    %28 = vector.broadcast %c3_i32_2 : i32 to vector<8x128xi32>
    %29 = arith.select %6, %27, %28 : vector<8x128xi1>, vector<8x128xi32>
    %30 = vector.broadcast %0 : vector<8x1xi32> to vector<8x128xi32>
    %31 = arith.cmpi sgt, %30, %29 : vector<8x128xi32>
    %c5_i32_3 = arith.constant 5 : i32
    %c2_i32_4 = arith.constant 2 : i32
    %32 = vector.broadcast %c5_i32_3 : i32 to vector<8x128xi32>
    %33 = vector.broadcast %c2_i32_4 : i32 to vector<8x128xi32>
    %34 = arith.select %6, %32, %33 : vector<8x128xi1>, vector<8x128xi32>
    %35 = vector.broadcast %0 : vector<8x1xi32> to vector<8x128xi32>
    %36 = arith.cmpi sgt, %35, %34 : vector<8x128xi32>
    %c6_i32_5 = arith.constant 6 : i32
    %c1_i32_6 = arith.constant 1 : i32
    %37 = vector.broadcast %c6_i32_5 : i32 to vector<8x128xi32>
    %38 = vector.broadcast %c1_i32_6 : i32 to vector<8x128xi32>
    %39 = arith.select %6, %37, %38 : vector<8x128xi1>, vector<8x128xi32>
    %40 = vector.broadcast %0 : vector<8x1xi32> to vector<8x128xi32>
    %41 = arith.cmpi sgt, %40, %39 : vector<8x128xi32>
    %c7_i32_7 = arith.constant 7 : i32
    %c0_i32_8 = arith.constant 0 : i32
    %42 = vector.broadcast %c7_i32_7 : i32 to vector<8x128xi32>
    %43 = vector.broadcast %c0_i32_8 : i32 to vector<8x128xi32>
    %44 = arith.select %6, %42, %43 : vector<8x128xi1>, vector<8x128xi32>
    %45 = vector.broadcast %0 : vector<8x1xi32> to vector<8x128xi32>
    %46 = arith.cmpi sgt, %45, %44 : vector<8x128xi32>
    %c0_9 = arith.constant 0 : index
    %c0_10 = arith.constant 0 : index
    %47 = vector.load %arg2[%c0_9, %c0_10] : memref<64x4xf32, #tpu.memory_space<vmem>>, vector<64x4xf32>
    %c0_11 = arith.constant 0 : index
    %c0_12 = arith.constant 0 : index
    %48 = vector.load %arg3[%c0_11, %c0_12] : memref<4x384xf32, #tpu.memory_space<vmem>>, vector<4x384xf32>
    %cst = arith.constant dense<0.000000e+00> : vector<64x384xf32>
    %49 = tpu.matmul %47, %48, %cst {dimension_numbers = #tpu.dot_dimension_numbers<[1], [0], [0], [1], [0, 0, 1, 1], [], []>} : vector<64x4xf32>, vector<4x384xf32>, vector<64x384xf32> -> vector<64x384xf32>
    %c0_13 = arith.constant 0 : index
    %c0_14 = arith.constant 0 : index
    %c0_15 = arith.constant 0 : index
    %50 = vector.load %arg6[%c0_13, %c0_14, %c0_15] : memref<4x1x384xf32, #tpu.memory_space<vmem>>, vector<1x1x384xf32>
    %51 = vector.shape_cast %50 : vector<1x1x384xf32> to vector<1x384xf32>
    %52 = vector.broadcast %51 : vector<1x384xf32> to vector<64x384xf32>
    %53 = arith.addf %49, %52 : vector<64x384xf32>
    %c0_16 = arith.constant 0 : index
    %c0_17 = arith.constant 0 : index
    %54 = vector.load %arg11[%c0_16, %c0_17] : memref<64x384xf32, #tpu.memory_space<vmem>>, vector<64x384xf32>
    tpu.vector_store %arg11[%c0_16, %c0_17], %53 {strides = array<i32>} : memref<64x384xf32, #tpu.memory_space<vmem>>, vector<64x384xf32>,
    %c0_18 = arith.constant 0 : index
    %c0_19 = arith.constant 0 : index
    %c0_20 = arith.constant 0 : index
    %55 = vector.load %arg5[%c0_18, %c0_19, %c0_20] : memref<4x96x384xf32, #tpu.memory_space<vmem>>, vector<1x96x384xf32>
    %56 = vector.shape_cast %55 : vector<1x96x384xf32> to vector<96x384xf32>
    %c0_21 = arith.constant 0 : index
    %c0_22 = arith.constant 0 : index
    %c0_23 = arith.constant 0 : index
    %57 = vector.load %arg7[%c0_21, %c0_22, %c0_23] : memref<4x1x384xf32, #tpu.memory_space<vmem>>, vector<1x1x384xf32>
    %58 = vector.shape_cast %57 : vector<1x1x384xf32> to vector<1x384xf32>
    %cst_24 = arith.constant 0.000000e+00 : f32
    %59 = vector.broadcast %cst_24 : f32 to vector<8x128xf32>
    %c0_25 = arith.constant 0 : index
    %c0_26 = arith.constant 0 : index
    %60 = vector.load %arg11[%c0_25, %c0_26] : memref<64x384xf32, #tpu.memory_space<vmem>>, vector<8x384xf32>
    %c56 = arith.constant 56 : index
    %c0_27 = arith.constant 0 : index
    %61 = vector.load %arg11[%c56, %c0_27] : memref<64x384xf32, #tpu.memory_space<vmem>>, vector<8x384xf32>
    %62 = arith.select %5, %60, %61 : vector<8x384xi1>, vector<8x384xf32>
    %63 = vector.extract_strided_slice %59 {offsets = [0, 0], sizes = [8, 96], strides = [1, 1]} : vector<8x128xf32> to vector<8x96xf32>
    %cst_28 = arith.constant dense<0.000000e+00> : vector<8x384xf32>
    %64 = tpu.matmul %63, %56, %cst_28 {dimension_numbers = #tpu.dot_dimension_numbers<[1], [0], [0], [1], [0, 0, 1, 1], [], []>} : vector<8x96xf32>, vector<96x384xf32>, vector<8x384xf32> -> vector<8x384xf32>
    %65 = vector.broadcast %58 : vector<1x384xf32> to vector<8x384xf32>
    %66 = arith.addf %64, %65 : vector<8x384xf32>
    %67 = vector.extract_strided_slice %62 {offsets = [0, 0], sizes = [8, 256], strides = [1, 1]} : vector<8x384xf32> to vector<8x256xf32>
    %68 = vector.extract_strided_slice %66 {offsets = [0, 0], sizes = [8, 256], strides = [1, 1]} : vector<8x384xf32> to vector<8x256xf32>
    %69 = arith.addf %67, %68 : vector<8x256xf32>
    %70 = arith.negf %69 : vector<8x256xf32>
    %71 = math.exp %70 : vector<8x256xf32>
    %cst_29 = arith.constant 1.000000e+00 : f32
    %72 = vector.broadcast %cst_29 : f32 to vector<8x256xf32>
    %73 = arith.addf %72, %71 : vector<8x256xf32>
    %74 = arith.divf %72, %73 : vector<8x256xf32>
    %75 = vector.extract_strided_slice %74 {offsets = [0, 0], sizes = [8, 128], strides = [1, 1]} : vector<8x256xf32> to vector<8x128xf32>
    %76 = vector.extract_strided_slice %74 {offsets = [0, 128], sizes = [8, 128], strides = [1, 1]} : vector<8x256xf32> to vector<8x128xf32>
    %77 = vector.extract_strided_slice %62 {offsets = [0, 256], sizes = [8, 128], strides = [1, 1]} : vector<8x384xf32> to vector<8x128xf32>
    %78 = vector.extract_strided_slice %66 {offsets = [0, 256], sizes = [8, 128], strides = [1, 1]} : vector<8x384xf32> to vector<8x128xf32>
    %79 = arith.mulf %75, %78 : vector<8x128xf32>
    %80 = arith.addf %77, %79 : vector<8x128xf32>
    %81 = math.tanh %80 : vector<8x128xf32>
    %cst_30 = arith.constant 1.000000e+00 : f32
    %82 = vector.broadcast %cst_30 : f32 to vector<8x128xf32>
    %83 = arith.subf %82, %76 : vector<8x128xf32>
    %84 = arith.mulf %83, %81 : vector<8x128xf32>
    %85 = arith.mulf %76, %59 : vector<8x128xf32>
    %86 = arith.addf %84, %85 : vector<8x128xf32>
    %87 = arith.select %11, %86, %59 : vector<8x128xi1>, vector<8x128xf32>
    %88 = vector.extract_strided_slice %87 {offsets = [0, 0], sizes = [8, 48], strides = [1, 1]} : vector<8x128xf32> to vector<8x48xf32>
    %c0_31 = arith.constant 0 : index
    %c0_32 = arith.constant 0 : index
    %89 = vector.load %arg12[%c0_31, %c0_32] : memref<64x128xf32, #tpu.memory_space<vmem>>, vector<8x48xf32>
    tpu.vector_store %arg12[%c0_31, %c0_32], %88 {strides = array<i32>} : memref<64x128xf32, #tpu.memory_space<vmem>>, vector<8x48xf32>,
    %90 = vector.extract_strided_slice %87 {offsets = [0, 48], sizes = [8, 48], strides = [1, 1]} : vector<8x128xf32> to vector<8x48xf32>
    %c56_33 = arith.constant 56 : index
    %c48 = arith.constant 48 : index
    %91 = vector.load %arg12[%c56_33, %c48] : memref<64x128xf32, #tpu.memory_space<vmem>>, vector<8x48xf32>
    tpu.vector_store %arg12[%c56_33, %c48], %90 {strides = array<i32>} : memref<64x128xf32, #tpu.memory_space<vmem>>, vector<8x48xf32>,
    %c8 = arith.constant 8 : index
    %c0_34 = arith.constant 0 : index
    %92 = vector.load %arg11[%c8, %c0_34] : memref<64x384xf32, #tpu.memory_space<vmem>>, vector<8x384xf32>
    %c48_35 = arith.constant 48 : index
    %c0_36 = arith.constant 0 : index
    %93 = vector.load %arg11[%c48_35, %c0_36] : memref<64x384xf32, #tpu.memory_space<vmem>>, vector<8x384xf32>
    %94 = arith.select %5, %92, %93 : vector<8x384xi1>, vector<8x384xf32>
    %95 = vector.extract_strided_slice %87 {offsets = [0, 0], sizes = [8, 96], strides = [1, 1]} : vector<8x128xf32> to vector<8x96xf32>
    %cst_37 = arith.constant dense<0.000000e+00> : vector<8x384xf32>
    %96 = tpu.matmul %95, %56, %cst_37 {dimension_numbers = #tpu.dot_dimension_numbers<[1], [0], [0], [1], [0, 0, 1, 1], [], []>} : vector<8x96xf32>, vector<96x384xf32>, vector<8x384xf32> -> vector<8x384xf32>
    %97 = vector.broadcast %58 : vector<1x384xf32> to vector<8x384xf32>
    %98 = arith.addf %96, %97 : vector<8x384xf32>
    %99 = vector.extract_strided_slice %94 {offsets = [0, 0], sizes = [8, 256], strides = [1, 1]} : vector<8x384xf32> to vector<8x256xf32>
    %100 = vector.extract_strided_slice %98 {offsets = [0, 0], sizes = [8, 256], strides = [1, 1]} : vector<8x384xf32> to vector<8x256xf32>
    %101 = arith.addf %99, %100 : vector<8x256xf32>
    %102 = arith.negf %101 : vector<8x256xf32>
    %103 = math.exp %102 : vector<8x256xf32>
    %cst_38 = arith.constant 1.000000e+00 : f32
    %104 = vector.broadcast %cst_38 : f32 to vector<8x256xf32>
    %105 = arith.addf %104, %103 : vector<8x256xf32>
    %106 = arith.divf %104, %105 : vector<8x256xf32>
    %107 = vector.extract_strided_slice %106 {offsets = [0, 0], sizes = [8, 128], strides = [1, 1]} : vector<8x256xf32> to vector<8x128xf32>
    %108 = vector.extract_strided_slice %106 {offsets = [0, 128], sizes = [8, 128], strides = [1, 1]} : vector<8x256xf32> to vector<8x128xf32>
    %109 = vector.extract_strided_slice %94 {offsets = [0, 256], sizes = [8, 128], strides = [1, 1]} : vector<8x384xf32> to vector<8x128xf32>
    %110 = vector.extract_strided_slice %98 {offsets = [0, 256], sizes = [8, 128], strides = [1, 1]} : vector<8x384xf32> to vector<8x128xf32>
    %111 = arith.mulf %107, %110 : vector<8x128xf32>
    %112 = arith.addf %109, %111 : vector<8x128xf32>
    %113 = math.tanh %112 : vector<8x128xf32>
    %cst_39 = arith.constant 1.000000e+00 : f32
    %114 = vector.broadcast %cst_39 : f32 to vector<8x128xf32>
    %115 = arith.subf %114, %108 : vector<8x128xf32>
    %116 = arith.mulf %115, %113 : vector<8x128xf32>
    %117 = arith.mulf %108, %87 : vector<8x128xf32>
    %118 = arith.addf %116, %117 : vector<8x128xf32>
    %119 = arith.select %16, %118, %87 : vector<8x128xi1>, vector<8x128xf32>
    %120 = vector.extract_strided_slice %119 {offsets = [0, 0], sizes = [8, 48], strides = [1, 1]} : vector<8x128xf32> to vector<8x48xf32>
    %c8_40 = arith.constant 8 : index
    %c0_41 = arith.constant 0 : index
    %121 = vector.load %arg12[%c8_40, %c0_41] : memref<64x128xf32, #tpu.memory_space<vmem>>, vector<8x48xf32>
    tpu.vector_store %arg12[%c8_40, %c0_41], %120 {strides = array<i32>} : memref<64x128xf32, #tpu.memory_space<vmem>>, vector<8x48xf32>,
    %122 = vector.extract_strided_slice %119 {offsets = [0, 48], sizes = [8, 48], strides = [1, 1]} : vector<8x128xf32> to vector<8x48xf32>
    %c48_42 = arith.constant 48 : index
    %c48_43 = arith.constant 48 : index
    %123 = vector.load %arg12[%c48_42, %c48_43] : memref<64x128xf32, #tpu.memory_space<vmem>>, vector<8x48xf32>
    tpu.vector_store %arg12[%c48_42, %c48_43], %122 {strides = array<i32>} : memref<64x128xf32, #tpu.memory_space<vmem>>, vector<8x48xf32>,
    %c16 = arith.constant 16 : index
    %c0_44 = arith.constant 0 : index
    %124 = vector.load %arg11[%c16, %c0_44] : memref<64x384xf32, #tpu.memory_space<vmem>>, vector<8x384xf32>
    %c40 = arith.constant 40 : index
    %c0_45 = arith.constant 0 : index
    %125 = vector.load %arg11[%c40, %c0_45] : memref<64x384xf32, #tpu.memory_space<vmem>>, vector<8x384xf32>
    %126 = arith.select %5, %124, %125 : vector<8x384xi1>, vector<8x384xf32>
    %127 = vector.extract_strided_slice %119 {offsets = [0, 0], sizes = [8, 96], strides = [1, 1]} : vector<8x128xf32> to vector<8x96xf32>
    %cst_46 = arith.constant dense<0.000000e+00> : vector<8x384xf32>
    %128 = tpu.matmul %127, %56, %cst_46 {dimension_numbers = #tpu.dot_dimension_numbers<[1], [0], [0], [1], [0, 0, 1, 1], [], []>} : vector<8x96xf32>, vector<96x384xf32>, vector<8x384xf32> -> vector<8x384xf32>
    %129 = vector.broadcast %58 : vector<1x384xf32> to vector<8x384xf32>
    %130 = arith.addf %128, %129 : vector<8x384xf32>
    %131 = vector.extract_strided_slice %126 {offsets = [0, 0], sizes = [8, 256], strides = [1, 1]} : vector<8x384xf32> to vector<8x256xf32>
    %132 = vector.extract_strided_slice %130 {offsets = [0, 0], sizes = [8, 256], strides = [1, 1]} : vector<8x384xf32> to vector<8x256xf32>
    %133 = arith.addf %131, %132 : vector<8x256xf32>
    %134 = arith.negf %133 : vector<8x256xf32>
    %135 = math.exp %134 : vector<8x256xf32>
    %cst_47 = arith.constant 1.000000e+00 : f32
    %136 = vector.broadcast %cst_47 : f32 to vector<8x256xf32>
    %137 = arith.addf %136, %135 : vector<8x256xf32>
    %138 = arith.divf %136, %137 : vector<8x256xf32>
    %139 = vector.extract_strided_slice %138 {offsets = [0, 0], sizes = [8, 128], strides = [1, 1]} : vector<8x256xf32> to vector<8x128xf32>
    %140 = vector.extract_strided_slice %138 {offsets = [0, 128], sizes = [8, 128], strides = [1, 1]} : vector<8x256xf32> to vector<8x128xf32>
    %141 = vector.extract_strided_slice %126 {offsets = [0, 256], sizes = [8, 128], strides = [1, 1]} : vector<8x384xf32> to vector<8x128xf32>
    %142 = vector.extract_strided_slice %130 {offsets = [0, 256], sizes = [8, 128], strides = [1, 1]} : vector<8x384xf32> to vector<8x128xf32>
    %143 = arith.mulf %139, %142 : vector<8x128xf32>
    %144 = arith.addf %141, %143 : vector<8x128xf32>
    %145 = math.tanh %144 : vector<8x128xf32>
    %cst_48 = arith.constant 1.000000e+00 : f32
    %146 = vector.broadcast %cst_48 : f32 to vector<8x128xf32>
    %147 = arith.subf %146, %140 : vector<8x128xf32>
    %148 = arith.mulf %147, %145 : vector<8x128xf32>
    %149 = arith.mulf %140, %119 : vector<8x128xf32>
    %150 = arith.addf %148, %149 : vector<8x128xf32>
    %151 = arith.select %21, %150, %119 : vector<8x128xi1>, vector<8x128xf32>
    %152 = vector.extract_strided_slice %151 {offsets = [0, 0], sizes = [8, 48], strides = [1, 1]} : vector<8x128xf32> to vector<8x48xf32>
    %c16_49 = arith.constant 16 : index
    %c0_50 = arith.constant 0 : index
    %153 = vector.load %arg12[%c16_49, %c0_50] : memref<64x128xf32, #tpu.memory_space<vmem>>, vector<8x48xf32>
    tpu.vector_store %arg12[%c16_49, %c0_50], %152 {strides = array<i32>} : memref<64x128xf32, #tpu.memory_space<vmem>>, vector<8x48xf32>,
    %154 = vector.extract_strided_slice %151 {offsets = [0, 48], sizes = [8, 48], strides = [1, 1]} : vector<8x128xf32> to vector<8x48xf32>
    %c40_51 = arith.constant 40 : index
    %c48_52 = arith.constant 48 : index
    %155 = vector.load %arg12[%c40_51, %c48_52] : memref<64x128xf32, #tpu.memory_space<vmem>>, vector<8x48xf32>
    tpu.vector_store %arg12[%c40_51, %c48_52], %154 {strides = array<i32>} : memref<64x128xf32, #tpu.memory_space<vmem>>, vector<8x48xf32>,
    %c24 = arith.constant 24 : index
    %c0_53 = arith.constant 0 : index
    %156 = vector.load %arg11[%c24, %c0_53] : memref<64x384xf32, #tpu.memory_space<vmem>>, vector<8x384xf32>
    %c32 = arith.constant 32 : index
    %c0_54 = arith.constant 0 : index
    %157 = vector.load %arg11[%c32, %c0_54] : memref<64x384xf32, #tpu.memory_space<vmem>>, vector<8x384xf32>
    %158 = arith.select %5, %156, %157 : vector<8x384xi1>, vector<8x384xf32>
    %159 = vector.extract_strided_slice %151 {offsets = [0, 0], sizes = [8, 96], strides = [1, 1]} : vector<8x128xf32> to vector<8x96xf32>
    %cst_55 = arith.constant dense<0.000000e+00> : vector<8x384xf32>
    %160 = tpu.matmul %159, %56, %cst_55 {dimension_numbers = #tpu.dot_dimension_numbers<[1], [0], [0], [1], [0, 0, 1, 1], [], []>} : vector<8x96xf32>, vector<96x384xf32>, vector<8x384xf32> -> vector<8x384xf32>
    %161 = vector.broadcast %58 : vector<1x384xf32> to vector<8x384xf32>
    %162 = arith.addf %160, %161 : vector<8x384xf32>
    %163 = vector.extract_strided_slice %158 {offsets = [0, 0], sizes = [8, 256], strides = [1, 1]} : vector<8x384xf32> to vector<8x256xf32>
    %164 = vector.extract_strided_slice %162 {offsets = [0, 0], sizes = [8, 256], strides = [1, 1]} : vector<8x384xf32> to vector<8x256xf32>
    %165 = arith.addf %163, %164 : vector<8x256xf32>
    %166 = arith.negf %165 : vector<8x256xf32>
    %167 = math.exp %166 : vector<8x256xf32>
    %cst_56 = arith.constant 1.000000e+00 : f32
    %168 = vector.broadcast %cst_56 : f32 to vector<8x256xf32>
    %169 = arith.addf %168, %167 : vector<8x256xf32>
    %170 = arith.divf %168, %169 : vector<8x256xf32>
    %171 = vector.extract_strided_slice %170 {offsets = [0, 0], sizes = [8, 128], strides = [1, 1]} : vector<8x256xf32> to vector<8x128xf32>
    %172 = vector.extract_strided_slice %170 {offsets = [0, 128], sizes = [8, 128], strides = [1, 1]} : vector<8x256xf32> to vector<8x128xf32>
    %173 = vector.extract_strided_slice %158 {offsets = [0, 256], sizes = [8, 128], strides = [1, 1]} : vector<8x384xf32> to vector<8x128xf32>
    %174 = vector.extract_strided_slice %162 {offsets = [0, 256], sizes = [8, 128], strides = [1, 1]} : vector<8x384xf32> to vector<8x128xf32>
    %175 = arith.mulf %171, %174 : vector<8x128xf32>
    %176 = arith.addf %173, %175 : vector<8x128xf32>
    %177 = math.tanh %176 : vector<8x128xf32>
    %cst_57 = arith.constant 1.000000e+00 : f32
    %178 = vector.broadcast %cst_57 : f32 to vector<8x128xf32>
    %179 = arith.subf %178, %172 : vector<8x128xf32>
    %180 = arith.mulf %179, %177 : vector<8x128xf32>
    %181 = arith.mulf %172, %151 : vector<8x128xf32>
    %182 = arith.addf %180, %181 : vector<8x128xf32>
    %183 = arith.select %26, %182, %151 : vector<8x128xi1>, vector<8x128xf32>
    %184 = vector.extract_strided_slice %183 {offsets = [0, 0], sizes = [8, 48], strides = [1, 1]} : vector<8x128xf32> to vector<8x48xf32>
    %c24_58 = arith.constant 24 : index
    %c0_59 = arith.constant 0 : index
    %185 = vector.load %arg12[%c24_58, %c0_59] : memref<64x128xf32, #tpu.memory_space<vmem>>, vector<8x48xf32>
    tpu.vector_store %arg12[%c24_58, %c0_59], %184 {strides = array<i32>} : memref<64x128xf32, #tpu.memory_space<vmem>>, vector<8x48xf32>,
    %186 = vector.extract_strided_slice %183 {offsets = [0, 48], sizes = [8, 48], strides = [1, 1]} : vector<8x128xf32> to vector<8x48xf32>
    %c32_60 = arith.constant 32 : index
    %c48_61 = arith.constant 48 : index
    %187 = vector.load %arg12[%c32_60, %c48_61] : memref<64x128xf32, #tpu.memory_space<vmem>>, vector<8x48xf32>
    tpu.vector_store %arg12[%c32_60, %c48_61], %186 {strides = array<i32>} : memref<64x128xf32, #tpu.memory_space<vmem>>, vector<8x48xf32>,
    %c32_62 = arith.constant 32 : index
    %c0_63 = arith.constant 0 : index
    %188 = vector.load %arg11[%c32_62, %c0_63] : memref<64x384xf32, #tpu.memory_space<vmem>>, vector<8x384xf32>
    %c24_64 = arith.constant 24 : index
    %c0_65 = arith.constant 0 : index
    %189 = vector.load %arg11[%c24_64, %c0_65] : memref<64x384xf32, #tpu.memory_space<vmem>>, vector<8x384xf32>
    %190 = arith.select %5, %188, %189 : vector<8x384xi1>, vector<8x384xf32>
    %191 = vector.extract_strided_slice %183 {offsets = [0, 0], sizes = [8, 96], strides = [1, 1]} : vector<8x128xf32> to vector<8x96xf32>
    %cst_66 = arith.constant dense<0.000000e+00> : vector<8x384xf32>
    %192 = tpu.matmul %191, %56, %cst_66 {dimension_numbers = #tpu.dot_dimension_numbers<[1], [0], [0], [1], [0, 0, 1, 1], [], []>} : vector<8x96xf32>, vector<96x384xf32>, vector<8x384xf32> -> vector<8x384xf32>
    %193 = vector.broadcast %58 : vector<1x384xf32> to vector<8x384xf32>
    %194 = arith.addf %192, %193 : vector<8x384xf32>
    %195 = vector.extract_strided_slice %190 {offsets = [0, 0], sizes = [8, 256], strides = [1, 1]} : vector<8x384xf32> to vector<8x256xf32>
    %196 = vector.extract_strided_slice %194 {offsets = [0, 0], sizes = [8, 256], strides = [1, 1]} : vector<8x384xf32> to vector<8x256xf32>
    %197 = arith.addf %195, %196 : vector<8x256xf32>
    %198 = arith.negf %197 : vector<8x256xf32>
    %199 = math.exp %198 : vector<8x256xf32>
    %cst_67 = arith.constant 1.000000e+00 : f32
    %200 = vector.broadcast %cst_67 : f32 to vector<8x256xf32>
    %201 = arith.addf %200, %199 : vector<8x256xf32>
    %202 = arith.divf %200, %201 : vector<8x256xf32>
    %203 = vector.extract_strided_slice %202 {offsets = [0, 0], sizes = [8, 128], strides = [1, 1]} : vector<8x256xf32> to vector<8x128xf32>
    %204 = vector.extract_strided_slice %202 {offsets = [0, 128], sizes = [8, 128], strides = [1, 1]} : vector<8x256xf32> to vector<8x128xf32>
    %205 = vector.extract_strided_slice %190 {offsets = [0, 256], sizes = [8, 128], strides = [1, 1]} : vector<8x384xf32> to vector<8x128xf32>
    %206 = vector.extract_strided_slice %194 {offsets = [0, 256], sizes = [8, 128], strides = [1, 1]} : vector<8x384xf32> to vector<8x128xf32>
    %207 = arith.mulf %203, %206 : vector<8x128xf32>
    %208 = arith.addf %205, %207 : vector<8x128xf32>
    %209 = math.tanh %208 : vector<8x128xf32>
    %cst_68 = arith.constant 1.000000e+00 : f32
    %210 = vector.broadcast %cst_68 : f32 to vector<8x128xf32>
    %211 = arith.subf %210, %204 : vector<8x128xf32>
    %212 = arith.mulf %211, %209 : vector<8x128xf32>
    %213 = arith.mulf %204, %183 : vector<8x128xf32>
    %214 = arith.addf %212, %213 : vector<8x128xf32>
    %215 = arith.select %31, %214, %183 : vector<8x128xi1>, vector<8x128xf32>
    %216 = vector.extract_strided_slice %215 {offsets = [0, 0], sizes = [8, 48], strides = [1, 1]} : vector<8x128xf32> to vector<8x48xf32>
    %c32_69 = arith.constant 32 : index
    %c0_70 = arith.constant 0 : index
    %217 = vector.load %arg12[%c32_69, %c0_70] : memref<64x128xf32, #tpu.memory_space<vmem>>, vector<8x48xf32>
    tpu.vector_store %arg12[%c32_69, %c0_70], %216 {strides = array<i32>} : memref<64x128xf32, #tpu.memory_space<vmem>>, vector<8x48xf32>,
    %218 = vector.extract_strided_slice %215 {offsets = [0, 48], sizes = [8, 48], strides = [1, 1]} : vector<8x128xf32> to vector<8x48xf32>
    %c24_71 = arith.constant 24 : index
    %c48_72 = arith.constant 48 : index
    %219 = vector.load %arg12[%c24_71, %c48_72] : memref<64x128xf32, #tpu.memory_space<vmem>>, vector<8x48xf32>
    tpu.vector_store %arg12[%c24_71, %c48_72], %218 {strides = array<i32>} : memref<64x128xf32, #tpu.memory_space<vmem>>, vector<8x48xf32>,
    %c40_73 = arith.constant 40 : index
    %c0_74 = arith.constant 0 : index
    %220 = vector.load %arg11[%c40_73, %c0_74] : memref<64x384xf32, #tpu.memory_space<vmem>>, vector<8x384xf32>
    %c16_75 = arith.constant 16 : index
    %c0_76 = arith.constant 0 : index
    %221 = vector.load %arg11[%c16_75, %c0_76] : memref<64x384xf32, #tpu.memory_space<vmem>>, vector<8x384xf32>
    %222 = arith.select %5, %220, %221 : vector<8x384xi1>, vector<8x384xf32>
    %223 = vector.extract_strided_slice %215 {offsets = [0, 0], sizes = [8, 96], strides = [1, 1]} : vector<8x128xf32> to vector<8x96xf32>
    %cst_77 = arith.constant dense<0.000000e+00> : vector<8x384xf32>
    %224 = tpu.matmul %223, %56, %cst_77 {dimension_numbers = #tpu.dot_dimension_numbers<[1], [0], [0], [1], [0, 0, 1, 1], [], []>} : vector<8x96xf32>, vector<96x384xf32>, vector<8x384xf32> -> vector<8x384xf32>
    %225 = vector.broadcast %58 : vector<1x384xf32> to vector<8x384xf32>
    %226 = arith.addf %224, %225 : vector<8x384xf32>
    %227 = vector.extract_strided_slice %222 {offsets = [0, 0], sizes = [8, 256], strides = [1, 1]} : vector<8x384xf32> to vector<8x256xf32>
    %228 = vector.extract_strided_slice %226 {offsets = [0, 0], sizes = [8, 256], strides = [1, 1]} : vector<8x384xf32> to vector<8x256xf32>
    %229 = arith.addf %227, %228 : vector<8x256xf32>
    %230 = arith.negf %229 : vector<8x256xf32>
    %231 = math.exp %230 : vector<8x256xf32>
    %cst_78 = arith.constant 1.000000e+00 : f32
    %232 = vector.broadcast %cst_78 : f32 to vector<8x256xf32>
    %233 = arith.addf %232, %231 : vector<8x256xf32>
    %234 = arith.divf %232, %233 : vector<8x256xf32>
    %235 = vector.extract_strided_slice %234 {offsets = [0, 0], sizes = [8, 128], strides = [1, 1]} : vector<8x256xf32> to vector<8x128xf32>
    %236 = vector.extract_strided_slice %234 {offsets = [0, 128], sizes = [8, 128], strides = [1, 1]} : vector<8x256xf32> to vector<8x128xf32>
    %237 = vector.extract_strided_slice %222 {offsets = [0, 256], sizes = [8, 128], strides = [1, 1]} : vector<8x384xf32> to vector<8x128xf32>
    %238 = vector.extract_strided_slice %226 {offsets = [0, 256], sizes = [8, 128], strides = [1, 1]} : vector<8x384xf32> to vector<8x128xf32>
    %239 = arith.mulf %235, %238 : vector<8x128xf32>
    %240 = arith.addf %237, %239 : vector<8x128xf32>
    %241 = math.tanh %240 : vector<8x128xf32>
    %cst_79 = arith.constant 1.000000e+00 : f32
    %242 = vector.broadcast %cst_79 : f32 to vector<8x128xf32>
    %243 = arith.subf %242, %236 : vector<8x128xf32>
    %244 = arith.mulf %243, %241 : vector<8x128xf32>
    %245 = arith.mulf %236, %215 : vector<8x128xf32>
    %246 = arith.addf %244, %245 : vector<8x128xf32>
    %247 = arith.select %36, %246, %215 : vector<8x128xi1>, vector<8x128xf32>
    %248 = vector.extract_strided_slice %247 {offsets = [0, 0], sizes = [8, 48], strides = [1, 1]} : vector<8x128xf32> to vector<8x48xf32>
    %c40_80 = arith.constant 40 : index
    %c0_81 = arith.constant 0 : index
    %249 = vector.load %arg12[%c40_80, %c0_81] : memref<64x128xf32, #tpu.memory_space<vmem>>, vector<8x48xf32>
    tpu.vector_store %arg12[%c40_80, %c0_81], %248 {strides = array<i32>} : memref<64x128xf32, #tpu.memory_space<vmem>>, vector<8x48xf32>,
    %250 = vector.extract_strided_slice %247 {offsets = [0, 48], sizes = [8, 48], strides = [1, 1]} : vector<8x128xf32> to vector<8x48xf32>
    %c16_82 = arith.constant 16 : index
    %c48_83 = arith.constant 48 : index
    %251 = vector.load %arg12[%c16_82, %c48_83] : memref<64x128xf32, #tpu.memory_space<vmem>>, vector<8x48xf32>
    tpu.vector_store %arg12[%c16_82, %c48_83], %250 {strides = array<i32>} : memref<64x128xf32, #tpu.memory_space<vmem>>, vector<8x48xf32>,
    %c48_84 = arith.constant 48 : index
    %c0_85 = arith.constant 0 : index
    %252 = vector.load %arg11[%c48_84, %c0_85] : memref<64x384xf32, #tpu.memory_space<vmem>>, vector<8x384xf32>
    %c8_86 = arith.constant 8 : index
    %c0_87 = arith.constant 0 : index
    %253 = vector.load %arg11[%c8_86, %c0_87] : memref<64x384xf32, #tpu.memory_space<vmem>>, vector<8x384xf32>
    %254 = arith.select %5, %252, %253 : vector<8x384xi1>, vector<8x384xf32>
    %255 = vector.extract_strided_slice %247 {offsets = [0, 0], sizes = [8, 96], strides = [1, 1]} : vector<8x128xf32> to vector<8x96xf32>
    %cst_88 = arith.constant dense<0.000000e+00> : vector<8x384xf32>
    %256 = tpu.matmul %255, %56, %cst_88 {dimension_numbers = #tpu.dot_dimension_numbers<[1], [0], [0], [1], [0, 0, 1, 1], [], []>} : vector<8x96xf32>, vector<96x384xf32>, vector<8x384xf32> -> vector<8x384xf32>
    %257 = vector.broadcast %58 : vector<1x384xf32> to vector<8x384xf32>
    %258 = arith.addf %256, %257 : vector<8x384xf32>
    %259 = vector.extract_strided_slice %254 {offsets = [0, 0], sizes = [8, 256], strides = [1, 1]} : vector<8x384xf32> to vector<8x256xf32>
    %260 = vector.extract_strided_slice %258 {offsets = [0, 0], sizes = [8, 256], strides = [1, 1]} : vector<8x384xf32> to vector<8x256xf32>
    %261 = arith.addf %259, %260 : vector<8x256xf32>
    %262 = arith.negf %261 : vector<8x256xf32>
    %263 = math.exp %262 : vector<8x256xf32>
    %cst_89 = arith.constant 1.000000e+00 : f32
    %264 = vector.broadcast %cst_89 : f32 to vector<8x256xf32>
    %265 = arith.addf %264, %263 : vector<8x256xf32>
    %266 = arith.divf %264, %265 : vector<8x256xf32>
    %267 = vector.extract_strided_slice %266 {offsets = [0, 0], sizes = [8, 128], strides = [1, 1]} : vector<8x256xf32> to vector<8x128xf32>
    %268 = vector.extract_strided_slice %266 {offsets = [0, 128], sizes = [8, 128], strides = [1, 1]} : vector<8x256xf32> to vector<8x128xf32>
    %269 = vector.extract_strided_slice %254 {offsets = [0, 256], sizes = [8, 128], strides = [1, 1]} : vector<8x384xf32> to vector<8x128xf32>
    %270 = vector.extract_strided_slice %258 {offsets = [0, 256], sizes = [8, 128], strides = [1, 1]} : vector<8x384xf32> to vector<8x128xf32>
    %271 = arith.mulf %267, %270 : vector<8x128xf32>
    %272 = arith.addf %269, %271 : vector<8x128xf32>
    %273 = math.tanh %272 : vector<8x128xf32>
    %cst_90 = arith.constant 1.000000e+00 : f32
    %274 = vector.broadcast %cst_90 : f32 to vector<8x128xf32>
    %275 = arith.subf %274, %268 : vector<8x128xf32>
    %276 = arith.mulf %275, %273 : vector<8x128xf32>
    %277 = arith.mulf %268, %247 : vector<8x128xf32>
    %278 = arith.addf %276, %277 : vector<8x128xf32>
    %279 = arith.select %41, %278, %247 : vector<8x128xi1>, vector<8x128xf32>
    %280 = vector.extract_strided_slice %279 {offsets = [0, 0], sizes = [8, 48], strides = [1, 1]} : vector<8x128xf32> to vector<8x48xf32>
    %c48_91 = arith.constant 48 : index
    %c0_92 = arith.constant 0 : index
    %281 = vector.load %arg12[%c48_91, %c0_92] : memref<64x128xf32, #tpu.memory_space<vmem>>, vector<8x48xf32>
    tpu.vector_store %arg12[%c48_91, %c0_92], %280 {strides = array<i32>} : memref<64x128xf32, #tpu.memory_space<vmem>>, vector<8x48xf32>,
    %282 = vector.extract_strided_slice %279 {offsets = [0, 48], sizes = [8, 48], strides = [1, 1]} : vector<8x128xf32> to vector<8x48xf32>
    %c8_93 = arith.constant 8 : index
    %c48_94 = arith.constant 48 : index
    %283 = vector.load %arg12[%c8_93, %c48_94] : memref<64x128xf32, #tpu.memory_space<vmem>>, vector<8x48xf32>
    tpu.vector_store %arg12[%c8_93, %c48_94], %282 {strides = array<i32>} : memref<64x128xf32, #tpu.memory_space<vmem>>, vector<8x48xf32>,
    %c56_95 = arith.constant 56 : index
    %c0_96 = arith.constant 0 : index
    %284 = vector.load %arg11[%c56_95, %c0_96] : memref<64x384xf32, #tpu.memory_space<vmem>>, vector<8x384xf32>
    %c0_97 = arith.constant 0 : index
    %c0_98 = arith.constant 0 : index
    %285 = vector.load %arg11[%c0_97, %c0_98] : memref<64x384xf32, #tpu.memory_space<vmem>>, vector<8x384xf32>
    %286 = arith.select %5, %284, %285 : vector<8x384xi1>, vector<8x384xf32>
    %287 = vector.extract_strided_slice %279 {offsets = [0, 0], sizes = [8, 96], strides = [1, 1]} : vector<8x128xf32> to vector<8x96xf32>
    %cst_99 = arith.constant dense<0.000000e+00> : vector<8x384xf32>
    %288 = tpu.matmul %287, %56, %cst_99 {dimension_numbers = #tpu.dot_dimension_numbers<[1], [0], [0], [1], [0, 0, 1, 1], [], []>} : vector<8x96xf32>, vector<96x384xf32>, vector<8x384xf32> -> vector<8x384xf32>
    %289 = vector.broadcast %58 : vector<1x384xf32> to vector<8x384xf32>
    %290 = arith.addf %288, %289 : vector<8x384xf32>
    %291 = vector.extract_strided_slice %286 {offsets = [0, 0], sizes = [8, 256], strides = [1, 1]} : vector<8x384xf32> to vector<8x256xf32>
    %292 = vector.extract_strided_slice %290 {offsets = [0, 0], sizes = [8, 256], strides = [1, 1]} : vector<8x384xf32> to vector<8x256xf32>
    %293 = arith.addf %291, %292 : vector<8x256xf32>
    %294 = arith.negf %293 : vector<8x256xf32>
    %295 = math.exp %294 : vector<8x256xf32>
    %cst_100 = arith.constant 1.000000e+00 : f32
    %296 = vector.broadcast %cst_100 : f32 to vector<8x256xf32>
    %297 = arith.addf %296, %295 : vector<8x256xf32>
    %298 = arith.divf %296, %297 : vector<8x256xf32>
    %299 = vector.extract_strided_slice %298 {offsets = [0, 0], sizes = [8, 128], strides = [1, 1]} : vector<8x256xf32> to vector<8x128xf32>
    %300 = vector.extract_strided_slice %298 {offsets = [0, 128], sizes = [8, 128], strides = [1, 1]} : vector<8x256xf32> to vector<8x128xf32>
    %301 = vector.extract_strided_slice %286 {offsets = [0, 256], sizes = [8, 128], strides = [1, 1]} : vector<8x384xf32> to vector<8x128xf32>
    %302 = vector.extract_strided_slice %290 {offsets = [0, 256], sizes = [8, 128], strides = [1, 1]} : vector<8x384xf32> to vector<8x128xf32>
    %303 = arith.mulf %299, %302 : vector<8x128xf32>
    %304 = arith.addf %301, %303 : vector<8x128xf32>
    %305 = math.tanh %304 : vector<8x128xf32>
    %cst_101 = arith.constant 1.000000e+00 : f32
    %306 = vector.broadcast %cst_101 : f32 to vector<8x128xf32>
    %307 = arith.subf %306, %300 : vector<8x128xf32>
    %308 = arith.mulf %307, %305 : vector<8x128xf32>
    %309 = arith.mulf %300, %279 : vector<8x128xf32>
    %310 = arith.addf %308, %309 : vector<8x128xf32>
    %311 = arith.select %46, %310, %279 : vector<8x128xi1>, vector<8x128xf32>
    %312 = vector.extract_strided_slice %311 {offsets = [0, 0], sizes = [8, 48], strides = [1, 1]} : vector<8x128xf32> to vector<8x48xf32>
    %c56_102 = arith.constant 56 : index
    %c0_103 = arith.constant 0 : index
    %313 = vector.load %arg12[%c56_102, %c0_103] : memref<64x128xf32, #tpu.memory_space<vmem>>, vector<8x48xf32>
    tpu.vector_store %arg12[%c56_102, %c0_103], %312 {strides = array<i32>} : memref<64x128xf32, #tpu.memory_space<vmem>>, vector<8x48xf32>,
    %314 = vector.extract_strided_slice %311 {offsets = [0, 48], sizes = [8, 48], strides = [1, 1]} : vector<8x128xf32> to vector<8x48xf32>
    %c0_104 = arith.constant 0 : index
    %c48_105 = arith.constant 48 : index
    %315 = vector.load %arg12[%c0_104, %c48_105] : memref<64x128xf32, #tpu.memory_space<vmem>>, vector<8x48xf32>
    tpu.vector_store %arg12[%c0_104, %c48_105], %314 {strides = array<i32>} : memref<64x128xf32, #tpu.memory_space<vmem>>, vector<8x48xf32>,
    %c0_106 = arith.constant 0 : index
    %c0_107 = arith.constant 0 : index
    %316 = vector.load %arg12[%c0_106, %c0_107] : memref<64x128xf32, #tpu.memory_space<vmem>>, vector<64x96xf32>
    %c0_108 = arith.constant 0 : index
    %c0_109 = arith.constant 0 : index
    %c0_110 = arith.constant 0 : index
    %317 = vector.load %arg4[%c0_108, %c0_109, %c0_110] : memref<3x96x384xf32, #tpu.memory_space<vmem>>, vector<1x96x384xf32>
    %318 = vector.shape_cast %317 : vector<1x96x384xf32> to vector<96x384xf32>
    %cst_111 = arith.constant dense<0.000000e+00> : vector<64x384xf32>
    %319 = tpu.matmul %316, %318, %cst_111 {dimension_numbers = #tpu.dot_dimension_numbers<[1], [0], [0], [1], [0, 0, 1, 1], [], []>} : vector<64x96xf32>, vector<96x384xf32>, vector<64x384xf32> -> vector<64x384xf32>
    %c1 = arith.constant 1 : index
    %c0_112 = arith.constant 0 : index
    %c0_113 = arith.constant 0 : index
    %320 = vector.load %arg6[%c1, %c0_112, %c0_113] : memref<4x1x384xf32, #tpu.memory_space<vmem>>, vector<1x1x384xf32>
    %321 = vector.shape_cast %320 : vector<1x1x384xf32> to vector<1x384xf32>
    %322 = vector.broadcast %321 : vector<1x384xf32> to vector<64x384xf32>
    %323 = arith.addf %319, %322 : vector<64x384xf32>
    %c0_114 = arith.constant 0 : index
    %c0_115 = arith.constant 0 : index
    %324 = vector.load %arg11[%c0_114, %c0_115] : memref<64x384xf32, #tpu.memory_space<vmem>>, vector<64x384xf32>
    tpu.vector_store %arg11[%c0_114, %c0_115], %323 {strides = array<i32>} : memref<64x384xf32, #tpu.memory_space<vmem>>, vector<64x384xf32>,
    %c1_116 = arith.constant 1 : index
    %c0_117 = arith.constant 0 : index
    %c0_118 = arith.constant 0 : index
    %325 = vector.load %arg5[%c1_116, %c0_117, %c0_118] : memref<4x96x384xf32, #tpu.memory_space<vmem>>, vector<1x96x384xf32>
    %326 = vector.shape_cast %325 : vector<1x96x384xf32> to vector<96x384xf32>
    %c1_119 = arith.constant 1 : index
    %c0_120 = arith.constant 0 : index
    %c0_121 = arith.constant 0 : index
    %327 = vector.load %arg7[%c1_119, %c0_120, %c0_121] : memref<4x1x384xf32, #tpu.memory_space<vmem>>, vector<1x1x384xf32>
    %328 = vector.shape_cast %327 : vector<1x1x384xf32> to vector<1x384xf32>
    %cst_122 = arith.constant 0.000000e+00 : f32
    %329 = vector.broadcast %cst_122 : f32 to vector<8x128xf32>
    %c0_123 = arith.constant 0 : index
    %c0_124 = arith.constant 0 : index
    %330 = vector.load %arg11[%c0_123, %c0_124] : memref<64x384xf32, #tpu.memory_space<vmem>>, vector<8x384xf32>
    %c56_125 = arith.constant 56 : index
    %c0_126 = arith.constant 0 : index
    %331 = vector.load %arg11[%c56_125, %c0_126] : memref<64x384xf32, #tpu.memory_space<vmem>>, vector<8x384xf32>
    %332 = arith.select %5, %330, %331 : vector<8x384xi1>, vector<8x384xf32>
    %333 = vector.extract_strided_slice %329 {offsets = [0, 0], sizes = [8, 96], strides = [1, 1]} : vector<8x128xf32> to vector<8x96xf32>
    %cst_127 = arith.constant dense<0.000000e+00> : vector<8x384xf32>
    %334 = tpu.matmul %333, %326, %cst_127 {dimension_numbers = #tpu.dot_dimension_numbers<[1], [0], [0], [1], [0, 0, 1, 1], [], []>} : vector<8x96xf32>, vector<96x384xf32>, vector<8x384xf32> -> vector<8x384xf32>
    %335 = vector.broadcast %328 : vector<1x384xf32> to vector<8x384xf32>
    %336 = arith.addf %334, %335 : vector<8x384xf32>
    %337 = vector.extract_strided_slice %332 {offsets = [0, 0], sizes = [8, 256], strides = [1, 1]} : vector<8x384xf32> to vector<8x256xf32>
    %338 = vector.extract_strided_slice %336 {offsets = [0, 0], sizes = [8, 256], strides = [1, 1]} : vector<8x384xf32> to vector<8x256xf32>
    %339 = arith.addf %337, %338 : vector<8x256xf32>
    %340 = arith.negf %339 : vector<8x256xf32>
    %341 = math.exp %340 : vector<8x256xf32>
    %cst_128 = arith.constant 1.000000e+00 : f32
    %342 = vector.broadcast %cst_128 : f32 to vector<8x256xf32>
    %343 = arith.addf %342, %341 : vector<8x256xf32>
    %344 = arith.divf %342, %343 : vector<8x256xf32>
    %345 = vector.extract_strided_slice %344 {offsets = [0, 0], sizes = [8, 128], strides = [1, 1]} : vector<8x256xf32> to vector<8x128xf32>
    %346 = vector.extract_strided_slice %344 {offsets = [0, 128], sizes = [8, 128], strides = [1, 1]} : vector<8x256xf32> to vector<8x128xf32>
    %347 = vector.extract_strided_slice %332 {offsets = [0, 256], sizes = [8, 128], strides = [1, 1]} : vector<8x384xf32> to vector<8x128xf32>
    %348 = vector.extract_strided_slice %336 {offsets = [0, 256], sizes = [8, 128], strides = [1, 1]} : vector<8x384xf32> to vector<8x128xf32>
    %349 = arith.mulf %345, %348 : vector<8x128xf32>
    %350 = arith.addf %347, %349 : vector<8x128xf32>
    %351 = math.tanh %350 : vector<8x128xf32>
    %cst_129 = arith.constant 1.000000e+00 : f32
    %352 = vector.broadcast %cst_129 : f32 to vector<8x128xf32>
    %353 = arith.subf %352, %346 : vector<8x128xf32>
    %354 = arith.mulf %353, %351 : vector<8x128xf32>
    %355 = arith.mulf %346, %329 : vector<8x128xf32>
    %356 = arith.addf %354, %355 : vector<8x128xf32>
    %357 = arith.select %11, %356, %329 : vector<8x128xi1>, vector<8x128xf32>
    %358 = vector.extract_strided_slice %357 {offsets = [0, 0], sizes = [8, 48], strides = [1, 1]} : vector<8x128xf32> to vector<8x48xf32>
    %c0_130 = arith.constant 0 : index
    %c0_131 = arith.constant 0 : index
    %359 = vector.load %arg12[%c0_130, %c0_131] : memref<64x128xf32, #tpu.memory_space<vmem>>, vector<8x48xf32>
    tpu.vector_store %arg12[%c0_130, %c0_131], %358 {strides = array<i32>} : memref<64x128xf32, #tpu.memory_space<vmem>>, vector<8x48xf32>,
    %360 = vector.extract_strided_slice %357 {offsets = [0, 48], sizes = [8, 48], strides = [1, 1]} : vector<8x128xf32> to vector<8x48xf32>
    %c56_132 = arith.constant 56 : index
    %c48_133 = arith.constant 48 : index
    %361 = vector.load %arg12[%c56_132, %c48_133] : memref<64x128xf32, #tpu.memory_space<vmem>>, vector<8x48xf32>
    tpu.vector_store %arg12[%c56_132, %c48_133], %360 {strides = array<i32>} : memref<64x128xf32, #tpu.memory_space<vmem>>, vector<8x48xf32>,
    %c8_134 = arith.constant 8 : index
    %c0_135 = arith.constant 0 : index
    %362 = vector.load %arg11[%c8_134, %c0_135] : memref<64x384xf32, #tpu.memory_space<vmem>>, vector<8x384xf32>
    %c48_136 = arith.constant 48 : index
    %c0_137 = arith.constant 0 : index
    %363 = vector.load %arg11[%c48_136, %c0_137] : memref<64x384xf32, #tpu.memory_space<vmem>>, vector<8x384xf32>
    %364 = arith.select %5, %362, %363 : vector<8x384xi1>, vector<8x384xf32>
    %365 = vector.extract_strided_slice %357 {offsets = [0, 0], sizes = [8, 96], strides = [1, 1]} : vector<8x128xf32> to vector<8x96xf32>
    %cst_138 = arith.constant dense<0.000000e+00> : vector<8x384xf32>
    %366 = tpu.matmul %365, %326, %cst_138 {dimension_numbers = #tpu.dot_dimension_numbers<[1], [0], [0], [1], [0, 0, 1, 1], [], []>} : vector<8x96xf32>, vector<96x384xf32>, vector<8x384xf32> -> vector<8x384xf32>
    %367 = vector.broadcast %328 : vector<1x384xf32> to vector<8x384xf32>
    %368 = arith.addf %366, %367 : vector<8x384xf32>
    %369 = vector.extract_strided_slice %364 {offsets = [0, 0], sizes = [8, 256], strides = [1, 1]} : vector<8x384xf32> to vector<8x256xf32>
    %370 = vector.extract_strided_slice %368 {offsets = [0, 0], sizes = [8, 256], strides = [1, 1]} : vector<8x384xf32> to vector<8x256xf32>
    %371 = arith.addf %369, %370 : vector<8x256xf32>
    %372 = arith.negf %371 : vector<8x256xf32>
    %373 = math.exp %372 : vector<8x256xf32>
    %cst_139 = arith.constant 1.000000e+00 : f32
    %374 = vector.broadcast %cst_139 : f32 to vector<8x256xf32>
    %375 = arith.addf %374, %373 : vector<8x256xf32>
    %376 = arith.divf %374, %375 : vector<8x256xf32>
    %377 = vector.extract_strided_slice %376 {offsets = [0, 0], sizes = [8, 128], strides = [1, 1]} : vector<8x256xf32> to vector<8x128xf32>
    %378 = vector.extract_strided_slice %376 {offsets = [0, 128], sizes = [8, 128], strides = [1, 1]} : vector<8x256xf32> to vector<8x128xf32>
    %379 = vector.extract_strided_slice %364 {offsets = [0, 256], sizes = [8, 128], strides = [1, 1]} : vector<8x384xf32> to vector<8x128xf32>
    %380 = vector.extract_strided_slice %368 {offsets = [0, 256], sizes = [8, 128], strides = [1, 1]} : vector<8x384xf32> to vector<8x128xf32>
    %381 = arith.mulf %377, %380 : vector<8x128xf32>
    %382 = arith.addf %379, %381 : vector<8x128xf32>
    %383 = math.tanh %382 : vector<8x128xf32>
    %cst_140 = arith.constant 1.000000e+00 : f32
    %384 = vector.broadcast %cst_140 : f32 to vector<8x128xf32>
    %385 = arith.subf %384, %378 : vector<8x128xf32>
    %386 = arith.mulf %385, %383 : vector<8x128xf32>
    %387 = arith.mulf %378, %357 : vector<8x128xf32>
    %388 = arith.addf %386, %387 : vector<8x128xf32>
    %389 = arith.select %16, %388, %357 : vector<8x128xi1>, vector<8x128xf32>
    %390 = vector.extract_strided_slice %389 {offsets = [0, 0], sizes = [8, 48], strides = [1, 1]} : vector<8x128xf32> to vector<8x48xf32>
    %c8_141 = arith.constant 8 : index
    %c0_142 = arith.constant 0 : index
    %391 = vector.load %arg12[%c8_141, %c0_142] : memref<64x128xf32, #tpu.memory_space<vmem>>, vector<8x48xf32>
    tpu.vector_store %arg12[%c8_141, %c0_142], %390 {strides = array<i32>} : memref<64x128xf32, #tpu.memory_space<vmem>>, vector<8x48xf32>,
    %392 = vector.extract_strided_slice %389 {offsets = [0, 48], sizes = [8, 48], strides = [1, 1]} : vector<8x128xf32> to vector<8x48xf32>
    %c48_143 = arith.constant 48 : index
    %c48_144 = arith.constant 48 : index
    %393 = vector.load %arg12[%c48_143, %c48_144] : memref<64x128xf32, #tpu.memory_space<vmem>>, vector<8x48xf32>
    tpu.vector_store %arg12[%c48_143, %c48_144], %392 {strides = array<i32>} : memref<64x128xf32, #tpu.memory_space<vmem>>, vector<8x48xf32>,
    %c16_145 = arith.constant 16 : index
    %c0_146 = arith.constant 0 : index
    %394 = vector.load %arg11[%c16_145, %c0_146] : memref<64x384xf32, #tpu.memory_space<vmem>>, vector<8x384xf32>
    %c40_147 = arith.constant 40 : index
    %c0_148 = arith.constant 0 : index
    %395 = vector.load %arg11[%c40_147, %c0_148] : memref<64x384xf32, #tpu.memory_space<vmem>>, vector<8x384xf32>
    %396 = arith.select %5, %394, %395 : vector<8x384xi1>, vector<8x384xf32>
    %397 = vector.extract_strided_slice %389 {offsets = [0, 0], sizes = [8, 96], strides = [1, 1]} : vector<8x128xf32> to vector<8x96xf32>
    %cst_149 = arith.constant dense<0.000000e+00> : vector<8x384xf32>
    %398 = tpu.matmul %397, %326, %cst_149 {dimension_numbers = #tpu.dot_dimension_numbers<[1], [0], [0], [1], [0, 0, 1, 1], [], []>} : vector<8x96xf32>, vector<96x384xf32>, vector<8x384xf32> -> vector<8x384xf32>
    %399 = vector.broadcast %328 : vector<1x384xf32> to vector<8x384xf32>
    %400 = arith.addf %398, %399 : vector<8x384xf32>
    %401 = vector.extract_strided_slice %396 {offsets = [0, 0], sizes = [8, 256], strides = [1, 1]} : vector<8x384xf32> to vector<8x256xf32>
    %402 = vector.extract_strided_slice %400 {offsets = [0, 0], sizes = [8, 256], strides = [1, 1]} : vector<8x384xf32> to vector<8x256xf32>
    %403 = arith.addf %401, %402 : vector<8x256xf32>
    %404 = arith.negf %403 : vector<8x256xf32>
    %405 = math.exp %404 : vector<8x256xf32>
    %cst_150 = arith.constant 1.000000e+00 : f32
    %406 = vector.broadcast %cst_150 : f32 to vector<8x256xf32>
    %407 = arith.addf %406, %405 : vector<8x256xf32>
    %408 = arith.divf %406, %407 : vector<8x256xf32>
    %409 = vector.extract_strided_slice %408 {offsets = [0, 0], sizes = [8, 128], strides = [1, 1]} : vector<8x256xf32> to vector<8x128xf32>
    %410 = vector.extract_strided_slice %408 {offsets = [0, 128], sizes = [8, 128], strides = [1, 1]} : vector<8x256xf32> to vector<8x128xf32>
    %411 = vector.extract_strided_slice %396 {offsets = [0, 256], sizes = [8, 128], strides = [1, 1]} : vector<8x384xf32> to vector<8x128xf32>
    %412 = vector.extract_strided_slice %400 {offsets = [0, 256], sizes = [8, 128], strides = [1, 1]} : vector<8x384xf32> to vector<8x128xf32>
    %413 = arith.mulf %409, %412 : vector<8x128xf32>
    %414 = arith.addf %411, %413 : vector<8x128xf32>
    %415 = math.tanh %414 : vector<8x128xf32>
    %cst_151 = arith.constant 1.000000e+00 : f32
    %416 = vector.broadcast %cst_151 : f32 to vector<8x128xf32>
    %417 = arith.subf %416, %410 : vector<8x128xf32>
    %418 = arith.mulf %417, %415 : vector<8x128xf32>
    %419 = arith.mulf %410, %389 : vector<8x128xf32>
    %420 = arith.addf %418, %419 : vector<8x128xf32>
    %421 = arith.select %21, %420, %389 : vector<8x128xi1>, vector<8x128xf32>
    %422 = vector.extract_strided_slice %421 {offsets = [0, 0], sizes = [8, 48], strides = [1, 1]} : vector<8x128xf32> to vector<8x48xf32>
    %c16_152 = arith.constant 16 : index
    %c0_153 = arith.constant 0 : index
    %423 = vector.load %arg12[%c16_152, %c0_153] : memref<64x128xf32, #tpu.memory_space<vmem>>, vector<8x48xf32>
    tpu.vector_store %arg12[%c16_152, %c0_153], %422 {strides = array<i32>} : memref<64x128xf32, #tpu.memory_space<vmem>>, vector<8x48xf32>,
    %424 = vector.extract_strided_slice %421 {offsets = [0, 48], sizes = [8, 48], strides = [1, 1]} : vector<8x128xf32> to vector<8x48xf32>
    %c40_154 = arith.constant 40 : index
    %c48_155 = arith.constant 48 : index
    %425 = vector.load %arg12[%c40_154, %c48_155] : memref<64x128xf32, #tpu.memory_space<vmem>>, vector<8x48xf32>
    tpu.vector_store %arg12[%c40_154, %c48_155], %424 {strides = array<i32>} : memref<64x128xf32, #tpu.memory_space<vmem>>, vector<8x48xf32>,
    %c24_156 = arith.constant 24 : index
    %c0_157 = arith.constant 0 : index
    %426 = vector.load %arg11[%c24_156, %c0_157] : memref<64x384xf32, #tpu.memory_space<vmem>>, vector<8x384xf32>
    %c32_158 = arith.constant 32 : index
    %c0_159 = arith.constant 0 : index
    %427 = vector.load %arg11[%c32_158, %c0_159] : memref<64x384xf32, #tpu.memory_space<vmem>>, vector<8x384xf32>
    %428 = arith.select %5, %426, %427 : vector<8x384xi1>, vector<8x384xf32>
    %429 = vector.extract_strided_slice %421 {offsets = [0, 0], sizes = [8, 96], strides = [1, 1]} : vector<8x128xf32> to vector<8x96xf32>
    %cst_160 = arith.constant dense<0.000000e+00> : vector<8x384xf32>
    %430 = tpu.matmul %429, %326, %cst_160 {dimension_numbers = #tpu.dot_dimension_numbers<[1], [0], [0], [1], [0, 0, 1, 1], [], []>} : vector<8x96xf32>, vector<96x384xf32>, vector<8x384xf32> -> vector<8x384xf32>
    %431 = vector.broadcast %328 : vector<1x384xf32> to vector<8x384xf32>
    %432 = arith.addf %430, %431 : vector<8x384xf32>
    %433 = vector.extract_strided_slice %428 {offsets = [0, 0], sizes = [8, 256], strides = [1, 1]} : vector<8x384xf32> to vector<8x256xf32>
    %434 = vector.extract_strided_slice %432 {offsets = [0, 0], sizes = [8, 256], strides = [1, 1]} : vector<8x384xf32> to vector<8x256xf32>
    %435 = arith.addf %433, %434 : vector<8x256xf32>
    %436 = arith.negf %435 : vector<8x256xf32>
    %437 = math.exp %436 : vector<8x256xf32>
    %cst_161 = arith.constant 1.000000e+00 : f32
    %438 = vector.broadcast %cst_161 : f32 to vector<8x256xf32>
    %439 = arith.addf %438, %437 : vector<8x256xf32>
    %440 = arith.divf %438, %439 : vector<8x256xf32>
    %441 = vector.extract_strided_slice %440 {offsets = [0, 0], sizes = [8, 128], strides = [1, 1]} : vector<8x256xf32> to vector<8x128xf32>
    %442 = vector.extract_strided_slice %440 {offsets = [0, 128], sizes = [8, 128], strides = [1, 1]} : vector<8x256xf32> to vector<8x128xf32>
    %443 = vector.extract_strided_slice %428 {offsets = [0, 256], sizes = [8, 128], strides = [1, 1]} : vector<8x384xf32> to vector<8x128xf32>
    %444 = vector.extract_strided_slice %432 {offsets = [0, 256], sizes = [8, 128], strides = [1, 1]} : vector<8x384xf32> to vector<8x128xf32>
    %445 = arith.mulf %441, %444 : vector<8x128xf32>
    %446 = arith.addf %443, %445 : vector<8x128xf32>
    %447 = math.tanh %446 : vector<8x128xf32>
    %cst_162 = arith.constant 1.000000e+00 : f32
    %448 = vector.broadcast %cst_162 : f32 to vector<8x128xf32>
    %449 = arith.subf %448, %442 : vector<8x128xf32>
    %450 = arith.mulf %449, %447 : vector<8x128xf32>
    %451 = arith.mulf %442, %421 : vector<8x128xf32>
    %452 = arith.addf %450, %451 : vector<8x128xf32>
    %453 = arith.select %26, %452, %421 : vector<8x128xi1>, vector<8x128xf32>
    %454 = vector.extract_strided_slice %453 {offsets = [0, 0], sizes = [8, 48], strides = [1, 1]} : vector<8x128xf32> to vector<8x48xf32>
    %c24_163 = arith.constant 24 : index
    %c0_164 = arith.constant 0 : index
    %455 = vector.load %arg12[%c24_163, %c0_164] : memref<64x128xf32, #tpu.memory_space<vmem>>, vector<8x48xf32>
    tpu.vector_store %arg12[%c24_163, %c0_164], %454 {strides = array<i32>} : memref<64x128xf32, #tpu.memory_space<vmem>>, vector<8x48xf32>,
    %456 = vector.extract_strided_slice %453 {offsets = [0, 48], sizes = [8, 48], strides = [1, 1]} : vector<8x128xf32> to vector<8x48xf32>
    %c32_165 = arith.constant 32 : index
    %c48_166 = arith.constant 48 : index
    %457 = vector.load %arg12[%c32_165, %c48_166] : memref<64x128xf32, #tpu.memory_space<vmem>>, vector<8x48xf32>
    tpu.vector_store %arg12[%c32_165, %c48_166], %456 {strides = array<i32>} : memref<64x128xf32, #tpu.memory_space<vmem>>, vector<8x48xf32>,
    %c32_167 = arith.constant 32 : index
    %c0_168 = arith.constant 0 : index
    %458 = vector.load %arg11[%c32_167, %c0_168] : memref<64x384xf32, #tpu.memory_space<vmem>>, vector<8x384xf32>
    %c24_169 = arith.constant 24 : index
    %c0_170 = arith.constant 0 : index
    %459 = vector.load %arg11[%c24_169, %c0_170] : memref<64x384xf32, #tpu.memory_space<vmem>>, vector<8x384xf32>
    %460 = arith.select %5, %458, %459 : vector<8x384xi1>, vector<8x384xf32>
    %461 = vector.extract_strided_slice %453 {offsets = [0, 0], sizes = [8, 96], strides = [1, 1]} : vector<8x128xf32> to vector<8x96xf32>
    %cst_171 = arith.constant dense<0.000000e+00> : vector<8x384xf32>
    %462 = tpu.matmul %461, %326, %cst_171 {dimension_numbers = #tpu.dot_dimension_numbers<[1], [0], [0], [1], [0, 0, 1, 1], [], []>} : vector<8x96xf32>, vector<96x384xf32>, vector<8x384xf32> -> vector<8x384xf32>
    %463 = vector.broadcast %328 : vector<1x384xf32> to vector<8x384xf32>
    %464 = arith.addf %462, %463 : vector<8x384xf32>
    %465 = vector.extract_strided_slice %460 {offsets = [0, 0], sizes = [8, 256], strides = [1, 1]} : vector<8x384xf32> to vector<8x256xf32>
    %466 = vector.extract_strided_slice %464 {offsets = [0, 0], sizes = [8, 256], strides = [1, 1]} : vector<8x384xf32> to vector<8x256xf32>
    %467 = arith.addf %465, %466 : vector<8x256xf32>
    %468 = arith.negf %467 : vector<8x256xf32>
    %469 = math.exp %468 : vector<8x256xf32>
    %cst_172 = arith.constant 1.000000e+00 : f32
    %470 = vector.broadcast %cst_172 : f32 to vector<8x256xf32>
    %471 = arith.addf %470, %469 : vector<8x256xf32>
    %472 = arith.divf %470, %471 : vector<8x256xf32>
    %473 = vector.extract_strided_slice %472 {offsets = [0, 0], sizes = [8, 128], strides = [1, 1]} : vector<8x256xf32> to vector<8x128xf32>
    %474 = vector.extract_strided_slice %472 {offsets = [0, 128], sizes = [8, 128], strides = [1, 1]} : vector<8x256xf32> to vector<8x128xf32>
    %475 = vector.extract_strided_slice %460 {offsets = [0, 256], sizes = [8, 128], strides = [1, 1]} : vector<8x384xf32> to vector<8x128xf32>
    %476 = vector.extract_strided_slice %464 {offsets = [0, 256], sizes = [8, 128], strides = [1, 1]} : vector<8x384xf32> to vector<8x128xf32>
    %477 = arith.mulf %473, %476 : vector<8x128xf32>
    %478 = arith.addf %475, %477 : vector<8x128xf32>
    %479 = math.tanh %478 : vector<8x128xf32>
    %cst_173 = arith.constant 1.000000e+00 : f32
    %480 = vector.broadcast %cst_173 : f32 to vector<8x128xf32>
    %481 = arith.subf %480, %474 : vector<8x128xf32>
    %482 = arith.mulf %481, %479 : vector<8x128xf32>
    %483 = arith.mulf %474, %453 : vector<8x128xf32>
    %484 = arith.addf %482, %483 : vector<8x128xf32>
    %485 = arith.select %31, %484, %453 : vector<8x128xi1>, vector<8x128xf32>
    %486 = vector.extract_strided_slice %485 {offsets = [0, 0], sizes = [8, 48], strides = [1, 1]} : vector<8x128xf32> to vector<8x48xf32>
    %c32_174 = arith.constant 32 : index
    %c0_175 = arith.constant 0 : index
    %487 = vector.load %arg12[%c32_174, %c0_175] : memref<64x128xf32, #tpu.memory_space<vmem>>, vector<8x48xf32>
    tpu.vector_store %arg12[%c32_174, %c0_175], %486 {strides = array<i32>} : memref<64x128xf32, #tpu.memory_space<vmem>>, vector<8x48xf32>,
    %488 = vector.extract_strided_slice %485 {offsets = [0, 48], sizes = [8, 48], strides = [1, 1]} : vector<8x128xf32> to vector<8x48xf32>
    %c24_176 = arith.constant 24 : index
    %c48_177 = arith.constant 48 : index
    %489 = vector.load %arg12[%c24_176, %c48_177] : memref<64x128xf32, #tpu.memory_space<vmem>>, vector<8x48xf32>
    tpu.vector_store %arg12[%c24_176, %c48_177], %488 {strides = array<i32>} : memref<64x128xf32, #tpu.memory_space<vmem>>, vector<8x48xf32>,
    %c40_178 = arith.constant 40 : index
    %c0_179 = arith.constant 0 : index
    %490 = vector.load %arg11[%c40_178, %c0_179] : memref<64x384xf32, #tpu.memory_space<vmem>>, vector<8x384xf32>
    %c16_180 = arith.constant 16 : index
    %c0_181 = arith.constant 0 : index
    %491 = vector.load %arg11[%c16_180, %c0_181] : memref<64x384xf32, #tpu.memory_space<vmem>>, vector<8x384xf32>
    %492 = arith.select %5, %490, %491 : vector<8x384xi1>, vector<8x384xf32>
    %493 = vector.extract_strided_slice %485 {offsets = [0, 0], sizes = [8, 96], strides = [1, 1]} : vector<8x128xf32> to vector<8x96xf32>
    %cst_182 = arith.constant dense<0.000000e+00> : vector<8x384xf32>
    %494 = tpu.matmul %493, %326, %cst_182 {dimension_numbers = #tpu.dot_dimension_numbers<[1], [0], [0], [1], [0, 0, 1, 1], [], []>} : vector<8x96xf32>, vector<96x384xf32>, vector<8x384xf32> -> vector<8x384xf32>
    %495 = vector.broadcast %328 : vector<1x384xf32> to vector<8x384xf32>
    %496 = arith.addf %494, %495 : vector<8x384xf32>
    %497 = vector.extract_strided_slice %492 {offsets = [0, 0], sizes = [8, 256], strides = [1, 1]} : vector<8x384xf32> to vector<8x256xf32>
    %498 = vector.extract_strided_slice %496 {offsets = [0, 0], sizes = [8, 256], strides = [1, 1]} : vector<8x384xf32> to vector<8x256xf32>
    %499 = arith.addf %497, %498 : vector<8x256xf32>
    %500 = arith.negf %499 : vector<8x256xf32>
    %501 = math.exp %500 : vector<8x256xf32>
    %cst_183 = arith.constant 1.000000e+00 : f32
    %502 = vector.broadcast %cst_183 : f32 to vector<8x256xf32>
    %503 = arith.addf %502, %501 : vector<8x256xf32>
    %504 = arith.divf %502, %503 : vector<8x256xf32>
    %505 = vector.extract_strided_slice %504 {offsets = [0, 0], sizes = [8, 128], strides = [1, 1]} : vector<8x256xf32> to vector<8x128xf32>
    %506 = vector.extract_strided_slice %504 {offsets = [0, 128], sizes = [8, 128], strides = [1, 1]} : vector<8x256xf32> to vector<8x128xf32>
    %507 = vector.extract_strided_slice %492 {offsets = [0, 256], sizes = [8, 128], strides = [1, 1]} : vector<8x384xf32> to vector<8x128xf32>
    %508 = vector.extract_strided_slice %496 {offsets = [0, 256], sizes = [8, 128], strides = [1, 1]} : vector<8x384xf32> to vector<8x128xf32>
    %509 = arith.mulf %505, %508 : vector<8x128xf32>
    %510 = arith.addf %507, %509 : vector<8x128xf32>
    %511 = math.tanh %510 : vector<8x128xf32>
    %cst_184 = arith.constant 1.000000e+00 : f32
    %512 = vector.broadcast %cst_184 : f32 to vector<8x128xf32>
    %513 = arith.subf %512, %506 : vector<8x128xf32>
    %514 = arith.mulf %513, %511 : vector<8x128xf32>
    %515 = arith.mulf %506, %485 : vector<8x128xf32>
    %516 = arith.addf %514, %515 : vector<8x128xf32>
    %517 = arith.select %36, %516, %485 : vector<8x128xi1>, vector<8x128xf32>
    %518 = vector.extract_strided_slice %517 {offsets = [0, 0], sizes = [8, 48], strides = [1, 1]} : vector<8x128xf32> to vector<8x48xf32>
    %c40_185 = arith.constant 40 : index
    %c0_186 = arith.constant 0 : index
    %519 = vector.load %arg12[%c40_185, %c0_186] : memref<64x128xf32, #tpu.memory_space<vmem>>, vector<8x48xf32>
    tpu.vector_store %arg12[%c40_185, %c0_186], %518 {strides = array<i32>} : memref<64x128xf32, #tpu.memory_space<vmem>>, vector<8x48xf32>,
    %520 = vector.extract_strided_slice %517 {offsets = [0, 48], sizes = [8, 48], strides = [1, 1]} : vector<8x128xf32> to vector<8x48xf32>
    %c16_187 = arith.constant 16 : index
    %c48_188 = arith.constant 48 : index
    %521 = vector.load %arg12[%c16_187, %c48_188] : memref<64x128xf32, #tpu.memory_space<vmem>>, vector<8x48xf32>
    tpu.vector_store %arg12[%c16_187, %c48_188], %520 {strides = array<i32>} : memref<64x128xf32, #tpu.memory_space<vmem>>, vector<8x48xf32>,
    %c48_189 = arith.constant 48 : index
    %c0_190 = arith.constant 0 : index
    %522 = vector.load %arg11[%c48_189, %c0_190] : memref<64x384xf32, #tpu.memory_space<vmem>>, vector<8x384xf32>
    %c8_191 = arith.constant 8 : index
    %c0_192 = arith.constant 0 : index
    %523 = vector.load %arg11[%c8_191, %c0_192] : memref<64x384xf32, #tpu.memory_space<vmem>>, vector<8x384xf32>
    %524 = arith.select %5, %522, %523 : vector<8x384xi1>, vector<8x384xf32>
    %525 = vector.extract_strided_slice %517 {offsets = [0, 0], sizes = [8, 96], strides = [1, 1]} : vector<8x128xf32> to vector<8x96xf32>
    %cst_193 = arith.constant dense<0.000000e+00> : vector<8x384xf32>
    %526 = tpu.matmul %525, %326, %cst_193 {dimension_numbers = #tpu.dot_dimension_numbers<[1], [0], [0], [1], [0, 0, 1, 1], [], []>} : vector<8x96xf32>, vector<96x384xf32>, vector<8x384xf32> -> vector<8x384xf32>
    %527 = vector.broadcast %328 : vector<1x384xf32> to vector<8x384xf32>
    %528 = arith.addf %526, %527 : vector<8x384xf32>
    %529 = vector.extract_strided_slice %524 {offsets = [0, 0], sizes = [8, 256], strides = [1, 1]} : vector<8x384xf32> to vector<8x256xf32>
    %530 = vector.extract_strided_slice %528 {offsets = [0, 0], sizes = [8, 256], strides = [1, 1]} : vector<8x384xf32> to vector<8x256xf32>
    %531 = arith.addf %529, %530 : vector<8x256xf32>
    %532 = arith.negf %531 : vector<8x256xf32>
    %533 = math.exp %532 : vector<8x256xf32>
    %cst_194 = arith.constant 1.000000e+00 : f32
    %534 = vector.broadcast %cst_194 : f32 to vector<8x256xf32>
    %535 = arith.addf %534, %533 : vector<8x256xf32>
    %536 = arith.divf %534, %535 : vector<8x256xf32>
    %537 = vector.extract_strided_slice %536 {offsets = [0, 0], sizes = [8, 128], strides = [1, 1]} : vector<8x256xf32> to vector<8x128xf32>
    %538 = vector.extract_strided_slice %536 {offsets = [0, 128], sizes = [8, 128], strides = [1, 1]} : vector<8x256xf32> to vector<8x128xf32>
    %539 = vector.extract_strided_slice %524 {offsets = [0, 256], sizes = [8, 128], strides = [1, 1]} : vector<8x384xf32> to vector<8x128xf32>
    %540 = vector.extract_strided_slice %528 {offsets = [0, 256], sizes = [8, 128], strides = [1, 1]} : vector<8x384xf32> to vector<8x128xf32>
    %541 = arith.mulf %537, %540 : vector<8x128xf32>
    %542 = arith.addf %539, %541 : vector<8x128xf32>
    %543 = math.tanh %542 : vector<8x128xf32>
    %cst_195 = arith.constant 1.000000e+00 : f32
    %544 = vector.broadcast %cst_195 : f32 to vector<8x128xf32>
    %545 = arith.subf %544, %538 : vector<8x128xf32>
    %546 = arith.mulf %545, %543 : vector<8x128xf32>
    %547 = arith.mulf %538, %517 : vector<8x128xf32>
    %548 = arith.addf %546, %547 : vector<8x128xf32>
    %549 = arith.select %41, %548, %517 : vector<8x128xi1>, vector<8x128xf32>
    %550 = vector.extract_strided_slice %549 {offsets = [0, 0], sizes = [8, 48], strides = [1, 1]} : vector<8x128xf32> to vector<8x48xf32>
    %c48_196 = arith.constant 48 : index
    %c0_197 = arith.constant 0 : index
    %551 = vector.load %arg12[%c48_196, %c0_197] : memref<64x128xf32, #tpu.memory_space<vmem>>, vector<8x48xf32>
    tpu.vector_store %arg12[%c48_196, %c0_197], %550 {strides = array<i32>} : memref<64x128xf32, #tpu.memory_space<vmem>>, vector<8x48xf32>,
    %552 = vector.extract_strided_slice %549 {offsets = [0, 48], sizes = [8, 48], strides = [1, 1]} : vector<8x128xf32> to vector<8x48xf32>
    %c8_198 = arith.constant 8 : index
    %c48_199 = arith.constant 48 : index
    %553 = vector.load %arg12[%c8_198, %c48_199] : memref<64x128xf32, #tpu.memory_space<vmem>>, vector<8x48xf32>
    tpu.vector_store %arg12[%c8_198, %c48_199], %552 {strides = array<i32>} : memref<64x128xf32, #tpu.memory_space<vmem>>, vector<8x48xf32>,
    %c56_200 = arith.constant 56 : index
    %c0_201 = arith.constant 0 : index
    %554 = vector.load %arg11[%c56_200, %c0_201] : memref<64x384xf32, #tpu.memory_space<vmem>>, vector<8x384xf32>
    %c0_202 = arith.constant 0 : index
    %c0_203 = arith.constant 0 : index
    %555 = vector.load %arg11[%c0_202, %c0_203] : memref<64x384xf32, #tpu.memory_space<vmem>>, vector<8x384xf32>
    %556 = arith.select %5, %554, %555 : vector<8x384xi1>, vector<8x384xf32>
    %557 = vector.extract_strided_slice %549 {offsets = [0, 0], sizes = [8, 96], strides = [1, 1]} : vector<8x128xf32> to vector<8x96xf32>
    %cst_204 = arith.constant dense<0.000000e+00> : vector<8x384xf32>
    %558 = tpu.matmul %557, %326, %cst_204 {dimension_numbers = #tpu.dot_dimension_numbers<[1], [0], [0], [1], [0, 0, 1, 1], [], []>} : vector<8x96xf32>, vector<96x384xf32>, vector<8x384xf32> -> vector<8x384xf32>
    %559 = vector.broadcast %328 : vector<1x384xf32> to vector<8x384xf32>
    %560 = arith.addf %558, %559 : vector<8x384xf32>
    %561 = vector.extract_strided_slice %556 {offsets = [0, 0], sizes = [8, 256], strides = [1, 1]} : vector<8x384xf32> to vector<8x256xf32>
    %562 = vector.extract_strided_slice %560 {offsets = [0, 0], sizes = [8, 256], strides = [1, 1]} : vector<8x384xf32> to vector<8x256xf32>
    %563 = arith.addf %561, %562 : vector<8x256xf32>
    %564 = arith.negf %563 : vector<8x256xf32>
    %565 = math.exp %564 : vector<8x256xf32>
    %cst_205 = arith.constant 1.000000e+00 : f32
    %566 = vector.broadcast %cst_205 : f32 to vector<8x256xf32>
    %567 = arith.addf %566, %565 : vector<8x256xf32>
    %568 = arith.divf %566, %567 : vector<8x256xf32>
    %569 = vector.extract_strided_slice %568 {offsets = [0, 0], sizes = [8, 128], strides = [1, 1]} : vector<8x256xf32> to vector<8x128xf32>
    %570 = vector.extract_strided_slice %568 {offsets = [0, 128], sizes = [8, 128], strides = [1, 1]} : vector<8x256xf32> to vector<8x128xf32>
    %571 = vector.extract_strided_slice %556 {offsets = [0, 256], sizes = [8, 128], strides = [1, 1]} : vector<8x384xf32> to vector<8x128xf32>
    %572 = vector.extract_strided_slice %560 {offsets = [0, 256], sizes = [8, 128], strides = [1, 1]} : vector<8x384xf32> to vector<8x128xf32>
    %573 = arith.mulf %569, %572 : vector<8x128xf32>
    %574 = arith.addf %571, %573 : vector<8x128xf32>
    %575 = math.tanh %574 : vector<8x128xf32>
    %cst_206 = arith.constant 1.000000e+00 : f32
    %576 = vector.broadcast %cst_206 : f32 to vector<8x128xf32>
    %577 = arith.subf %576, %570 : vector<8x128xf32>
    %578 = arith.mulf %577, %575 : vector<8x128xf32>
    %579 = arith.mulf %570, %549 : vector<8x128xf32>
    %580 = arith.addf %578, %579 : vector<8x128xf32>
    %581 = arith.select %46, %580, %549 : vector<8x128xi1>, vector<8x128xf32>
    %582 = vector.extract_strided_slice %581 {offsets = [0, 0], sizes = [8, 48], strides = [1, 1]} : vector<8x128xf32> to vector<8x48xf32>
    %c56_207 = arith.constant 56 : index
    %c0_208 = arith.constant 0 : index
    %583 = vector.load %arg12[%c56_207, %c0_208] : memref<64x128xf32, #tpu.memory_space<vmem>>, vector<8x48xf32>
    tpu.vector_store %arg12[%c56_207, %c0_208], %582 {strides = array<i32>} : memref<64x128xf32, #tpu.memory_space<vmem>>, vector<8x48xf32>,
    %584 = vector.extract_strided_slice %581 {offsets = [0, 48], sizes = [8, 48], strides = [1, 1]} : vector<8x128xf32> to vector<8x48xf32>
    %c0_209 = arith.constant 0 : index
    %c48_210 = arith.constant 48 : index
    %585 = vector.load %arg12[%c0_209, %c48_210] : memref<64x128xf32, #tpu.memory_space<vmem>>, vector<8x48xf32>
    tpu.vector_store %arg12[%c0_209, %c48_210], %584 {strides = array<i32>} : memref<64x128xf32, #tpu.memory_space<vmem>>, vector<8x48xf32>,
    %c0_211 = arith.constant 0 : index
    %c0_212 = arith.constant 0 : index
    %586 = vector.load %arg12[%c0_211, %c0_212] : memref<64x128xf32, #tpu.memory_space<vmem>>, vector<64x96xf32>
    %c1_213 = arith.constant 1 : index
    %c0_214 = arith.constant 0 : index
    %c0_215 = arith.constant 0 : index
    %587 = vector.load %arg4[%c1_213, %c0_214, %c0_215] : memref<3x96x384xf32, #tpu.memory_space<vmem>>, vector<1x96x384xf32>
    %588 = vector.shape_cast %587 : vector<1x96x384xf32> to vector<96x384xf32>
    %cst_216 = arith.constant dense<0.000000e+00> : vector<64x384xf32>
    %589 = tpu.matmul %586, %588, %cst_216 {dimension_numbers = #tpu.dot_dimension_numbers<[1], [0], [0], [1], [0, 0, 1, 1], [], []>} : vector<64x96xf32>, vector<96x384xf32>, vector<64x384xf32> -> vector<64x384xf32>
    %c2 = arith.constant 2 : index
    %c0_217 = arith.constant 0 : index
    %c0_218 = arith.constant 0 : index
    %590 = vector.load %arg6[%c2, %c0_217, %c0_218] : memref<4x1x384xf32, #tpu.memory_space<vmem>>, vector<1x1x384xf32>
    %591 = vector.shape_cast %590 : vector<1x1x384xf32> to vector<1x384xf32>
    %592 = vector.broadcast %591 : vector<1x384xf32> to vector<64x384xf32>
    %593 = arith.addf %589, %592 : vector<64x384xf32>
    %c0_219 = arith.constant 0 : index
    %c0_220 = arith.constant 0 : index
    %594 = vector.load %arg11[%c0_219, %c0_220] : memref<64x384xf32, #tpu.memory_space<vmem>>, vector<64x384xf32>
    tpu.vector_store %arg11[%c0_219, %c0_220], %593 {strides = array<i32>} : memref<64x384xf32, #tpu.memory_space<vmem>>, vector<64x384xf32>,
    %c2_221 = arith.constant 2 : index
    %c0_222 = arith.constant 0 : index
    %c0_223 = arith.constant 0 : index
    %595 = vector.load %arg5[%c2_221, %c0_222, %c0_223] : memref<4x96x384xf32, #tpu.memory_space<vmem>>, vector<1x96x384xf32>
    %596 = vector.shape_cast %595 : vector<1x96x384xf32> to vector<96x384xf32>
    %c2_224 = arith.constant 2 : index
    %c0_225 = arith.constant 0 : index
    %c0_226 = arith.constant 0 : index
    %597 = vector.load %arg7[%c2_224, %c0_225, %c0_226] : memref<4x1x384xf32, #tpu.memory_space<vmem>>, vector<1x1x384xf32>
    %598 = vector.shape_cast %597 : vector<1x1x384xf32> to vector<1x384xf32>
    %cst_227 = arith.constant 0.000000e+00 : f32
    %599 = vector.broadcast %cst_227 : f32 to vector<8x128xf32>
    %c0_228 = arith.constant 0 : index
    %c0_229 = arith.constant 0 : index
    %600 = vector.load %arg11[%c0_228, %c0_229] : memref<64x384xf32, #tpu.memory_space<vmem>>, vector<8x384xf32>
    %c56_230 = arith.constant 56 : index
    %c0_231 = arith.constant 0 : index
    %601 = vector.load %arg11[%c56_230, %c0_231] : memref<64x384xf32, #tpu.memory_space<vmem>>, vector<8x384xf32>
    %602 = arith.select %5, %600, %601 : vector<8x384xi1>, vector<8x384xf32>
    %603 = vector.extract_strided_slice %599 {offsets = [0, 0], sizes = [8, 96], strides = [1, 1]} : vector<8x128xf32> to vector<8x96xf32>
    %cst_232 = arith.constant dense<0.000000e+00> : vector<8x384xf32>
    %604 = tpu.matmul %603, %596, %cst_232 {dimension_numbers = #tpu.dot_dimension_numbers<[1], [0], [0], [1], [0, 0, 1, 1], [], []>} : vector<8x96xf32>, vector<96x384xf32>, vector<8x384xf32> -> vector<8x384xf32>
    %605 = vector.broadcast %598 : vector<1x384xf32> to vector<8x384xf32>
    %606 = arith.addf %604, %605 : vector<8x384xf32>
    %607 = vector.extract_strided_slice %602 {offsets = [0, 0], sizes = [8, 256], strides = [1, 1]} : vector<8x384xf32> to vector<8x256xf32>
    %608 = vector.extract_strided_slice %606 {offsets = [0, 0], sizes = [8, 256], strides = [1, 1]} : vector<8x384xf32> to vector<8x256xf32>
    %609 = arith.addf %607, %608 : vector<8x256xf32>
    %610 = arith.negf %609 : vector<8x256xf32>
    %611 = math.exp %610 : vector<8x256xf32>
    %cst_233 = arith.constant 1.000000e+00 : f32
    %612 = vector.broadcast %cst_233 : f32 to vector<8x256xf32>
    %613 = arith.addf %612, %611 : vector<8x256xf32>
    %614 = arith.divf %612, %613 : vector<8x256xf32>
    %615 = vector.extract_strided_slice %614 {offsets = [0, 0], sizes = [8, 128], strides = [1, 1]} : vector<8x256xf32> to vector<8x128xf32>
    %616 = vector.extract_strided_slice %614 {offsets = [0, 128], sizes = [8, 128], strides = [1, 1]} : vector<8x256xf32> to vector<8x128xf32>
    %617 = vector.extract_strided_slice %602 {offsets = [0, 256], sizes = [8, 128], strides = [1, 1]} : vector<8x384xf32> to vector<8x128xf32>
    %618 = vector.extract_strided_slice %606 {offsets = [0, 256], sizes = [8, 128], strides = [1, 1]} : vector<8x384xf32> to vector<8x128xf32>
    %619 = arith.mulf %615, %618 : vector<8x128xf32>
    %620 = arith.addf %617, %619 : vector<8x128xf32>
    %621 = math.tanh %620 : vector<8x128xf32>
    %cst_234 = arith.constant 1.000000e+00 : f32
    %622 = vector.broadcast %cst_234 : f32 to vector<8x128xf32>
    %623 = arith.subf %622, %616 : vector<8x128xf32>
    %624 = arith.mulf %623, %621 : vector<8x128xf32>
    %625 = arith.mulf %616, %599 : vector<8x128xf32>
    %626 = arith.addf %624, %625 : vector<8x128xf32>
    %627 = arith.select %11, %626, %599 : vector<8x128xi1>, vector<8x128xf32>
    %628 = vector.extract_strided_slice %627 {offsets = [0, 0], sizes = [8, 48], strides = [1, 1]} : vector<8x128xf32> to vector<8x48xf32>
    %c0_235 = arith.constant 0 : index
    %c0_236 = arith.constant 0 : index
    %629 = vector.load %arg12[%c0_235, %c0_236] : memref<64x128xf32, #tpu.memory_space<vmem>>, vector<8x48xf32>
    tpu.vector_store %arg12[%c0_235, %c0_236], %628 {strides = array<i32>} : memref<64x128xf32, #tpu.memory_space<vmem>>, vector<8x48xf32>,
    %630 = vector.extract_strided_slice %627 {offsets = [0, 48], sizes = [8, 48], strides = [1, 1]} : vector<8x128xf32> to vector<8x48xf32>
    %c56_237 = arith.constant 56 : index
    %c48_238 = arith.constant 48 : index
    %631 = vector.load %arg12[%c56_237, %c48_238] : memref<64x128xf32, #tpu.memory_space<vmem>>, vector<8x48xf32>
    tpu.vector_store %arg12[%c56_237, %c48_238], %630 {strides = array<i32>} : memref<64x128xf32, #tpu.memory_space<vmem>>, vector<8x48xf32>,
    %c8_239 = arith.constant 8 : index
    %c0_240 = arith.constant 0 : index
    %632 = vector.load %arg11[%c8_239, %c0_240] : memref<64x384xf32, #tpu.memory_space<vmem>>, vector<8x384xf32>
    %c48_241 = arith.constant 48 : index
    %c0_242 = arith.constant 0 : index
    %633 = vector.load %arg11[%c48_241, %c0_242] : memref<64x384xf32, #tpu.memory_space<vmem>>, vector<8x384xf32>
    %634 = arith.select %5, %632, %633 : vector<8x384xi1>, vector<8x384xf32>
    %635 = vector.extract_strided_slice %627 {offsets = [0, 0], sizes = [8, 96], strides = [1, 1]} : vector<8x128xf32> to vector<8x96xf32>
    %cst_243 = arith.constant dense<0.000000e+00> : vector<8x384xf32>
    %636 = tpu.matmul %635, %596, %cst_243 {dimension_numbers = #tpu.dot_dimension_numbers<[1], [0], [0], [1], [0, 0, 1, 1], [], []>} : vector<8x96xf32>, vector<96x384xf32>, vector<8x384xf32> -> vector<8x384xf32>
    %637 = vector.broadcast %598 : vector<1x384xf32> to vector<8x384xf32>
    %638 = arith.addf %636, %637 : vector<8x384xf32>
    %639 = vector.extract_strided_slice %634 {offsets = [0, 0], sizes = [8, 256], strides = [1, 1]} : vector<8x384xf32> to vector<8x256xf32>
    %640 = vector.extract_strided_slice %638 {offsets = [0, 0], sizes = [8, 256], strides = [1, 1]} : vector<8x384xf32> to vector<8x256xf32>
    %641 = arith.addf %639, %640 : vector<8x256xf32>
    %642 = arith.negf %641 : vector<8x256xf32>
    %643 = math.exp %642 : vector<8x256xf32>
    %cst_244 = arith.constant 1.000000e+00 : f32
    %644 = vector.broadcast %cst_244 : f32 to vector<8x256xf32>
    %645 = arith.addf %644, %643 : vector<8x256xf32>
    %646 = arith.divf %644, %645 : vector<8x256xf32>
    %647 = vector.extract_strided_slice %646 {offsets = [0, 0], sizes = [8, 128], strides = [1, 1]} : vector<8x256xf32> to vector<8x128xf32>
    %648 = vector.extract_strided_slice %646 {offsets = [0, 128], sizes = [8, 128], strides = [1, 1]} : vector<8x256xf32> to vector<8x128xf32>
    %649 = vector.extract_strided_slice %634 {offsets = [0, 256], sizes = [8, 128], strides = [1, 1]} : vector<8x384xf32> to vector<8x128xf32>
    %650 = vector.extract_strided_slice %638 {offsets = [0, 256], sizes = [8, 128], strides = [1, 1]} : vector<8x384xf32> to vector<8x128xf32>
    %651 = arith.mulf %647, %650 : vector<8x128xf32>
    %652 = arith.addf %649, %651 : vector<8x128xf32>
    %653 = math.tanh %652 : vector<8x128xf32>
    %cst_245 = arith.constant 1.000000e+00 : f32
    %654 = vector.broadcast %cst_245 : f32 to vector<8x128xf32>
    %655 = arith.subf %654, %648 : vector<8x128xf32>
    %656 = arith.mulf %655, %653 : vector<8x128xf32>
    %657 = arith.mulf %648, %627 : vector<8x128xf32>
    %658 = arith.addf %656, %657 : vector<8x128xf32>
    %659 = arith.select %16, %658, %627 : vector<8x128xi1>, vector<8x128xf32>
    %660 = vector.extract_strided_slice %659 {offsets = [0, 0], sizes = [8, 48], strides = [1, 1]} : vector<8x128xf32> to vector<8x48xf32>
    %c8_246 = arith.constant 8 : index
    %c0_247 = arith.constant 0 : index
    %661 = vector.load %arg12[%c8_246, %c0_247] : memref<64x128xf32, #tpu.memory_space<vmem>>, vector<8x48xf32>
    tpu.vector_store %arg12[%c8_246, %c0_247], %660 {strides = array<i32>} : memref<64x128xf32, #tpu.memory_space<vmem>>, vector<8x48xf32>,
    %662 = vector.extract_strided_slice %659 {offsets = [0, 48], sizes = [8, 48], strides = [1, 1]} : vector<8x128xf32> to vector<8x48xf32>
    %c48_248 = arith.constant 48 : index
    %c48_249 = arith.constant 48 : index
    %663 = vector.load %arg12[%c48_248, %c48_249] : memref<64x128xf32, #tpu.memory_space<vmem>>, vector<8x48xf32>
    tpu.vector_store %arg12[%c48_248, %c48_249], %662 {strides = array<i32>} : memref<64x128xf32, #tpu.memory_space<vmem>>, vector<8x48xf32>,
    %c16_250 = arith.constant 16 : index
    %c0_251 = arith.constant 0 : index
    %664 = vector.load %arg11[%c16_250, %c0_251] : memref<64x384xf32, #tpu.memory_space<vmem>>, vector<8x384xf32>
    %c40_252 = arith.constant 40 : index
    %c0_253 = arith.constant 0 : index
    %665 = vector.load %arg11[%c40_252, %c0_253] : memref<64x384xf32, #tpu.memory_space<vmem>>, vector<8x384xf32>
    %666 = arith.select %5, %664, %665 : vector<8x384xi1>, vector<8x384xf32>
    %667 = vector.extract_strided_slice %659 {offsets = [0, 0], sizes = [8, 96], strides = [1, 1]} : vector<8x128xf32> to vector<8x96xf32>
    %cst_254 = arith.constant dense<0.000000e+00> : vector<8x384xf32>
    %668 = tpu.matmul %667, %596, %cst_254 {dimension_numbers = #tpu.dot_dimension_numbers<[1], [0], [0], [1], [0, 0, 1, 1], [], []>} : vector<8x96xf32>, vector<96x384xf32>, vector<8x384xf32> -> vector<8x384xf32>
    %669 = vector.broadcast %598 : vector<1x384xf32> to vector<8x384xf32>
    %670 = arith.addf %668, %669 : vector<8x384xf32>
    %671 = vector.extract_strided_slice %666 {offsets = [0, 0], sizes = [8, 256], strides = [1, 1]} : vector<8x384xf32> to vector<8x256xf32>
    %672 = vector.extract_strided_slice %670 {offsets = [0, 0], sizes = [8, 256], strides = [1, 1]} : vector<8x384xf32> to vector<8x256xf32>
    %673 = arith.addf %671, %672 : vector<8x256xf32>
    %674 = arith.negf %673 : vector<8x256xf32>
    %675 = math.exp %674 : vector<8x256xf32>
    %cst_255 = arith.constant 1.000000e+00 : f32
    %676 = vector.broadcast %cst_255 : f32 to vector<8x256xf32>
    %677 = arith.addf %676, %675 : vector<8x256xf32>
    %678 = arith.divf %676, %677 : vector<8x256xf32>
    %679 = vector.extract_strided_slice %678 {offsets = [0, 0], sizes = [8, 128], strides = [1, 1]} : vector<8x256xf32> to vector<8x128xf32>
    %680 = vector.extract_strided_slice %678 {offsets = [0, 128], sizes = [8, 128], strides = [1, 1]} : vector<8x256xf32> to vector<8x128xf32>
    %681 = vector.extract_strided_slice %666 {offsets = [0, 256], sizes = [8, 128], strides = [1, 1]} : vector<8x384xf32> to vector<8x128xf32>
    %682 = vector.extract_strided_slice %670 {offsets = [0, 256], sizes = [8, 128], strides = [1, 1]} : vector<8x384xf32> to vector<8x128xf32>
    %683 = arith.mulf %679, %682 : vector<8x128xf32>
    %684 = arith.addf %681, %683 : vector<8x128xf32>
    %685 = math.tanh %684 : vector<8x128xf32>
    %cst_256 = arith.constant 1.000000e+00 : f32
    %686 = vector.broadcast %cst_256 : f32 to vector<8x128xf32>
    %687 = arith.subf %686, %680 : vector<8x128xf32>
    %688 = arith.mulf %687, %685 : vector<8x128xf32>
    %689 = arith.mulf %680, %659 : vector<8x128xf32>
    %690 = arith.addf %688, %689 : vector<8x128xf32>
    %691 = arith.select %21, %690, %659 : vector<8x128xi1>, vector<8x128xf32>
    %692 = vector.extract_strided_slice %691 {offsets = [0, 0], sizes = [8, 48], strides = [1, 1]} : vector<8x128xf32> to vector<8x48xf32>
    %c16_257 = arith.constant 16 : index
    %c0_258 = arith.constant 0 : index
    %693 = vector.load %arg12[%c16_257, %c0_258] : memref<64x128xf32, #tpu.memory_space<vmem>>, vector<8x48xf32>
    tpu.vector_store %arg12[%c16_257, %c0_258], %692 {strides = array<i32>} : memref<64x128xf32, #tpu.memory_space<vmem>>, vector<8x48xf32>,
    %694 = vector.extract_strided_slice %691 {offsets = [0, 48], sizes = [8, 48], strides = [1, 1]} : vector<8x128xf32> to vector<8x48xf32>
    %c40_259 = arith.constant 40 : index
    %c48_260 = arith.constant 48 : index
    %695 = vector.load %arg12[%c40_259, %c48_260] : memref<64x128xf32, #tpu.memory_space<vmem>>, vector<8x48xf32>
    tpu.vector_store %arg12[%c40_259, %c48_260], %694 {strides = array<i32>} : memref<64x128xf32, #tpu.memory_space<vmem>>, vector<8x48xf32>,
    %c24_261 = arith.constant 24 : index
    %c0_262 = arith.constant 0 : index
    %696 = vector.load %arg11[%c24_261, %c0_262] : memref<64x384xf32, #tpu.memory_space<vmem>>, vector<8x384xf32>
    %c32_263 = arith.constant 32 : index
    %c0_264 = arith.constant 0 : index
    %697 = vector.load %arg11[%c32_263, %c0_264] : memref<64x384xf32, #tpu.memory_space<vmem>>, vector<8x384xf32>
    %698 = arith.select %5, %696, %697 : vector<8x384xi1>, vector<8x384xf32>
    %699 = vector.extract_strided_slice %691 {offsets = [0, 0], sizes = [8, 96], strides = [1, 1]} : vector<8x128xf32> to vector<8x96xf32>
    %cst_265 = arith.constant dense<0.000000e+00> : vector<8x384xf32>
    %700 = tpu.matmul %699, %596, %cst_265 {dimension_numbers = #tpu.dot_dimension_numbers<[1], [0], [0], [1], [0, 0, 1, 1], [], []>} : vector<8x96xf32>, vector<96x384xf32>, vector<8x384xf32> -> vector<8x384xf32>
    %701 = vector.broadcast %598 : vector<1x384xf32> to vector<8x384xf32>
    %702 = arith.addf %700, %701 : vector<8x384xf32>
    %703 = vector.extract_strided_slice %698 {offsets = [0, 0], sizes = [8, 256], strides = [1, 1]} : vector<8x384xf32> to vector<8x256xf32>
    %704 = vector.extract_strided_slice %702 {offsets = [0, 0], sizes = [8, 256], strides = [1, 1]} : vector<8x384xf32> to vector<8x256xf32>
    %705 = arith.addf %703, %704 : vector<8x256xf32>
    %706 = arith.negf %705 : vector<8x256xf32>
    %707 = math.exp %706 : vector<8x256xf32>
    %cst_266 = arith.constant 1.000000e+00 : f32
    %708 = vector.broadcast %cst_266 : f32 to vector<8x256xf32>
    %709 = arith.addf %708, %707 : vector<8x256xf32>
    %710 = arith.divf %708, %709 : vector<8x256xf32>
    %711 = vector.extract_strided_slice %710 {offsets = [0, 0], sizes = [8, 128], strides = [1, 1]} : vector<8x256xf32> to vector<8x128xf32>
    %712 = vector.extract_strided_slice %710 {offsets = [0, 128], sizes = [8, 128], strides = [1, 1]} : vector<8x256xf32> to vector<8x128xf32>
    %713 = vector.extract_strided_slice %698 {offsets = [0, 256], sizes = [8, 128], strides = [1, 1]} : vector<8x384xf32> to vector<8x128xf32>
    %714 = vector.extract_strided_slice %702 {offsets = [0, 256], sizes = [8, 128], strides = [1, 1]} : vector<8x384xf32> to vector<8x128xf32>
    %715 = arith.mulf %711, %714 : vector<8x128xf32>
    %716 = arith.addf %713, %715 : vector<8x128xf32>
    %717 = math.tanh %716 : vector<8x128xf32>
    %cst_267 = arith.constant 1.000000e+00 : f32
    %718 = vector.broadcast %cst_267 : f32 to vector<8x128xf32>
    %719 = arith.subf %718, %712 : vector<8x128xf32>
    %720 = arith.mulf %719, %717 : vector<8x128xf32>
    %721 = arith.mulf %712, %691 : vector<8x128xf32>
    %722 = arith.addf %720, %721 : vector<8x128xf32>
    %723 = arith.select %26, %722, %691 : vector<8x128xi1>, vector<8x128xf32>
    %724 = vector.extract_strided_slice %723 {offsets = [0, 0], sizes = [8, 48], strides = [1, 1]} : vector<8x128xf32> to vector<8x48xf32>
    %c24_268 = arith.constant 24 : index
    %c0_269 = arith.constant 0 : index
    %725 = vector.load %arg12[%c24_268, %c0_269] : memref<64x128xf32, #tpu.memory_space<vmem>>, vector<8x48xf32>
    tpu.vector_store %arg12[%c24_268, %c0_269], %724 {strides = array<i32>} : memref<64x128xf32, #tpu.memory_space<vmem>>, vector<8x48xf32>,
    %726 = vector.extract_strided_slice %723 {offsets = [0, 48], sizes = [8, 48], strides = [1, 1]} : vector<8x128xf32> to vector<8x48xf32>
    %c32_270 = arith.constant 32 : index
    %c48_271 = arith.constant 48 : index
    %727 = vector.load %arg12[%c32_270, %c48_271] : memref<64x128xf32, #tpu.memory_space<vmem>>, vector<8x48xf32>
    tpu.vector_store %arg12[%c32_270, %c48_271], %726 {strides = array<i32>} : memref<64x128xf32, #tpu.memory_space<vmem>>, vector<8x48xf32>,
    %c32_272 = arith.constant 32 : index
    %c0_273 = arith.constant 0 : index
    %728 = vector.load %arg11[%c32_272, %c0_273] : memref<64x384xf32, #tpu.memory_space<vmem>>, vector<8x384xf32>
    %c24_274 = arith.constant 24 : index
    %c0_275 = arith.constant 0 : index
    %729 = vector.load %arg11[%c24_274, %c0_275] : memref<64x384xf32, #tpu.memory_space<vmem>>, vector<8x384xf32>
    %730 = arith.select %5, %728, %729 : vector<8x384xi1>, vector<8x384xf32>
    %731 = vector.extract_strided_slice %723 {offsets = [0, 0], sizes = [8, 96], strides = [1, 1]} : vector<8x128xf32> to vector<8x96xf32>
    %cst_276 = arith.constant dense<0.000000e+00> : vector<8x384xf32>
    %732 = tpu.matmul %731, %596, %cst_276 {dimension_numbers = #tpu.dot_dimension_numbers<[1], [0], [0], [1], [0, 0, 1, 1], [], []>} : vector<8x96xf32>, vector<96x384xf32>, vector<8x384xf32> -> vector<8x384xf32>
    %733 = vector.broadcast %598 : vector<1x384xf32> to vector<8x384xf32>
    %734 = arith.addf %732, %733 : vector<8x384xf32>
    %735 = vector.extract_strided_slice %730 {offsets = [0, 0], sizes = [8, 256], strides = [1, 1]} : vector<8x384xf32> to vector<8x256xf32>
    %736 = vector.extract_strided_slice %734 {offsets = [0, 0], sizes = [8, 256], strides = [1, 1]} : vector<8x384xf32> to vector<8x256xf32>
    %737 = arith.addf %735, %736 : vector<8x256xf32>
    %738 = arith.negf %737 : vector<8x256xf32>
    %739 = math.exp %738 : vector<8x256xf32>
    %cst_277 = arith.constant 1.000000e+00 : f32
    %740 = vector.broadcast %cst_277 : f32 to vector<8x256xf32>
    %741 = arith.addf %740, %739 : vector<8x256xf32>
    %742 = arith.divf %740, %741 : vector<8x256xf32>
    %743 = vector.extract_strided_slice %742 {offsets = [0, 0], sizes = [8, 128], strides = [1, 1]} : vector<8x256xf32> to vector<8x128xf32>
    %744 = vector.extract_strided_slice %742 {offsets = [0, 128], sizes = [8, 128], strides = [1, 1]} : vector<8x256xf32> to vector<8x128xf32>
    %745 = vector.extract_strided_slice %730 {offsets = [0, 256], sizes = [8, 128], strides = [1, 1]} : vector<8x384xf32> to vector<8x128xf32>
    %746 = vector.extract_strided_slice %734 {offsets = [0, 256], sizes = [8, 128], strides = [1, 1]} : vector<8x384xf32> to vector<8x128xf32>
    %747 = arith.mulf %743, %746 : vector<8x128xf32>
    %748 = arith.addf %745, %747 : vector<8x128xf32>
    %749 = math.tanh %748 : vector<8x128xf32>
    %cst_278 = arith.constant 1.000000e+00 : f32
    %750 = vector.broadcast %cst_278 : f32 to vector<8x128xf32>
    %751 = arith.subf %750, %744 : vector<8x128xf32>
    %752 = arith.mulf %751, %749 : vector<8x128xf32>
    %753 = arith.mulf %744, %723 : vector<8x128xf32>
    %754 = arith.addf %752, %753 : vector<8x128xf32>
    %755 = arith.select %31, %754, %723 : vector<8x128xi1>, vector<8x128xf32>
    %756 = vector.extract_strided_slice %755 {offsets = [0, 0], sizes = [8, 48], strides = [1, 1]} : vector<8x128xf32> to vector<8x48xf32>
    %c32_279 = arith.constant 32 : index
    %c0_280 = arith.constant 0 : index
    %757 = vector.load %arg12[%c32_279, %c0_280] : memref<64x128xf32, #tpu.memory_space<vmem>>, vector<8x48xf32>
    tpu.vector_store %arg12[%c32_279, %c0_280], %756 {strides = array<i32>} : memref<64x128xf32, #tpu.memory_space<vmem>>, vector<8x48xf32>,
    %758 = vector.extract_strided_slice %755 {offsets = [0, 48], sizes = [8, 48], strides = [1, 1]} : vector<8x128xf32> to vector<8x48xf32>
    %c24_281 = arith.constant 24 : index
    %c48_282 = arith.constant 48 : index
    %759 = vector.load %arg12[%c24_281, %c48_282] : memref<64x128xf32, #tpu.memory_space<vmem>>, vector<8x48xf32>
    tpu.vector_store %arg12[%c24_281, %c48_282], %758 {strides = array<i32>} : memref<64x128xf32, #tpu.memory_space<vmem>>, vector<8x48xf32>,
    %c40_283 = arith.constant 40 : index
    %c0_284 = arith.constant 0 : index
    %760 = vector.load %arg11[%c40_283, %c0_284] : memref<64x384xf32, #tpu.memory_space<vmem>>, vector<8x384xf32>
    %c16_285 = arith.constant 16 : index
    %c0_286 = arith.constant 0 : index
    %761 = vector.load %arg11[%c16_285, %c0_286] : memref<64x384xf32, #tpu.memory_space<vmem>>, vector<8x384xf32>
    %762 = arith.select %5, %760, %761 : vector<8x384xi1>, vector<8x384xf32>
    %763 = vector.extract_strided_slice %755 {offsets = [0, 0], sizes = [8, 96], strides = [1, 1]} : vector<8x128xf32> to vector<8x96xf32>
    %cst_287 = arith.constant dense<0.000000e+00> : vector<8x384xf32>
    %764 = tpu.matmul %763, %596, %cst_287 {dimension_numbers = #tpu.dot_dimension_numbers<[1], [0], [0], [1], [0, 0, 1, 1], [], []>} : vector<8x96xf32>, vector<96x384xf32>, vector<8x384xf32> -> vector<8x384xf32>
    %765 = vector.broadcast %598 : vector<1x384xf32> to vector<8x384xf32>
    %766 = arith.addf %764, %765 : vector<8x384xf32>
    %767 = vector.extract_strided_slice %762 {offsets = [0, 0], sizes = [8, 256], strides = [1, 1]} : vector<8x384xf32> to vector<8x256xf32>
    %768 = vector.extract_strided_slice %766 {offsets = [0, 0], sizes = [8, 256], strides = [1, 1]} : vector<8x384xf32> to vector<8x256xf32>
    %769 = arith.addf %767, %768 : vector<8x256xf32>
    %770 = arith.negf %769 : vector<8x256xf32>
    %771 = math.exp %770 : vector<8x256xf32>
    %cst_288 = arith.constant 1.000000e+00 : f32
    %772 = vector.broadcast %cst_288 : f32 to vector<8x256xf32>
    %773 = arith.addf %772, %771 : vector<8x256xf32>
    %774 = arith.divf %772, %773 : vector<8x256xf32>
    %775 = vector.extract_strided_slice %774 {offsets = [0, 0], sizes = [8, 128], strides = [1, 1]} : vector<8x256xf32> to vector<8x128xf32>
    %776 = vector.extract_strided_slice %774 {offsets = [0, 128], sizes = [8, 128], strides = [1, 1]} : vector<8x256xf32> to vector<8x128xf32>
    %777 = vector.extract_strided_slice %762 {offsets = [0, 256], sizes = [8, 128], strides = [1, 1]} : vector<8x384xf32> to vector<8x128xf32>
    %778 = vector.extract_strided_slice %766 {offsets = [0, 256], sizes = [8, 128], strides = [1, 1]} : vector<8x384xf32> to vector<8x128xf32>
    %779 = arith.mulf %775, %778 : vector<8x128xf32>
    %780 = arith.addf %777, %779 : vector<8x128xf32>
    %781 = math.tanh %780 : vector<8x128xf32>
    %cst_289 = arith.constant 1.000000e+00 : f32
    %782 = vector.broadcast %cst_289 : f32 to vector<8x128xf32>
    %783 = arith.subf %782, %776 : vector<8x128xf32>
    %784 = arith.mulf %783, %781 : vector<8x128xf32>
    %785 = arith.mulf %776, %755 : vector<8x128xf32>
    %786 = arith.addf %784, %785 : vector<8x128xf32>
    %787 = arith.select %36, %786, %755 : vector<8x128xi1>, vector<8x128xf32>
    %788 = vector.extract_strided_slice %787 {offsets = [0, 0], sizes = [8, 48], strides = [1, 1]} : vector<8x128xf32> to vector<8x48xf32>
    %c40_290 = arith.constant 40 : index
    %c0_291 = arith.constant 0 : index
    %789 = vector.load %arg12[%c40_290, %c0_291] : memref<64x128xf32, #tpu.memory_space<vmem>>, vector<8x48xf32>
    tpu.vector_store %arg12[%c40_290, %c0_291], %788 {strides = array<i32>} : memref<64x128xf32, #tpu.memory_space<vmem>>, vector<8x48xf32>,
    %790 = vector.extract_strided_slice %787 {offsets = [0, 48], sizes = [8, 48], strides = [1, 1]} : vector<8x128xf32> to vector<8x48xf32>
    %c16_292 = arith.constant 16 : index
    %c48_293 = arith.constant 48 : index
    %791 = vector.load %arg12[%c16_292, %c48_293] : memref<64x128xf32, #tpu.memory_space<vmem>>, vector<8x48xf32>
    tpu.vector_store %arg12[%c16_292, %c48_293], %790 {strides = array<i32>} : memref<64x128xf32, #tpu.memory_space<vmem>>, vector<8x48xf32>,
    %c48_294 = arith.constant 48 : index
    %c0_295 = arith.constant 0 : index
    %792 = vector.load %arg11[%c48_294, %c0_295] : memref<64x384xf32, #tpu.memory_space<vmem>>, vector<8x384xf32>
    %c8_296 = arith.constant 8 : index
    %c0_297 = arith.constant 0 : index
    %793 = vector.load %arg11[%c8_296, %c0_297] : memref<64x384xf32, #tpu.memory_space<vmem>>, vector<8x384xf32>
    %794 = arith.select %5, %792, %793 : vector<8x384xi1>, vector<8x384xf32>
    %795 = vector.extract_strided_slice %787 {offsets = [0, 0], sizes = [8, 96], strides = [1, 1]} : vector<8x128xf32> to vector<8x96xf32>
    %cst_298 = arith.constant dense<0.000000e+00> : vector<8x384xf32>
    %796 = tpu.matmul %795, %596, %cst_298 {dimension_numbers = #tpu.dot_dimension_numbers<[1], [0], [0], [1], [0, 0, 1, 1], [], []>} : vector<8x96xf32>, vector<96x384xf32>, vector<8x384xf32> -> vector<8x384xf32>
    %797 = vector.broadcast %598 : vector<1x384xf32> to vector<8x384xf32>
    %798 = arith.addf %796, %797 : vector<8x384xf32>
    %799 = vector.extract_strided_slice %794 {offsets = [0, 0], sizes = [8, 256], strides = [1, 1]} : vector<8x384xf32> to vector<8x256xf32>
    %800 = vector.extract_strided_slice %798 {offsets = [0, 0], sizes = [8, 256], strides = [1, 1]} : vector<8x384xf32> to vector<8x256xf32>
    %801 = arith.addf %799, %800 : vector<8x256xf32>
    %802 = arith.negf %801 : vector<8x256xf32>
    %803 = math.exp %802 : vector<8x256xf32>
    %cst_299 = arith.constant 1.000000e+00 : f32
    %804 = vector.broadcast %cst_299 : f32 to vector<8x256xf32>
    %805 = arith.addf %804, %803 : vector<8x256xf32>
    %806 = arith.divf %804, %805 : vector<8x256xf32>
    %807 = vector.extract_strided_slice %806 {offsets = [0, 0], sizes = [8, 128], strides = [1, 1]} : vector<8x256xf32> to vector<8x128xf32>
    %808 = vector.extract_strided_slice %806 {offsets = [0, 128], sizes = [8, 128], strides = [1, 1]} : vector<8x256xf32> to vector<8x128xf32>
    %809 = vector.extract_strided_slice %794 {offsets = [0, 256], sizes = [8, 128], strides = [1, 1]} : vector<8x384xf32> to vector<8x128xf32>
    %810 = vector.extract_strided_slice %798 {offsets = [0, 256], sizes = [8, 128], strides = [1, 1]} : vector<8x384xf32> to vector<8x128xf32>
    %811 = arith.mulf %807, %810 : vector<8x128xf32>
    %812 = arith.addf %809, %811 : vector<8x128xf32>
    %813 = math.tanh %812 : vector<8x128xf32>
    %cst_300 = arith.constant 1.000000e+00 : f32
    %814 = vector.broadcast %cst_300 : f32 to vector<8x128xf32>
    %815 = arith.subf %814, %808 : vector<8x128xf32>
    %816 = arith.mulf %815, %813 : vector<8x128xf32>
    %817 = arith.mulf %808, %787 : vector<8x128xf32>
    %818 = arith.addf %816, %817 : vector<8x128xf32>
    %819 = arith.select %41, %818, %787 : vector<8x128xi1>, vector<8x128xf32>
    %820 = vector.extract_strided_slice %819 {offsets = [0, 0], sizes = [8, 48], strides = [1, 1]} : vector<8x128xf32> to vector<8x48xf32>
    %c48_301 = arith.constant 48 : index
    %c0_302 = arith.constant 0 : index
    %821 = vector.load %arg12[%c48_301, %c0_302] : memref<64x128xf32, #tpu.memory_space<vmem>>, vector<8x48xf32>
    tpu.vector_store %arg12[%c48_301, %c0_302], %820 {strides = array<i32>} : memref<64x128xf32, #tpu.memory_space<vmem>>, vector<8x48xf32>,
    %822 = vector.extract_strided_slice %819 {offsets = [0, 48], sizes = [8, 48], strides = [1, 1]} : vector<8x128xf32> to vector<8x48xf32>
    %c8_303 = arith.constant 8 : index
    %c48_304 = arith.constant 48 : index
    %823 = vector.load %arg12[%c8_303, %c48_304] : memref<64x128xf32, #tpu.memory_space<vmem>>, vector<8x48xf32>
    tpu.vector_store %arg12[%c8_303, %c48_304], %822 {strides = array<i32>} : memref<64x128xf32, #tpu.memory_space<vmem>>, vector<8x48xf32>,
    %c56_305 = arith.constant 56 : index
    %c0_306 = arith.constant 0 : index
    %824 = vector.load %arg11[%c56_305, %c0_306] : memref<64x384xf32, #tpu.memory_space<vmem>>, vector<8x384xf32>
    %c0_307 = arith.constant 0 : index
    %c0_308 = arith.constant 0 : index
    %825 = vector.load %arg11[%c0_307, %c0_308] : memref<64x384xf32, #tpu.memory_space<vmem>>, vector<8x384xf32>
    %826 = arith.select %5, %824, %825 : vector<8x384xi1>, vector<8x384xf32>
    %827 = vector.extract_strided_slice %819 {offsets = [0, 0], sizes = [8, 96], strides = [1, 1]} : vector<8x128xf32> to vector<8x96xf32>
    %cst_309 = arith.constant dense<0.000000e+00> : vector<8x384xf32>
    %828 = tpu.matmul %827, %596, %cst_309 {dimension_numbers = #tpu.dot_dimension_numbers<[1], [0], [0], [1], [0, 0, 1, 1], [], []>} : vector<8x96xf32>, vector<96x384xf32>, vector<8x384xf32> -> vector<8x384xf32>
    %829 = vector.broadcast %598 : vector<1x384xf32> to vector<8x384xf32>
    %830 = arith.addf %828, %829 : vector<8x384xf32>
    %831 = vector.extract_strided_slice %826 {offsets = [0, 0], sizes = [8, 256], strides = [1, 1]} : vector<8x384xf32> to vector<8x256xf32>
    %832 = vector.extract_strided_slice %830 {offsets = [0, 0], sizes = [8, 256], strides = [1, 1]} : vector<8x384xf32> to vector<8x256xf32>
    %833 = arith.addf %831, %832 : vector<8x256xf32>
    %834 = arith.negf %833 : vector<8x256xf32>
    %835 = math.exp %834 : vector<8x256xf32>
    %cst_310 = arith.constant 1.000000e+00 : f32
    %836 = vector.broadcast %cst_310 : f32 to vector<8x256xf32>
    %837 = arith.addf %836, %835 : vector<8x256xf32>
    %838 = arith.divf %836, %837 : vector<8x256xf32>
    %839 = vector.extract_strided_slice %838 {offsets = [0, 0], sizes = [8, 128], strides = [1, 1]} : vector<8x256xf32> to vector<8x128xf32>
    %840 = vector.extract_strided_slice %838 {offsets = [0, 128], sizes = [8, 128], strides = [1, 1]} : vector<8x256xf32> to vector<8x128xf32>
    %841 = vector.extract_strided_slice %826 {offsets = [0, 256], sizes = [8, 128], strides = [1, 1]} : vector<8x384xf32> to vector<8x128xf32>
    %842 = vector.extract_strided_slice %830 {offsets = [0, 256], sizes = [8, 128], strides = [1, 1]} : vector<8x384xf32> to vector<8x128xf32>
    %843 = arith.mulf %839, %842 : vector<8x128xf32>
    %844 = arith.addf %841, %843 : vector<8x128xf32>
    %845 = math.tanh %844 : vector<8x128xf32>
    %cst_311 = arith.constant 1.000000e+00 : f32
    %846 = vector.broadcast %cst_311 : f32 to vector<8x128xf32>
    %847 = arith.subf %846, %840 : vector<8x128xf32>
    %848 = arith.mulf %847, %845 : vector<8x128xf32>
    %849 = arith.mulf %840, %819 : vector<8x128xf32>
    %850 = arith.addf %848, %849 : vector<8x128xf32>
    %851 = arith.select %46, %850, %819 : vector<8x128xi1>, vector<8x128xf32>
    %852 = vector.extract_strided_slice %851 {offsets = [0, 0], sizes = [8, 48], strides = [1, 1]} : vector<8x128xf32> to vector<8x48xf32>
    %c56_312 = arith.constant 56 : index
    %c0_313 = arith.constant 0 : index
    %853 = vector.load %arg12[%c56_312, %c0_313] : memref<64x128xf32, #tpu.memory_space<vmem>>, vector<8x48xf32>
    tpu.vector_store %arg12[%c56_312, %c0_313], %852 {strides = array<i32>} : memref<64x128xf32, #tpu.memory_space<vmem>>, vector<8x48xf32>,
    %854 = vector.extract_strided_slice %851 {offsets = [0, 48], sizes = [8, 48], strides = [1, 1]} : vector<8x128xf32> to vector<8x48xf32>
    %c0_314 = arith.constant 0 : index
    %c48_315 = arith.constant 48 : index
    %855 = vector.load %arg12[%c0_314, %c48_315] : memref<64x128xf32, #tpu.memory_space<vmem>>, vector<8x48xf32>
    tpu.vector_store %arg12[%c0_314, %c48_315], %854 {strides = array<i32>} : memref<64x128xf32, #tpu.memory_space<vmem>>, vector<8x48xf32>,
    %c0_316 = arith.constant 0 : index
    %c0_317 = arith.constant 0 : index
    %856 = vector.load %arg12[%c0_316, %c0_317] : memref<64x128xf32, #tpu.memory_space<vmem>>, vector<64x96xf32>
    %c2_318 = arith.constant 2 : index
    %c0_319 = arith.constant 0 : index
    %c0_320 = arith.constant 0 : index
    %857 = vector.load %arg4[%c2_318, %c0_319, %c0_320] : memref<3x96x384xf32, #tpu.memory_space<vmem>>, vector<1x96x384xf32>
    %858 = vector.shape_cast %857 : vector<1x96x384xf32> to vector<96x384xf32>
    %cst_321 = arith.constant dense<0.000000e+00> : vector<64x384xf32>
    %859 = tpu.matmul %856, %858, %cst_321 {dimension_numbers = #tpu.dot_dimension_numbers<[1], [0], [0], [1], [0, 0, 1, 1], [], []>} : vector<64x96xf32>, vector<96x384xf32>, vector<64x384xf32> -> vector<64x384xf32>
    %c3 = arith.constant 3 : index
    %c0_322 = arith.constant 0 : index
    %c0_323 = arith.constant 0 : index
    %860 = vector.load %arg6[%c3, %c0_322, %c0_323] : memref<4x1x384xf32, #tpu.memory_space<vmem>>, vector<1x1x384xf32>
    %861 = vector.shape_cast %860 : vector<1x1x384xf32> to vector<1x384xf32>
    %862 = vector.broadcast %861 : vector<1x384xf32> to vector<64x384xf32>
    %863 = arith.addf %859, %862 : vector<64x384xf32>
    %c0_324 = arith.constant 0 : index
    %c0_325 = arith.constant 0 : index
    %864 = vector.load %arg11[%c0_324, %c0_325] : memref<64x384xf32, #tpu.memory_space<vmem>>, vector<64x384xf32>
    tpu.vector_store %arg11[%c0_324, %c0_325], %863 {strides = array<i32>} : memref<64x384xf32, #tpu.memory_space<vmem>>, vector<64x384xf32>,
    %c3_326 = arith.constant 3 : index
    %c0_327 = arith.constant 0 : index
    %c0_328 = arith.constant 0 : index
    %865 = vector.load %arg5[%c3_326, %c0_327, %c0_328] : memref<4x96x384xf32, #tpu.memory_space<vmem>>, vector<1x96x384xf32>
    %866 = vector.shape_cast %865 : vector<1x96x384xf32> to vector<96x384xf32>
    %c3_329 = arith.constant 3 : index
    %c0_330 = arith.constant 0 : index
    %c0_331 = arith.constant 0 : index
    %867 = vector.load %arg7[%c3_329, %c0_330, %c0_331] : memref<4x1x384xf32, #tpu.memory_space<vmem>>, vector<1x1x384xf32>
    %868 = vector.shape_cast %867 : vector<1x1x384xf32> to vector<1x384xf32>
    %cst_332 = arith.constant 0.000000e+00 : f32
    %869 = vector.broadcast %cst_332 : f32 to vector<8x128xf32>
    %c0_333 = arith.constant 0 : index
    %c0_334 = arith.constant 0 : index
    %870 = vector.load %arg11[%c0_333, %c0_334] : memref<64x384xf32, #tpu.memory_space<vmem>>, vector<8x384xf32>
    %c56_335 = arith.constant 56 : index
    %c0_336 = arith.constant 0 : index
    %871 = vector.load %arg11[%c56_335, %c0_336] : memref<64x384xf32, #tpu.memory_space<vmem>>, vector<8x384xf32>
    %872 = arith.select %5, %870, %871 : vector<8x384xi1>, vector<8x384xf32>
    %873 = vector.extract_strided_slice %869 {offsets = [0, 0], sizes = [8, 96], strides = [1, 1]} : vector<8x128xf32> to vector<8x96xf32>
    %cst_337 = arith.constant dense<0.000000e+00> : vector<8x384xf32>
    %874 = tpu.matmul %873, %866, %cst_337 {dimension_numbers = #tpu.dot_dimension_numbers<[1], [0], [0], [1], [0, 0, 1, 1], [], []>} : vector<8x96xf32>, vector<96x384xf32>, vector<8x384xf32> -> vector<8x384xf32>
    %875 = vector.broadcast %868 : vector<1x384xf32> to vector<8x384xf32>
    %876 = arith.addf %874, %875 : vector<8x384xf32>
    %877 = vector.extract_strided_slice %872 {offsets = [0, 0], sizes = [8, 256], strides = [1, 1]} : vector<8x384xf32> to vector<8x256xf32>
    %878 = vector.extract_strided_slice %876 {offsets = [0, 0], sizes = [8, 256], strides = [1, 1]} : vector<8x384xf32> to vector<8x256xf32>
    %879 = arith.addf %877, %878 : vector<8x256xf32>
    %880 = arith.negf %879 : vector<8x256xf32>
    %881 = math.exp %880 : vector<8x256xf32>
    %cst_338 = arith.constant 1.000000e+00 : f32
    %882 = vector.broadcast %cst_338 : f32 to vector<8x256xf32>
    %883 = arith.addf %882, %881 : vector<8x256xf32>
    %884 = arith.divf %882, %883 : vector<8x256xf32>
    %885 = vector.extract_strided_slice %884 {offsets = [0, 0], sizes = [8, 128], strides = [1, 1]} : vector<8x256xf32> to vector<8x128xf32>
    %886 = vector.extract_strided_slice %884 {offsets = [0, 128], sizes = [8, 128], strides = [1, 1]} : vector<8x256xf32> to vector<8x128xf32>
    %887 = vector.extract_strided_slice %872 {offsets = [0, 256], sizes = [8, 128], strides = [1, 1]} : vector<8x384xf32> to vector<8x128xf32>
    %888 = vector.extract_strided_slice %876 {offsets = [0, 256], sizes = [8, 128], strides = [1, 1]} : vector<8x384xf32> to vector<8x128xf32>
    %889 = arith.mulf %885, %888 : vector<8x128xf32>
    %890 = arith.addf %887, %889 : vector<8x128xf32>
    %891 = math.tanh %890 : vector<8x128xf32>
    %cst_339 = arith.constant 1.000000e+00 : f32
    %892 = vector.broadcast %cst_339 : f32 to vector<8x128xf32>
    %893 = arith.subf %892, %886 : vector<8x128xf32>
    %894 = arith.mulf %893, %891 : vector<8x128xf32>
    %895 = arith.mulf %886, %869 : vector<8x128xf32>
    %896 = arith.addf %894, %895 : vector<8x128xf32>
    %897 = arith.select %11, %896, %869 : vector<8x128xi1>, vector<8x128xf32>
    %c8_340 = arith.constant 8 : index
    %c0_341 = arith.constant 0 : index
    %898 = vector.load %arg11[%c8_340, %c0_341] : memref<64x384xf32, #tpu.memory_space<vmem>>, vector<8x384xf32>
    %c48_342 = arith.constant 48 : index
    %c0_343 = arith.constant 0 : index
    %899 = vector.load %arg11[%c48_342, %c0_343] : memref<64x384xf32, #tpu.memory_space<vmem>>, vector<8x384xf32>
    %900 = arith.select %5, %898, %899 : vector<8x384xi1>, vector<8x384xf32>
    %901 = vector.extract_strided_slice %897 {offsets = [0, 0], sizes = [8, 96], strides = [1, 1]} : vector<8x128xf32> to vector<8x96xf32>
    %cst_344 = arith.constant dense<0.000000e+00> : vector<8x384xf32>
    %902 = tpu.matmul %901, %866, %cst_344 {dimension_numbers = #tpu.dot_dimension_numbers<[1], [0], [0], [1], [0, 0, 1, 1], [], []>} : vector<8x96xf32>, vector<96x384xf32>, vector<8x384xf32> -> vector<8x384xf32>
    %903 = vector.broadcast %868 : vector<1x384xf32> to vector<8x384xf32>
    %904 = arith.addf %902, %903 : vector<8x384xf32>
    %905 = vector.extract_strided_slice %900 {offsets = [0, 0], sizes = [8, 256], strides = [1, 1]} : vector<8x384xf32> to vector<8x256xf32>
    %906 = vector.extract_strided_slice %904 {offsets = [0, 0], sizes = [8, 256], strides = [1, 1]} : vector<8x384xf32> to vector<8x256xf32>
    %907 = arith.addf %905, %906 : vector<8x256xf32>
    %908 = arith.negf %907 : vector<8x256xf32>
    %909 = math.exp %908 : vector<8x256xf32>
    %cst_345 = arith.constant 1.000000e+00 : f32
    %910 = vector.broadcast %cst_345 : f32 to vector<8x256xf32>
    %911 = arith.addf %910, %909 : vector<8x256xf32>
    %912 = arith.divf %910, %911 : vector<8x256xf32>
    %913 = vector.extract_strided_slice %912 {offsets = [0, 0], sizes = [8, 128], strides = [1, 1]} : vector<8x256xf32> to vector<8x128xf32>
    %914 = vector.extract_strided_slice %912 {offsets = [0, 128], sizes = [8, 128], strides = [1, 1]} : vector<8x256xf32> to vector<8x128xf32>
    %915 = vector.extract_strided_slice %900 {offsets = [0, 256], sizes = [8, 128], strides = [1, 1]} : vector<8x384xf32> to vector<8x128xf32>
    %916 = vector.extract_strided_slice %904 {offsets = [0, 256], sizes = [8, 128], strides = [1, 1]} : vector<8x384xf32> to vector<8x128xf32>
    %917 = arith.mulf %913, %916 : vector<8x128xf32>
    %918 = arith.addf %915, %917 : vector<8x128xf32>
    %919 = math.tanh %918 : vector<8x128xf32>
    %cst_346 = arith.constant 1.000000e+00 : f32
    %920 = vector.broadcast %cst_346 : f32 to vector<8x128xf32>
    %921 = arith.subf %920, %914 : vector<8x128xf32>
    %922 = arith.mulf %921, %919 : vector<8x128xf32>
    %923 = arith.mulf %914, %897 : vector<8x128xf32>
    %924 = arith.addf %922, %923 : vector<8x128xf32>
    %925 = arith.select %16, %924, %897 : vector<8x128xi1>, vector<8x128xf32>
    %c16_347 = arith.constant 16 : index
    %c0_348 = arith.constant 0 : index
    %926 = vector.load %arg11[%c16_347, %c0_348] : memref<64x384xf32, #tpu.memory_space<vmem>>, vector<8x384xf32>
    %c40_349 = arith.constant 40 : index
    %c0_350 = arith.constant 0 : index
    %927 = vector.load %arg11[%c40_349, %c0_350] : memref<64x384xf32, #tpu.memory_space<vmem>>, vector<8x384xf32>
    %928 = arith.select %5, %926, %927 : vector<8x384xi1>, vector<8x384xf32>
    %929 = vector.extract_strided_slice %925 {offsets = [0, 0], sizes = [8, 96], strides = [1, 1]} : vector<8x128xf32> to vector<8x96xf32>
    %cst_351 = arith.constant dense<0.000000e+00> : vector<8x384xf32>
    %930 = tpu.matmul %929, %866, %cst_351 {dimension_numbers = #tpu.dot_dimension_numbers<[1], [0], [0], [1], [0, 0, 1, 1], [], []>} : vector<8x96xf32>, vector<96x384xf32>, vector<8x384xf32> -> vector<8x384xf32>
    %931 = vector.broadcast %868 : vector<1x384xf32> to vector<8x384xf32>
    %932 = arith.addf %930, %931 : vector<8x384xf32>
    %933 = vector.extract_strided_slice %928 {offsets = [0, 0], sizes = [8, 256], strides = [1, 1]} : vector<8x384xf32> to vector<8x256xf32>
    %934 = vector.extract_strided_slice %932 {offsets = [0, 0], sizes = [8, 256], strides = [1, 1]} : vector<8x384xf32> to vector<8x256xf32>
    %935 = arith.addf %933, %934 : vector<8x256xf32>
    %936 = arith.negf %935 : vector<8x256xf32>
    %937 = math.exp %936 : vector<8x256xf32>
    %cst_352 = arith.constant 1.000000e+00 : f32
    %938 = vector.broadcast %cst_352 : f32 to vector<8x256xf32>
    %939 = arith.addf %938, %937 : vector<8x256xf32>
    %940 = arith.divf %938, %939 : vector<8x256xf32>
    %941 = vector.extract_strided_slice %940 {offsets = [0, 0], sizes = [8, 128], strides = [1, 1]} : vector<8x256xf32> to vector<8x128xf32>
    %942 = vector.extract_strided_slice %940 {offsets = [0, 128], sizes = [8, 128], strides = [1, 1]} : vector<8x256xf32> to vector<8x128xf32>
    %943 = vector.extract_strided_slice %928 {offsets = [0, 256], sizes = [8, 128], strides = [1, 1]} : vector<8x384xf32> to vector<8x128xf32>
    %944 = vector.extract_strided_slice %932 {offsets = [0, 256], sizes = [8, 128], strides = [1, 1]} : vector<8x384xf32> to vector<8x128xf32>
    %945 = arith.mulf %941, %944 : vector<8x128xf32>
    %946 = arith.addf %943, %945 : vector<8x128xf32>
    %947 = math.tanh %946 : vector<8x128xf32>
    %cst_353 = arith.constant 1.000000e+00 : f32
    %948 = vector.broadcast %cst_353 : f32 to vector<8x128xf32>
    %949 = arith.subf %948, %942 : vector<8x128xf32>
    %950 = arith.mulf %949, %947 : vector<8x128xf32>
    %951 = arith.mulf %942, %925 : vector<8x128xf32>
    %952 = arith.addf %950, %951 : vector<8x128xf32>
    %953 = arith.select %21, %952, %925 : vector<8x128xi1>, vector<8x128xf32>
    %c24_354 = arith.constant 24 : index
    %c0_355 = arith.constant 0 : index
    %954 = vector.load %arg11[%c24_354, %c0_355] : memref<64x384xf32, #tpu.memory_space<vmem>>, vector<8x384xf32>
    %c32_356 = arith.constant 32 : index
    %c0_357 = arith.constant 0 : index
    %955 = vector.load %arg11[%c32_356, %c0_357] : memref<64x384xf32, #tpu.memory_space<vmem>>, vector<8x384xf32>
    %956 = arith.select %5, %954, %955 : vector<8x384xi1>, vector<8x384xf32>
    %957 = vector.extract_strided_slice %953 {offsets = [0, 0], sizes = [8, 96], strides = [1, 1]} : vector<8x128xf32> to vector<8x96xf32>
    %cst_358 = arith.constant dense<0.000000e+00> : vector<8x384xf32>
    %958 = tpu.matmul %957, %866, %cst_358 {dimension_numbers = #tpu.dot_dimension_numbers<[1], [0], [0], [1], [0, 0, 1, 1], [], []>} : vector<8x96xf32>, vector<96x384xf32>, vector<8x384xf32> -> vector<8x384xf32>
    %959 = vector.broadcast %868 : vector<1x384xf32> to vector<8x384xf32>
    %960 = arith.addf %958, %959 : vector<8x384xf32>
    %961 = vector.extract_strided_slice %956 {offsets = [0, 0], sizes = [8, 256], strides = [1, 1]} : vector<8x384xf32> to vector<8x256xf32>
    %962 = vector.extract_strided_slice %960 {offsets = [0, 0], sizes = [8, 256], strides = [1, 1]} : vector<8x384xf32> to vector<8x256xf32>
    %963 = arith.addf %961, %962 : vector<8x256xf32>
    %964 = arith.negf %963 : vector<8x256xf32>
    %965 = math.exp %964 : vector<8x256xf32>
    %cst_359 = arith.constant 1.000000e+00 : f32
    %966 = vector.broadcast %cst_359 : f32 to vector<8x256xf32>
    %967 = arith.addf %966, %965 : vector<8x256xf32>
    %968 = arith.divf %966, %967 : vector<8x256xf32>
    %969 = vector.extract_strided_slice %968 {offsets = [0, 0], sizes = [8, 128], strides = [1, 1]} : vector<8x256xf32> to vector<8x128xf32>
    %970 = vector.extract_strided_slice %968 {offsets = [0, 128], sizes = [8, 128], strides = [1, 1]} : vector<8x256xf32> to vector<8x128xf32>
    %971 = vector.extract_strided_slice %956 {offsets = [0, 256], sizes = [8, 128], strides = [1, 1]} : vector<8x384xf32> to vector<8x128xf32>
    %972 = vector.extract_strided_slice %960 {offsets = [0, 256], sizes = [8, 128], strides = [1, 1]} : vector<8x384xf32> to vector<8x128xf32>
    %973 = arith.mulf %969, %972 : vector<8x128xf32>
    %974 = arith.addf %971, %973 : vector<8x128xf32>
    %975 = math.tanh %974 : vector<8x128xf32>
    %cst_360 = arith.constant 1.000000e+00 : f32
    %976 = vector.broadcast %cst_360 : f32 to vector<8x128xf32>
    %977 = arith.subf %976, %970 : vector<8x128xf32>
    %978 = arith.mulf %977, %975 : vector<8x128xf32>
    %979 = arith.mulf %970, %953 : vector<8x128xf32>
    %980 = arith.addf %978, %979 : vector<8x128xf32>
    %981 = arith.select %26, %980, %953 : vector<8x128xi1>, vector<8x128xf32>
    %c32_361 = arith.constant 32 : index
    %c0_362 = arith.constant 0 : index
    %982 = vector.load %arg11[%c32_361, %c0_362] : memref<64x384xf32, #tpu.memory_space<vmem>>, vector<8x384xf32>
    %c24_363 = arith.constant 24 : index
    %c0_364 = arith.constant 0 : index
    %983 = vector.load %arg11[%c24_363, %c0_364] : memref<64x384xf32, #tpu.memory_space<vmem>>, vector<8x384xf32>
    %984 = arith.select %5, %982, %983 : vector<8x384xi1>, vector<8x384xf32>
    %985 = vector.extract_strided_slice %981 {offsets = [0, 0], sizes = [8, 96], strides = [1, 1]} : vector<8x128xf32> to vector<8x96xf32>
    %cst_365 = arith.constant dense<0.000000e+00> : vector<8x384xf32>
    %986 = tpu.matmul %985, %866, %cst_365 {dimension_numbers = #tpu.dot_dimension_numbers<[1], [0], [0], [1], [0, 0, 1, 1], [], []>} : vector<8x96xf32>, vector<96x384xf32>, vector<8x384xf32> -> vector<8x384xf32>
    %987 = vector.broadcast %868 : vector<1x384xf32> to vector<8x384xf32>
    %988 = arith.addf %986, %987 : vector<8x384xf32>
    %989 = vector.extract_strided_slice %984 {offsets = [0, 0], sizes = [8, 256], strides = [1, 1]} : vector<8x384xf32> to vector<8x256xf32>
    %990 = vector.extract_strided_slice %988 {offsets = [0, 0], sizes = [8, 256], strides = [1, 1]} : vector<8x384xf32> to vector<8x256xf32>
    %991 = arith.addf %989, %990 : vector<8x256xf32>
    %992 = arith.negf %991 : vector<8x256xf32>
    %993 = math.exp %992 : vector<8x256xf32>
    %cst_366 = arith.constant 1.000000e+00 : f32
    %994 = vector.broadcast %cst_366 : f32 to vector<8x256xf32>
    %995 = arith.addf %994, %993 : vector<8x256xf32>
    %996 = arith.divf %994, %995 : vector<8x256xf32>
    %997 = vector.extract_strided_slice %996 {offsets = [0, 0], sizes = [8, 128], strides = [1, 1]} : vector<8x256xf32> to vector<8x128xf32>
    %998 = vector.extract_strided_slice %996 {offsets = [0, 128], sizes = [8, 128], strides = [1, 1]} : vector<8x256xf32> to vector<8x128xf32>
    %999 = vector.extract_strided_slice %984 {offsets = [0, 256], sizes = [8, 128], strides = [1, 1]} : vector<8x384xf32> to vector<8x128xf32>
    %1000 = vector.extract_strided_slice %988 {offsets = [0, 256], sizes = [8, 128], strides = [1, 1]} : vector<8x384xf32> to vector<8x128xf32>
    %1001 = arith.mulf %997, %1000 : vector<8x128xf32>
    %1002 = arith.addf %999, %1001 : vector<8x128xf32>
    %1003 = math.tanh %1002 : vector<8x128xf32>
    %cst_367 = arith.constant 1.000000e+00 : f32
    %1004 = vector.broadcast %cst_367 : f32 to vector<8x128xf32>
    %1005 = arith.subf %1004, %998 : vector<8x128xf32>
    %1006 = arith.mulf %1005, %1003 : vector<8x128xf32>
    %1007 = arith.mulf %998, %981 : vector<8x128xf32>
    %1008 = arith.addf %1006, %1007 : vector<8x128xf32>
    %1009 = arith.select %31, %1008, %981 : vector<8x128xi1>, vector<8x128xf32>
    %c40_368 = arith.constant 40 : index
    %c0_369 = arith.constant 0 : index
    %1010 = vector.load %arg11[%c40_368, %c0_369] : memref<64x384xf32, #tpu.memory_space<vmem>>, vector<8x384xf32>
    %c16_370 = arith.constant 16 : index
    %c0_371 = arith.constant 0 : index
    %1011 = vector.load %arg11[%c16_370, %c0_371] : memref<64x384xf32, #tpu.memory_space<vmem>>, vector<8x384xf32>
    %1012 = arith.select %5, %1010, %1011 : vector<8x384xi1>, vector<8x384xf32>
    %1013 = vector.extract_strided_slice %1009 {offsets = [0, 0], sizes = [8, 96], strides = [1, 1]} : vector<8x128xf32> to vector<8x96xf32>
    %cst_372 = arith.constant dense<0.000000e+00> : vector<8x384xf32>
    %1014 = tpu.matmul %1013, %866, %cst_372 {dimension_numbers = #tpu.dot_dimension_numbers<[1], [0], [0], [1], [0, 0, 1, 1], [], []>} : vector<8x96xf32>, vector<96x384xf32>, vector<8x384xf32> -> vector<8x384xf32>
    %1015 = vector.broadcast %868 : vector<1x384xf32> to vector<8x384xf32>
    %1016 = arith.addf %1014, %1015 : vector<8x384xf32>
    %1017 = vector.extract_strided_slice %1012 {offsets = [0, 0], sizes = [8, 256], strides = [1, 1]} : vector<8x384xf32> to vector<8x256xf32>
    %1018 = vector.extract_strided_slice %1016 {offsets = [0, 0], sizes = [8, 256], strides = [1, 1]} : vector<8x384xf32> to vector<8x256xf32>
    %1019 = arith.addf %1017, %1018 : vector<8x256xf32>
    %1020 = arith.negf %1019 : vector<8x256xf32>
    %1021 = math.exp %1020 : vector<8x256xf32>
    %cst_373 = arith.constant 1.000000e+00 : f32
    %1022 = vector.broadcast %cst_373 : f32 to vector<8x256xf32>
    %1023 = arith.addf %1022, %1021 : vector<8x256xf32>
    %1024 = arith.divf %1022, %1023 : vector<8x256xf32>
    %1025 = vector.extract_strided_slice %1024 {offsets = [0, 0], sizes = [8, 128], strides = [1, 1]} : vector<8x256xf32> to vector<8x128xf32>
    %1026 = vector.extract_strided_slice %1024 {offsets = [0, 128], sizes = [8, 128], strides = [1, 1]} : vector<8x256xf32> to vector<8x128xf32>
    %1027 = vector.extract_strided_slice %1012 {offsets = [0, 256], sizes = [8, 128], strides = [1, 1]} : vector<8x384xf32> to vector<8x128xf32>
    %1028 = vector.extract_strided_slice %1016 {offsets = [0, 256], sizes = [8, 128], strides = [1, 1]} : vector<8x384xf32> to vector<8x128xf32>
    %1029 = arith.mulf %1025, %1028 : vector<8x128xf32>
    %1030 = arith.addf %1027, %1029 : vector<8x128xf32>
    %1031 = math.tanh %1030 : vector<8x128xf32>
    %cst_374 = arith.constant 1.000000e+00 : f32
    %1032 = vector.broadcast %cst_374 : f32 to vector<8x128xf32>
    %1033 = arith.subf %1032, %1026 : vector<8x128xf32>
    %1034 = arith.mulf %1033, %1031 : vector<8x128xf32>
    %1035 = arith.mulf %1026, %1009 : vector<8x128xf32>
    %1036 = arith.addf %1034, %1035 : vector<8x128xf32>
    %1037 = arith.select %36, %1036, %1009 : vector<8x128xi1>, vector<8x128xf32>
    %c48_375 = arith.constant 48 : index
    %c0_376 = arith.constant 0 : index
    %1038 = vector.load %arg11[%c48_375, %c0_376] : memref<64x384xf32, #tpu.memory_space<vmem>>, vector<8x384xf32>
    %c8_377 = arith.constant 8 : index
    %c0_378 = arith.constant 0 : index
    %1039 = vector.load %arg11[%c8_377, %c0_378] : memref<64x384xf32, #tpu.memory_space<vmem>>, vector<8x384xf32>
    %1040 = arith.select %5, %1038, %1039 : vector<8x384xi1>, vector<8x384xf32>
    %1041 = vector.extract_strided_slice %1037 {offsets = [0, 0], sizes = [8, 96], strides = [1, 1]} : vector<8x128xf32> to vector<8x96xf32>
    %cst_379 = arith.constant dense<0.000000e+00> : vector<8x384xf32>
    %1042 = tpu.matmul %1041, %866, %cst_379 {dimension_numbers = #tpu.dot_dimension_numbers<[1], [0], [0], [1], [0, 0, 1, 1], [], []>} : vector<8x96xf32>, vector<96x384xf32>, vector<8x384xf32> -> vector<8x384xf32>
    %1043 = vector.broadcast %868 : vector<1x384xf32> to vector<8x384xf32>
    %1044 = arith.addf %1042, %1043 : vector<8x384xf32>
    %1045 = vector.extract_strided_slice %1040 {offsets = [0, 0], sizes = [8, 256], strides = [1, 1]} : vector<8x384xf32> to vector<8x256xf32>
    %1046 = vector.extract_strided_slice %1044 {offsets = [0, 0], sizes = [8, 256], strides = [1, 1]} : vector<8x384xf32> to vector<8x256xf32>
    %1047 = arith.addf %1045, %1046 : vector<8x256xf32>
    %1048 = arith.negf %1047 : vector<8x256xf32>
    %1049 = math.exp %1048 : vector<8x256xf32>
    %cst_380 = arith.constant 1.000000e+00 : f32
    %1050 = vector.broadcast %cst_380 : f32 to vector<8x256xf32>
    %1051 = arith.addf %1050, %1049 : vector<8x256xf32>
    %1052 = arith.divf %1050, %1051 : vector<8x256xf32>
    %1053 = vector.extract_strided_slice %1052 {offsets = [0, 0], sizes = [8, 128], strides = [1, 1]} : vector<8x256xf32> to vector<8x128xf32>
    %1054 = vector.extract_strided_slice %1052 {offsets = [0, 128], sizes = [8, 128], strides = [1, 1]} : vector<8x256xf32> to vector<8x128xf32>
    %1055 = vector.extract_strided_slice %1040 {offsets = [0, 256], sizes = [8, 128], strides = [1, 1]} : vector<8x384xf32> to vector<8x128xf32>
    %1056 = vector.extract_strided_slice %1044 {offsets = [0, 256], sizes = [8, 128], strides = [1, 1]} : vector<8x384xf32> to vector<8x128xf32>
    %1057 = arith.mulf %1053, %1056 : vector<8x128xf32>
    %1058 = arith.addf %1055, %1057 : vector<8x128xf32>
    %1059 = math.tanh %1058 : vector<8x128xf32>
    %cst_381 = arith.constant 1.000000e+00 : f32
    %1060 = vector.broadcast %cst_381 : f32 to vector<8x128xf32>
    %1061 = arith.subf %1060, %1054 : vector<8x128xf32>
    %1062 = arith.mulf %1061, %1059 : vector<8x128xf32>
    %1063 = arith.mulf %1054, %1037 : vector<8x128xf32>
    %1064 = arith.addf %1062, %1063 : vector<8x128xf32>
    %1065 = arith.select %41, %1064, %1037 : vector<8x128xi1>, vector<8x128xf32>
    %c56_382 = arith.constant 56 : index
    %c0_383 = arith.constant 0 : index
    %1066 = vector.load %arg11[%c56_382, %c0_383] : memref<64x384xf32, #tpu.memory_space<vmem>>, vector<8x384xf32>
    %c0_384 = arith.constant 0 : index
    %c0_385 = arith.constant 0 : index
    %1067 = vector.load %arg11[%c0_384, %c0_385] : memref<64x384xf32, #tpu.memory_space<vmem>>, vector<8x384xf32>
    %1068 = arith.select %5, %1066, %1067 : vector<8x384xi1>, vector<8x384xf32>
    %1069 = vector.extract_strided_slice %1065 {offsets = [0, 0], sizes = [8, 96], strides = [1, 1]} : vector<8x128xf32> to vector<8x96xf32>
    %cst_386 = arith.constant dense<0.000000e+00> : vector<8x384xf32>
    %1070 = tpu.matmul %1069, %866, %cst_386 {dimension_numbers = #tpu.dot_dimension_numbers<[1], [0], [0], [1], [0, 0, 1, 1], [], []>} : vector<8x96xf32>, vector<96x384xf32>, vector<8x384xf32> -> vector<8x384xf32>
    %1071 = vector.broadcast %868 : vector<1x384xf32> to vector<8x384xf32>
    %1072 = arith.addf %1070, %1071 : vector<8x384xf32>
    %1073 = vector.extract_strided_slice %1068 {offsets = [0, 0], sizes = [8, 256], strides = [1, 1]} : vector<8x384xf32> to vector<8x256xf32>
    %1074 = vector.extract_strided_slice %1072 {offsets = [0, 0], sizes = [8, 256], strides = [1, 1]} : vector<8x384xf32> to vector<8x256xf32>
    %1075 = arith.addf %1073, %1074 : vector<8x256xf32>
    %1076 = arith.negf %1075 : vector<8x256xf32>
    %1077 = math.exp %1076 : vector<8x256xf32>
    %cst_387 = arith.constant 1.000000e+00 : f32
    %1078 = vector.broadcast %cst_387 : f32 to vector<8x256xf32>
    %1079 = arith.addf %1078, %1077 : vector<8x256xf32>
    %1080 = arith.divf %1078, %1079 : vector<8x256xf32>
    %1081 = vector.extract_strided_slice %1080 {offsets = [0, 0], sizes = [8, 128], strides = [1, 1]} : vector<8x256xf32> to vector<8x128xf32>
    %1082 = vector.extract_strided_slice %1080 {offsets = [0, 128], sizes = [8, 128], strides = [1, 1]} : vector<8x256xf32> to vector<8x128xf32>
    %1083 = vector.extract_strided_slice %1068 {offsets = [0, 256], sizes = [8, 128], strides = [1, 1]} : vector<8x384xf32> to vector<8x128xf32>
    %1084 = vector.extract_strided_slice %1072 {offsets = [0, 256], sizes = [8, 128], strides = [1, 1]} : vector<8x384xf32> to vector<8x128xf32>
    %1085 = arith.mulf %1081, %1084 : vector<8x128xf32>
    %1086 = arith.addf %1083, %1085 : vector<8x128xf32>
    %1087 = math.tanh %1086 : vector<8x128xf32>
    %cst_388 = arith.constant 1.000000e+00 : f32
    %1088 = vector.broadcast %cst_388 : f32 to vector<8x128xf32>
    %1089 = arith.subf %1088, %1082 : vector<8x128xf32>
    %1090 = arith.mulf %1089, %1087 : vector<8x128xf32>
    %1091 = arith.mulf %1082, %1065 : vector<8x128xf32>
    %1092 = arith.addf %1090, %1091 : vector<8x128xf32>
    %1093 = arith.select %46, %1092, %1065 : vector<8x128xi1>, vector<8x128xf32>
    tpu.wait_dma2 semaphore(%arg14 : memref<!tpu.dma_semaphore, #tpu.memory_space<semaphore_mem>>) src(%arg8 : memref<96x3840xbf16, #tpu.memory_space<any>>) dst(%arg13 : memref<96x3840xbf16, #tpu.memory_space<vmem>>)
    %1094 = vector.extract_strided_slice %1093 {offsets = [0, 0], sizes = [8, 96], strides = [1, 1]} : vector<8x128xf32> to vector<8x96xf32>
    %1095 = arith.truncf %1094 : vector<8x96xf32> to vector<8x96xbf16>
    %c0_389 = arith.constant 0 : index
    %c0_390 = arith.constant 0 : index
    %1096 = vector.load %arg13[%c0_389, %c0_390] : memref<96x3840xbf16, #tpu.memory_space<vmem>>, vector<96x3840xbf16>
    %cst_391 = arith.constant dense<0.000000e+00> : vector<8x3840xf32>
    %1097 = tpu.matmul %1095, %1096, %cst_391 {dimension_numbers = #tpu.dot_dimension_numbers<[1], [0], [0], [1], [0, 0, 1, 1], [], []>} : vector<8x96xbf16>, vector<96x3840xbf16>, vector<8x3840xf32> -> vector<8x3840xf32>
    %c0_392 = arith.constant 0 : index
    %c0_393 = arith.constant 0 : index
    %1098 = vector.load %arg9[%c0_392, %c0_393] : memref<1x3840xf32, #tpu.memory_space<vmem>>, vector<1x3840xf32>
    %1099 = vector.broadcast %1098 : vector<1x3840xf32> to vector<8x3840xf32>
    %1100 = arith.addf %1097, %1099 : vector<8x3840xf32>
    %cst_394 = arith.constant dense<0xFF800000> : vector<8xf32>
    %1101 = vector.multi_reduction <maximumf>, %1100, %cst_394 [1] : vector<8x3840xf32> to vector<8xf32>
    %1102 = vector.shape_cast %1101 : vector<8xf32> to vector<8x1xf32>
    %1103 = vector.broadcast %1102 : vector<8x1xf32> to vector<8x3840xf32>
    %1104 = arith.subf %1100, %1103 : vector<8x3840xf32>
    %1105 = math.exp %1104 : vector<8x3840xf32>
    %cst_395 = arith.constant dense<0.000000e+00> : vector<8xf32>
    %1106 = vector.multi_reduction <add>, %1105, %cst_395 [1] : vector<8x3840xf32> to vector<8xf32>
    %1107 = vector.shape_cast %1106 : vector<8xf32> to vector<8x1xf32>
    %1108 = math.log %1107 : vector<8x1xf32>
    %1109 = vector.broadcast %1108 : vector<8x1xf32> to vector<8x3840xf32>
    %1110 = arith.subf %1104, %1109 : vector<8x3840xf32>
    %c0_396 = arith.constant 0 : index
    %c0_397 = arith.constant 0 : index
    %1111 = vector.load %arg10[%c0_396, %c0_397] : memref<8x3840xf32, #tpu.memory_space<vmem>>, vector<8x3840xf32>
    tpu.vector_store %arg10[%c0_396, %c0_397], %1110 {strides = array<i32>} : memref<8x3840xf32, #tpu.memory_space<vmem>>, vector<8x3840xf32>,
    return
  }
  func.func @transform_0(%arg0: i32) -> (i32, i32) {
    %c0_i32 = arith.constant 0 : i32
    %c0_i32_0 = arith.constant 0 : i32
    %c0_i32_1 = arith.constant 0 : i32
    return %c0_i32, %c0_i32_0 : i32, i32
  }
  func.func @transform_1(%arg0: i32) -> (i32, i32) {
    %c0_i32 = arith.constant 0 : i32
    %c0_i32_0 = arith.constant 0 : i32
    %c0_i32_1 = arith.constant 0 : i32
    return %c0_i32, %c0_i32_0 : i32, i32
  }
  func.func @transform_2(%arg0: i32) -> (i32, i32) {
    %c0_i32 = arith.constant 0 : i32
    %c0_i32_0 = arith.constant 0 : i32
    %c0_i32_1 = arith.constant 0 : i32
    return %c0_i32, %c0_i32_0 : i32, i32
  }
  func.func @transform_3(%arg0: i32) -> (i32, i32, i32) {
    %c0_i32 = arith.constant 0 : i32
    %c0_i32_0 = arith.constant 0 : i32
    %c0_i32_1 = arith.constant 0 : i32
    %c0_i32_2 = arith.constant 0 : i32
    return %c0_i32, %c0_i32_0, %c0_i32_1 : i32, i32, i32
  }
  func.func @transform_4(%arg0: i32) -> (i32, i32, i32) {
    %c0_i32 = arith.constant 0 : i32
    %c0_i32_0 = arith.constant 0 : i32
    %c0_i32_1 = arith.constant 0 : i32
    %c0_i32_2 = arith.constant 0 : i32
    return %c0_i32, %c0_i32_0, %c0_i32_1 : i32, i32, i32
  }
  func.func @transform_5(%arg0: i32) -> (i32, i32, i32) {
    %c0_i32 = arith.constant 0 : i32
    %c0_i32_0 = arith.constant 0 : i32
    %c0_i32_1 = arith.constant 0 : i32
    %c0_i32_2 = arith.constant 0 : i32
    return %c0_i32, %c0_i32_0, %c0_i32_1 : i32, i32, i32
  }
  func.func @transform_6(%arg0: i32) -> (i32, i32, i32) {
    %c0_i32 = arith.constant 0 : i32
    %c0_i32_0 = arith.constant 0 : i32
    %c0_i32_1 = arith.constant 0 : i32
    %c0_i32_2 = arith.constant 0 : i32
    return %c0_i32, %c0_i32_0, %c0_i32_1 : i32, i32, i32
  }
  func.func @transform_8(%arg0: i32) -> (i32, i32) {
    %c0_i32 = arith.constant 0 : i32
    %c0_i32_0 = arith.constant 0 : i32
    %c0_i32_1 = arith.constant 0 : i32
    return %c0_i32, %c0_i32_0 : i32, i32
  }
  func.func @transform_9(%arg0: i32) -> (i32, i32) {
    %c0_i32 = arith.constant 0 : i32
    %c0_i32_0 = arith.constant 0 : i32
    %c0_i32_1 = arith.constant 0 : i32
    return %c0_i32, %c0_i32_0 : i32, i32
  }
}

</mosaic_0001>

<bundles_post_ra>
// kernel: gru_model_forward.1
= control target key start
LH: loop header
LB: loop body
LE: loop exit
PB: predicated region body
PF: predicated region fallthrough
CT: control target
= control target key end

     0   :  { %14 = vsyncpa [#allocation7], 0  ;;  %s15319_s0 = inlined_call_operand.vmem [shape: s32[8,1], index: 0, kind: input, shape index: {}]   ;;  %s15320_s1 = inlined_call_operand.vmem [shape: f32[64,4], index: 1, kind: input, shape index: {}]   ;;  %s15321_s2 = inlined_call_operand.vmem [shape: f32[4,384], index: 2, kind: input, shape index: {}]   ;;  %s15322_s3 = inlined_call_operand.hbm [shape: f32[3,96,384], index: 3, kind: input, shape index: {}]   ;;  %s15323_s4 = inlined_call_operand.hbm [shape: f32[4,96,384], index: 4, kind: input, shape index: {}]   ;;  %s15324_s5 = inlined_call_operand.vmem [shape: f32[4,1,384], index: 5, kind: input, shape index: {}]   ;;  %s15325_s6 = inlined_call_operand.vmem [shape: f32[4,1,384], index: 6, kind: input, shape index: {}]   ;;  %s15326_s7 = inlined_call_operand.hbm [shape: bf16[96,3840], index: 7, kind: input, shape index: {}]   ;;  %s15327_s8 = inlined_call_operand.vmem [shape: f32[1,3840], index: 8, kind: input, shape index: {}]   ;;  %s15328_s9 = inlined_call_operand.vmem [shape: f32[8,3840], index: 9, kind: output, shape index: {}]  }
   0x1   :  { %15 = vsyncpa [#allocation9], 0  ;;  %s12068_s30 = smov [#allocation6]   ;;  %s12018_s13 = scalar_lea.hbm %s15322_s3, 13824 }
   0x2   :  { %s27_s10 = sshll.u32 %s12068_s30, 4  ;;  %p12019_p0 = scmp.ne.s32.totalorder %s15322_s3, %s12018_s13  ;;  %s28_s10 = int_to_ptr.vmem [resolvable:$true] %s27_s10 }
   0x3   :  { %p12022_p1 = scmp.lt.u32.totalorder %s12018_s13, %s15322_s3 }
   0x5   :  { %p12024_p2 = pnand %p12022_p1, %p12019_p0 }
   0x7   :  { %12027 = shalt.err (!%p12024_p2)
}
   0x8   :  { %s12028_s18 = scalar_lea.vmem %s28_s10, 13824  ;;  %p12033_p4 = scmp.lt.s32.totalorder %s28_s10, %s28_s10 }
   0x9   :  { %p12029_p3 = scmp.ne.s32.totalorder %s28_s10, %s12028_s18  ;;  %p12034_p5 = scmp.lt.s32.totalorder %s12028_s18, %s12028_s18 }
   0xb   :  { %p12035_p6 = por %p12034_p5, %p12033_p4 }
   0xd   :  { %p12036_p7 = pnand %p12035_p6, %p12029_p3 }
   0xf   :  { %12039 = shalt.err (!%p12036_p7)
}
  0x10   :  { %s12069_s19 = smov 384   ;;  %s12070_s20 = smov 24  }
  0x11   :  { %33 = dma.hbm_to_vmem [thread:$0]  %s15322_s3, 13824, %s28_s10, [#allocation7], %s12069_s19, %s12069_s19, %s12070_s20  }
  0x12   :  { %s12071_s23 = smov [#allocation8]   ;;  %s12040_s27 = scalar_lea.hbm %s15323_s4, 18432 }
  0x13   :  { %s39_s24 = sshll.u32 %s12071_s23, 4  ;;  %p12041_p8 = scmp.ne.s32.totalorder %s15323_s4, %s12040_s27  ;;  %s40_s24 = int_to_ptr.vmem [resolvable:$true] %s39_s24 }
  0x14   :  { %p12044_p9 = scmp.lt.u32.totalorder %s12040_s27, %s15323_s4 }
  0x16   :  { %p12046_p10 = pnand %p12044_p9, %p12041_p8 }
  0x18   :  { %12049 = shalt.err (!%p12046_p10)
}
  0x19   :  { %s12050_s12 = scalar_lea.vmem %s40_s24, 18432  ;;  %p12055_p12 = scmp.lt.s32.totalorder %s40_s24, %s40_s24 }
  0x1a   :  { %p12051_p11 = scmp.ne.s32.totalorder %s40_s24, %s12050_s12  ;;  %p12056_p13 = scmp.lt.s32.totalorder %s12050_s12, %s12050_s12 }
  0x1c   :  { %p12057_p0 = por %p12056_p13, %p12055_p12 }
  0x1e   :  { %p12058_p1 = pnand %p12057_p0, %p12051_p11 }
  0x20   :  { %12061 = shalt.err (!%p12058_p1)
}
  0x21   :  { %45 = dma.hbm_to_vmem [thread:$0]  %s15323_s4, 18432, %s40_s24, [#allocation9], %s12069_s19, %s12069_s19, %s12070_s20  }
  0x22   :  { %12062 = dma.done.wait [#allocation7], 13824  }
  0x23   :  { %12063 = vsyncadd [#allocation7], 4294953472 }
  0x24   :  { %12064 = dma.done.wait [#allocation9], 18432  }
  0x25   :  { %12065 = vsyncadd [#allocation9], 4294948864  ;;  %s63_s13 = sld [smem:[#allocation0]]   ;;  %s12072_s14 = smov 3840   ;;  %v15331_v0 = vmov 0.0   ;;  %v15329_v1 = vmov 0  }
  0x26   :  { %75 = sst [smem:[#allocation11]] %s12072_s14  ;;  %250 = vmatprep.mubr.f32.mxu0 %v15331_v0  ;;  %286 = vmatprep.mubr.f32.mxu1 %v15331_v0  ;;  %s12074_s15 = smov 30   ;;  %vm179_vm0 = vcmask 1043456   ;;  %vm154_vm1 = vcmask 31744   ;;  %v15333_v16 = vmov 0.0|0.0   ;;  %vm12085_vm2 = vmmov 0  }
  0x27   :  { %77 = sst [smem:[#allocation11 + $0x1]] %s12072_s14  ;;  %11634 = vset.pattern.permute.xlu0 %v15329_v1  ;;  %s12076_s16 = smov 64   ;;  %vm490_vm8 = vcmask 785408   ;;  %vm657_vm9 = vcmask 392192   ;;  %vm659_vm10 = vcmask 785792  }
  0x28   :  { %79 = sst [smem:[#allocation11 + $0x2]] %s12074_s15  ;;  %s12077_s4 = smov 128  }
  0x29   :  { %81 = sst [smem:[#allocation11 + $0x3]] %s12076_s16  ;;  %s12078_s17 = smov 2  }
  0x2a   :  { %83 = sst [smem:[#allocation11 + $0x4]] %s12077_s4  ;;  %s12079_s19 = smov 1920  }
  0x2b   :  { %85 = sst [smem:[#allocation11 + $0x5]] %s12078_s17  ;;  %s8437_s18 = sshll.u32 %s63_s13, 26 }
  0x2c   :  { %87 = sst [smem:[#allocation11 + $0x6]] %s12079_s19  ;;  %s8438_s20 = sadd.s32 134217728, %s8437_s18 }
  0x2d   :  { %89 = sst [smem:[#allocation11 + $0x7]] %s12076_s16  ;;  %s12080_s21 = smov 4  }
  0x2e   :  { %91 = sst [smem:[#allocation11 + $0x8]] %s12080_s21  ;;  %s12081_s22 = smov [#allocation4]  }
  0x2f   :  { %s71_s23 = sshll.u32 %s12081_s22, 4  ;;  %s12082_s24 = smov [#allocation5]   ;;  %s72_s23 = int_to_ptr.vmem [resolvable:$true] %s71_s23 }
  0x30   :  { %s12083_s25 = smov [#allocation10]  }
  0x31   :  { %93 = dma.general %s15326_s7, 23040, %s72_s23, %s12082_s24, %s12083_s25, [#allocation11], %s8438_s20, 0  }
  0x32   :  { %v132_v2 = vld [vmem:[%s15321_s2] sm:$0xff]  ;;  %v12182_v5 = vld [vmem:[%s15320_s1 + $0x30] sm:$0xff]  ;;  %v429_v6 = vld [vmem:[#allocation8 + $0x8] sm:$0xff] }
  0x33   :  { %v153_v3 = vcombine.high %v132_v2, %v132_v2  ;;  %v124_v4 = vld [vmem:[%s15320_s1] sm:$0xff]  ;;  %v133_v8 = vld [vmem:[%s15321_s2 + $0x8] sm:$0xf]  ;;  %v12204_v11 = vld [vmem:[%s15320_s1 + $0x38] sm:$0xff] }
  0x34   :  { %v432_v7 = vld [vmem:[#allocation8 + $0x20] sm:$0xff]  ;;  %v125_v10 = vld [vmem:[%s15320_s1 + $0x8] sm:$0xff]  ;;  %v431_v13 = vld [vmem:[#allocation8 + $0x18] sm:$0xff] }
  0x35   :  { %8439 = vmatprep.subr.msk.mxu0 %vm179_vm0, %v153_v3  ;;  %11607 = vmatprep.subr.msk.mxu1 %vm179_vm0, %v153_v3  ;;  %v12191_v9 = vpack.c.bf16 %v432_v7, %v429_v6  ;;  %v428_v12 = vld [vmem:[#allocation8] sm:$0xff]  ;;  %v435_v14 = vld [vmem:[#allocation8 + $0x38] sm:$0xff]  ;;  %v438_v15 = vld [vmem:[#allocation8 + $0x50] sm:$0xff]  ;;  %v95_v7 = vlaneseq }
  0x36   :  { %8440 = vmatpush1.msk.msra.mxu0 %vm179_vm0, %v132_v2  ;;  %11608 = vmatpush1.msk.msra.mxu1 %vm179_vm0, %v132_v2  ;;  %v12214_v17 = vpack.c.bf16 %v431_v13, %v428_v12  ;;  %v126_v18 = vld [vmem:[%s15320_s1 + $0x10] sm:$0xff]  ;;  %v12220_v20 = vpack.c.bf16 %v438_v15, %v435_v14  ;;  %v437_v21 = vld [vmem:[#allocation8 + $0x48] sm:$0xff]  ;;  %v444_v25 = vld [vmem:[#allocation8 + $0x80] sm:$0xff] }
  0x37   :  { %8441 = vmatmul.mubr.msk.f32.vlgmr.msra.gmra.mrb[0].mxu0 %vm154_vm1, %v124_v4  ;;  %8447 = vmatmul.mubr.msk.f32.vlgmr.msra.gmra.mrb[0].mxu1 %vm154_vm1, %v12182_v5  ;;  %v434_v19 = vld [vmem:[#allocation8 + $0x30] sm:$0xff]  ;;  %v433_v23 = vld [vmem:[#allocation8 + $0x28] sm:$0xff]  ;;  %v127_v27 = vld [vmem:[%s15320_s1 + $0x18] sm:$0xff]  ;;  %v12348_v12 = vshrl.u32 %v95_v7, 7 }
  0x38   :  { %9133 = vmatprep.subr.msk.mxu1 %vm179_vm0, %v133_v8  ;;  %256 = vmatprep.mubr.f32.mxu0 %v15331_v0  ;;  %v430_v22 = vld [vmem:[#allocation8 + $0x10] sm:$0xff]  ;;  %v441_v24 = vld [vmem:[#allocation8 + $0x68] sm:$0xff]  ;;  %v12231_v28 = vpack.c.bf16 %v437_v21, %v434_v19  ;;  %v128_v29 = vld [vmem:[%s15320_s1 + $0x20] sm:$0xff] }
  0x39   :  { %9134 = vmatpush3.msk.msra.mxu1 %vm179_vm0, %v133_v8  ;;  %292 = vmatprep.mubr.f32.mxu1 %v15331_v0  ;;  %v12222_v26 = vpack.c.bf16 %v433_v23, %v430_v22  ;;  %v440_v30 = vld [vmem:[#allocation8 + $0x60] sm:$0xff]  ;;  %v12237_v31 = vpack.c.bf16 %v444_v25, %v441_v24  ;;  %v443_v32 = vld [vmem:[#allocation8 + $0x78] sm:$0xff]  ;;  %v450_v35 = vld [vmem:[#allocation8 + $0xb0] sm:$0xff]  ;;  %v12336_v8 = vand.u32 127, %v95_v7  ;;  %15377 = vst [vmem:[#allocation17_spill] sm:$0xff] %v12348_v12  ;;  %v12351_v13 = vsub.s32 0, %v12348_v12 }
  0x3a   :  { %10120 = vmatprep.subr.bf16.mxu1 %v12191_v9  ;;  %10143 = vmatprep.subr.bf16.mxu0 %v15333_v16  ;;  %v447_v33 = vld [vmem:[#allocation8 + $0x98] sm:$0xff]  ;;  %v94_v34 = vld [vmem:[%s15319_s0] sm:$0xff]  ;;  %v129_v38 = vld [vmem:[%s15320_s1 + $0x28] sm:$0xff]  ;;  %v12251_v39 = vpack.c.bf16 %v443_v32, %v440_v30  ;;  %v12357_v15 = vsub.s32 1, %v12348_v12  ;;  %v12368_v30 = vsub.s32 2, %v12348_v12 }
  0x3b   :  { %8442 = vmatmul.mubr.msk.f32.gmra.mrb[2].mxu0 %vm154_vm1, %v125_v10  ;;  %8448 = vmatmul.mubr.msk.f32.gmra.mrb[2].mxu1 %vm154_vm1, %v12204_v11  ;;  %v436_v36 = vld [vmem:[#allocation8 + $0x40] sm:$0xff]  ;;  %v439_v37 = vld [vmem:[#allocation8 + $0x58] sm:$0xff]  ;;  %v12254_v40 = vpack.c.bf16 %v450_v35, %v447_v33  ;;  %v446_v41 = vld [vmem:[#allocation8 + $0x90] sm:$0xff]  ;;  %15375 = vst [vmem:[#allocation15_spill] sm:$0xff] %v12336_v8  ;;  %vm102_vm3 = vcmp.lt.s32.totalorder %v12336_v8, 48  ;;  %v97_v19 = vadd.s32 128, %v12336_v8 }
  0x3c   :  { %9135 = vmatprep.mubr.msk.f32.mxu1 %vm154_vm1, %v124_v4  ;;  %262 = vmatprep.mubr.f32.mxu0 %v15331_v0  ;;  %v449_v42 = vld [vmem:[#allocation8 + $0xa8] sm:$0xff]  ;;  %v12257_v44 = vpack.c.bf16 %v439_v37, %v436_v36  ;;  %v456_v45 = vld [vmem:[#allocation8 + $0xe0] sm:$0xff]  ;;  %v442_v46 = vld [vmem:[#allocation8 + $0x70] sm:$0xff]  ;;  %15378 = vst [vmem:[#allocation18_spill] sm:$0xff] %v12351_v13 }
  0x3d   :  { %10145 = vmatpush3.bf16.msra.mxu0 %v12222_v26  ;;  %107 = vperm.xlu0 %11634, %v94_v34   ;;  %v453_v43 = vld [vmem:[#allocation8 + $0xc8] sm:$0xff]  ;;  %v12265_v48 = vpack.c.bf16 %v449_v42, %v446_v41  ;;  %v452_v50 = vld [vmem:[#allocation8 + $0xc0] sm:$0xff]  ;;  %v455_v51 = vld [vmem:[#allocation8 + $0xd8] sm:$0xff]  ;;  %15379 = vst [vmem:[#allocation19_spill] sm:$0xff] %v12357_v15 }
  0x3e   :  { %10146 = vmatprep.subr.bf16.mxu0 %v15333_v16  ;;  %v445_v47 = vld [vmem:[#allocation8 + $0x88] sm:$0xff]  ;;  %v12268_v49 = vpack.c.bf16 %v456_v45, %v453_v43  ;;  %v459_v52 = vld [vmem:[#allocation8 + $0xf8] sm:$0xff]  ;;  %v462_v54 = vld [vmem:[#allocation8 + $0x110] sm:$0xff]  ;;  %v12279_v57 = vpack.c.bf16 %v455_v51, %v452_v50  ;;  %v98_v50 = vadd.s32 256, %v12336_v8 }
  0x3f   :  { %9136 = vmatmul.mubr.msk.f32.vlgmr.msra.gmra.mrb[4].mxu1 %vm154_vm1, %v125_v10  ;;  %8443 = vmatmul.mubr.msk.f32.gmra.mrb[4].mxu0 %vm154_vm1, %v126_v18  ;;  %v12271_v53 = vpack.c.bf16 %v445_v47, %v442_v46  ;;  %v448_v55 = vld [vmem:[#allocation8 + $0xa0] sm:$0xff]  ;;  %v451_v56 = vld [vmem:[#allocation8 + $0xb8] sm:$0xff]  ;;  %v12283_v58 = vpack.c.bf16 %v462_v54, %v459_v52  ;;  %v458_v59 = vld [vmem:[#allocation8 + $0xf0] sm:$0xff]  ;;  %v12342_v10 = vsel %vm102_vm3, 7, %v15329_v1 }
  0x40   :  { %10122 = vmatpush1.bf16.msra.mxu1 %v12214_v17  ;;  %9138 = vmatprep.mubr.msk.f32.mxu1 %vm154_vm1, %v126_v18  ;;  %v461_v60 = vld [vmem:[#allocation8 + $0x108] sm:$0xff]  ;;  %v12286_v61 = vpack.c.bf16 %v451_v56, %v448_v55  ;;  %v454_v62 = vld [vmem:[#allocation8 + $0xd0] sm:$0xff]  ;;  %v460_v4 = vld [vmem:[#allocation8 + $0x100] sm:$0xff]  ;;  %15376 = vst [vmem:[#allocation16_spill] sm:$0xff] %v12342_v10 }
  0x41   :  { %10124 = vmatprep.subr.bf16.mxu1 %v12220_v20  ;;  %268 = vmatprep.mubr.f32.mxu0 %v15331_v0  ;;  %v457_v63 = vld [vmem:[#allocation8 + $0xe8] sm:$0xff]  ;;  %v12292_v2 = vpack.c.bf16 %v461_v60, %v458_v59  ;;  %v134_v14 = vld [vmem:[%s15324_s5] sm:$0x7] }
  0x42   :  { %10148 = vmatpush3.bf16.msra.mxu0 %v12257_v44  ;;  %v12296_v3 = vpack.c.bf16 %v457_v63, %v454_v62  ;;  %v12360_v18 = vrot.slane %v134_v14, %v12351_v13  ;;  %v12364_v21 = vrot.slane %v134_v14, %v12357_v15  ;;  %v147_v45 = vrot.slane %v134_v14, %v12368_v30 }
  0x43   :  { %9139 = vmatmul.mubr.msk.f32.gmra.mrb[6].mxu1 %vm154_vm1, %v127_v27  ;;  %8444 = vmatmul.mubr.msk.f32.gmra.mrb[6].mxu0 %vm154_vm1, %v127_v27 }
  0x44   :  { %10126 = vmatpush1.bf16.msra.mxu1 %v12231_v28  ;;  %9141 = vmatprep.mubr.msk.f32.mxu1 %vm154_vm1, %v128_v29 }
  0x45   :  { %10128 = vmatprep.subr.bf16.mxu1 %v12237_v31  ;;  %274 = vmatprep.mubr.f32.mxu0 %v15331_v0 }
  0x46   :  { %10149 = vmatprep.subr.bf16.mxu0 %v15333_v16 }
  0x47   :  { %9142 = vmatmul.mubr.msk.f32.gmra.mrb[8].mxu1 %vm154_vm1, %v129_v38  ;;  %8445 = vmatmul.mubr.msk.f32.gmra.mrb[8].mxu0 %vm154_vm1, %v128_v29  ;;  %v100_v29 = vand.u32 127, %v97_v19 }
  0x48   :  { %10130 = vmatpush1.bf16.msra.mxu1 %v12251_v39  ;;  %9144 = vmatprep.mubr.msk.f32.mxu1 %vm154_vm1, %v12182_v5  ;;  %v463_v5 = vld [vmem:[#allocation8 + $0x118] sm:$0xff] }
  0x49   :  { %10132 = vmatprep.subr.bf16.mxu1 %v12254_v40  ;;  %280 = vmatprep.mubr.f32.mxu0 %v15331_v0  ;;  %v12301_v6 = vpack.c.bf16 %v463_v5, %v460_v4  ;;  %vm12379_vm5 = vcmp.lt.s32.totalorder %v100_v29, 48 }
  0x4a   :  { %10151 = vmatpush3.bf16.msra.mxu0 %v12271_v53 }
  0x4b   :  { %9145 = vmatmul.mubr.msk.f32.gmra.mrb[10].mxu1 %vm154_vm1, %v12204_v11  ;;  %8446 = vmatmul.mubr.msk.f32.gmra.mrb[10].mxu0 %vm154_vm1, %v129_v38 }
  0x4c   :  { %10134 = vmatpush1.bf16.msra.mxu1 %v12265_v48  ;;  %558 = vmatprep.mubr.f32.mxu1 %v15331_v0 }
  0x4d   :  { %10136 = vmatprep.subr.bf16.mxu1 %v12268_v49  ;;  %10152 = vmatprep.subr.bf16.mxu0 %v15333_v16 }
  0x4e   :  { %9171 = vmatprep.mubr.msk.f32.mxu0 %vm12085_vm2, %v15331_v0  ;;  %10154 = vmatpush3.bf16.msra.mxu0 %v12286_v61 }
  0x4f   :  { %10155 = vmatprep.subr.bf16.mxu0 %v15333_v16 }
  0x50   :  { %10138 = vmatpush1.bf16.msra.mxu1 %v12279_v57 }
  0x51   :  { %10140 = vmatprep.subr.bf16.mxu1 %v12283_v58 }
  0x52   :  { %10157 = vmatpush3.bf16.msra.mxu0 %v12296_v3 }
  0x53   :  { %10158 = vmatprep.subr.bf16.mxu0 %v15333_v16 }
  0x54   :  { %10142 = vmatpush1.bf16.msra.mxu1 %v12292_v2 }
  0x55   :  { %10162 = vmatprep.subr.bf16.mxu1 %v12191_v9 }
  0x56   :  { %10160 = vmatpush3.bf16.msra.mxu0 %v12301_v6 }
  0x57   :  { %559 = vmatmul.mubr.f32.vlgmr.msra.gmra.mrb[12].mxu1 %v15331_v0  ;;  %10185 = vmatprep.subr.bf16.mxu0 %v15333_v16 }
  0x58   :  { %10164 = vmatpush1.bf16.msra.mxu1 %v12214_v17  ;;  %737 = vmatprep.mubr.f32.mxu1 %v15331_v0 }
  0x59   :  { %10166 = vmatprep.subr.bf16.mxu1 %v12220_v20  ;;  %9172 = vmatmul.mubr.f32.vlgmr.msra.gmra.mrb[12].mxu0 %v15331_v0 }
  0x5a   :  { %10187 = vmatpush3.bf16.msra.mxu0 %v12222_v26  ;;  %9198 = vmatprep.mubr.msk.f32.mxu0 %vm12085_vm2, %v15331_v0 }
  0x5b   :  { %10188 = vmatprep.subr.bf16.mxu0 %v15333_v16 }
  0x5c   :  { %10168 = vmatpush1.bf16.msra.mxu1 %v12231_v28 }
  0x5d   :  { %10170 = vmatprep.subr.bf16.mxu1 %v12237_v31 }
  0x5e   :  { %10190 = vmatpush3.bf16.msra.mxu0 %v12257_v44 }
  0x5f   :  { %10191 = vmatprep.subr.bf16.mxu0 %v15333_v16 }
  0x60   :  { %10172 = vmatpush1.bf16.msra.mxu1 %v12251_v39 }
  0x61   :  { %10174 = vmatprep.subr.bf16.mxu1 %v12254_v40 }
  0x62   :  { %10193 = vmatpush3.bf16.msra.mxu0 %v12271_v53 }
  0x63   :  { %10194 = vmatprep.subr.bf16.mxu0 %v15333_v16 }
  0x64   :  { %10176 = vmatpush1.bf16.msra.mxu1 %v12265_v48 }
  0x65   :  { %10178 = vmatprep.subr.bf16.mxu1 %v12268_v49 }
  0x66   :  { %10196 = vmatpush3.bf16.msra.mxu0 %v12286_v61 }
  0x67   :  { %10197 = vmatprep.subr.bf16.mxu0 %v15333_v16 }
  0x68   :  { %10180 = vmatpush1.bf16.msra.mxu1 %v12279_v57 }
  0x69   :  { %10182 = vmatprep.subr.bf16.mxu1 %v12283_v58 }
  0x6a   :  { %10199 = vmatpush3.bf16.msra.mxu0 %v12296_v3 }
  0x6b   :  { %10200 = vmatprep.subr.bf16.mxu0 %v15333_v16 }
  0x6c   :  { %10184 = vmatpush1.bf16.msra.mxu1 %v12292_v2 }
  0x6d   :  { %10204 = vmatprep.subr.bf16.mxu1 %v12191_v9 }
  0x6e   :  { %10202 = vmatpush3.bf16.msra.mxu0 %v12301_v6 }
  0x6f   :  { %10227 = vmatprep.subr.bf16.mxu0 %v15333_v16 }
  0xbc   :  { %v12344_v11 = vpop.permute.xlu0 %107 }
  0xbd   :  { %vm123_vm4 = vcmp.gt.s32.totalorder %v12344_v11, %v12342_v10 }
 0x10a   :  { %v288_v22 = vpop.f32.mrb[0].mxu1  ;;  %v252_v23 = vpop.f32.mrb[0].mxu0 }
 0x10b   :  { %v289_v24 = vadd.f32 %v288_v22, %v12360_v18  ;;  %v290_v25 = vpop.f32.mrb[1].mxu1  ;;  %v254_v27 = vpop.f32.mrb[1].mxu0  ;;  %v253_v33 = vadd.f32 %v252_v23, %v12360_v18  ;;  %v101_v23 = vand.u32 127, %v98_v50 }
 0x10c   :  { %v12371_v32 = vadd.f32 %v290_v25, %v12364_v21  ;;  %v12375_v34 = vadd.f32 %v254_v27, %v12364_v21 }
 0x10d   :  { %vm12437_vm6 = vcmp.lt.s32.totalorder %v101_v23, 48 }
 0x10e   :  { %15380 = vst [vmem:[#allocation20_spill] sm:$0xff] %v12375_v34  ;;  %v258_v35 = vpop.f32.mrb[2].mxu0  ;;  %v294_v36 = vpop.f32.mrb[2].mxu1 }
 0x10f   :  { %v259_v37 = vadd.f32 %v258_v35, %v12360_v18  ;;  %v295_v38 = vadd.f32 %v294_v36, %v12360_v18  ;;  %v260_v41 = vpop.f32.mrb[3].mxu0  ;;  %v296_v42 = vpop.f32.mrb[3].mxu1 }
 0x110   :  { %v12385_v46 = vadd.f32 %v260_v41, %v12364_v21  ;;  %v12388_v47 = vadd.f32 %v296_v42, %v12364_v21 }
 0x111   :  { %v12393_v51 = vsel %vm102_vm3, %v253_v33, %v295_v38  ;;  %v12397_v52 = vsel %vm102_vm3, %v259_v37, %v289_v24  ;;  %v12401_v54 = vsel %vm102_vm3, %v289_v24, %v259_v37  ;;  %v12405_v55 = vsel %vm102_vm3, %v295_v38, %v253_v33 }
 0x112   :  { %v9137_v56 = vpop.f32.mrb[4].mxu1  ;;  %v472_v59 = vsel %vm12379_vm5, %v12375_v34, %v12388_v47  ;;  %v264_v60 = vpop.f32.mrb[4].mxu0 }
 0x113   :  { %v12423_v5 = vadd.f32 %v9137_v56, %v147_v45  ;;  %v365_v7 = vpop.f32.mrb[5].mxu1  ;;  %v265_v14 = vadd.f32 %v264_v60, %v12360_v18  ;;  %v266_v19 = vpop.f32.mrb[5].mxu0 }
 0x114   :  { %v12427_v22 = vadd.f32 %v266_v19, %v12364_v21 }
 0x116   :  { %v9140_v24 = vpop.f32.mrb[6].mxu1  ;;  %v270_v25 = vpop.f32.mrb[6].mxu0 }
 0x117   :  { %v12429_v27 = vadd.f32 %v9140_v24, %v147_v45  ;;  %v375_v29 = vpop.f32.mrb[7].mxu1  ;;  %v271_v33 = vadd.f32 %v270_v25, %v12360_v18  ;;  %v272_v35 = vpop.f32.mrb[7].mxu0 }
 0x118   :  { %v12432_v36 = vadd.f32 %v375_v29, %v147_v45  ;;  %v12435_v37 = vadd.f32 %v272_v35, %v12364_v21 }
 0x11a   :  { %v9143_v41 = vpop.f32.mrb[8].mxu1  ;;  %v276_v42 = vpop.f32.mrb[8].mxu0 }
 0x11b   :  { %v12441_v50 = vadd.f32 %v9143_v41, %v147_v45  ;;  %v385_v56 = vpop.f32.mrb[9].mxu1  ;;  %v277_v60 = vadd.f32 %v276_v42, %v12360_v18  ;;  %v278_v19 = vpop.f32.mrb[9].mxu0 }
 0x11c   :  { %v12444_v24 = vadd.f32 %v385_v56, %v147_v45  ;;  %v12447_v25 = vadd.f32 %v278_v19, %v12364_v21 }
 0x11d   :  { %v12459_v35 = vsel %vm102_vm3, %v271_v33, %v277_v60  ;;  %v12463_v41 = vsel %vm102_vm3, %v277_v60, %v271_v33  ;;  %v12481_v60 = vadd.f32 %v365_v7, %v147_v45 }
 0x11e   :  { %v9146_v19 = vpop.f32.mrb[10].mxu1  ;;  %v282_v1 = vpop.f32.mrb[10].mxu0 }
 0x11f   :  { %15385 = vst [vmem:[#allocation21_spill] sm:$0xff] %v12481_v60  ;;  %v12483_v63 = vadd.f32 %v9146_v19, %v147_v45  ;;  %v395_v29 = vpop.f32.mrb[11].mxu1  ;;  %v283_v42 = vadd.f32 %v282_v1, %v12360_v18  ;;  %v284_v56 = vpop.f32.mrb[11].mxu0 }
 0x120   :  { %v12486_v23 = vadd.f32 %v395_v29, %v147_v45  ;;  %v12489_v62 = vadd.f32 %v284_v56, %v12364_v21  ;;  %v464_v29 = vld [vmem:[%s15325_s6] sm:$0x7] }
 0x121   :  { %15386 = vst [vmem:[#allocation22_spill] sm:$0xff] %v12483_v63  ;;  %v473_v4 = vsel %vm12437_vm6, %v12481_v60, %v12483_v63  ;;  %v12501_v19 = vsel %vm102_vm3, %v265_v14, %v283_v42  ;;  %v12505_v1 = vsel %vm102_vm3, %v283_v42, %v265_v14  ;;  %v12527_v42 = vrot.slane %v464_v29, %v12351_v13 }
 0x122   :  { %v12530_v56 = vrot.slane %v464_v29, %v12357_v15  ;;  %v12536_v15 = vrot.slane %v464_v29, %v12368_v30 }
 0x12a   :  { %v560_v7 = vpop.f32.mrb[12].mxu1 }
 0x12b   :  { %v561_v21 = vadd.f32 %v560_v7, %v12527_v42  ;;  %v562_v33 = vpop.f32.mrb[13].mxu1 }
 0x12c   :  { %v563_v45 = vadd.f32 %v562_v33, %v12530_v56  ;;  %v631_v16 = vpop.f32.mrb[12].mxu0 }
 0x12d   :  { %v635_v18 = vadd.f32 %v561_v21, %v12393_v51  ;;  %v9173_v12 = vpop.f32.mrb[13].mxu0  ;;  %v632_v34 = vadd.f32 %v631_v16, %v12536_v15 }
 0x12e   :  { %v636_v0 = vadd.f32 %v563_v45, %v472_v59  ;;  %v12086_v12 = vmov 7  }
 0x12f   :  { %v8458_v14 = vmul.f32 -1.442695, %v635_v18 }
 0x130   :  { %v8459_v10 = vmul.f32 -1.442695, %v636_v0  ;;  %v12541_v0 = vsel %vm102_vm3, 0, %v12086_v12 }
 0x131   :  { %11636 = vpow2.f32 %v8458_v14  ;;  %15387 = vst [vmem:[#allocation23_spill] sm:$0xff] %v12541_v0  ;;  %vm109_vm7 = vcmp.gt.s32.totalorder %v12344_v11, %v12541_v0 }
 0x132   :  { %11638 = vpow2.f32 %v8459_v10 }
 0x13b   :  { %v11637_v13 = vpop.eup %11636 }
 0x13c   :  { %v643_v60 = vadd.f32 1.0, %v11637_v13  ;;  %v11639_v63 = vpop.eup %11638 }
 0x13d   :  { %v644_v7 = vadd.f32 1.0, %v11639_v63  ;;  %v15388_v63 = vmov 0.0|0.0  }
 0x13e   :  { %11640 = vrcp.f32 %v643_v60 }
 0x13f   :  { %11642 = vrcp.f32 %v644_v7 }
 0x148   :  { %v11641_v33 = vpop.eup %11640 }
 0x149   :  { %v649_v51 = vmul.f32 %v11641_v33, %v632_v34  ;;  %v11643_v18 = vpop.eup %11642 }
 0x14a   :  { %v652_v10 = vsub.f32 1.0, %v11643_v18  ;;  %v654_v21 = vmul.f32 0.0, %v11643_v18  ;;  %v15390_v18 = vsel %vm12379_vm5, %v12385_v46, %v12371_v32 }
 0x14b   :  { %v650_v59 = vadd.f32 %v649_v51, %v473_v4  ;;  %v15389_v4 = vmov 0.0  }
 0x14d   :  { %11644 = vtanh.f32 %v650_v59 }
 0x157   :  { %v11645_v13 = vpop.eup %11644 }
 0x158   :  { %v653_v60 = vmul.f32 %v11645_v13, %v652_v10 }
 0x15a   :  { %v655_v16 = vadd.f32 %v654_v21, %v653_v60 }
 0x15c   :  { %v12548_v34 = vsel %vm109_vm7, %v655_v16, 0.0 }
 0x15d   :  { %658 = vst.msk [vmem:[#allocation3] sm:$0xff] %vm657_vm9, %v12548_v34  ;;  %8460 = vmatmul.mubr.msk.f32.vlgmr.msra.gmra.mrb[14].mxu1 %vm490_vm8, %v12548_v34  ;;  %9199 = vmatmul.mubr.msk.f32.vlgmr.msra.gmra.mrb[14].mxu0 %vm490_vm8, %v12548_v34 }
 0x15e   :  { %660 = vst.msk [vmem:[#allocation3 + $0x38] sm:$0xff] %vm659_vm10, %v12548_v34  ;;  %10206 = vmatpush1.bf16.msra.mxu1 %v12214_v17  ;;  %10229 = vmatpush3.bf16.msra.mxu0 %v12222_v26 }
 0x15f   :  { %10208 = vmatprep.subr.bf16.mxu1 %v12220_v20  ;;  %10230 = vmatprep.subr.bf16.mxu0 %v15388_v63 }
 0x160   :  { %914 = vmatprep.mubr.f32.mxu1 %v15389_v4  ;;  %9225 = vmatprep.mubr.msk.f32.mxu0 %vm12085_vm2, %v15389_v4 }
 0x162   :  { %10210 = vmatpush1.bf16.msra.mxu1 %v12231_v28  ;;  %10232 = vmatpush3.bf16.msra.mxu0 %v12257_v44 }
 0x163   :  { %10212 = vmatprep.subr.bf16.mxu1 %v12237_v31  ;;  %10233 = vmatprep.subr.bf16.mxu0 %v15388_v63 }
 0x166   :  { %10214 = vmatpush1.bf16.msra.mxu1 %v12251_v39  ;;  %10235 = vmatpush3.bf16.msra.mxu0 %v12271_v53 }
 0x167   :  { %10216 = vmatprep.subr.bf16.mxu1 %v12254_v40  ;;  %10236 = vmatprep.subr.bf16.mxu0 %v15388_v63 }
 0x16a   :  { %10218 = vmatpush1.bf16.msra.mxu1 %v12265_v48  ;;  %10238 = vmatpush3.bf16.msra.mxu0 %v12286_v61 }
 0x16b   :  { %10220 = vmatprep.subr.bf16.mxu1 %v12268_v49  ;;  %10239 = vmatprep.subr.bf16.mxu0 %v15388_v63 }
 0x16e   :  { %10222 = vmatpush1.bf16.msra.mxu1 %v12279_v57  ;;  %10241 = vmatpush3.bf16.msra.mxu0 %v12296_v3 }
 0x16f   :  { %10224 = vmatprep.subr.bf16.mxu1 %v12283_v58  ;;  %10242 = vmatprep.subr.bf16.mxu0 %v15388_v63 }
 0x172   :  { %10226 = vmatpush1.bf16.msra.mxu1 %v12292_v2  ;;  %10244 = vmatpush3.bf16.msra.mxu0 %v12301_v6 }
 0x173   :  { %10246 = vmatprep.subr.bf16.mxu1 %v12191_v9  ;;  %10269 = vmatprep.subr.bf16.mxu0 %v15388_v63 }
 0x230   :  { %v739_v45 = vpop.f32.mrb[14].mxu1  ;;  %v810_v14 = vpop.f32.mrb[14].mxu0 }
 0x231   :  { %v740_v29 = vadd.f32 %v739_v45, %v12527_v42  ;;  %v741_v7 = vpop.f32.mrb[15].mxu1  ;;  %v9200_v33 = vpop.f32.mrb[15].mxu0 }
 0x232   :  { %v742_v51 = vadd.f32 %v741_v7, %v12530_v56  ;;  %v811_v33 = vadd.f32 %v810_v14, %v12536_v15 }
 0x233   :  { %v814_v59 = vadd.f32 %v740_v29, %v12397_v52  ;;  %v15391_v52 = vsel %vm12437_vm6, %v12423_v5, %v12486_v23 }
 0x234   :  { %v815_v12 = vadd.f32 %v742_v51, %v15390_v18 }
 0x235   :  { %v8462_v10 = vmul.f32 -1.442695, %v814_v59 }
 0x236   :  { %v8463_v13 = vmul.f32 -1.442695, %v815_v12  ;;  %v12087_v12 = vmov 6  }
 0x237   :  { %11646 = vpow2.f32 %v8462_v10  ;;  %v12601_v10 = vsel %vm102_vm3, 1, %v12087_v12 }
 0x238   :  { %11648 = vpow2.f32 %v8463_v13  ;;  %vm111_vm11 = vcmp.gt.s32.totalorder %v12344_v11, %v12601_v10 }
 0x241   :  { %v11647_v60 = vpop.eup %11646 }
 0x242   :  { %v822_v21 = vadd.f32 1.0, %v11647_v60  ;;  %v11649_v16 = vpop.eup %11648 }
 0x243   :  { %v823_v45 = vadd.f32 1.0, %v11649_v16 }
 0x244   :  { %11650 = vrcp.f32 %v822_v21 }
 0x245   :  { %11652 = vrcp.f32 %v823_v45 }
 0x24e   :  { %v11651_v7 = vpop.eup %11650 }
 0x24f   :  { %v828_v0 = vmul.f32 %v11651_v7, %v811_v33  ;;  %v11653_v51 = vpop.eup %11652 }
 0x250   :  { %v831_v59 = vsub.f32 1.0, %v11653_v51  ;;  %v833_v14 = vmul.f32 %v11653_v51, %v12548_v34 }
 0x251   :  { %v829_v29 = vadd.f32 %v828_v0, %v15391_v52 }
 0x253   :  { %11654 = vtanh.f32 %v829_v29  ;;  %v15392_v29 = vsel %vm12379_vm5, %v12427_v22, %v12489_v62 }
 0x25d   :  { %v11655_v18 = vpop.eup %11654 }
 0x25e   :  { %v832_v13 = vmul.f32 %v11655_v18, %v831_v59 }
 0x260   :  { %v834_v60 = vadd.f32 %v833_v14, %v832_v13 }
 0x262   :  { %v12610_v0 = vsel %vm111_vm11, %v834_v60, %v12548_v34 }
 0x263   :  { %836 = vst.msk [vmem:[#allocation3 + $0x8] sm:$0xff] %vm657_vm9, %v12610_v0  ;;  %8464 = vmatmul.mubr.msk.f32.vlgmr.msra.gmra.mrb[16].mxu1 %vm490_vm8, %v12610_v0  ;;  %9226 = vmatmul.mubr.msk.f32.vlgmr.msra.gmra.mrb[16].mxu0 %vm490_vm8, %v12610_v0 }
 0x264   :  { %837 = vst.msk [vmem:[#allocation3 + $0x30] sm:$0xff] %vm659_vm10, %v12610_v0  ;;  %10248 = vmatpush1.bf16.msra.mxu1 %v12214_v17  ;;  %10271 = vmatpush3.bf16.msra.mxu0 %v12222_v26 }
 0x265   :  { %10250 = vmatprep.subr.bf16.mxu1 %v12220_v20  ;;  %10272 = vmatprep.subr.bf16.mxu0 %v15388_v63 }
 0x266   :  { %1091 = vmatprep.mubr.f32.mxu1 %v15389_v4  ;;  %9252 = vmatprep.mubr.msk.f32.mxu0 %vm12085_vm2, %v15389_v4 }
 0x268   :  { %10252 = vmatpush1.bf16.msra.mxu1 %v12231_v28  ;;  %10274 = vmatpush3.bf16.msra.mxu0 %v12257_v44 }
 0x269   :  { %10254 = vmatprep.subr.bf16.mxu1 %v12237_v31  ;;  %10275 = vmatprep.subr.bf16.mxu0 %v15388_v63 }
 0x26c   :  { %10256 = vmatpush1.bf16.msra.mxu1 %v12251_v39  ;;  %10277 = vmatpush3.bf16.msra.mxu0 %v12271_v53 }
 0x26d   :  { %10258 = vmatprep.subr.bf16.mxu1 %v12254_v40  ;;  %10278 = vmatprep.subr.bf16.mxu0 %v15388_v63 }
 0x270   :  { %10260 = vmatpush1.bf16.msra.mxu1 %v12265_v48  ;;  %10280 = vmatpush3.bf16.msra.mxu0 %v12286_v61 }
 0x271   :  { %10262 = vmatprep.subr.bf16.mxu1 %v12268_v49  ;;  %10281 = vmatprep.subr.bf16.mxu0 %v15388_v63 }
 0x274   :  { %10264 = vmatpush1.bf16.msra.mxu1 %v12279_v57  ;;  %10283 = vmatpush3.bf16.msra.mxu0 %v12296_v3 }
 0x275   :  { %10266 = vmatprep.subr.bf16.mxu1 %v12283_v58  ;;  %10284 = vmatprep.subr.bf16.mxu0 %v15388_v63 }
 0x278   :  { %10268 = vmatpush1.bf16.msra.mxu1 %v12292_v2  ;;  %10286 = vmatpush3.bf16.msra.mxu0 %v12301_v6 }
 0x279   :  { %10288 = vmatprep.subr.bf16.mxu1 %v12191_v9  ;;  %10311 = vmatprep.subr.bf16.mxu0 %v15388_v63 }
 0x336   :  { %v916_v34 = vpop.f32.mrb[16].mxu1  ;;  %v987_v21 = vpop.f32.mrb[16].mxu0 }
 0x337   :  { %v917_v16 = vadd.f32 %v916_v34, %v12527_v42  ;;  %v918_v45 = vpop.f32.mrb[17].mxu1  ;;  %v9227_v33 = vpop.f32.mrb[17].mxu0  ;;  %v988_v34 = vadd.f32 %v987_v21, %v12536_v15 }
 0x338   :  { %v919_v7 = vadd.f32 %v918_v45, %v12530_v56 }
 0x339   :  { %v991_v52 = vadd.f32 %v917_v16, %v12501_v19  ;;  %v15393_v19 = vsel %vm12437_vm6, %v12432_v36, %v12441_v50 }
 0x33a   :  { %v992_v51 = vadd.f32 %v919_v7, %v15392_v29 }
 0x33b   :  { %v8466_v59 = vmul.f32 -1.442695, %v991_v52 }
 0x33c   :  { %v8467_v18 = vmul.f32 -1.442695, %v992_v51  ;;  %v12088_v51 = vmov 5  }
 0x33d   :  { %11656 = vpow2.f32 %v8466_v59  ;;  %v12663_v59 = vsel %vm102_vm3, 2, %v12088_v51 }
 0x33e   :  { %11658 = vpow2.f32 %v8467_v18  ;;  %vm113_vm12 = vcmp.gt.s32.totalorder %v12344_v11, %v12663_v59 }
 0x347   :  { %v11657_v12 = vpop.eup %11656 }
 0x348   :  { %v999_v13 = vadd.f32 1.0, %v11657_v12  ;;  %v11659_v14 = vpop.eup %11658 }
 0x349   :  { %v1000_v60 = vadd.f32 1.0, %v11659_v14 }
 0x34a   :  { %11660 = vrcp.f32 %v999_v13 }
 0x34b   :  { %11662 = vrcp.f32 %v1000_v60 }
 0x354   :  { %v11661_v45 = vpop.eup %11660 }
 0x355   :  { %v1005_v33 = vmul.f32 %v11661_v45, %v988_v34  ;;  %v11663_v7 = vpop.eup %11662 }
 0x356   :  { %v1008_v52 = vsub.f32 1.0, %v11663_v7  ;;  %v1010_v21 = vmul.f32 %v11663_v7, %v12610_v0 }
 0x357   :  { %v1006_v16 = vadd.f32 %v1005_v33, %v15393_v19 }
 0x359   :  { %11664 = vtanh.f32 %v1006_v16  ;;  %v15394_v16 = vsel %vm12379_vm5, %v12435_v37, %v12447_v25 }
 0x363   :  { %v11665_v29 = vpop.eup %11664 }
 0x364   :  { %v1009_v18 = vmul.f32 %v11665_v29, %v1008_v52 }
 0x366   :  { %v1011_v12 = vadd.f32 %v1010_v21, %v1009_v18 }
 0x368   :  { %v12672_v13 = vsel %vm113_vm12, %v1011_v12, %v12610_v0 }
 0x369   :  { %1013 = vst.msk [vmem:[#allocation3 + $0x10] sm:$0xff] %vm657_vm9, %v12672_v13  ;;  %8468 = vmatmul.mubr.msk.f32.vlgmr.msra.gmra.mrb[18].mxu1 %vm490_vm8, %v12672_v13  ;;  %9253 = vmatmul.mubr.msk.f32.vlgmr.msra.gmra.mrb[18].mxu0 %vm490_vm8, %v12672_v13 }
 0x36a   :  { %1014 = vst.msk [vmem:[#allocation3 + $0x28] sm:$0xff] %vm659_vm10, %v12672_v13  ;;  %10290 = vmatpush1.bf16.msra.mxu1 %v12214_v17  ;;  %10313 = vmatpush3.bf16.msra.mxu0 %v12222_v26 }
 0x36b   :  { %10292 = vmatprep.subr.bf16.mxu1 %v12220_v20  ;;  %10314 = vmatprep.subr.bf16.mxu0 %v15388_v63 }
 0x36c   :  { %1268 = vmatprep.mubr.f32.mxu1 %v15389_v4  ;;  %9279 = vmatprep.mubr.msk.f32.mxu0 %vm12085_vm2, %v15389_v4 }
 0x36e   :  { %10294 = vmatpush1.bf16.msra.mxu1 %v12231_v28  ;;  %10316 = vmatpush3.bf16.msra.mxu0 %v12257_v44 }
 0x36f   :  { %10296 = vmatprep.subr.bf16.mxu1 %v12237_v31  ;;  %10317 = vmatprep.subr.bf16.mxu0 %v15388_v63 }
 0x372   :  { %10298 = vmatpush1.bf16.msra.mxu1 %v12251_v39  ;;  %10319 = vmatpush3.bf16.msra.mxu0 %v12271_v53 }
 0x373   :  { %10300 = vmatprep.subr.bf16.mxu1 %v12254_v40  ;;  %10320 = vmatprep.subr.bf16.mxu0 %v15388_v63 }
 0x376   :  { %10302 = vmatpush1.bf16.msra.mxu1 %v12265_v48  ;;  %10322 = vmatpush3.bf16.msra.mxu0 %v12286_v61 }
 0x377   :  { %10304 = vmatprep.subr.bf16.mxu1 %v12268_v49  ;;  %10323 = vmatprep.subr.bf16.mxu0 %v15388_v63 }
 0x37a   :  { %10306 = vmatpush1.bf16.msra.mxu1 %v12279_v57  ;;  %10325 = vmatpush3.bf16.msra.mxu0 %v12296_v3 }
 0x37b   :  { %10308 = vmatprep.subr.bf16.mxu1 %v12283_v58  ;;  %10326 = vmatprep.subr.bf16.mxu0 %v15388_v63 }
 0x37e   :  { %10310 = vmatpush1.bf16.msra.mxu1 %v12292_v2  ;;  %10328 = vmatpush3.bf16.msra.mxu0 %v12301_v6 }
 0x37f   :  { %10330 = vmatprep.subr.bf16.mxu1 %v12191_v9  ;;  %10353 = vmatprep.subr.bf16.mxu0 %v15388_v63 }
 0x43c   :  { %v1093_v0 = vpop.f32.mrb[18].mxu1  ;;  %v1164_v14 = vpop.f32.mrb[18].mxu0 }
 0x43d   :  { %v1094_v60 = vadd.f32 %v1093_v0, %v12527_v42  ;;  %v1095_v34 = vpop.f32.mrb[19].mxu1  ;;  %v9254_v45 = vpop.f32.mrb[19].mxu0  ;;  %v1165_v0 = vadd.f32 %v1164_v14, %v12536_v15 }
 0x43e   :  { %v1096_v33 = vadd.f32 %v1095_v34, %v12530_v56 }
 0x43f   :  { %v1168_v19 = vadd.f32 %v1094_v60, %v12459_v35  ;;  %v15395_v35 = vsel %vm12437_vm6, %v12429_v27, %v12444_v24 }
 0x440   :  { %v1169_v7 = vadd.f32 %v1096_v33, %v15394_v16 }
 0x441   :  { %v8470_v52 = vmul.f32 -1.442695, %v1168_v19 }
 0x442   :  { %v8471_v29 = vmul.f32 -1.442695, %v1169_v7  ;;  %v12089_v7 = vmov 4  }
 0x443   :  { %11666 = vpow2.f32 %v8470_v52  ;;  %v12725_v52 = vsel %vm102_vm3, 3, %v12089_v7 }
 0x444   :  { %11668 = vpow2.f32 %v8471_v29  ;;  %15396 = vst [vmem:[#allocation24_spill] sm:$0xff] %v12725_v52  ;;  %vm115_vm13 = vcmp.gt.s32.totalorder %v12344_v11, %v12725_v52 }
 0x44d   :  { %v11667_v51 = vpop.eup %11666 }
 0x44e   :  { %v1176_v18 = vadd.f32 1.0, %v11667_v51  ;;  %v11669_v21 = vpop.eup %11668 }
 0x44f   :  { %v1177_v12 = vadd.f32 1.0, %v11669_v21 }
 0x450   :  { %11670 = vrcp.f32 %v1176_v18 }
 0x451   :  { %11672 = vrcp.f32 %v1177_v12 }
 0x45a   :  { %v11671_v34 = vpop.eup %11670 }
 0x45b   :  { %v1182_v45 = vmul.f32 %v11671_v34, %v1165_v0  ;;  %v11673_v33 = vpop.eup %11672 }
 0x45c   :  { %v1185_v19 = vsub.f32 1.0, %v11673_v33  ;;  %v1187_v14 = vmul.f32 %v11673_v33, %v12672_v13 }
 0x45d   :  { %v1183_v60 = vadd.f32 %v1182_v45, %v15395_v35 }
 0x45f   :  { %11674 = vtanh.f32 %v1183_v60  ;;  %v15397_v60 = vsel %vm12379_vm5, %v12447_v25, %v12435_v37  ;;  %v15398_v37 = vsel %vm12437_vm6, %v12444_v24, %v12429_v27 }
 0x469   :  { %v11675_v16 = vpop.eup %11674 }
 0x46a   :  { %v1186_v29 = vmul.f32 %v11675_v16, %v1185_v19 }
 0x46c   :  { %v1188_v51 = vadd.f32 %v1187_v14, %v1186_v29 }
 0x46e   :  { %v12734_v18 = vsel %vm115_vm13, %v1188_v51, %v12672_v13 }
 0x46f   :  { %1190 = vst.msk [vmem:[#allocation3 + $0x18] sm:$0xff] %vm657_vm9, %v12734_v18  ;;  %8472 = vmatmul.mubr.msk.f32.vlgmr.msra.gmra.mrb[20].mxu1 %vm490_vm8, %v12734_v18  ;;  %9280 = vmatmul.mubr.msk.f32.vlgmr.msra.gmra.mrb[20].mxu0 %vm490_vm8, %v12734_v18 }
 0x470   :  { %1191 = vst.msk [vmem:[#allocation3 + $0x20] sm:$0xff] %vm659_vm10, %v12734_v18  ;;  %10332 = vmatpush1.bf16.msra.mxu1 %v12214_v17  ;;  %10355 = vmatpush3.bf16.msra.mxu0 %v12222_v26 }
 0x471   :  { %10334 = vmatprep.subr.bf16.mxu1 %v12220_v20  ;;  %10356 = vmatprep.subr.bf16.mxu0 %v15388_v63 }
 0x472   :  { %1445 = vmatprep.mubr.f32.mxu1 %v15389_v4  ;;  %9306 = vmatprep.mubr.msk.f32.mxu0 %vm12085_vm2, %v15389_v4 }
 0x474   :  { %10336 = vmatpush1.bf16.msra.mxu1 %v12231_v28  ;;  %10358 = vmatpush3.bf16.msra.mxu0 %v12257_v44 }
 0x475   :  { %10338 = vmatprep.subr.bf16.mxu1 %v12237_v31  ;;  %10359 = vmatprep.subr.bf16.mxu0 %v15388_v63 }
 0x478   :  { %10340 = vmatpush1.bf16.msra.mxu1 %v12251_v39  ;;  %10361 = vmatpush3.bf16.msra.mxu0 %v12271_v53 }
 0x479   :  { %10342 = vmatprep.subr.bf16.mxu1 %v12254_v40  ;;  %10362 = vmatprep.subr.bf16.mxu0 %v15388_v63 }
 0x47c   :  { %10344 = vmatpush1.bf16.msra.mxu1 %v12265_v48  ;;  %10364 = vmatpush3.bf16.msra.mxu0 %v12286_v61 }
 0x47d   :  { %10346 = vmatprep.subr.bf16.mxu1 %v12268_v49  ;;  %10365 = vmatprep.subr.bf16.mxu0 %v15388_v63 }
 0x480   :  { %10348 = vmatpush1.bf16.msra.mxu1 %v12279_v57  ;;  %10367 = vmatpush3.bf16.msra.mxu0 %v12296_v3 }
 0x481   :  { %10350 = vmatprep.subr.bf16.mxu1 %v12283_v58  ;;  %10368 = vmatprep.subr.bf16.mxu0 %v15388_v63 }
 0x484   :  { %10352 = vmatpush1.bf16.msra.mxu1 %v12292_v2  ;;  %10370 = vmatpush3.bf16.msra.mxu0 %v12301_v6 }
 0x485   :  { %10372 = vmatprep.subr.bf16.mxu1 %v12191_v9  ;;  %10395 = vmatprep.subr.bf16.mxu0 %v15388_v63 }
 0x542   :  { %v1270_v13 = vpop.f32.mrb[20].mxu1  ;;  %v1341_v21 = vpop.f32.mrb[20].mxu0 }
 0x543   :  { %v1271_v12 = vadd.f32 %v1270_v13, %v12527_v42  ;;  %v1272_v0 = vpop.f32.mrb[21].mxu1  ;;  %v9281_v34 = vpop.f32.mrb[21].mxu0  ;;  %v1342_v13 = vadd.f32 %v1341_v21, %v12536_v15 }
 0x544   :  { %v1273_v45 = vadd.f32 %v1272_v0, %v12530_v56 }
 0x545   :  { %v1345_v35 = vadd.f32 %v1271_v12, %v12463_v41 }
 0x546   :  { %v1346_v33 = vadd.f32 %v1273_v45, %v15397_v60 }
 0x547   :  { %v8474_v19 = vmul.f32 -1.442695, %v1345_v35  ;;  %v12090_v35 = vmov 3  }
 0x548   :  { %v8475_v16 = vmul.f32 -1.442695, %v1346_v33  ;;  %v12787_v60 = vsel %vm102_vm3, 4, %v12090_v35 }
 0x549   :  { %11676 = vpow2.f32 %v8474_v19  ;;  %15399 = vst [vmem:[#allocation25_spill] sm:$0xff] %v12787_v60  ;;  %vm117_vm14 = vcmp.gt.s32.totalorder %v12344_v11, %v12787_v60 }
 0x54a   :  { %11678 = vpow2.f32 %v8475_v16 }
 0x553   :  { %v11677_v7 = vpop.eup %11676 }
 0x554   :  { %v1353_v29 = vadd.f32 1.0, %v11677_v7  ;;  %v11679_v14 = vpop.eup %11678 }
 0x555   :  { %v1354_v51 = vadd.f32 1.0, %v11679_v14 }
 0x556   :  { %11680 = vrcp.f32 %v1353_v29 }
 0x557   :  { %11682 = vrcp.f32 %v1354_v51 }
 0x560   :  { %v11681_v0 = vpop.eup %11680 }
 0x561   :  { %v1359_v34 = vmul.f32 %v11681_v0, %v1342_v13  ;;  %v11683_v41 = vpop.eup %11682  ;;  %v15400_v13 = vsel %vm12379_vm5, %v12489_v62, %v12427_v22  ;;  %v15401_v62 = vsel %vm12437_vm6, %v12441_v50, %v12432_v36 }
 0x562   :  { %v1362_v12 = vsub.f32 1.0, %v11683_v41  ;;  %v1364_v21 = vmul.f32 %v11683_v41, %v12734_v18 }
 0x563   :  { %v1360_v25 = vadd.f32 %v1359_v34, %v15398_v37 }
 0x565   :  { %11684 = vtanh.f32 %v1360_v25 }
 0x56f   :  { %v11685_v45 = vpop.eup %11684 }
 0x570   :  { %v1363_v33 = vmul.f32 %v11685_v45, %v1362_v12 }
 0x572   :  { %v1365_v19 = vadd.f32 %v1364_v21, %v1363_v33 }
 0x574   :  { %v12796_v27 = vsel %vm117_vm14, %v1365_v19, %v12734_v18 }
 0x575   :  { %1367 = vst.msk [vmem:[#allocation3 + $0x20] sm:$0xff] %vm657_vm9, %v12796_v27  ;;  %8476 = vmatmul.mubr.msk.f32.vlgmr.msra.gmra.mrb[22].mxu1 %vm490_vm8, %v12796_v27  ;;  %9307 = vmatmul.mubr.msk.f32.vlgmr.msra.gmra.mrb[22].mxu0 %vm490_vm8, %v12796_v27 }
 0x576   :  { %1368 = vst.msk [vmem:[#allocation3 + $0x18] sm:$0xff] %vm659_vm10, %v12796_v27  ;;  %10374 = vmatpush1.bf16.msra.mxu1 %v12214_v17  ;;  %10397 = vmatpush3.bf16.msra.mxu0 %v12222_v26 }
 0x577   :  { %10376 = vmatprep.subr.bf16.mxu1 %v12220_v20  ;;  %10398 = vmatprep.subr.bf16.mxu0 %v15388_v63 }
 0x578   :  { %1622 = vmatprep.mubr.f32.mxu1 %v15389_v4  ;;  %9333 = vmatprep.mubr.msk.f32.mxu0 %vm12085_vm2, %v15389_v4 }
 0x57a   :  { %10378 = vmatpush1.bf16.msra.mxu1 %v12231_v28  ;;  %10400 = vmatpush3.bf16.msra.mxu0 %v12257_v44 }
 0x57b   :  { %10380 = vmatprep.subr.bf16.mxu1 %v12237_v31  ;;  %10401 = vmatprep.subr.bf16.mxu0 %v15388_v63 }
 0x57e   :  { %10382 = vmatpush1.bf16.msra.mxu1 %v12251_v39  ;;  %10403 = vmatpush3.bf16.msra.mxu0 %v12271_v53 }
 0x57f   :  { %10384 = vmatprep.subr.bf16.mxu1 %v12254_v40  ;;  %10404 = vmatprep.subr.bf16.mxu0 %v15388_v63 }
 0x582   :  { %10386 = vmatpush1.bf16.msra.mxu1 %v12265_v48  ;;  %10406 = vmatpush3.bf16.msra.mxu0 %v12286_v61 }
 0x583   :  { %10388 = vmatprep.subr.bf16.mxu1 %v12268_v49  ;;  %10407 = vmatprep.subr.bf16.mxu0 %v15388_v63 }
 0x586   :  { %10390 = vmatpush1.bf16.msra.mxu1 %v12279_v57  ;;  %10409 = vmatpush3.bf16.msra.mxu0 %v12296_v3 }
 0x587   :  { %10392 = vmatprep.subr.bf16.mxu1 %v12283_v58  ;;  %10410 = vmatprep.subr.bf16.mxu0 %v15388_v63 }
 0x58a   :  { %10394 = vmatpush1.bf16.msra.mxu1 %v12292_v2  ;;  %10412 = vmatpush3.bf16.msra.mxu0 %v12301_v6 }
 0x58b   :  { %10414 = vmatprep.subr.bf16.mxu1 %v12191_v9  ;;  %10437 = vmatprep.subr.bf16.mxu0 %v15388_v63 }
 0x648   :  { %v1447_v24 = vpop.f32.mrb[22].mxu1  ;;  %v1518_v18 = vpop.f32.mrb[22].mxu0 }
 0x649   :  { %v1448_v16 = vadd.f32 %v1447_v24, %v12527_v42  ;;  %v1449_v7 = vpop.f32.mrb[23].mxu1  ;;  %v9308_v29 = vpop.f32.mrb[23].mxu0  ;;  %v1519_v45 = vadd.f32 %v1518_v18, %v12536_v15  ;;  %v12091_v24 = vmov 2  }
 0x64a   :  { %v1450_v14 = vadd.f32 %v1449_v7, %v12530_v56 }
 0x64b   :  { %v1522_v51 = vadd.f32 %v1448_v16, %v12505_v1  ;;  %v12849_v16 = vsel %vm102_vm3, 5, %v12091_v24  ;;  %v1917_v24 = vld [vmem:[#allocation6 + $0x48] sm:$0xff] }
 0x64c   :  { %v1523_v0 = vadd.f32 %v1450_v14, %v15400_v13  ;;  %15402 = vst [vmem:[#allocation26_spill] sm:$0xff] %v12849_v16  ;;  %vm119_vm15 = vcmp.gt.s32.totalorder %v12344_v11, %v12849_v16 }
 0x64d   :  { %v8478_v34 = vmul.f32 -1.442695, %v1522_v51  ;;  %v12092_v51 = vmov 1  }
 0x64e   :  { %v8479_v9 = vmul.f32 -1.442695, %v1523_v0  ;;  %v12903_v13 = vsel %vm102_vm3, 6, %v12092_v51  ;;  %v1934_v51 = vld [vmem:[#allocation6 + $0xd0] sm:$0xff] }
 0x64f   :  { %11686 = vpow2.f32 %v8478_v34  ;;  %15405 = vst [vmem:[#allocation27_spill] sm:$0xff] %v12903_v13  ;;  %vm121_vm0 = vcmp.gt.s32.totalorder %v12344_v11, %v12903_v13 }
 0x650   :  { %11688 = vpow2.f32 %v8479_v9 }
 0x659   :  { %v11687_v37 = vpop.eup %11686 }
 0x65a   :  { %v1530_v25 = vadd.f32 1.0, %v11687_v37  ;;  %v11689_v41 = vpop.eup %11688  ;;  %v1912_v37 = vld [vmem:[#allocation6 + $0x20] sm:$0xff] }
 0x65b   :  { %v1531_v12 = vadd.f32 1.0, %v11689_v41  ;;  %v1908_v41 = vld [vmem:[#allocation6] sm:$0xff] }
 0x65c   :  { %11690 = vrcp.f32 %v1530_v25 }
 0x65d   :  { %11692 = vrcp.f32 %v1531_v12  ;;  %v1911_v12 = vld [vmem:[#allocation6 + $0x18] sm:$0xff] }
 0x666   :  { %v11691_v35 = vpop.eup %11690 }
 0x667   :  { %v1536_v33 = vmul.f32 %v11691_v35, %v1519_v45  ;;  %v11693_v1 = vpop.eup %11692  ;;  %v1910_v45 = vld [vmem:[#allocation6 + $0x10] sm:$0xff]  ;;  %v10457_v35 = vpack.c.bf16 %v1911_v12, %v1908_v41  ;;  %v1941_v12 = vld [vmem:[#allocation6 + $0x108] sm:$0xff] }
 0x668   :  { %v1539_v21 = vsub.f32 1.0, %v11693_v1  ;;  %v1541_v18 = vmul.f32 %v11693_v1, %v12796_v27  ;;  %v1918_v1 = vld [vmem:[#allocation6 + $0x50] sm:$0xff] }
 0x669   :  { %v1537_v22 = vadd.f32 %v1536_v33, %v15401_v62  ;;  %v1913_v33 = vld [vmem:[#allocation6 + $0x28] sm:$0xff] }
 0x66a   :  { %v10479_v62 = vpack.c.bf16 %v1913_v33, %v1910_v45  ;;  %v1940_v45 = vld [vmem:[#allocation6 + $0x100] sm:$0xff] }
 0x66b   :  { %11694 = vtanh.f32 %v1537_v22  ;;  %v1915_v22 = vld [vmem:[#allocation6 + $0x38] sm:$0xff] }
 0x675   :  { %v11695_v19 = vpop.eup %11694 }
 0x676   :  { %v1540_v7 = vmul.f32 %v11695_v19, %v1539_v21  ;;  %v10459_v21 = vpack.c.bf16 %v1918_v1, %v1915_v22  ;;  %v1914_v19 = vld [vmem:[#allocation6 + $0x30] sm:$0xff]  ;;  %v2230_v22 = vld [vmem:[#allocation8 + $0x128] sm:$0xff]  ;;  %v2233_v1 = vld [vmem:[#allocation8 + $0x140] sm:$0xff] }
 0x678   :  { %v1542_v29 = vadd.f32 %v1541_v18, %v1540_v7  ;;  %v1916_v7 = vld [vmem:[#allocation6 + $0x40] sm:$0xff]  ;;  %v10461_v18 = vpack.c.bf16 %v1917_v24, %v1914_v19 }
 0x67a   :  { %v1543_v36 = vsel %vm119_vm15, %v1542_v29, %v12796_v27  ;;  %v1919_v29 = vld [vmem:[#allocation6 + $0x58] sm:$0xff] }
 0x67b   :  { %1544 = vst.msk [vmem:[#allocation3 + $0x28] sm:$0xff] %vm657_vm9, %v1543_v36  ;;  %8480 = vmatmul.mubr.msk.f32.vlgmr.msra.gmra.mrb[24].mxu1 %vm490_vm8, %v1543_v36  ;;  %9334 = vmatmul.mubr.msk.f32.vlgmr.msra.gmra.mrb[24].mxu0 %vm490_vm8, %v1543_v36 }
 0x67c   :  { %1545 = vst.msk [vmem:[#allocation3 + $0x10] sm:$0xff] %vm659_vm10, %v1543_v36  ;;  %10416 = vmatpush1.bf16.msra.mxu1 %v12214_v17  ;;  %10439 = vmatpush3.bf16.msra.mxu0 %v12222_v26 }
 0x67d   :  { %10418 = vmatprep.subr.bf16.mxu1 %v12220_v20  ;;  %10440 = vmatprep.subr.bf16.mxu0 %v15388_v63 }
 0x67e   :  { %1799 = vmatprep.mubr.f32.mxu1 %v15389_v4  ;;  %9360 = vmatprep.mubr.msk.f32.mxu0 %vm12085_vm2, %v15389_v4 }
 0x680   :  { %10420 = vmatpush1.bf16.msra.mxu1 %v12231_v28  ;;  %10442 = vmatpush3.bf16.msra.mxu0 %v12257_v44  ;;  %v15403_v44 = vsel %vm12379_vm5, %v12371_v32, %v12385_v46  ;;  %v15404_v32 = vsel %vm12437_vm6, %v12486_v23, %v12423_v5  ;;  %v1909_v23 = vld [vmem:[#allocation6 + $0x8] sm:$0xff] }
 0x681   :  { %10422 = vmatprep.subr.bf16.mxu1 %v12237_v31  ;;  %10443 = vmatprep.subr.bf16.mxu0 %v15388_v63  ;;  %v10455_v25 = vpack.c.bf16 %v1912_v37, %v1909_v23  ;;  %v1939_v23 = vld [vmem:[#allocation6 + $0xf8] sm:$0xff]  ;;  %v1942_v37 = vld [vmem:[#allocation6 + $0x110] sm:$0xff] }
 0x682   :  { %v10475_v41 = vpack.c.bf16 %v1942_v37, %v1939_v23  ;;  %v2235_v37 = vld [vmem:[#allocation8 + $0x150] sm:$0xff] }
 0x684   :  { %10424 = vmatpush1.bf16.msra.mxu1 %v12251_v39  ;;  %10445 = vmatpush3.bf16.msra.mxu0 %v12271_v53 }
 0x685   :  { %10426 = vmatprep.subr.bf16.mxu1 %v12254_v40  ;;  %10446 = vmatprep.subr.bf16.mxu0 %v15388_v63 }
 0x688   :  { %10428 = vmatpush1.bf16.msra.mxu1 %v12265_v48  ;;  %10448 = vmatpush3.bf16.msra.mxu0 %v12286_v61 }
 0x689   :  { %10430 = vmatprep.subr.bf16.mxu1 %v12268_v49  ;;  %10449 = vmatprep.subr.bf16.mxu0 %v15388_v63 }
 0x68c   :  { %10432 = vmatpush1.bf16.msra.mxu1 %v12279_v57  ;;  %10451 = vmatpush3.bf16.msra.mxu0 %v12296_v3 }
 0x68d   :  { %10434 = vmatprep.subr.bf16.mxu1 %v12283_v58  ;;  %10452 = vmatprep.subr.bf16.mxu0 %v15388_v63 }
 0x690   :  { %10436 = vmatpush1.bf16.msra.mxu1 %v12292_v2  ;;  %10454 = vmatpush3.bf16.msra.mxu0 %v12301_v6 }
 0x691   :  { %10456 = vmatprep.subr.bf16.mxu1 %v10455_v25  ;;  %10480 = vmatprep.subr.bf16.mxu0 %v10479_v62  ;;  %v1938_v25 = vld [vmem:[#allocation6 + $0xf0] sm:$0xff] }
 0x692   :  { %v10477_v33 = vpack.c.bf16 %v1941_v12, %v1938_v25  ;;  %v2238_v12 = vld [vmem:[#allocation8 + $0x168] sm:$0xff] }
 0x74e   :  { %v1624_v17 = vpop.f32.mrb[24].mxu1  ;;  %v1695_v20 = vpop.f32.mrb[24].mxu0 }
 0x74f   :  { %v1625_v26 = vadd.f32 %v1624_v17, %v12527_v42  ;;  %v1626_v28 = vpop.f32.mrb[25].mxu1  ;;  %v9335_v31 = vpop.f32.mrb[25].mxu0  ;;  %v1696_v3 = vadd.f32 %v1695_v20, %v12536_v15  ;;  %v1921_v17 = vld [vmem:[#allocation6 + $0x68] sm:$0xff]  ;;  %v1924_v20 = vld [vmem:[#allocation6 + $0x80] sm:$0xff] }
 0x750   :  { %v1627_v39 = vadd.f32 %v1626_v28, %v12530_v56  ;;  %v1920_v28 = vld [vmem:[#allocation6 + $0x60] sm:$0xff]  ;;  %v1923_v31 = vld [vmem:[#allocation6 + $0x78] sm:$0xff] }
 0x751   :  { %v1699_v40 = vadd.f32 %v1625_v26, %v12401_v54  ;;  %v10463_v26 = vpack.c.bf16 %v1924_v20, %v1921_v17  ;;  %v15406_v20 = vld [vmem:[#allocation20_spill] sm:$0xff] }
 0x752   :  { %v1700_v48 = vadd.f32 %v1627_v39, %v15403_v44  ;;  %v1922_v39 = vld [vmem:[#allocation6 + $0x70] sm:$0xff]  ;;  %v1925_v44 = vld [vmem:[#allocation6 + $0x88] sm:$0xff] }
 0x753   :  { %v8482_v49 = vmul.f32 -1.442695, %v1699_v40  ;;  %v10465_v40 = vpack.c.bf16 %v1923_v31, %v1920_v28 }
 0x754   :  { %v8483_v53 = vmul.f32 -1.442695, %v1700_v48  ;;  %v10487_v48 = vpack.c.bf16 %v1925_v44, %v1922_v39 }
 0x755   :  { %11696 = vpow2.f32 %v8482_v49  ;;  %v1927_v49 = vld [vmem:[#allocation6 + $0x98] sm:$0xff] }
 0x756   :  { %11698 = vpow2.f32 %v8483_v53  ;;  %v1930_v53 = vld [vmem:[#allocation6 + $0xb0] sm:$0xff] }
 0x75f   :  { %v11697_v57 = vpop.eup %11696 }
 0x760   :  { %v1707_v58 = vadd.f32 1.0, %v11697_v57  ;;  %v11699_v61 = vpop.eup %11698  ;;  %v10467_v57 = vpack.c.bf16 %v1930_v53, %v1927_v49 }
 0x761   :  { %v1708_v2 = vadd.f32 1.0, %v11699_v61  ;;  %v1929_v61 = vld [vmem:[#allocation6 + $0xa8] sm:$0xff] }
 0x762   :  { %11700 = vrcp.f32 %v1707_v58  ;;  %v1926_v58 = vld [vmem:[#allocation6 + $0x90] sm:$0xff] }
 0x763   :  { %11702 = vrcp.f32 %v1708_v2  ;;  %v1928_v2 = vld [vmem:[#allocation6 + $0xa0] sm:$0xff] }
 0x76c   :  { %v11701_v6 = vpop.eup %11700 }
 0x76d   :  { %v1713_v50 = vmul.f32 %v11701_v6, %v1696_v3  ;;  %v11703_v54 = vpop.eup %11702  ;;  %v10469_v3 = vpack.c.bf16 %v1929_v61, %v1926_v58  ;;  %v1931_v6 = vld [vmem:[#allocation6 + $0xb8] sm:$0xff] }
 0x76e   :  { %v1716_v27 = vsub.f32 1.0, %v11703_v54  ;;  %v1718_v34 = vmul.f32 %v11703_v54, %v1543_v36 }
 0x76f   :  { %v1714_v46 = vadd.f32 %v1713_v50, %v15404_v32  ;;  %v10491_v50 = vpack.c.bf16 %v1931_v6, %v1928_v2  ;;  %v1933_v32 = vld [vmem:[#allocation6 + $0xc8] sm:$0xff] }
 0x771   :  { %11704 = vtanh.f32 %v1714_v46  ;;  %v1936_v46 = vld [vmem:[#allocation6 + $0xe0] sm:$0xff] }
 0x772   :  { %v10471_v54 = vpack.c.bf16 %v1936_v46, %v1933_v32 }
 0x77b   :  { %v11705_v14 = vpop.eup %11704 }
 0x77c   :  { %v1717_v0 = vmul.f32 %v11705_v14, %v1716_v27  ;;  %v1932_v27 = vld [vmem:[#allocation6 + $0xc0] sm:$0xff]  ;;  %v1935_v14 = vld [vmem:[#allocation6 + $0xd8] sm:$0xff] }
 0x77e   :  { %v1719_v9 = vadd.f32 %v1718_v34, %v1717_v0  ;;  %v10473_v0 = vpack.c.bf16 %v1935_v14, %v1932_v27  ;;  %v1937_v34 = vld [vmem:[#allocation6 + $0xe8] sm:$0xff]  ;;  %v2232_v27 = vld [vmem:[#allocation8 + $0x138] sm:$0xff] }
 0x77f   :  { %v2236_v14 = vld [vmem:[#allocation8 + $0x158] sm:$0xff] }
 0x780   :  { %v12910_v5 = vsel %vm121_vm0, %v1719_v9, %v1543_v36  ;;  %v10483_v36 = vpack.c.bf16 %v1919_v29, %v1916_v7  ;;  %v10495_v9 = vpack.c.bf16 %v1937_v34, %v1934_v51  ;;  %v2239_v51 = vld [vmem:[#allocation8 + $0x170] sm:$0xff]  ;;  %v2234_v34 = vld [vmem:[#allocation8 + $0x148] sm:$0xff] }
 0x781   :  { %1721 = vst.msk [vmem:[#allocation3 + $0x30] sm:$0xff] %vm657_vm9, %v12910_v5  ;;  %8484 = vmatmul.mubr.msk.f32.vlgmr.msra.gmra.mrb[26].mxu1 %vm490_vm8, %v12910_v5  ;;  %9361 = vmatmul.mubr.msk.f32.vlgmr.msra.gmra.mrb[26].mxu0 %vm490_vm8, %v12910_v5 }
 0x782   :  { %1722 = vst.msk [vmem:[#allocation3 + $0x8] sm:$0xff] %vm659_vm10, %v12910_v5  ;;  %2050 = vmatprep.mubr.f32.mxu1 %v15389_v4  ;;  %10458 = vmatpush1.bf16.msra.mxu1 %v10457_v35  ;;  %v1943_v35 = vld [vmem:[#allocation6 + $0x118] sm:$0xff] }
 0x783   :  { %10482 = vmatpush3.bf16.msra.mxu0 %v10479_v62  ;;  %10460 = vmatprep.subr.bf16.mxu1 %v10459_v21  ;;  %v10499_v62 = vpack.c.bf16 %v1943_v35, %v1940_v45  ;;  %v12922_v21 = vpack.c.bf16 %v2233_v1, %v2230_v22  ;;  %v2242_v45 = vld [vmem:[#allocation8 + $0x188] sm:$0xff]  ;;  %v2245_v35 = vld [vmem:[#allocation8 + $0x1a0] sm:$0xff]  ;;  %v1902_v22 = vld [vmem:[#allocation3 + $0x10] sm:$0xff] }
 0x784   :  { %10484 = vmatprep.subr.bf16.mxu0 %v10483_v36  ;;  %v1903_v1 = vld [vmem:[#allocation3 + $0x18] sm:$0xff] }
 0x786   :  { %10462 = vmatpush1.bf16.msra.mxu1 %v10461_v18 }
 0x787   :  { %10486 = vmatpush3.bf16.msra.mxu0 %v10483_v36  ;;  %10464 = vmatprep.subr.bf16.mxu1 %v10463_v26  ;;  %v15407_v26 = vsel %vm12379_vm5, %v12388_v47, %v15406_v20  ;;  %v2243_v20 = vld [vmem:[#allocation8 + $0x190] sm:$0xff] }
 0x788   :  { %10488 = vmatprep.subr.bf16.mxu0 %v10487_v48 }
 0x78a   :  { %10466 = vmatpush1.bf16.msra.mxu1 %v10465_v40 }
 0x78b   :  { %10490 = vmatpush3.bf16.msra.mxu0 %v10487_v48  ;;  %10468 = vmatprep.subr.bf16.mxu1 %v10467_v57  ;;  %v15409_v57 = vld [vmem:[#allocation21_spill] sm:$0xff] }
 0x78c   :  { %10492 = vmatprep.subr.bf16.mxu0 %v10491_v50 }
 0x78e   :  { %10470 = vmatpush1.bf16.msra.mxu1 %v10469_v3 }
 0x78f   :  { %10494 = vmatpush3.bf16.msra.mxu0 %v10491_v50  ;;  %10472 = vmatprep.subr.bf16.mxu1 %v10471_v54  ;;  %v2229_v54 = vld [vmem:[#allocation8 + $0x120] sm:$0xff] }
 0x790   :  { %10496 = vmatprep.subr.bf16.mxu0 %v10495_v9  ;;  %v12946_v23 = vpack.c.bf16 %v2232_v27, %v2229_v54  ;;  %v2258_v54 = vld [vmem:[#allocation8 + $0x208] sm:$0xff] }
 0x792   :  { %10474 = vmatpush1.bf16.msra.mxu1 %v10473_v0  ;;  %v2231_v0 = vld [vmem:[#allocation8 + $0x130] sm:$0xff] }
 0x793   :  { %10498 = vmatpush3.bf16.msra.mxu0 %v10495_v9  ;;  %10476 = vmatprep.subr.bf16.mxu1 %v10475_v41  ;;  %v1901_v9 = vld [vmem:[#allocation3 + $0x8] sm:$0xff]  ;;  %v12948_v41 = vpack.c.bf16 %v2239_v51, %v2236_v14  ;;  %v2259_v51 = vld [vmem:[#allocation8 + $0x210] sm:$0xff] }
 0x794   :  { %10500 = vmatprep.subr.bf16.mxu0 %v10499_v62 }
 0x796   :  { %10478 = vmatpush1.bf16.msra.mxu1 %v10477_v33  ;;  %v2237_v33 = vld [vmem:[#allocation8 + $0x160] sm:$0xff] }
 0x797   :  { %10527 = vmatprep.subr.bf16.mxu1 %v15388_v63  ;;  %10502 = vmatpush3.bf16.msra.mxu0 %v10499_v62  ;;  %v2240_v62 = vld [vmem:[#allocation8 + $0x178] sm:$0xff] }
 0x798   :  { %10504 = vmatprep.subr.bf16.mxu0 %v12922_v21 }
 0x854   :  { %v1801_v19 = vpop.f32.mrb[26].mxu1  ;;  %v1872_v24 = vpop.f32.mrb[26].mxu0 }
 0x855   :  { %v1802_v7 = vadd.f32 %v1801_v19, %v12527_v42  ;;  %v1803_v18 = vpop.f32.mrb[27].mxu1  ;;  %v9362_v29 = vpop.f32.mrb[27].mxu0  ;;  %v1873_v49 = vadd.f32 %v1872_v24, %v12536_v15  ;;  %v12958_v19 = vpack.c.bf16 %v2238_v12, %v2235_v37  ;;  %v12961_v24 = vpack.c.bf16 %v2245_v35, %v2242_v45  ;;  %v2264_v37 = vld [vmem:[#allocation8 + $0x238] sm:$0xff]  ;;  %v8488_v45 = vld [vmem:[%s15324_s5 + $0x3] sm:$0x7] }
 0x856   :  { %v1804_v36 = vadd.f32 %v1803_v18, %v12530_v56  ;;  %v2244_v18 = vld [vmem:[#allocation8 + $0x198] sm:$0xff]  ;;  %v1958_v35 = vrot.slane %v8488_v45, %v12368_v30 }
 0x857   :  { %v1876_v17 = vadd.f32 %v1802_v7, %v12405_v55  ;;  %v15408_v55 = vld [vmem:[#allocation22_spill] sm:$0xff]  ;;  %v2241_v7 = vld [vmem:[#allocation8 + $0x180] sm:$0xff] }
 0x858   :  { %v1877_v28 = vadd.f32 %v1804_v36, %v15407_v26  ;;  %v15410_v47 = vsel %vm12437_vm6, %v15408_v55, %v15409_v57  ;;  %v2248_v29 = vld [vmem:[#allocation8 + $0x1b8] sm:$0xff]  ;;  %v12964_v36 = vpack.c.bf16 %v2240_v62, %v2237_v33  ;;  %v2246_v26 = vld [vmem:[#allocation8 + $0x1a8] sm:$0xff]  ;;  %v1906_v57 = vld [vmem:[#allocation3 + $0x30] sm:$0xff] }
 0x859   :  { %v8486_v31 = vmul.f32 -1.442695, %v1876_v17  ;;  %v2251_v17 = vld [vmem:[#allocation8 + $0x1d0] sm:$0xff]  ;;  %v2252_v55 = vld [vmem:[#allocation8 + $0x1d8] sm:$0xff] }
 0x85a   :  { %v8487_v39 = vmul.f32 -1.442695, %v1877_v28  ;;  %v1904_v28 = vld [vmem:[#allocation3 + $0x20] sm:$0xff] }
 0x85b   :  { %11706 = vpow2.f32 %v8486_v31  ;;  %v1905_v31 = vld [vmem:[#allocation3 + $0x28] sm:$0xff] }
 0x85c   :  { %11708 = vpow2.f32 %v8487_v39  ;;  %v12972_v39 = vpack.c.bf16 %v2244_v18, %v2241_v7  ;;  %v15412_v18 = vld [vmem:[#allocation18_spill] sm:$0xff] }
 0x865   :  { %v11707_v40 = vpop.eup %11706 }
 0x866   :  { %v1884_v44 = vadd.f32 1.0, %v11707_v40  ;;  %v11709_v42 = vpop.eup %11708  ;;  %v12975_v40 = vpack.c.bf16 %v2251_v17, %v2248_v29  ;;  %v13070_v29 = vrot.slane %v8488_v45, %v15412_v18  ;;  %v15413_v17 = vld [vmem:[#allocation19_spill] sm:$0xff] }
 0x867   :  { %v1885_v48 = vadd.f32 1.0, %v11709_v42  ;;  %v2250_v42 = vld [vmem:[#allocation8 + $0x1c8] sm:$0xff] }
 0x868   :  { %11710 = vrcp.f32 %v1884_v44  ;;  %v2247_v44 = vld [vmem:[#allocation8 + $0x1b0] sm:$0xff] }
 0x869   :  { %11712 = vrcp.f32 %v1885_v48  ;;  %v2254_v48 = vld [vmem:[#allocation8 + $0x1e8] sm:$0xff] }
 0x872   :  { %v11711_v56 = vpop.eup %11710 }
 0x873   :  { %v1890_v53 = vmul.f32 %v11711_v56, %v1873_v49  ;;  %v11713_v61 = vpop.eup %11712  ;;  %v12978_v49 = vpack.c.bf16 %v2246_v26, %v2243_v20  ;;  %v2257_v56 = vld [vmem:[#allocation8 + $0x200] sm:$0xff]  ;;  %v13073_v20 = vrot.slane %v8488_v45, %v15413_v17 }
 0x874   :  { %v1893_v2 = vsub.f32 1.0, %v11713_v61  ;;  %v1895_v50 = vmul.f32 %v11713_v61, %v12910_v5  ;;  %v12989_v61 = vpack.c.bf16 %v2257_v56, %v2254_v48 }
 0x875   :  { %v1891_v58 = vadd.f32 %v1890_v53, %v15410_v47  ;;  %v2249_v53 = vld [vmem:[#allocation8 + $0x1c0] sm:$0xff]  ;;  %v12986_v47 = vpack.c.bf16 %v2250_v42, %v2247_v44 }
 0x877   :  { %11714 = vtanh.f32 %v1891_v58  ;;  %v2253_v58 = vld [vmem:[#allocation8 + $0x1e0] sm:$0xff] }
 0x881   :  { %v11715_v3 = vpop.eup %11714 }
 0x882   :  { %v1894_v6 = vmul.f32 %v11715_v3, %v1893_v2  ;;  %v2256_v2 = vld [vmem:[#allocation8 + $0x1f8] sm:$0xff] }
 0x883   :  { %v2260_v3 = vld [vmem:[#allocation8 + $0x218] sm:$0xff]  ;;  %v12999_v27 = vpack.c.bf16 %v2256_v2, %v2253_v58 }
 0x884   :  { %v1896_v32 = vadd.f32 %v1895_v50, %v1894_v6  ;;  %v2263_v6 = vld [vmem:[#allocation8 + $0x230] sm:$0xff]  ;;  %v12992_v50 = vpack.c.bf16 %v2252_v55, %v2249_v53 }
 0x885   :  { %v13003_v14 = vpack.c.bf16 %v2263_v6, %v2260_v3 }
 0x886   :  { %v1897_v46 = vsel %vm123_vm4, %v1896_v32, %v12910_v5  ;;  %v12950_v5 = vpack.c.bf16 %v2234_v34, %v2231_v0  ;;  %v2262_v0 = vld [vmem:[#allocation8 + $0x228] sm:$0xff] }
 0x887   :  { %1898 = vst.msk [vmem:[#allocation3 + $0x38] sm:$0xff] %vm657_vm9, %v1897_v46 }
 0x888   :  { %1899 = vst.msk [vmem:[#allocation3] sm:$0xff] %vm659_vm10, %v1897_v46  ;;  %v2255_v46 = vld [vmem:[#allocation8 + $0x1f0] sm:$0xff] }
 0x889   :  { %v13006_v34 = vpack.c.bf16 %v2258_v54, %v2255_v46  ;;  %v8505_v54 = vld [vmem:[%s15325_s6 + $0x3] sm:$0x7] }
 0x88e   :  { %v1907_v32 = vld [vmem:[#allocation3 + $0x38] sm:$0xff] }
 0x88f   :  { %v1900_v25 = vld [vmem:[#allocation3] sm:$0xff] }
 0x890   :  { %8489 = vmatmul.mubr.msk.f32.vlgmr.msra.gmra.mrb[28].mxu1 %vm490_vm8, %v1900_v25  ;;  %9387 = vmatprep.mubr.msk.f32.mxu0 %vm490_vm8, %v1900_v25  ;;  %v13012_v25 = vpack.c.bf16 %v2262_v0, %v2259_v51 }
 0x891   :  { %9388 = vmatmul.mubr.msk.f32.vlgmr.msra.gmra.mrb[28].mxu0 %vm490_vm8, %v1901_v9  ;;  %2056 = vmatprep.mubr.f32.mxu1 %v15389_v4 }
 0x892   :  { %9390 = vmatprep.mubr.msk.f32.mxu0 %vm490_vm8, %v1902_v22  ;;  %10506 = vmatpush1.bf16.msra.mxu0 %v12946_v23 }
 0x893   :  { %10508 = vmatprep.subr.bf16.mxu0 %v12948_v41  ;;  %10529 = vmatpush3.bf16.msra.mxu1 %v12950_v5 }
 0x894   :  { %8490 = vmatmul.mubr.msk.f32.gmra.mrb[30].mxu1 %vm490_vm8, %v1901_v9  ;;  %10530 = vmatprep.subr.bf16.mxu1 %v15388_v63  ;;  %v2261_v9 = vld [vmem:[#allocation8 + $0x220] sm:$0xff] }
 0x895   :  { %9391 = vmatmul.mubr.msk.f32.gmra.mrb[30].mxu0 %vm490_vm8, %v1903_v1  ;;  %2062 = vmatprep.mubr.f32.mxu1 %v15389_v4  ;;  %v13016_v12 = vpack.c.bf16 %v2264_v37, %v2261_v9 }
 0x896   :  { %9393 = vmatprep.mubr.msk.f32.mxu0 %vm490_vm8, %v1904_v28  ;;  %10510 = vmatpush1.bf16.msra.mxu0 %v12958_v19 }
 0x897   :  { %10512 = vmatprep.subr.bf16.mxu0 %v12961_v24  ;;  %10532 = vmatpush3.bf16.msra.mxu1 %v12964_v36 }
 0x898   :  { %8491 = vmatmul.mubr.msk.f32.gmra.mrb[32].mxu1 %vm490_vm8, %v1902_v22  ;;  %10533 = vmatprep.subr.bf16.mxu1 %v15388_v63 }
 0x899   :  { %9394 = vmatmul.mubr.msk.f32.gmra.mrb[32].mxu0 %vm490_vm8, %v1905_v31  ;;  %2068 = vmatprep.mubr.f32.mxu1 %v15389_v4 }
 0x89a   :  { %9396 = vmatprep.mubr.msk.f32.mxu0 %vm490_vm8, %v1906_v57  ;;  %10514 = vmatpush1.bf16.msra.mxu0 %v12972_v39 }
 0x89b   :  { %10516 = vmatprep.subr.bf16.mxu0 %v12975_v40  ;;  %10535 = vmatpush3.bf16.msra.mxu1 %v12978_v49 }
 0x89c   :  { %8492 = vmatmul.mubr.msk.f32.gmra.mrb[34].mxu1 %vm490_vm8, %v1903_v1  ;;  %10536 = vmatprep.subr.bf16.mxu1 %v15388_v63 }
 0x89d   :  { %9397 = vmatmul.mubr.msk.f32.gmra.mrb[34].mxu0 %vm490_vm8, %v1907_v32  ;;  %2074 = vmatprep.mubr.f32.mxu1 %v15389_v4 }
 0x89e   :  { %10518 = vmatpush1.bf16.msra.mxu0 %v12986_v47  ;;  %2356 = vmatprep.mubr.f32.mxu0 %v15389_v4 }
 0x89f   :  { %10520 = vmatprep.subr.bf16.mxu0 %v12989_v61  ;;  %10538 = vmatpush3.bf16.msra.mxu1 %v12992_v50 }
 0x8a0   :  { %8493 = vmatmul.mubr.msk.f32.gmra.mrb[36].mxu1 %vm490_vm8, %v1904_v28  ;;  %10539 = vmatprep.subr.bf16.mxu1 %v15388_v63 }
 0x8a1   :  { %2080 = vmatprep.mubr.f32.mxu1 %v15389_v4 }
 0x8a2   :  { %10522 = vmatpush1.bf16.msra.mxu0 %v12999_v27 }
 0x8a3   :  { %10524 = vmatprep.subr.bf16.mxu0 %v13003_v14  ;;  %10541 = vmatpush3.bf16.msra.mxu1 %v13006_v34 }
 0x8a4   :  { %8494 = vmatmul.mubr.msk.f32.gmra.mrb[38].mxu1 %vm490_vm8, %v1905_v31  ;;  %10542 = vmatprep.subr.bf16.mxu1 %v15388_v63 }
 0x8a5   :  { %2086 = vmatprep.mubr.f32.mxu1 %v15389_v4 }
 0x8a6   :  { %10526 = vmatpush1.bf16.msra.mxu0 %v13012_v25 }
 0x8a7   :  { %10544 = vmatpush3.bf16.msra.mxu1 %v13016_v12  ;;  %10546 = vmatprep.subr.bf16.mxu0 %v12922_v21 }
 0x8a8   :  { %8495 = vmatmul.mubr.msk.f32.gmra.mrb[40].mxu1 %vm490_vm8, %v1906_v57  ;;  %10569 = vmatprep.subr.bf16.mxu1 %v15388_v63 }
 0x8a9   :  { %2092 = vmatprep.mubr.f32.mxu1 %v15389_v4  ;;  %2357 = vmatmul.mubr.f32.vlgmr.msra.gmra.mrb[36].mxu0 %v15389_v4 }
 0x8aa   :  { %10548 = vmatpush1.bf16.msra.mxu0 %v12946_v23  ;;  %2533 = vmatprep.mubr.f32.mxu0 %v15389_v4 }
 0x8ab   :  { %10550 = vmatprep.subr.bf16.mxu0 %v12948_v41 }
 0x8ac   :  { %8496 = vmatmul.mubr.msk.f32.gmra.mrb[42].mxu1 %vm490_vm8, %v1907_v32 }
 0x8ad   :  { %9423 = vmatprep.mubr.msk.f32.mxu1 %vm12085_vm2, %v15389_v4 }
 0x8ae   :  { %10552 = vmatpush1.bf16.msra.mxu0 %v12958_v19 }
 0x8af   :  { %10554 = vmatprep.subr.bf16.mxu0 %v12961_v24 }
 0x8b0   :  { %9424 = vmatmul.mubr.f32.vlgmr.msra.gmra.mrb[44].mxu1 %v15389_v4 }
 0x8b1   :  { %10571 = vmatpush3.bf16.msra.mxu1 %v12950_v5  ;;  %9450 = vmatprep.mubr.msk.f32.mxu1 %vm12085_vm2, %v15389_v4 }
 0x8b2   :  { %10572 = vmatprep.subr.bf16.mxu1 %v15388_v63  ;;  %10556 = vmatpush1.bf16.msra.mxu0 %v12972_v39 }
 0x8b3   :  { %10558 = vmatprep.subr.bf16.mxu0 %v12975_v40 }
 0x8b5   :  { %10574 = vmatpush3.bf16.msra.mxu1 %v12964_v36 }
 0x8b6   :  { %10575 = vmatprep.subr.bf16.mxu1 %v15388_v63  ;;  %10560 = vmatpush1.bf16.msra.mxu0 %v12986_v47 }
 0x8b7   :  { %10562 = vmatprep.subr.bf16.mxu0 %v12989_v61 }
 0x8b9   :  { %10577 = vmatpush3.bf16.msra.mxu1 %v12978_v49 }
 0x8ba   :  { %10578 = vmatprep.subr.bf16.mxu1 %v15388_v63  ;;  %10564 = vmatpush1.bf16.msra.mxu0 %v12999_v27 }
 0x8bb   :  { %10566 = vmatprep.subr.bf16.mxu0 %v13003_v14 }
 0x8bd   :  { %10580 = vmatpush3.bf16.msra.mxu1 %v12992_v50 }
 0x8be   :  { %10581 = vmatprep.subr.bf16.mxu1 %v15388_v63  ;;  %10568 = vmatpush1.bf16.msra.mxu0 %v13012_v25 }
 0x8bf   :  { %10588 = vmatprep.subr.bf16.mxu0 %v12922_v21 }
 0x8c1   :  { %10583 = vmatpush3.bf16.msra.mxu1 %v13006_v34 }
 0x8c2   :  { %10584 = vmatprep.subr.bf16.mxu1 %v15388_v63 }
 0x8c5   :  { %10586 = vmatpush3.bf16.msra.mxu1 %v13016_v12 }
 0x8c6   :  { %10611 = vmatprep.subr.bf16.mxu1 %v15388_v63 }
 0x963   :  { %v13063_v33 = vpop.f32.mrb[28].mxu1 }
 0x964   :  { %v13065_v62 = vpop.f32.mrb[29].mxu1  ;;  %v9389_v22 = vpop.f32.mrb[28].mxu0 }
 0x965   :  { %v13067_v1 = vadd.f32 %v9389_v22, %v1958_v35  ;;  %v2165_v7 = vpop.f32.mrb[29].mxu0 }
 0x967   :  { %v2058_v26 = vpop.f32.mrb[30].mxu1 }
 0x968   :  { %v2059_v28 = vadd.f32 %v2058_v26, %v13070_v29  ;;  %v2060_v31 = vpop.f32.mrb[31].mxu1  ;;  %v9392_v44 = vpop.f32.mrb[30].mxu0 }
 0x969   :  { %v13077_v42 = vadd.f32 %v2060_v31, %v13073_v20  ;;  %v13079_v48 = vadd.f32 %v9392_v44, %v1958_v35  ;;  %v2175_v56 = vpop.f32.mrb[31].mxu0  ;;  %v13108_v31 = vadd.f32 %v2165_v7, %v1958_v35 }
 0x96a   :  { %v13081_v53 = vadd.f32 %v2175_v56, %v1958_v35 }
 0x96b   :  { %v2064_v55 = vpop.f32.mrb[32].mxu1 }
 0x96c   :  { %v2065_v57 = vadd.f32 %v2064_v55, %v13070_v29  ;;  %v2066_v58 = vpop.f32.mrb[33].mxu1  ;;  %v9395_v2 = vpop.f32.mrb[32].mxu0 }
 0x96d   :  { %v13085_v3 = vadd.f32 %v2066_v58, %v13073_v20  ;;  %v13087_v6 = vadd.f32 %v9395_v2, %v1958_v35  ;;  %v2185_v32 = vpop.f32.mrb[33].mxu0 }
 0x96e   :  { %v13089_v46 = vadd.f32 %v2185_v32, %v1958_v35 }
 0x96f   :  { %v2070_v0 = vpop.f32.mrb[34].mxu1 }
 0x970   :  { %15414 = vst [vmem:[#allocation20_spill] sm:$0xff] %v13089_v46  ;;  %v2071_v45 = vadd.f32 %v2070_v0, %v13070_v29  ;;  %v2072_v22 = vpop.f32.mrb[35].mxu1  ;;  %v9398_v26 = vpop.f32.mrb[34].mxu0 }
 0x971   :  { %v13111_v44 = vadd.f32 %v2072_v22, %v13073_v20  ;;  %v13113_v56 = vadd.f32 %v9398_v26, %v1958_v35  ;;  %v2195_v55 = vpop.f32.mrb[35].mxu0 }
 0x972   :  { %v13115_v58 = vadd.f32 %v2195_v55, %v1958_v35 }
 0x973   :  { %v2076_v7 = vpop.f32.mrb[36].mxu1 }
 0x974   :  { %v2077_v22 = vadd.f32 %v2076_v7, %v13070_v29  ;;  %v2078_v26 = vpop.f32.mrb[37].mxu1  ;;  %v13169_v7 = vrot.slane %v8505_v54, %v15412_v18 }
 0x975   :  { %v13135_v55 = vadd.f32 %v2078_v26, %v13073_v20 }
 0x976   :  { %v13139_v32 = vsel %vm102_vm3, %v2071_v45, %v2077_v22  ;;  %v13143_v51 = vsel %vm102_vm3, %v2077_v22, %v2071_v45 }
 0x977   :  { %15415 = vst [vmem:[#allocation22_spill] sm:$0xff] %v13143_v51  ;;  %v2082_v37 = vpop.f32.mrb[38].mxu1 }
 0x978   :  { %v2083_v26 = vadd.f32 %v2082_v37, %v13070_v29  ;;  %v2084_v9 = vpop.f32.mrb[39].mxu1 }
 0x979   :  { %v13158_v45 = vadd.f32 %v2084_v9, %v13073_v20 }
 0x97a   :  { %v13162_v22 = vsel %vm102_vm3, %v2065_v57, %v2083_v26  ;;  %v13166_v35 = vsel %vm102_vm3, %v2083_v26, %v2065_v57  ;;  %v13181_v57 = vrot.slane %v8505_v54, %v15413_v17 }
 0x97b   :  { %15416 = vst [vmem:[#allocation21_spill] sm:$0xff] %v13166_v35  ;;  %v2088_v0 = vpop.f32.mrb[40].mxu1  ;;  %v2053_v35 = vadd.f32 %v13063_v33, %v13070_v29 }
 0x97c   :  { %v2089_v2 = vadd.f32 %v2088_v0, %v13070_v29  ;;  %v2090_v15 = vpop.f32.mrb[41].mxu1  ;;  %v2358_v13 = vpop.f32.mrb[36].mxu0 }
 0x97d   :  { %v13184_v26 = vadd.f32 %v2090_v15, %v13073_v20  ;;  %v2360_v18 = vpop.f32.mrb[37].mxu0  ;;  %v2359_v0 = vadd.f32 %v2358_v13, %v13169_v7  ;;  %v13209_v13 = vadd.f32 %v13065_v62, %v13073_v20 }
 0x97e   :  { %v13188_v16 = vsel %vm102_vm3, %v2059_v28, %v2089_v2  ;;  %v13192_v37 = vsel %vm102_vm3, %v2089_v2, %v2059_v28  ;;  %v2361_v2 = vadd.f32 %v2360_v18, %v13181_v57 }
 0x97f   :  { %15417 = vst [vmem:[#allocation28_spill] sm:$0xff] %v13192_v37  ;;  %v2094_v9 = vpop.f32.mrb[42].mxu1 }
 0x980   :  { %v2095_v60 = vadd.f32 %v2094_v9, %v13070_v29  ;;  %v2096_v28 = vpop.f32.mrb[43].mxu1 }
 0x981   :  { %v13212_v37 = vadd.f32 %v2096_v28, %v13073_v20 }
 0x982   :  { %v2273_v17 = vsel %vm102_vm3, %v2053_v35, %v2095_v60  ;;  %v13218_v15 = vsel %vm102_vm3, %v2095_v60, %v2053_v35 }
 0x983   :  { %15418 = vst [vmem:[#allocation29_spill] sm:$0xff] %v13218_v15  ;;  %v2433_v33 = vadd.f32 %v2359_v0, %v2273_v17  ;;  %v2274_v18 = vsel %vm12379_vm5, %v13209_v13, %v13212_v37  ;;  %v2429_v29 = vpop.f32.mrb[44].mxu1  ;;  %v13229_v17 = vrot.slane %v8505_v54, %v12368_v30 }
 0x984   :  { %v2434_v20 = vadd.f32 %v2361_v2, %v2274_v18  ;;  %v9425_v9 = vpop.f32.mrb[45].mxu1  ;;  %v15419_v2 = vsel %vm12437_vm6, %v13108_v31, %v13113_v56 }
 0x985   :  { %v8506_v28 = vmul.f32 -1.442695, %v2433_v33  ;;  %v2430_v15 = vadd.f32 %v2429_v29, %v13229_v17 }
 0x986   :  { %v8507_v51 = vmul.f32 -1.442695, %v2434_v20 }
 0x987   :  { %11716 = vpow2.f32 %v8506_v28 }
 0x988   :  { %11718 = vpow2.f32 %v8507_v51 }
 0x991   :  { %v11717_v60 = vpop.eup %11716 }
 0x992   :  { %v2441_v35 = vadd.f32 1.0, %v11717_v60  ;;  %v11719_v0 = vpop.eup %11718 }
 0x993   :  { %v2442_v8 = vadd.f32 1.0, %v11719_v0 }
 0x994   :  { %11720 = vrcp.f32 %v2441_v35 }
 0x995   :  { %11722 = vrcp.f32 %v2442_v8 }
 0x99e   :  { %v11721_v52 = vpop.eup %11720 }
 0x99f   :  { %v2447_v46 = vmul.f32 %v11721_v52, %v2430_v15  ;;  %v11723_v51 = vpop.eup %11722 }
 0x9a0   :  { %v2450_v18 = vsub.f32 1.0, %v11723_v51  ;;  %v2452_v54 = vmul.f32 0.0, %v11723_v51 }
 0x9a1   :  { %v2448_v33 = vadd.f32 %v2447_v46, %v15419_v2 }
 0x9a3   :  { %11724 = vtanh.f32 %v2448_v33  ;;  %v15421_v33 = vsel %vm12379_vm5, %v13077_v42, %v13184_v26 }
 0x9ad   :  { %v11725_v20 = vpop.eup %11724 }
 0x9ae   :  { %v2451_v9 = vmul.f32 %v11725_v20, %v2450_v18 }
 0x9b0   :  { %v2453_v28 = vadd.f32 %v2452_v54, %v2451_v9 }
 0x9b2   :  { %v2454_v29 = vsel %vm109_vm7, %v2453_v28, 0.0 }
 0x9b3   :  { %2455 = vst.msk [vmem:[#allocation3] sm:$0xff] %vm657_vm9, %v2454_v29  ;;  %8508 = vmatmul.mubr.msk.f32.vlgmr.msra.gmra.mrb[38].mxu0 %vm490_vm8, %v2454_v29  ;;  %9451 = vmatmul.mubr.msk.f32.vlgmr.msra.gmra.mrb[46].mxu1 %vm490_vm8, %v2454_v29 }
 0x9b4   :  { %2456 = vst.msk [vmem:[#allocation3 + $0x38] sm:$0xff] %vm659_vm10, %v2454_v29  ;;  %10590 = vmatpush1.bf16.msra.mxu0 %v12946_v23  ;;  %10613 = vmatpush3.bf16.msra.mxu1 %v12950_v5 }
 0x9b5   :  { %10592 = vmatprep.subr.bf16.mxu0 %v12948_v41  ;;  %10614 = vmatprep.subr.bf16.mxu1 %v15388_v63 }
 0x9b6   :  { %2710 = vmatprep.mubr.f32.mxu0 %v15389_v4  ;;  %9477 = vmatprep.mubr.msk.f32.mxu1 %vm12085_vm2, %v15389_v4 }
 0x9b8   :  { %10594 = vmatpush1.bf16.msra.mxu0 %v12958_v19  ;;  %10616 = vmatpush3.bf16.msra.mxu1 %v12964_v36 }
 0x9b9   :  { %10596 = vmatprep.subr.bf16.mxu0 %v12961_v24  ;;  %10617 = vmatprep.subr.bf16.mxu1 %v15388_v63 }
 0x9bc   :  { %10598 = vmatpush1.bf16.msra.mxu0 %v12972_v39  ;;  %10619 = vmatpush3.bf16.msra.mxu1 %v12978_v49 }
 0x9bd   :  { %10600 = vmatprep.subr.bf16.mxu0 %v12975_v40  ;;  %10620 = vmatprep.subr.bf16.mxu1 %v15388_v63 }
 0x9c0   :  { %10602 = vmatpush1.bf16.msra.mxu0 %v12986_v47  ;;  %10622 = vmatpush3.bf16.msra.mxu1 %v12992_v50 }
 0x9c1   :  { %10604 = vmatprep.subr.bf16.mxu0 %v12989_v61  ;;  %10623 = vmatprep.subr.bf16.mxu1 %v15388_v63 }
 0x9c4   :  { %10606 = vmatpush1.bf16.msra.mxu0 %v12999_v27  ;;  %10625 = vmatpush3.bf16.msra.mxu1 %v13006_v34 }
 0x9c5   :  { %10608 = vmatprep.subr.bf16.mxu0 %v13003_v14  ;;  %10626 = vmatprep.subr.bf16.mxu1 %v15388_v63 }
 0x9c8   :  { %10610 = vmatpush1.bf16.msra.mxu0 %v13012_v25  ;;  %10628 = vmatpush3.bf16.msra.mxu1 %v13016_v12 }
 0x9c9   :  { %10630 = vmatprep.subr.bf16.mxu0 %v12922_v21  ;;  %10653 = vmatprep.subr.bf16.mxu1 %v15388_v63 }
 0xa86   :  { %v2535_v8 = vpop.f32.mrb[38].mxu0  ;;  %v2606_v52 = vpop.f32.mrb[46].mxu1 }
 0xa87   :  { %v2536_v46 = vadd.f32 %v2535_v8, %v13169_v7  ;;  %v2537_v15 = vpop.f32.mrb[39].mxu0  ;;  %v9452_v35 = vpop.f32.mrb[47].mxu1 }
 0xa88   :  { %v2538_v0 = vadd.f32 %v2537_v15, %v13181_v57  ;;  %v2607_v35 = vadd.f32 %v2606_v52, %v13229_v17 }
 0xa89   :  { %v2610_v2 = vadd.f32 %v2536_v46, %v13188_v16  ;;  %v15422_v16 = vsel %vm12437_vm6, %v13067_v1, %v13115_v58 }
 0xa8a   :  { %v2611_v51 = vadd.f32 %v2538_v0, %v15421_v33 }
 0xa8b   :  { %v8510_v18 = vmul.f32 -1.442695, %v2610_v2 }
 0xa8c   :  { %v8511_v20 = vmul.f32 -1.442695, %v2611_v51 }
 0xa8d   :  { %11726 = vpow2.f32 %v8510_v18 }
 0xa8e   :  { %11728 = vpow2.f32 %v8511_v20 }
 0xa97   :  { %v11727_v9 = vpop.eup %11726 }
 0xa98   :  { %v2618_v54 = vadd.f32 1.0, %v11727_v9  ;;  %v11729_v28 = vpop.eup %11728 }
 0xa99   :  { %v2619_v8 = vadd.f32 1.0, %v11729_v28 }
 0xa9a   :  { %11730 = vrcp.f32 %v2618_v54 }
 0xa9b   :  { %11732 = vrcp.f32 %v2619_v8 }
 0xaa4   :  { %v11731_v15 = vpop.eup %11730 }
 0xaa5   :  { %v2624_v62 = vmul.f32 %v11731_v15, %v2607_v35  ;;  %v11733_v0 = vpop.eup %11732  ;;  %v15423_v15 = vsel %vm12379_vm5, %v13085_v3, %v13158_v45 }
 0xaa6   :  { %v2627_v2 = vsub.f32 1.0, %v11733_v0  ;;  %v2629_v18 = vmul.f32 %v11733_v0, %v2454_v29 }
 0xaa7   :  { %v2625_v46 = vadd.f32 %v2624_v62, %v15422_v16 }
 0xaa9   :  { %11734 = vtanh.f32 %v2625_v46 }
 0xab3   :  { %v11735_v33 = vpop.eup %11734 }
 0xab4   :  { %v2628_v51 = vmul.f32 %v11735_v33, %v2627_v2 }
 0xab6   :  { %v2630_v20 = vadd.f32 %v2629_v18, %v2628_v51 }
 0xab8   :  { %v2631_v52 = vsel %vm111_vm11, %v2630_v20, %v2454_v29 }
 0xab9   :  { %2632 = vst.msk [vmem:[#allocation3 + $0x8] sm:$0xff] %vm657_vm9, %v2631_v52  ;;  %8512 = vmatmul.mubr.msk.f32.vlgmr.msra.gmra.mrb[40].mxu0 %vm490_vm8, %v2631_v52  ;;  %9478 = vmatmul.mubr.msk.f32.vlgmr.msra.gmra.mrb[48].mxu1 %vm490_vm8, %v2631_v52 }
 0xaba   :  { %2633 = vst.msk [vmem:[#allocation3 + $0x30] sm:$0xff] %vm659_vm10, %v2631_v52  ;;  %10632 = vmatpush1.bf16.msra.mxu0 %v12946_v23  ;;  %10655 = vmatpush3.bf16.msra.mxu1 %v12950_v5 }
 0xabb   :  { %10634 = vmatprep.subr.bf16.mxu0 %v12948_v41  ;;  %10656 = vmatprep.subr.bf16.mxu1 %v15388_v63 }
 0xabc   :  { %2887 = vmatprep.mubr.f32.mxu0 %v15389_v4  ;;  %9504 = vmatprep.mubr.msk.f32.mxu1 %vm12085_vm2, %v15389_v4 }
 0xabe   :  { %10636 = vmatpush1.bf16.msra.mxu0 %v12958_v19  ;;  %10658 = vmatpush3.bf16.msra.mxu1 %v12964_v36 }
 0xabf   :  { %10638 = vmatprep.subr.bf16.mxu0 %v12961_v24  ;;  %10659 = vmatprep.subr.bf16.mxu1 %v15388_v63 }
 0xac2   :  { %10640 = vmatpush1.bf16.msra.mxu0 %v12972_v39  ;;  %10661 = vmatpush3.bf16.msra.mxu1 %v12978_v49 }
 0xac3   :  { %10642 = vmatprep.subr.bf16.mxu0 %v12975_v40  ;;  %10662 = vmatprep.subr.bf16.mxu1 %v15388_v63 }
 0xac6   :  { %10644 = vmatpush1.bf16.msra.mxu0 %v12986_v47  ;;  %10664 = vmatpush3.bf16.msra.mxu1 %v12992_v50 }
 0xac7   :  { %10646 = vmatprep.subr.bf16.mxu0 %v12989_v61  ;;  %10665 = vmatprep.subr.bf16.mxu1 %v15388_v63 }
 0xaca   :  { %10648 = vmatpush1.bf16.msra.mxu0 %v12999_v27  ;;  %10667 = vmatpush3.bf16.msra.mxu1 %v13006_v34 }
 0xacb   :  { %10650 = vmatprep.subr.bf16.mxu0 %v13003_v14  ;;  %10668 = vmatprep.subr.bf16.mxu1 %v15388_v63 }
 0xace   :  { %10652 = vmatpush1.bf16.msra.mxu0 %v13012_v25  ;;  %10670 = vmatpush3.bf16.msra.mxu1 %v13016_v12 }
 0xacf   :  { %10672 = vmatprep.subr.bf16.mxu0 %v12922_v21  ;;  %10695 = vmatprep.subr.bf16.mxu1 %v15388_v63 }
 0xb8c   :  { %v2712_v62 = vpop.f32.mrb[40].mxu0  ;;  %v2783_v29 = vpop.f32.mrb[48].mxu1 }
 0xb8d   :  { %v2713_v9 = vadd.f32 %v2712_v62, %v13169_v7  ;;  %v2714_v54 = vpop.f32.mrb[41].mxu0  ;;  %v9479_v28 = vpop.f32.mrb[49].mxu1  ;;  %v2784_v20 = vadd.f32 %v2783_v29, %v13229_v17 }
 0xb8e   :  { %v2715_v8 = vadd.f32 %v2714_v54, %v13181_v57 }
 0xb8f   :  { %v2787_v35 = vadd.f32 %v2713_v9, %v13162_v22  ;;  %v15424_v22 = vsel %vm12437_vm6, %v13081_v53, %v13087_v6 }
 0xb90   :  { %v2788_v16 = vadd.f32 %v2715_v8, %v15423_v15 }
 0xb91   :  { %v8514_v46 = vmul.f32 -1.442695, %v2787_v35 }
 0xb92   :  { %v8515_v0 = vmul.f32 -1.442695, %v2788_v16 }
 0xb93   :  { %11736 = vpow2.f32 %v8514_v46 }
 0xb94   :  { %11738 = vpow2.f32 %v8515_v0 }
 0xb9d   :  { %v11737_v2 = vpop.eup %11736 }
 0xb9e   :  { %v2795_v33 = vadd.f32 1.0, %v11737_v2  ;;  %v11739_v51 = vpop.eup %11738 }
 0xb9f   :  { %v2796_v18 = vadd.f32 1.0, %v11739_v51 }
 0xba0   :  { %11740 = vrcp.f32 %v2795_v33 }
 0xba1   :  { %11742 = vrcp.f32 %v2796_v18 }
 0xbaa   :  { %v11741_v62 = vpop.eup %11740 }
 0xbab   :  { %v2801_v54 = vmul.f32 %v11741_v62, %v2784_v20  ;;  %v11743_v28 = vpop.eup %11742  ;;  %v15425_v62 = vsel %vm12379_vm5, %v13111_v44, %v13135_v55 }
 0xbac   :  { %v2804_v8 = vsub.f32 1.0, %v11743_v28  ;;  %v2806_v16 = vmul.f32 %v11743_v28, %v2631_v52 }
 0xbad   :  { %v2802_v9 = vadd.f32 %v2801_v54, %v15424_v22 }
 0xbaf   :  { %11744 = vtanh.f32 %v2802_v9 }
 0xbb9   :  { %v11745_v35 = vpop.eup %11744 }
 0xbba   :  { %v2805_v15 = vmul.f32 %v11745_v35, %v2804_v8 }
 0xbbc   :  { %v2807_v46 = vadd.f32 %v2806_v16, %v2805_v15 }
 0xbbe   :  { %v2808_v29 = vsel %vm113_vm12, %v2807_v46, %v2631_v52 }
 0xbbf   :  { %2809 = vst.msk [vmem:[#allocation3 + $0x10] sm:$0xff] %vm657_vm9, %v2808_v29  ;;  %8516 = vmatmul.mubr.msk.f32.vlgmr.msra.gmra.mrb[42].mxu0 %vm490_vm8, %v2808_v29  ;;  %9505 = vmatmul.mubr.msk.f32.vlgmr.msra.gmra.mrb[50].mxu1 %vm490_vm8, %v2808_v29 }
 0xbc0   :  { %2810 = vst.msk [vmem:[#allocation3 + $0x28] sm:$0xff] %vm659_vm10, %v2808_v29  ;;  %10674 = vmatpush1.bf16.msra.mxu0 %v12946_v23  ;;  %10697 = vmatpush3.bf16.msra.mxu1 %v12950_v5 }
 0xbc1   :  { %10676 = vmatprep.subr.bf16.mxu0 %v12948_v41  ;;  %10698 = vmatprep.subr.bf16.mxu1 %v15388_v63 }
 0xbc2   :  { %3064 = vmatprep.mubr.f32.mxu0 %v15389_v4  ;;  %9531 = vmatprep.mubr.msk.f32.mxu1 %vm12085_vm2, %v15389_v4 }
 0xbc4   :  { %10678 = vmatpush1.bf16.msra.mxu0 %v12958_v19  ;;  %10700 = vmatpush3.bf16.msra.mxu1 %v12964_v36 }
 0xbc5   :  { %10680 = vmatprep.subr.bf16.mxu0 %v12961_v24  ;;  %10701 = vmatprep.subr.bf16.mxu1 %v15388_v63 }
 0xbc8   :  { %10682 = vmatpush1.bf16.msra.mxu0 %v12972_v39  ;;  %10703 = vmatpush3.bf16.msra.mxu1 %v12978_v49 }
 0xbc9   :  { %10684 = vmatprep.subr.bf16.mxu0 %v12975_v40  ;;  %10704 = vmatprep.subr.bf16.mxu1 %v15388_v63 }
 0xbcc   :  { %10686 = vmatpush1.bf16.msra.mxu0 %v12986_v47  ;;  %10706 = vmatpush3.bf16.msra.mxu1 %v12992_v50 }
 0xbcd   :  { %10688 = vmatprep.subr.bf16.mxu0 %v12989_v61  ;;  %10707 = vmatprep.subr.bf16.mxu1 %v15388_v63 }
 0xbd0   :  { %10690 = vmatpush1.bf16.msra.mxu0 %v12999_v27  ;;  %10709 = vmatpush3.bf16.msra.mxu1 %v13006_v34 }
 0xbd1   :  { %10692 = vmatprep.subr.bf16.mxu0 %v13003_v14  ;;  %10710 = vmatprep.subr.bf16.mxu1 %v15388_v63 }
 0xbd4   :  { %10694 = vmatpush1.bf16.msra.mxu0 %v13012_v25  ;;  %10712 = vmatpush3.bf16.msra.mxu1 %v13016_v12 }
 0xbd5   :  { %10714 = vmatprep.subr.bf16.mxu0 %v12922_v21  ;;  %10737 = vmatprep.subr.bf16.mxu1 %v15388_v63 }
 0xc92   :  { %v2889_v52 = vpop.f32.mrb[42].mxu0  ;;  %v2960_v0 = vpop.f32.mrb[50].mxu1 }
 0xc93   :  { %v2890_v2 = vadd.f32 %v2889_v52, %v13169_v7  ;;  %v2891_v33 = vpop.f32.mrb[43].mxu0  ;;  %v9506_v51 = vpop.f32.mrb[51].mxu1  ;;  %v2961_v16 = vadd.f32 %v2960_v0, %v13229_v17 }
 0xc94   :  { %v2892_v18 = vadd.f32 %v2891_v33, %v13181_v57 }
 0xc95   :  { %v2964_v20 = vadd.f32 %v2890_v2, %v13139_v32  ;;  %v15426_v32 = vld [vmem:[#allocation20_spill] sm:$0xff] }
 0xc96   :  { %v2965_v54 = vadd.f32 %v2892_v18, %v15425_v62  ;;  %v15427_v2 = vsel %vm12437_vm6, %v13079_v48, %v15426_v32 }
 0xc97   :  { %v8518_v22 = vmul.f32 -1.442695, %v2964_v20 }
 0xc98   :  { %v8519_v9 = vmul.f32 -1.442695, %v2965_v54 }
 0xc99   :  { %11746 = vpow2.f32 %v8518_v22 }
 0xc9a   :  { %11748 = vpow2.f32 %v8519_v9 }
 0xca3   :  { %v11747_v28 = vpop.eup %11746 }
 0xca4   :  { %v2972_v8 = vadd.f32 1.0, %v11747_v28  ;;  %v11749_v35 = vpop.eup %11748 }
 0xca5   :  { %v2973_v15 = vadd.f32 1.0, %v11749_v35 }
 0xca6   :  { %11750 = vrcp.f32 %v2972_v8 }
 0xca7   :  { %11752 = vrcp.f32 %v2973_v15 }
 0xcb0   :  { %v11751_v46 = vpop.eup %11750 }
 0xcb1   :  { %v2978_v52 = vmul.f32 %v11751_v46, %v2961_v16  ;;  %v11753_v51 = vpop.eup %11752  ;;  %v15429_v46 = vld [vmem:[#allocation22_spill] sm:$0xff] }
 0xcb2   :  { %v2981_v18 = vsub.f32 1.0, %v11753_v51  ;;  %v2983_v54 = vmul.f32 %v11753_v51, %v2808_v29 }
 0xcb3   :  { %v2979_v33 = vadd.f32 %v2978_v52, %v15427_v2  ;;  %v15430_v2 = vsel %vm12379_vm5, %v13135_v55, %v13111_v44  ;;  %v15431_v44 = vsel %vm12437_vm6, %v15426_v32, %v13079_v48 }
 0xcb5   :  { %11754 = vtanh.f32 %v2979_v33 }
 0xcbf   :  { %v11755_v20 = vpop.eup %11754 }
 0xcc0   :  { %v2982_v62 = vmul.f32 %v11755_v20, %v2981_v18 }
 0xcc2   :  { %v2984_v22 = vadd.f32 %v2983_v54, %v2982_v62 }
 0xcc4   :  { %v2985_v0 = vsel %vm115_vm13, %v2984_v22, %v2808_v29 }
 0xcc5   :  { %2986 = vst.msk [vmem:[#allocation3 + $0x18] sm:$0xff] %vm657_vm9, %v2985_v0  ;;  %8520 = vmatmul.mubr.msk.f32.vlgmr.msra.gmra.mrb[44].mxu0 %vm490_vm8, %v2985_v0  ;;  %9532 = vmatmul.mubr.msk.f32.vlgmr.msra.gmra.mrb[52].mxu1 %vm490_vm8, %v2985_v0 }
 0xcc6   :  { %2987 = vst.msk [vmem:[#allocation3 + $0x20] sm:$0xff] %vm659_vm10, %v2985_v0  ;;  %10716 = vmatpush1.bf16.msra.mxu0 %v12946_v23  ;;  %10739 = vmatpush3.bf16.msra.mxu1 %v12950_v5 }
 0xcc7   :  { %10718 = vmatprep.subr.bf16.mxu0 %v12948_v41  ;;  %10740 = vmatprep.subr.bf16.mxu1 %v15388_v63 }
 0xcc8   :  { %3241 = vmatprep.mubr.f32.mxu0 %v15389_v4  ;;  %9558 = vmatprep.mubr.msk.f32.mxu1 %vm12085_vm2, %v15389_v4 }
 0xcca   :  { %10720 = vmatpush1.bf16.msra.mxu0 %v12958_v19  ;;  %10742 = vmatpush3.bf16.msra.mxu1 %v12964_v36 }
 0xccb   :  { %10722 = vmatprep.subr.bf16.mxu0 %v12961_v24  ;;  %10743 = vmatprep.subr.bf16.mxu1 %v15388_v63 }
 0xcce   :  { %10724 = vmatpush1.bf16.msra.mxu0 %v12972_v39  ;;  %10745 = vmatpush3.bf16.msra.mxu1 %v12978_v49 }
 0xccf   :  { %10726 = vmatprep.subr.bf16.mxu0 %v12975_v40  ;;  %10746 = vmatprep.subr.bf16.mxu1 %v15388_v63 }
 0xcd2   :  { %10728 = vmatpush1.bf16.msra.mxu0 %v12986_v47  ;;  %10748 = vmatpush3.bf16.msra.mxu1 %v12992_v50 }
 0xcd3   :  { %10730 = vmatprep.subr.bf16.mxu0 %v12989_v61  ;;  %10749 = vmatprep.subr.bf16.mxu1 %v15388_v63 }
 0xcd6   :  { %10732 = vmatpush1.bf16.msra.mxu0 %v12999_v27  ;;  %10751 = vmatpush3.bf16.msra.mxu1 %v13006_v34 }
 0xcd7   :  { %10734 = vmatprep.subr.bf16.mxu0 %v13003_v14  ;;  %10752 = vmatprep.subr.bf16.mxu1 %v15388_v63 }
 0xcda   :  { %10736 = vmatpush1.bf16.msra.mxu0 %v13012_v25  ;;  %10754 = vmatpush3.bf16.msra.mxu1 %v13016_v12 }
 0xcdb   :  { %10756 = vmatprep.subr.bf16.mxu0 %v12922_v21  ;;  %10779 = vmatprep.subr.bf16.mxu1 %v15388_v63 }
 0xd98   :  { %v3066_v29 = vpop.f32.mrb[44].mxu0  ;;  %v3137_v28 = vpop.f32.mrb[52].mxu1 }
 0xd99   :  { %v3067_v8 = vadd.f32 %v3066_v29, %v13169_v7  ;;  %v3068_v35 = vpop.f32.mrb[45].mxu0  ;;  %v9533_v15 = vpop.f32.mrb[53].mxu1  ;;  %v3138_v29 = vadd.f32 %v3137_v28, %v13229_v17 }
 0xd9a   :  { %v3069_v16 = vadd.f32 %v3068_v35, %v13181_v57 }
 0xd9b   :  { %v3141_v52 = vadd.f32 %v3067_v8, %v15429_v46 }
 0xd9c   :  { %v3142_v33 = vadd.f32 %v3069_v16, %v15430_v2 }
 0xd9d   :  { %v8522_v51 = vmul.f32 -1.442695, %v3141_v52 }
 0xd9e   :  { %v8523_v18 = vmul.f32 -1.442695, %v3142_v33 }
 0xd9f   :  { %11756 = vpow2.f32 %v8522_v51 }
 0xda0   :  { %11758 = vpow2.f32 %v8523_v18 }
 0xda9   :  { %v11757_v20 = vpop.eup %11756 }
 0xdaa   :  { %v3149_v62 = vadd.f32 1.0, %v11757_v20  ;;  %v11759_v54 = vpop.eup %11758 }
 0xdab   :  { %v3150_v22 = vadd.f32 1.0, %v11759_v54  ;;  %v15433_v54 = vld [vmem:[#allocation21_spill] sm:$0xff] }
 0xdac   :  { %11760 = vrcp.f32 %v3149_v62 }
 0xdad   :  { %11762 = vrcp.f32 %v3150_v22 }
 0xdb6   :  { %v11761_v35 = vpop.eup %11760 }
 0xdb7   :  { %v3155_v15 = vmul.f32 %v11761_v35, %v3138_v29  ;;  %v11763_v8 = vpop.eup %11762  ;;  %v15434_v29 = vsel %vm12379_vm5, %v13158_v45, %v13085_v3  ;;  %v15435_v3 = vsel %vm12437_vm6, %v13087_v6, %v13081_v53 }
 0xdb8   :  { %v3158_v16 = vsub.f32 1.0, %v11763_v8  ;;  %v3160_v2 = vmul.f32 %v11763_v8, %v2985_v0 }
 0xdb9   :  { %v3156_v55 = vadd.f32 %v3155_v15, %v15431_v44 }
 0xdbb   :  { %11764 = vtanh.f32 %v3156_v55 }
 0xdc5   :  { %v11765_v46 = vpop.eup %11764 }
 0xdc6   :  { %v3159_v52 = vmul.f32 %v11765_v46, %v3158_v16 }
 0xdc8   :  { %v3161_v33 = vadd.f32 %v3160_v2, %v3159_v52 }
 0xdca   :  { %v3162_v28 = vsel %vm117_vm14, %v3161_v33, %v2985_v0 }
 0xdcb   :  { %3163 = vst.msk [vmem:[#allocation3 + $0x20] sm:$0xff] %vm657_vm9, %v3162_v28  ;;  %8524 = vmatmul.mubr.msk.f32.vlgmr.msra.gmra.mrb[46].mxu0 %vm490_vm8, %v3162_v28  ;;  %9559 = vmatmul.mubr.msk.f32.vlgmr.msra.gmra.mrb[54].mxu1 %vm490_vm8, %v3162_v28 }
 0xdcc   :  { %3164 = vst.msk [vmem:[#allocation3 + $0x18] sm:$0xff] %vm659_vm10, %v3162_v28  ;;  %10758 = vmatpush1.bf16.msra.mxu0 %v12946_v23  ;;  %10781 = vmatpush3.bf16.msra.mxu1 %v12950_v5 }
 0xdcd   :  { %10760 = vmatprep.subr.bf16.mxu0 %v12948_v41  ;;  %10782 = vmatprep.subr.bf16.mxu1 %v15388_v63 }
 0xdce   :  { %3418 = vmatprep.mubr.f32.mxu0 %v15389_v4  ;;  %9585 = vmatprep.mubr.msk.f32.mxu1 %vm12085_vm2, %v15389_v4 }
 0xdd0   :  { %10762 = vmatpush1.bf16.msra.mxu0 %v12958_v19  ;;  %10784 = vmatpush3.bf16.msra.mxu1 %v12964_v36 }
 0xdd1   :  { %10764 = vmatprep.subr.bf16.mxu0 %v12961_v24  ;;  %10785 = vmatprep.subr.bf16.mxu1 %v15388_v63 }
 0xdd4   :  { %10766 = vmatpush1.bf16.msra.mxu0 %v12972_v39  ;;  %10787 = vmatpush3.bf16.msra.mxu1 %v12978_v49 }
 0xdd5   :  { %10768 = vmatprep.subr.bf16.mxu0 %v12975_v40  ;;  %10788 = vmatprep.subr.bf16.mxu1 %v15388_v63 }
 0xdd8   :  { %10770 = vmatpush1.bf16.msra.mxu0 %v12986_v47  ;;  %10790 = vmatpush3.bf16.msra.mxu1 %v12992_v50 }
 0xdd9   :  { %10772 = vmatprep.subr.bf16.mxu0 %v12989_v61  ;;  %10791 = vmatprep.subr.bf16.mxu1 %v15388_v63 }
 0xddc   :  { %10774 = vmatpush1.bf16.msra.mxu0 %v12999_v27  ;;  %10793 = vmatpush3.bf16.msra.mxu1 %v13006_v34 }
 0xddd   :  { %10776 = vmatprep.subr.bf16.mxu0 %v13003_v14  ;;  %10794 = vmatprep.subr.bf16.mxu1 %v15388_v63 }
 0xde0   :  { %10778 = vmatpush1.bf16.msra.mxu0 %v13012_v25  ;;  %10796 = vmatpush3.bf16.msra.mxu1 %v13016_v12 }
 0xde1   :  { %10798 = vmatprep.subr.bf16.mxu0 %v12922_v21  ;;  %10821 = vmatprep.subr.bf16.mxu1 %v15388_v63 }
 0xe9e   :  { %v3243_v48 = vpop.f32.mrb[46].mxu0  ;;  %v3314_v32 = vpop.f32.mrb[54].mxu1 }
 0xe9f   :  { %v3244_v0 = vadd.f32 %v3243_v48, %v13169_v7  ;;  %v3245_v18 = vpop.f32.mrb[47].mxu0  ;;  %v9560_v20 = vpop.f32.mrb[55].mxu1  ;;  %v3315_v46 = vadd.f32 %v3314_v32, %v13229_v17 }
 0xea0   :  { %v3246_v62 = vadd.f32 %v3245_v18, %v13181_v57 }
 0xea1   :  { %v3318_v22 = vadd.f32 %v3244_v0, %v15433_v54 }
 0xea2   :  { %v3319_v35 = vadd.f32 %v3246_v62, %v15434_v29 }
 0xea3   :  { %v8526_v15 = vmul.f32 -1.442695, %v3318_v22 }
 0xea4   :  { %v8527_v21 = vmul.f32 -1.442695, %v3319_v35 }
 0xea5   :  { %11766 = vpow2.f32 %v8526_v15 }
 0xea6   :  { %11768 = vpow2.f32 %v8527_v21 }
 0xeaf   :  { %v11767_v44 = vpop.eup %11766 }
 0xeb0   :  { %v3326_v55 = vadd.f32 1.0, %v11767_v44  ;;  %v11769_v8 = vpop.eup %11768 }
 0xeb1   :  { %v3327_v16 = vadd.f32 1.0, %v11769_v8 }
 0xeb2   :  { %11770 = vrcp.f32 %v3326_v55 }
 0xeb3   :  { %11772 = vrcp.f32 %v3327_v16  ;;  %v3705_v16 = vld [vmem:[#allocation6 + $0x120] sm:$0xff] }
 0xebc   :  { %v11771_v52 = vpop.eup %11770 }
 0xebd   :  { %v3332_v2 = vmul.f32 %v11771_v52, %v3315_v46  ;;  %v11773_v33 = vpop.eup %11772  ;;  %v3708_v46 = vld [vmem:[#allocation6 + $0x138] sm:$0xff]  ;;  %v3707_v52 = vld [vmem:[#allocation6 + $0x130] sm:$0xff] }
 0xebe   :  { %v3335_v48 = vsub.f32 1.0, %v11773_v33  ;;  %v3337_v20 = vmul.f32 %v11773_v33, %v3162_v28  ;;  %v3712_v33 = vld [vmem:[#allocation6 + $0x158] sm:$0xff] }
 0xebf   :  { %v3333_v45 = vadd.f32 %v3332_v2, %v15435_v3  ;;  %v10841_v2 = vpack.c.bf16 %v3708_v46, %v3705_v16  ;;  %v3710_v3 = vld [vmem:[#allocation6 + $0x148] sm:$0xff]  ;;  %v3739_v16 = vld [vmem:[#allocation6 + $0x230] sm:$0xff] }
 0xec0   :  { %v3735_v46 = vld [vmem:[#allocation6 + $0x210] sm:$0xff] }
 0xec1   :  { %11774 = vtanh.f32 %v3333_v45  ;;  %v10863_v45 = vpack.c.bf16 %v3710_v3, %v3707_v52  ;;  %v3737_v3 = vld [vmem:[#allocation6 + $0x220] sm:$0xff] }
 0xecb   :  { %v11775_v0 = vpop.eup %11774 }
 0xecc   :  { %v3336_v18 = vmul.f32 %v11775_v0, %v3335_v48  ;;  %v3715_v48 = vld [vmem:[#allocation6 + $0x170] sm:$0xff] }
 0xecd   :  { %v10843_v0 = vpack.c.bf16 %v3715_v48, %v3712_v33 }
 0xece   :  { %v3338_v62 = vadd.f32 %v3337_v20, %v3336_v18  ;;  %v3711_v18 = vld [vmem:[#allocation6 + $0x150] sm:$0xff]  ;;  %v3714_v20 = vld [vmem:[#allocation6 + $0x168] sm:$0xff] }
 0xed0   :  { %v3339_v32 = vsel %vm119_vm15, %v3338_v62, %v3162_v28  ;;  %v3713_v62 = vld [vmem:[#allocation6 + $0x160] sm:$0xff] }
 0xed1   :  { %3340 = vst.msk [vmem:[#allocation3 + $0x28] sm:$0xff] %vm657_vm9, %v3339_v32  ;;  %8528 = vmatmul.mubr.msk.f32.vlgmr.msra.gmra.mrb[48].mxu0 %vm490_vm8, %v3339_v32  ;;  %9586 = vmatmul.mubr.msk.f32.vlgmr.msra.gmra.mrb[56].mxu1 %vm490_vm8, %v3339_v32 }
 0xed2   :  { %3341 = vst.msk [vmem:[#allocation3 + $0x10] sm:$0xff] %vm659_vm10, %v3339_v32  ;;  %10800 = vmatpush1.bf16.msra.mxu0 %v12946_v23  ;;  %10823 = vmatpush3.bf16.msra.mxu1 %v12950_v5 }
 0xed3   :  { %10802 = vmatprep.subr.bf16.mxu0 %v12948_v41  ;;  %10824 = vmatprep.subr.bf16.mxu1 %v15388_v63 }
 0xed4   :  { %3595 = vmatprep.mubr.f32.mxu0 %v15389_v4  ;;  %9612 = vmatprep.mubr.msk.f32.mxu1 %vm12085_vm2, %v15389_v4 }
 0xed6   :  { %10804 = vmatpush1.bf16.msra.mxu0 %v12958_v19  ;;  %10826 = vmatpush3.bf16.msra.mxu1 %v12964_v36 }
 0xed7   :  { %10806 = vmatprep.subr.bf16.mxu0 %v12961_v24  ;;  %10827 = vmatprep.subr.bf16.mxu1 %v15388_v63 }
 0xeda   :  { %10808 = vmatpush1.bf16.msra.mxu0 %v12972_v39  ;;  %10829 = vmatpush3.bf16.msra.mxu1 %v12978_v49  ;;  %v15437_v39 = vld [vmem:[#allocation28_spill] sm:$0xff]  ;;  %v15438_v49 = vsel %vm12379_vm5, %v13184_v26, %v13077_v42  ;;  %v15439_v42 = vsel %vm12437_vm6, %v13115_v58, %v13067_v1  ;;  %v3709_v58 = vld [vmem:[#allocation6 + $0x140] sm:$0xff] }
 0xedb   :  { %10810 = vmatprep.subr.bf16.mxu0 %v12975_v40  ;;  %10830 = vmatprep.subr.bf16.mxu1 %v15388_v63  ;;  %v3706_v1 = vld [vmem:[#allocation6 + $0x128] sm:$0xff] }
 0xedc   :  { %v10839_v8 = vpack.c.bf16 %v3709_v58, %v3706_v1  ;;  %v3734_v1 = vld [vmem:[#allocation6 + $0x208] sm:$0xff] }
 0xede   :  { %10812 = vmatpush1.bf16.msra.mxu0 %v12986_v47  ;;  %10832 = vmatpush3.bf16.msra.mxu1 %v12992_v50 }
 0xedf   :  { %10814 = vmatprep.subr.bf16.mxu0 %v12989_v61  ;;  %10833 = vmatprep.subr.bf16.mxu1 %v15388_v63 }
 0xee2   :  { %10816 = vmatpush1.bf16.msra.mxu0 %v12999_v27  ;;  %10835 = vmatpush3.bf16.msra.mxu1 %v13006_v34 }
 0xee3   :  { %10818 = vmatprep.subr.bf16.mxu0 %v13003_v14  ;;  %10836 = vmatprep.subr.bf16.mxu1 %v15388_v63 }
 0xee6   :  { %10820 = vmatpush1.bf16.msra.mxu0 %v13012_v25  ;;  %10838 = vmatpush3.bf16.msra.mxu1 %v13016_v12 }
 0xee7   :  { %10840 = vmatprep.subr.bf16.mxu0 %v10839_v8  ;;  %10864 = vmatprep.subr.bf16.mxu1 %v10863_v45  ;;  %v3736_v8 = vld [vmem:[#allocation6 + $0x218] sm:$0xff] }
 0xee8   :  { %v10859_v52 = vpack.c.bf16 %v3739_v16, %v3736_v8 }
 0xfa4   :  { %v3420_v23 = vpop.f32.mrb[48].mxu0  ;;  %v3491_v41 = vpop.f32.mrb[56].mxu1 }
 0xfa5   :  { %v3421_v5 = vadd.f32 %v3420_v23, %v13169_v7  ;;  %v3422_v19 = vpop.f32.mrb[49].mxu0  ;;  %v9587_v24 = vpop.f32.mrb[57].mxu1  ;;  %v3492_v12 = vadd.f32 %v3491_v41, %v13229_v17  ;;  %v3716_v23 = vld [vmem:[#allocation6 + $0x178] sm:$0xff] }
 0xfa6   :  { %v3423_v36 = vadd.f32 %v3422_v19, %v13181_v57  ;;  %v10867_v41 = vpack.c.bf16 %v3716_v23, %v3713_v62  ;;  %v3721_v19 = vld [vmem:[#allocation6 + $0x1a0] sm:$0xff] }
 0xfa7   :  { %v3495_v40 = vadd.f32 %v3421_v5, %v15437_v39  ;;  %v3718_v5 = vld [vmem:[#allocation6 + $0x188] sm:$0xff]  ;;  %v3720_v39 = vld [vmem:[#allocation6 + $0x198] sm:$0xff] }
 0xfa8   :  { %v3496_v47 = vadd.f32 %v3423_v36, %v15438_v49  ;;  %v10847_v24 = vpack.c.bf16 %v3721_v19, %v3718_v5  ;;  %v3717_v36 = vld [vmem:[#allocation6 + $0x180] sm:$0xff] }
 0xfa9   :  { %v8530_v61 = vmul.f32 -1.442695, %v3495_v40  ;;  %v3719_v40 = vld [vmem:[#allocation6 + $0x190] sm:$0xff]  ;;  %v10849_v49 = vpack.c.bf16 %v3720_v39, %v3717_v36  ;;  %v15442_v39 = vsel %vm12379_vm5, %v13212_v37, %v13209_v13  ;;  %v15443_v37 = vsel %vm12437_vm6, %v13113_v56, %v13108_v31  ;;  %v4029_v31 = vld [vmem:[#allocation8 + $0x258] sm:$0xff] }
 0xfaa   :  { %v8531_v50 = vmul.f32 -1.442695, %v3496_v47  ;;  %v3722_v47 = vld [vmem:[#allocation6 + $0x1a8] sm:$0xff]  ;;  %v4033_v56 = vld [vmem:[#allocation8 + $0x278] sm:$0xff] }
 0xfab   :  { %11776 = vpow2.f32 %v8530_v61  ;;  %v10871_v61 = vpack.c.bf16 %v3722_v47, %v3719_v40 }
 0xfac   :  { %11778 = vpow2.f32 %v8531_v50  ;;  %v3724_v50 = vld [vmem:[#allocation6 + $0x1b8] sm:$0xff] }
 0xfb5   :  { %v11777_v27 = vpop.eup %11776 }
 0xfb6   :  { %v3503_v14 = vadd.f32 1.0, %v11777_v27  ;;  %v11779_v34 = vpop.eup %11778  ;;  %v3727_v27 = vld [vmem:[#allocation6 + $0x1d0] sm:$0xff] }
 0xfb7   :  { %v3504_v25 = vadd.f32 1.0, %v11779_v34  ;;  %v3723_v34 = vld [vmem:[#allocation6 + $0x1b0] sm:$0xff] }
 0xfb8   :  { %11780 = vrcp.f32 %v3503_v14  ;;  %v10851_v14 = vpack.c.bf16 %v3727_v27, %v3724_v50 }
 0xfb9   :  { %11782 = vrcp.f32 %v3504_v25  ;;  %v3726_v25 = vld [vmem:[#allocation6 + $0x1c8] sm:$0xff] }
 0xfc2   :  { %v11781_v53 = vpop.eup %11780 }
 0xfc3   :  { %v3509_v6 = vmul.f32 %v11781_v53, %v3492_v12  ;;  %v11783_v28 = vpop.eup %11782  ;;  %v3725_v12 = vld [vmem:[#allocation6 + $0x1c0] sm:$0xff]  ;;  %v10853_v53 = vpack.c.bf16 %v3726_v25, %v3723_v34 }
 0xfc4   :  { %v3512_v22 = vsub.f32 1.0, %v11783_v28  ;;  %v3514_v15 = vmul.f32 %v11783_v28, %v3339_v32  ;;  %v3733_v28 = vld [vmem:[#allocation6 + $0x200] sm:$0xff] }
 0xfc5   :  { %v3510_v26 = vadd.f32 %v3509_v6, %v15439_v42  ;;  %v3728_v6 = vld [vmem:[#allocation6 + $0x1d8] sm:$0xff] }
 0xfc6   :  { %v10875_v42 = vpack.c.bf16 %v3728_v6, %v3725_v12 }
 0xfc7   :  { %11784 = vtanh.f32 %v3510_v26  ;;  %v3730_v26 = vld [vmem:[#allocation6 + $0x1e8] sm:$0xff] }
 0xfd1   :  { %v11785_v29 = vpop.eup %11784 }
 0xfd2   :  { %v3513_v35 = vmul.f32 %v11785_v29, %v3512_v22  ;;  %v10855_v22 = vpack.c.bf16 %v3733_v28, %v3730_v26  ;;  %v3729_v29 = vld [vmem:[#allocation6 + $0x1e0] sm:$0xff] }
 0xfd4   :  { %v3515_v21 = vadd.f32 %v3514_v15, %v3513_v35  ;;  %v3732_v35 = vld [vmem:[#allocation6 + $0x1f8] sm:$0xff]  ;;  %v3731_v15 = vld [vmem:[#allocation6 + $0x1f0] sm:$0xff] }
 0xfd5   :  { %v10879_v58 = vpack.c.bf16 %v3734_v1, %v3731_v15  ;;  %v4031_v15 = vld [vmem:[#allocation8 + $0x268] sm:$0xff] }
 0xfd6   :  { %v13526_v55 = vsel %vm121_vm0, %v3515_v21, %v3339_v32  ;;  %v10845_v32 = vpack.c.bf16 %v3714_v20, %v3711_v18  ;;  %v10857_v21 = vpack.c.bf16 %v3732_v35, %v3729_v29  ;;  %v4030_v18 = vld [vmem:[#allocation8 + $0x260] sm:$0xff]  ;;  %v4036_v29 = vld [vmem:[#allocation8 + $0x290] sm:$0xff] }
 0xfd7   :  { %3517 = vst.msk [vmem:[#allocation3 + $0x30] sm:$0xff] %vm657_vm9, %v13526_v55  ;;  %8532 = vmatmul.mubr.msk.f32.vlgmr.msra.gmra.mrb[50].mxu0 %vm490_vm8, %v13526_v55  ;;  %9613 = vmatmul.mubr.msk.f32.vlgmr.msra.gmra.mrb[58].mxu1 %vm490_vm8, %v13526_v55  ;;  %v4028_v35 = vld [vmem:[#allocation8 + $0x250] sm:$0xff]  ;;  %v13564_v16 = vpack.c.bf16 %v4036_v29, %v4033_v56 }
 0xfd8   :  { %3518 = vst.msk [vmem:[#allocation3 + $0x8] sm:$0xff] %vm659_vm10, %v13526_v55  ;;  %3847 = vmatprep.mubr.f32.mxu0 %v15389_v4  ;;  %10842 = vmatpush1.bf16.msra.mxu0 %v10841_v2  ;;  %v3738_v2 = vld [vmem:[#allocation6 + $0x228] sm:$0xff]  ;;  %v4056_v29 = vld [vmem:[#allocation8 + $0x330] sm:$0xff] }
 0xfd9   :  { %10866 = vmatpush3.bf16.msra.mxu1 %v10863_v45  ;;  %10844 = vmatprep.subr.bf16.mxu0 %v10843_v0  ;;  %v3740_v45 = vld [vmem:[#allocation6 + $0x238] sm:$0xff]  ;;  %v10861_v33 = vpack.c.bf16 %v3738_v2, %v3735_v46  ;;  %v4027_v0 = vld [vmem:[#allocation8 + $0x248] sm:$0xff]  ;;  %v4042_v2 = vld [vmem:[#allocation8 + $0x2c0] sm:$0xff] }
 0xfda   :  { %10868 = vmatprep.subr.bf16.mxu1 %v10867_v41  ;;  %v10883_v48 = vpack.c.bf16 %v3740_v45, %v3737_v3  ;;  %v13538_v20 = vpack.c.bf16 %v4030_v18, %v4027_v0  ;;  %v4035_v46 = vld [vmem:[#allocation8 + $0x288] sm:$0xff]  ;;  %v4034_v3 = vld [vmem:[#allocation8 + $0x280] sm:$0xff]  ;;  %v4037_v45 = vld [vmem:[#allocation8 + $0x298] sm:$0xff] }
 0xfdc   :  { %10846 = vmatpush1.bf16.msra.mxu0 %v10845_v32 }
 0xfdd   :  { %10870 = vmatpush3.bf16.msra.mxu1 %v10867_v41  ;;  %10848 = vmatprep.subr.bf16.mxu0 %v10847_v24  ;;  %v15441_v24 = vld [vmem:[#allocation29_spill] sm:$0xff] }
 0xfde   :  { %10872 = vmatprep.subr.bf16.mxu1 %v10871_v61 }
 0xfe0   :  { %10850 = vmatpush1.bf16.msra.mxu0 %v10849_v49 }
 0xfe1   :  { %10874 = vmatpush3.bf16.msra.mxu1 %v10871_v61  ;;  %10852 = vmatprep.subr.bf16.mxu0 %v10851_v14 }
 0xfe2   :  { %10876 = vmatprep.subr.bf16.mxu1 %v10875_v42 }
 0xfe4   :  { %10854 = vmatpush1.bf16.msra.mxu0 %v10853_v53 }
 0xfe5   :  { %10878 = vmatpush3.bf16.msra.mxu1 %v10875_v42  ;;  %10856 = vmatprep.subr.bf16.mxu0 %v10855_v22  ;;  %v4026_v22 = vld [vmem:[#allocation8 + $0x240] sm:$0xff] }
 0xfe6   :  { %10880 = vmatprep.subr.bf16.mxu1 %v10879_v58  ;;  %v13562_v1 = vpack.c.bf16 %v4029_v31, %v4026_v22  ;;  %v4055_v22 = vld [vmem:[#allocation8 + $0x328] sm:$0xff] }
 0xfe8   :  { %10858 = vmatpush1.bf16.msra.mxu0 %v10857_v21  ;;  %v3697_v21 = vld [vmem:[#allocation3 + $0x8] sm:$0xff] }
 0xfe9   :  { %10882 = vmatpush3.bf16.msra.mxu1 %v10879_v58  ;;  %10860 = vmatprep.subr.bf16.mxu0 %v10859_v52  ;;  %v4032_v58 = vld [vmem:[#allocation8 + $0x270] sm:$0xff]  ;;  %v4039_v52 = vld [vmem:[#allocation8 + $0x2a8] sm:$0xff] }
 0xfea   :  { %10884 = vmatprep.subr.bf16.mxu1 %v10883_v48  ;;  %v13574_v0 = vpack.c.bf16 %v4035_v46, %v4032_v58  ;;  %v13577_v18 = vpack.c.bf16 %v4042_v2, %v4039_v52  ;;  %v4061_v58 = vld [vmem:[#allocation8 + $0x358] sm:$0xff]  ;;  %v8536_v52 = vld [vmem:[%s15324_s5 + $0x6] sm:$0x7] }
 0xfeb   :  { %v3755_v2 = vrot.slane %v8536_v52, %v12368_v30 }
 0xfec   :  { %10862 = vmatpush1.bf16.msra.mxu0 %v10861_v33  ;;  %v3698_v33 = vld [vmem:[#allocation3 + $0x10] sm:$0xff] }
 0xfed   :  { %10911 = vmatprep.subr.bf16.mxu0 %v15388_v63  ;;  %10886 = vmatpush3.bf16.msra.mxu1 %v10883_v48  ;;  %v3699_v48 = vld [vmem:[#allocation3 + $0x18] sm:$0xff] }
 0xfee   :  { %10888 = vmatprep.subr.bf16.mxu1 %v13538_v20 }
0x10aa   :  { %v3597_v62 = vpop.f32.mrb[50].mxu0  ;;  %v3668_v32 = vpop.f32.mrb[58].mxu1 }
0x10ab   :  { %v3598_v23 = vadd.f32 %v3597_v62, %v13169_v7  ;;  %v3599_v41 = vpop.f32.mrb[51].mxu0  ;;  %v9614_v5 = vpop.f32.mrb[59].mxu1  ;;  %v3669_v14 = vadd.f32 %v3668_v32, %v13229_v17  ;;  %v4038_v62 = vld [vmem:[#allocation8 + $0x2a0] sm:$0xff]  ;;  %v4041_v32 = vld [vmem:[#allocation8 + $0x2b8] sm:$0xff] }
0x10ac   :  { %v3600_v19 = vadd.f32 %v3599_v41, %v13181_v57  ;;  %v13580_v41 = vpack.c.bf16 %v4037_v45, %v4034_v3  ;;  %v4048_v5 = vld [vmem:[#allocation8 + $0x2f0] sm:$0xff] }
0x10ad   :  { %v3672_v36 = vadd.f32 %v3598_v23, %v15441_v24  ;;  %v4045_v23 = vld [vmem:[#allocation8 + $0x2d8] sm:$0xff]  ;;  %v4043_v24 = vld [vmem:[#allocation8 + $0x2c8] sm:$0xff] }
0x10ae   :  { %v3673_v40 = vadd.f32 %v3600_v19, %v15442_v39  ;;  %v4040_v19 = vld [vmem:[#allocation8 + $0x2b0] sm:$0xff]  ;;  %v3701_v39 = vld [vmem:[#allocation3 + $0x28] sm:$0xff] }
0x10af   :  { %v8534_v49 = vmul.f32 -1.442695, %v3672_v36  ;;  %v3700_v36 = vld [vmem:[#allocation3 + $0x20] sm:$0xff] }
0x10b0   :  { %v8535_v47 = vmul.f32 -1.442695, %v3673_v40  ;;  %v13588_v40 = vpack.c.bf16 %v4041_v32, %v4038_v62  ;;  %v15445_v32 = vld [vmem:[#allocation18_spill] sm:$0xff] }
0x10b1   :  { %11786 = vpow2.f32 %v8534_v49  ;;  %v13591_v49 = vpack.c.bf16 %v4048_v5, %v4045_v23  ;;  %v13686_v23 = vrot.slane %v8536_v52, %v15445_v32  ;;  %v15446_v5 = vld [vmem:[#allocation19_spill] sm:$0xff] }
0x10b2   :  { %11788 = vpow2.f32 %v8535_v47  ;;  %v4044_v47 = vld [vmem:[#allocation8 + $0x2d0] sm:$0xff] }
0x10bb   :  { %v11787_v61 = vpop.eup %11786 }
0x10bc   :  { %v3680_v50 = vadd.f32 1.0, %v11787_v61  ;;  %v11789_v7 = vpop.eup %11788  ;;  %v4047_v61 = vld [vmem:[#allocation8 + $0x2e8] sm:$0xff] }
0x10bd   :  { %v3681_v27 = vadd.f32 1.0, %v11789_v7  ;;  %v13594_v7 = vpack.c.bf16 %v4043_v24, %v4040_v19  ;;  %v13689_v19 = vrot.slane %v8536_v52, %v15446_v5 }
0x10be   :  { %11790 = vrcp.f32 %v3680_v50  ;;  %v4051_v50 = vld [vmem:[#allocation8 + $0x308] sm:$0xff] }
0x10bf   :  { %11792 = vrcp.f32 %v3681_v27  ;;  %v4054_v27 = vld [vmem:[#allocation8 + $0x320] sm:$0xff] }
0x10c8   :  { %v11791_v57 = vpop.eup %11790 }
0x10c9   :  { %v3686_v34 = vmul.f32 %v11791_v57, %v3669_v14  ;;  %v11793_v25 = vpop.eup %11792  ;;  %v4046_v14 = vld [vmem:[#allocation8 + $0x2e0] sm:$0xff]  ;;  %v4049_v57 = vld [vmem:[#allocation8 + $0x2f8] sm:$0xff] }
0x10ca   :  { %v3689_v12 = vsub.f32 1.0, %v11793_v25  ;;  %v3691_v42 = vmul.f32 %v11793_v25, %v13526_v55  ;;  %v13605_v25 = vpack.c.bf16 %v4054_v27, %v4051_v50 }
0x10cb   :  { %v3687_v13 = vadd.f32 %v3686_v34, %v15443_v37  ;;  %v3702_v34 = vld [vmem:[#allocation3 + $0x30] sm:$0xff]  ;;  %v13602_v37 = vpack.c.bf16 %v4047_v61, %v4044_v47 }
0x10cd   :  { %11794 = vtanh.f32 %v3687_v13  ;;  %v4050_v13 = vld [vmem:[#allocation8 + $0x300] sm:$0xff] }
0x10d7   :  { %v11795_v53 = vpop.eup %11794 }
0x10d8   :  { %v3690_v6 = vmul.f32 %v11795_v53, %v3689_v12  ;;  %v4053_v12 = vld [vmem:[#allocation8 + $0x318] sm:$0xff] }
0x10d9   :  { %v4057_v53 = vld [vmem:[#allocation8 + $0x338] sm:$0xff]  ;;  %v13615_v31 = vpack.c.bf16 %v4053_v12, %v4050_v13 }
0x10da   :  { %v3692_v26 = vadd.f32 %v3691_v42, %v3690_v6  ;;  %v4060_v6 = vld [vmem:[#allocation8 + $0x350] sm:$0xff]  ;;  %v13608_v42 = vpack.c.bf16 %v4049_v57, %v4046_v14 }
0x10db   :  { %v13619_v56 = vpack.c.bf16 %v4060_v6, %v4057_v53 }
0x10dc   :  { %v3693_v28 = vsel %vm123_vm4, %v3692_v26, %v13526_v55  ;;  %v13566_v55 = vpack.c.bf16 %v4031_v15, %v4028_v35  ;;  %v4059_v35 = vld [vmem:[#allocation8 + $0x348] sm:$0xff] }
0x10dd   :  { %3694 = vst.msk [vmem:[#allocation3 + $0x38] sm:$0xff] %vm657_vm9, %v3693_v28 }
0x10de   :  { %3695 = vst.msk [vmem:[#allocation3] sm:$0xff] %vm659_vm10, %v3693_v28  ;;  %v4052_v28 = vld [vmem:[#allocation8 + $0x310] sm:$0xff] }
0x10df   :  { %v13622_v15 = vpack.c.bf16 %v4055_v22, %v4052_v28 }
0x10e4   :  { %v3703_v26 = vld [vmem:[#allocation3 + $0x38] sm:$0xff] }
0x10e5   :  { %v3696_v8 = vld [vmem:[#allocation3] sm:$0xff] }
0x10e6   :  { %8537 = vmatmul.mubr.msk.f32.vlgmr.msra.gmra.mrb[52].mxu0 %vm490_vm8, %v3696_v8  ;;  %9639 = vmatprep.mubr.msk.f32.mxu1 %vm490_vm8, %v3696_v8  ;;  %v13628_v8 = vpack.c.bf16 %v4059_v35, %v4056_v29 }
0x10e7   :  { %9640 = vmatmul.mubr.msk.f32.vlgmr.msra.gmra.mrb[60].mxu1 %vm490_vm8, %v3697_v21  ;;  %3853 = vmatprep.mubr.f32.mxu0 %v15389_v4 }
0x10e8   :  { %9642 = vmatprep.mubr.msk.f32.mxu1 %vm490_vm8, %v3698_v33  ;;  %10890 = vmatpush1.bf16.msra.mxu1 %v13562_v1 }
0x10e9   :  { %10892 = vmatprep.subr.bf16.mxu1 %v13564_v16  ;;  %10913 = vmatpush3.bf16.msra.mxu0 %v13566_v55 }
0x10ea   :  { %8538 = vmatmul.mubr.msk.f32.gmra.mrb[54].mxu0 %vm490_vm8, %v3697_v21  ;;  %10914 = vmatprep.subr.bf16.mxu0 %v15388_v63  ;;  %v4058_v21 = vld [vmem:[#allocation8 + $0x340] sm:$0xff] }
0x10eb   :  { %9643 = vmatmul.mubr.msk.f32.gmra.mrb[62].mxu1 %vm490_vm8, %v3699_v48  ;;  %3859 = vmatprep.mubr.f32.mxu0 %v15389_v4  ;;  %v13632_v46 = vpack.c.bf16 %v4061_v58, %v4058_v21 }
0x10ec   :  { %9645 = vmatprep.mubr.msk.f32.mxu1 %vm490_vm8, %v3700_v36  ;;  %10894 = vmatpush1.bf16.msra.mxu1 %v13574_v0 }
0x10ed   :  { %10896 = vmatprep.subr.bf16.mxu1 %v13577_v18  ;;  %10916 = vmatpush3.bf16.msra.mxu0 %v13580_v41 }
0x10ee   :  { %8539 = vmatmul.mubr.msk.f32.gmra.mrb[56].mxu0 %vm490_vm8, %v3698_v33  ;;  %10917 = vmatprep.subr.bf16.mxu0 %v15388_v63 }
0x10ef   :  { %9646 = vmatmul.mubr.msk.f32.gmra.mrb[64].mxu1 %vm490_vm8, %v3701_v39  ;;  %3865 = vmatprep.mubr.f32.mxu0 %v15389_v4 }
0x10f0   :  { %9648 = vmatprep.mubr.msk.f32.mxu1 %vm490_vm8, %v3702_v34  ;;  %10898 = vmatpush1.bf16.msra.mxu1 %v13588_v40 }
0x10f1   :  { %10900 = vmatprep.subr.bf16.mxu1 %v13591_v49  ;;  %10919 = vmatpush3.bf16.msra.mxu0 %v13594_v7 }
0x10f2   :  { %8540 = vmatmul.mubr.msk.f32.gmra.mrb[58].mxu0 %vm490_vm8, %v3699_v48  ;;  %10920 = vmatprep.subr.bf16.mxu0 %v15388_v63 }
0x10f3   :  { %9649 = vmatmul.mubr.msk.f32.gmra.mrb[66].mxu1 %vm490_vm8, %v3703_v26  ;;  %3871 = vmatprep.mubr.f32.mxu0 %v15389_v4 }
0x10f4   :  { %10902 = vmatpush1.bf16.msra.mxu1 %v13602_v37  ;;  %4153 = vmatprep.mubr.f32.mxu1 %v15389_v4 }
0x10f5   :  { %10904 = vmatprep.subr.bf16.mxu1 %v13605_v25  ;;  %10922 = vmatpush3.bf16.msra.mxu0 %v13608_v42 }
0x10f6   :  { %8541 = vmatmul.mubr.msk.f32.gmra.mrb[60].mxu0 %vm490_vm8, %v3700_v36  ;;  %10923 = vmatprep.subr.bf16.mxu0 %v15388_v63 }
0x10f7   :  { %3877 = vmatprep.mubr.f32.mxu0 %v15389_v4 }
0x10f8   :  { %10906 = vmatpush1.bf16.msra.mxu1 %v13615_v31 }
0x10f9   :  { %10908 = vmatprep.subr.bf16.mxu1 %v13619_v56  ;;  %10925 = vmatpush3.bf16.msra.mxu0 %v13622_v15 }
0x10fa   :  { %8542 = vmatmul.mubr.msk.f32.gmra.mrb[62].mxu0 %vm490_vm8, %v3701_v39  ;;  %10926 = vmatprep.subr.bf16.mxu0 %v15388_v63 }
0x10fb   :  { %3883 = vmatprep.mubr.f32.mxu0 %v15389_v4 }
0x10fc   :  { %10910 = vmatpush1.bf16.msra.mxu1 %v13628_v8 }
0x10fd   :  { %10928 = vmatpush3.bf16.msra.mxu0 %v13632_v46  ;;  %10930 = vmatprep.subr.bf16.mxu1 %v13538_v20 }
0x10fe   :  { %8543 = vmatmul.mubr.msk.f32.gmra.mrb[64].mxu0 %vm490_vm8, %v3702_v34  ;;  %10953 = vmatprep.subr.bf16.mxu0 %v15388_v63 }
0x10ff   :  { %3889 = vmatprep.mubr.f32.mxu0 %v15389_v4  ;;  %4154 = vmatmul.mubr.f32.vlgmr.msra.gmra.mrb[68].mxu1 %v15389_v4 }
0x1100   :  { %10932 = vmatpush1.bf16.msra.mxu1 %v13562_v1  ;;  %4330 = vmatprep.mubr.f32.mxu1 %v15389_v4 }
0x1101   :  { %10934 = vmatprep.subr.bf16.mxu1 %v13564_v16 }
0x1102   :  { %8544 = vmatmul.mubr.msk.f32.gmra.mrb[66].mxu0 %vm490_vm8, %v3703_v26 }
0x1103   :  { %9675 = vmatprep.mubr.msk.f32.mxu0 %vm12085_vm2, %v15389_v4 }
0x1104   :  { %10936 = vmatpush1.bf16.msra.mxu1 %v13574_v0 }
0x1105   :  { %10938 = vmatprep.subr.bf16.mxu1 %v13577_v18 }
0x1106   :  { %9676 = vmatmul.mubr.f32.vlgmr.msra.gmra.mrb[68].mxu0 %v15389_v4 }
0x1107   :  { %10955 = vmatpush3.bf16.msra.mxu0 %v13566_v55  ;;  %9702 = vmatprep.mubr.msk.f32.mxu0 %vm12085_vm2, %v15389_v4 }
0x1108   :  { %10956 = vmatprep.subr.bf16.mxu0 %v15388_v63  ;;  %10940 = vmatpush1.bf16.msra.mxu1 %v13588_v40 }
0x1109   :  { %10942 = vmatprep.subr.bf16.mxu1 %v13591_v49 }
0x110b   :  { %10958 = vmatpush3.bf16.msra.mxu0 %v13580_v41 }
0x110c   :  { %10959 = vmatprep.subr.bf16.mxu0 %v15388_v63  ;;  %10944 = vmatpush1.bf16.msra.mxu1 %v13602_v37 }
0x110d   :  { %10946 = vmatprep.subr.bf16.mxu1 %v13605_v25 }
0x110f   :  { %10961 = vmatpush3.bf16.msra.mxu0 %v13594_v7 }
0x1110   :  { %10962 = vmatprep.subr.bf16.mxu0 %v15388_v63  ;;  %10948 = vmatpush1.bf16.msra.mxu1 %v13615_v31 }
0x1111   :  { %10950 = vmatprep.subr.bf16.mxu1 %v13619_v56 }
0x1113   :  { %10964 = vmatpush3.bf16.msra.mxu0 %v13608_v42 }
0x1114   :  { %10965 = vmatprep.subr.bf16.mxu0 %v15388_v63  ;;  %10952 = vmatpush1.bf16.msra.mxu1 %v13628_v8 }
0x1115   :  { %10972 = vmatprep.subr.bf16.mxu1 %v13538_v20 }
0x1117   :  { %10967 = vmatpush3.bf16.msra.mxu0 %v13622_v15 }
0x1118   :  { %10968 = vmatprep.subr.bf16.mxu0 %v15388_v63 }
0x111b   :  { %10970 = vmatpush3.bf16.msra.mxu0 %v13632_v46 }
0x111c   :  { %10995 = vmatprep.subr.bf16.mxu0 %v15388_v63 }
0x11b9   :  { %v13679_v3 = vpop.f32.mrb[52].mxu0 }
0x11ba   :  { %v13681_v45 = vpop.f32.mrb[53].mxu0  ;;  %v9641_v33 = vpop.f32.mrb[60].mxu1  ;;  %v3850_v51 = vadd.f32 %v13679_v3, %v13686_v23 }
0x11bb   :  { %v13683_v48 = vadd.f32 %v9641_v33, %v3755_v2  ;;  %v3962_v62 = vpop.f32.mrb[61].mxu1 }
0x11bd   :  { %v3855_v24 = vpop.f32.mrb[54].mxu0 }
0x11be   :  { %v3856_v36 = vadd.f32 %v3855_v24, %v13686_v23  ;;  %v3857_v39 = vpop.f32.mrb[55].mxu0  ;;  %v9644_v47 = vpop.f32.mrb[62].mxu1 }
0x11bf   :  { %v13693_v61 = vadd.f32 %v3857_v39, %v13689_v19  ;;  %v13695_v50 = vadd.f32 %v9644_v47, %v3755_v2  ;;  %v3972_v27 = vpop.f32.mrb[63].mxu1  ;;  %v13724_v39 = vadd.f32 %v3962_v62, %v3755_v2 }
0x11c0   :  { %v13697_v14 = vadd.f32 %v3972_v27, %v3755_v2 }
0x11c1   :  { %15447 = vst [vmem:[#allocation23_spill] sm:$0xff] %v13695_v50  ;;  %v3861_v57 = vpop.f32.mrb[56].mxu0 }
0x11c2   :  { %v3862_v34 = vadd.f32 %v3861_v57, %v13686_v23  ;;  %v3863_v13 = vpop.f32.mrb[57].mxu0  ;;  %v9647_v12 = vpop.f32.mrb[64].mxu1 }
0x11c3   :  { %v13701_v53 = vadd.f32 %v3863_v13, %v13689_v19  ;;  %v13703_v6 = vadd.f32 %v9647_v12, %v3755_v2  ;;  %v3982_v26 = vpop.f32.mrb[65].mxu1 }
0x11c4   :  { %v13705_v28 = vadd.f32 %v3982_v26, %v3755_v2 }
0x11c5   :  { %v3867_v35 = vpop.f32.mrb[58].mxu0 }
0x11c6   :  { %15448 = vst [vmem:[#allocation20_spill] sm:$0xff] %v13705_v28  ;;  %v3868_v52 = vadd.f32 %v3867_v35, %v13686_v23  ;;  %v3869_v33 = vpop.f32.mrb[59].mxu0  ;;  %v9650_v24 = vpop.f32.mrb[66].mxu1  ;;  %v8553_v35 = vld [vmem:[%s15325_s6 + $0x6] sm:$0x7] }
0x11c7   :  { %v13727_v47 = vadd.f32 %v3869_v33, %v13689_v19  ;;  %v13729_v27 = vadd.f32 %v9650_v24, %v3755_v2  ;;  %v3992_v57 = vpop.f32.mrb[67].mxu1 }
0x11c8   :  { %v13731_v13 = vadd.f32 %v3992_v57, %v3755_v2 }
0x11c9   :  { %v3873_v62 = vpop.f32.mrb[60].mxu0 }
0x11ca   :  { %v3874_v33 = vadd.f32 %v3873_v62, %v13686_v23  ;;  %v3875_v24 = vpop.f32.mrb[61].mxu0  ;;  %v13785_v62 = vrot.slane %v8553_v35, %v15445_v32 }
0x11cb   :  { %v13751_v57 = vadd.f32 %v3875_v24, %v13689_v19 }
0x11cc   :  { %v13755_v26 = vsel %vm102_vm3, %v3868_v52, %v3874_v33  ;;  %v13759_v58 = vsel %vm102_vm3, %v3874_v33, %v3868_v52 }
0x11cd   :  { %15450 = vst [vmem:[#allocation22_spill] sm:$0xff] %v13759_v58  ;;  %v3879_v21 = vpop.f32.mrb[62].mxu0 }
0x11ce   :  { %v3880_v24 = vadd.f32 %v3879_v21, %v13686_v23  ;;  %v3881_v22 = vpop.f32.mrb[63].mxu0 }
0x11cf   :  { %v13774_v52 = vadd.f32 %v3881_v22, %v13689_v19 }
0x11d0   :  { %v13778_v33 = vsel %vm102_vm3, %v3862_v34, %v3880_v24  ;;  %v13782_v2 = vsel %vm102_vm3, %v3880_v24, %v3862_v34  ;;  %v13797_v34 = vrot.slane %v8553_v35, %v15446_v5 }
0x11d1   :  { %15451 = vst [vmem:[#allocation21_spill] sm:$0xff] %v13782_v2  ;;  %v3885_v12 = vpop.f32.mrb[64].mxu0 }
0x11d2   :  { %v3886_v17 = vadd.f32 %v3885_v12, %v13686_v23  ;;  %v3887_v44 = vpop.f32.mrb[65].mxu0  ;;  %v4155_v54 = vpop.f32.mrb[68].mxu1 }
0x11d3   :  { %v13800_v24 = vadd.f32 %v3887_v44, %v13689_v19  ;;  %v4157_v32 = vpop.f32.mrb[69].mxu1  ;;  %v4156_v12 = vadd.f32 %v4155_v54, %v13785_v62  ;;  %v13825_v54 = vadd.f32 %v13681_v45, %v13689_v19 }
0x11d4   :  { %v13804_v2 = vsel %vm102_vm3, %v3856_v36, %v3886_v17  ;;  %v13808_v21 = vsel %vm102_vm3, %v3886_v17, %v3856_v36  ;;  %v4158_v36 = vadd.f32 %v4157_v32, %v13797_v34 }
0x11d5   :  { %15452 = vst [vmem:[#allocation28_spill] sm:$0xff] %v13808_v21  ;;  %v3891_v22 = vpop.f32.mrb[66].mxu0 }
0x11d6   :  { %v3892_v58 = vadd.f32 %v3891_v22, %v13686_v23  ;;  %v3893_v17 = vpop.f32.mrb[67].mxu0 }
0x11d7   :  { %v13828_v21 = vadd.f32 %v3893_v17, %v13689_v19 }
0x11d8   :  { %v4070_v5 = vsel %vm102_vm3, %v3850_v51, %v3892_v58  ;;  %v13834_v44 = vsel %vm102_vm3, %v3892_v58, %v3850_v51 }
0x11d9   :  { %15453 = vst [vmem:[#allocation29_spill] sm:$0xff] %v13834_v44  ;;  %v4230_v3 = vadd.f32 %v4156_v12, %v4070_v5  ;;  %v4071_v32 = vsel %vm12379_vm5, %v13825_v54, %v13828_v21  ;;  %v4226_v23 = vpop.f32.mrb[68].mxu0  ;;  %v13845_v5 = vrot.slane %v8553_v35, %v12368_v30 }
0x11da   :  { %v4231_v19 = vadd.f32 %v4158_v36, %v4071_v32  ;;  %v9677_v22 = vpop.f32.mrb[69].mxu0  ;;  %v15454_v36 = vsel %vm12437_vm6, %v13724_v39, %v13729_v27 }
0x11db   :  { %v8554_v17 = vmul.f32 -1.442695, %v4230_v3  ;;  %v4227_v44 = vadd.f32 %v4226_v23, %v13845_v5 }
0x11dc   :  { %v8555_v9 = vmul.f32 -1.442695, %v4231_v19 }
0x11dd   :  { %11796 = vpow2.f32 %v8554_v17 }
0x11de   :  { %11798 = vpow2.f32 %v8555_v9 }
0x11e7   :  { %v11797_v51 = vpop.eup %11796 }
0x11e8   :  { %v4238_v58 = vadd.f32 1.0, %v11797_v51  ;;  %v11799_v12 = vpop.eup %11798 }
0x11e9   :  { %v4239_v29 = vadd.f32 1.0, %v11799_v12 }
0x11ea   :  { %11800 = vrcp.f32 %v4238_v58 }
0x11eb   :  { %11802 = vrcp.f32 %v4239_v29 }
0x11f4   :  { %v11801_v28 = vpop.eup %11800 }
0x11f5   :  { %v4244_v50 = vmul.f32 %v11801_v28, %v4227_v44  ;;  %v11803_v9 = vpop.eup %11802 }
0x11f6   :  { %v4247_v32 = vsub.f32 1.0, %v11803_v9  ;;  %v4249_v35 = vmul.f32 0.0, %v11803_v9 }
0x11f7   :  { %v4245_v3 = vadd.f32 %v4244_v50, %v15454_v36  ;;  %v15455_v36 = vsel %vm12379_vm5, %v13693_v61, %v13800_v24 }
0x11f9   :  { %11804 = vtanh.f32 %v4245_v3 }
0x1203   :  { %v11805_v19 = vpop.eup %11804 }
0x1204   :  { %v4248_v22 = vmul.f32 %v11805_v19, %v4247_v32 }
0x1206   :  { %v4250_v17 = vadd.f32 %v4249_v35, %v4248_v22 }
0x1208   :  { %v4251_v23 = vsel %vm109_vm7, %v4250_v17, 0.0 }
0x1209   :  { %4252 = vst.msk [vmem:[#allocation3] sm:$0xff] %vm657_vm9, %v4251_v23  ;;  %8556 = vmatmul.mubr.msk.f32.vlgmr.msra.gmra.mrb[70].mxu1 %vm490_vm8, %v4251_v23  ;;  %9703 = vmatmul.mubr.msk.f32.vlgmr.msra.gmra.mrb[70].mxu0 %vm490_vm8, %v4251_v23 }
0x120a   :  { %4253 = vst.msk [vmem:[#allocation3 + $0x38] sm:$0xff] %vm659_vm10, %v4251_v23  ;;  %10974 = vmatpush1.bf16.msra.mxu1 %v13562_v1  ;;  %10997 = vmatpush3.bf16.msra.mxu0 %v13566_v55 }
0x120b   :  { %10976 = vmatprep.subr.bf16.mxu1 %v13564_v16  ;;  %10998 = vmatprep.subr.bf16.mxu0 %v15388_v63 }
0x120c   :  { %4507 = vmatprep.mubr.f32.mxu1 %v15389_v4  ;;  %9729 = vmatprep.mubr.msk.f32.mxu0 %vm12085_vm2, %v15389_v4 }
0x120e   :  { %10978 = vmatpush1.bf16.msra.mxu1 %v13574_v0  ;;  %11000 = vmatpush3.bf16.msra.mxu0 %v13580_v41 }
0x120f   :  { %10980 = vmatprep.subr.bf16.mxu1 %v13577_v18  ;;  %11001 = vmatprep.subr.bf16.mxu0 %v15388_v63 }
0x1212   :  { %10982 = vmatpush1.bf16.msra.mxu1 %v13588_v40  ;;  %11003 = vmatpush3.bf16.msra.mxu0 %v13594_v7 }
0x1213   :  { %10984 = vmatprep.subr.bf16.mxu1 %v13591_v49  ;;  %11004 = vmatprep.subr.bf16.mxu0 %v15388_v63 }
0x1216   :  { %10986 = vmatpush1.bf16.msra.mxu1 %v13602_v37  ;;  %11006 = vmatpush3.bf16.msra.mxu0 %v13608_v42 }
0x1217   :  { %10988 = vmatprep.subr.bf16.mxu1 %v13605_v25  ;;  %11007 = vmatprep.subr.bf16.mxu0 %v15388_v63 }
0x121a   :  { %10990 = vmatpush1.bf16.msra.mxu1 %v13615_v31  ;;  %11009 = vmatpush3.bf16.msra.mxu0 %v13622_v15 }
0x121b   :  { %10992 = vmatprep.subr.bf16.mxu1 %v13619_v56  ;;  %11010 = vmatprep.subr.bf16.mxu0 %v15388_v63 }
0x121e   :  { %10994 = vmatpush1.bf16.msra.mxu1 %v13628_v8  ;;  %11012 = vmatpush3.bf16.msra.mxu0 %v13632_v46 }
0x121f   :  { %11014 = vmatprep.subr.bf16.mxu1 %v13538_v20  ;;  %11037 = vmatprep.subr.bf16.mxu0 %v15388_v63 }
0x12dc   :  { %v4332_v50 = vpop.f32.mrb[70].mxu1  ;;  %v4403_v28 = vpop.f32.mrb[70].mxu0 }
0x12dd   :  { %v4333_v29 = vadd.f32 %v4332_v50, %v13785_v62  ;;  %v4334_v44 = vpop.f32.mrb[71].mxu1  ;;  %v9704_v51 = vpop.f32.mrb[71].mxu0  ;;  %v4404_v50 = vadd.f32 %v4403_v28, %v13845_v5 }
0x12de   :  { %v4335_v58 = vadd.f32 %v4334_v44, %v13797_v34 }
0x12df   :  { %v4407_v12 = vadd.f32 %v4333_v29, %v13804_v2  ;;  %v15456_v2 = vsel %vm12437_vm6, %v13683_v48, %v13731_v13 }
0x12e0   :  { %v4408_v3 = vadd.f32 %v4335_v58, %v15455_v36 }
0x12e1   :  { %v8558_v9 = vmul.f32 -1.442695, %v4407_v12 }
0x12e2   :  { %v8559_v32 = vmul.f32 -1.442695, %v4408_v3 }
0x12e3   :  { %11806 = vpow2.f32 %v8558_v9 }
0x12e4   :  { %11808 = vpow2.f32 %v8559_v32 }
0x12ed   :  { %v11807_v19 = vpop.eup %11806 }
0x12ee   :  { %v4415_v22 = vadd.f32 1.0, %v11807_v19  ;;  %v11809_v35 = vpop.eup %11808 }
0x12ef   :  { %v4416_v17 = vadd.f32 1.0, %v11809_v35 }
0x12f0   :  { %11810 = vrcp.f32 %v4415_v22 }
0x12f1   :  { %11812 = vrcp.f32 %v4416_v17 }
0x12fa   :  { %v11811_v44 = vpop.eup %11810 }
0x12fb   :  { %v4421_v51 = vmul.f32 %v11811_v44, %v4404_v50  ;;  %v11813_v58 = vpop.eup %11812 }
0x12fc   :  { %v4424_v12 = vsub.f32 1.0, %v11813_v58  ;;  %v4426_v9 = vmul.f32 %v11813_v58, %v4251_v23 }
0x12fd   :  { %v4422_v29 = vadd.f32 %v4421_v51, %v15456_v2  ;;  %v15457_v51 = vsel %vm12379_vm5, %v13701_v53, %v13774_v52 }
0x12ff   :  { %11814 = vtanh.f32 %v4422_v29 }
0x1309   :  { %v11815_v36 = vpop.eup %11814 }
0x130a   :  { %v4425_v3 = vmul.f32 %v11815_v36, %v4424_v12 }
0x130c   :  { %v4427_v32 = vadd.f32 %v4426_v9, %v4425_v3 }
0x130e   :  { %v4428_v28 = vsel %vm111_vm11, %v4427_v32, %v4251_v23 }
0x130f   :  { %4429 = vst.msk [vmem:[#allocation3 + $0x8] sm:$0xff] %vm657_vm9, %v4428_v28  ;;  %8560 = vmatmul.mubr.msk.f32.vlgmr.msra.gmra.mrb[72].mxu1 %vm490_vm8, %v4428_v28  ;;  %9730 = vmatmul.mubr.msk.f32.vlgmr.msra.gmra.mrb[72].mxu0 %vm490_vm8, %v4428_v28 }
0x1310   :  { %4430 = vst.msk [vmem:[#allocation3 + $0x30] sm:$0xff] %vm659_vm10, %v4428_v28  ;;  %11016 = vmatpush1.bf16.msra.mxu1 %v13562_v1  ;;  %11039 = vmatpush3.bf16.msra.mxu0 %v13566_v55 }
0x1311   :  { %11018 = vmatprep.subr.bf16.mxu1 %v13564_v16  ;;  %11040 = vmatprep.subr.bf16.mxu0 %v15388_v63 }
0x1312   :  { %4684 = vmatprep.mubr.f32.mxu1 %v15389_v4  ;;  %9756 = vmatprep.mubr.msk.f32.mxu0 %vm12085_vm2, %v15389_v4 }
0x1314   :  { %11020 = vmatpush1.bf16.msra.mxu1 %v13574_v0  ;;  %11042 = vmatpush3.bf16.msra.mxu0 %v13580_v41 }
0x1315   :  { %11022 = vmatprep.subr.bf16.mxu1 %v13577_v18  ;;  %11043 = vmatprep.subr.bf16.mxu0 %v15388_v63 }
0x1318   :  { %11024 = vmatpush1.bf16.msra.mxu1 %v13588_v40  ;;  %11045 = vmatpush3.bf16.msra.mxu0 %v13594_v7 }
0x1319   :  { %11026 = vmatprep.subr.bf16.mxu1 %v13591_v49  ;;  %11046 = vmatprep.subr.bf16.mxu0 %v15388_v63 }
0x131c   :  { %11028 = vmatpush1.bf16.msra.mxu1 %v13602_v37  ;;  %11048 = vmatpush3.bf16.msra.mxu0 %v13608_v42 }
0x131d   :  { %11030 = vmatprep.subr.bf16.mxu1 %v13605_v25  ;;  %11049 = vmatprep.subr.bf16.mxu0 %v15388_v63 }
0x1320   :  { %11032 = vmatpush1.bf16.msra.mxu1 %v13615_v31  ;;  %11051 = vmatpush3.bf16.msra.mxu0 %v13622_v15 }
0x1321   :  { %11034 = vmatprep.subr.bf16.mxu1 %v13619_v56  ;;  %11052 = vmatprep.subr.bf16.mxu0 %v15388_v63 }
0x1324   :  { %11036 = vmatpush1.bf16.msra.mxu1 %v13628_v8  ;;  %11054 = vmatpush3.bf16.msra.mxu0 %v13632_v46 }
0x1325   :  { %11056 = vmatprep.subr.bf16.mxu1 %v13538_v20  ;;  %11079 = vmatprep.subr.bf16.mxu0 %v15388_v63 }
0x13e2   :  { %v4509_v23 = vpop.f32.mrb[72].mxu1  ;;  %v4580_v19 = vpop.f32.mrb[72].mxu0 }
0x13e3   :  { %v4510_v22 = vadd.f32 %v4509_v23, %v13785_v62  ;;  %v4511_v35 = vpop.f32.mrb[73].mxu1  ;;  %v9731_v17 = vpop.f32.mrb[73].mxu0  ;;  %v4581_v32 = vadd.f32 %v4580_v19, %v13845_v5 }
0x13e4   :  { %v4512_v50 = vadd.f32 %v4511_v35, %v13797_v34 }
0x13e5   :  { %v4584_v44 = vadd.f32 %v4510_v22, %v13778_v33  ;;  %v15458_v33 = vsel %vm12437_vm6, %v13697_v14, %v13703_v6 }
0x13e6   :  { %v4585_v2 = vadd.f32 %v4512_v50, %v15457_v51 }
0x13e7   :  { %v8562_v29 = vmul.f32 -1.442695, %v4584_v44 }
0x13e8   :  { %v8563_v58 = vmul.f32 -1.442695, %v4585_v2 }
0x13e9   :  { %11816 = vpow2.f32 %v8562_v29 }
0x13ea   :  { %11818 = vpow2.f32 %v8563_v58 }
0x13f3   :  { %v11817_v12 = vpop.eup %11816 }
0x13f4   :  { %v4592_v36 = vadd.f32 1.0, %v11817_v12  ;;  %v11819_v3 = vpop.eup %11818 }
0x13f5   :  { %v4593_v9 = vadd.f32 1.0, %v11819_v3 }
0x13f6   :  { %11820 = vrcp.f32 %v4592_v36 }
0x13f7   :  { %11822 = vrcp.f32 %v4593_v9 }
0x1400   :  { %v11821_v23 = vpop.eup %11820 }
0x1401   :  { %v4598_v35 = vmul.f32 %v11821_v23, %v4581_v32  ;;  %v11823_v17 = vpop.eup %11822  ;;  %v15459_v23 = vsel %vm12379_vm5, %v13727_v47, %v13751_v57 }
0x1402   :  { %v4601_v50 = vsub.f32 1.0, %v11823_v17  ;;  %v4603_v2 = vmul.f32 %v11823_v17, %v4428_v28 }
0x1403   :  { %v4599_v22 = vadd.f32 %v4598_v35, %v15458_v33 }
0x1405   :  { %11824 = vtanh.f32 %v4599_v22 }
0x140f   :  { %v11825_v44 = vpop.eup %11824 }
0x1410   :  { %v4602_v51 = vmul.f32 %v11825_v44, %v4601_v50 }
0x1412   :  { %v4604_v29 = vadd.f32 %v4603_v2, %v4602_v51 }
0x1414   :  { %v4605_v19 = vsel %vm113_vm12, %v4604_v29, %v4428_v28 }
0x1415   :  { %4606 = vst.msk [vmem:[#allocation3 + $0x10] sm:$0xff] %vm657_vm9, %v4605_v19  ;;  %8564 = vmatmul.mubr.msk.f32.vlgmr.msra.gmra.mrb[74].mxu1 %vm490_vm8, %v4605_v19  ;;  %9757 = vmatmul.mubr.msk.f32.vlgmr.msra.gmra.mrb[74].mxu0 %vm490_vm8, %v4605_v19 }
0x1416   :  { %4607 = vst.msk [vmem:[#allocation3 + $0x28] sm:$0xff] %vm659_vm10, %v4605_v19  ;;  %11058 = vmatpush1.bf16.msra.mxu1 %v13562_v1  ;;  %11081 = vmatpush3.bf16.msra.mxu0 %v13566_v55 }
0x1417   :  { %11060 = vmatprep.subr.bf16.mxu1 %v13564_v16  ;;  %11082 = vmatprep.subr.bf16.mxu0 %v15388_v63 }
0x1418   :  { %4861 = vmatprep.mubr.f32.mxu1 %v15389_v4  ;;  %9783 = vmatprep.mubr.msk.f32.mxu0 %vm12085_vm2, %v15389_v4 }
0x141a   :  { %11062 = vmatpush1.bf16.msra.mxu1 %v13574_v0  ;;  %11084 = vmatpush3.bf16.msra.mxu0 %v13580_v41 }
0x141b   :  { %11064 = vmatprep.subr.bf16.mxu1 %v13577_v18  ;;  %11085 = vmatprep.subr.bf16.mxu0 %v15388_v63 }
0x141e   :  { %11066 = vmatpush1.bf16.msra.mxu1 %v13588_v40  ;;  %11087 = vmatpush3.bf16.msra.mxu0 %v13594_v7 }
0x141f   :  { %11068 = vmatprep.subr.bf16.mxu1 %v13591_v49  ;;  %11088 = vmatprep.subr.bf16.mxu0 %v15388_v63 }
0x1422   :  { %11070 = vmatpush1.bf16.msra.mxu1 %v13602_v37  ;;  %11090 = vmatpush3.bf16.msra.mxu0 %v13608_v42 }
0x1423   :  { %11072 = vmatprep.subr.bf16.mxu1 %v13605_v25  ;;  %11091 = vmatprep.subr.bf16.mxu0 %v15388_v63 }
0x1426   :  { %11074 = vmatpush1.bf16.msra.mxu1 %v13615_v31  ;;  %11093 = vmatpush3.bf16.msra.mxu0 %v13622_v15 }
0x1427   :  { %11076 = vmatprep.subr.bf16.mxu1 %v13619_v56  ;;  %11094 = vmatprep.subr.bf16.mxu0 %v15388_v63 }
0x142a   :  { %11078 = vmatpush1.bf16.msra.mxu1 %v13628_v8  ;;  %11096 = vmatpush3.bf16.msra.mxu0 %v13632_v46 }
0x142b   :  { %11098 = vmatprep.subr.bf16.mxu1 %v13538_v20  ;;  %11121 = vmatprep.subr.bf16.mxu0 %v15388_v63 }
0x14e8   :  { %v4686_v28 = vpop.f32.mrb[74].mxu1  ;;  %v4757_v58 = vpop.f32.mrb[74].mxu0 }
0x14e9   :  { %v4687_v12 = vadd.f32 %v4686_v28, %v13785_v62  ;;  %v4688_v36 = vpop.f32.mrb[75].mxu1  ;;  %v9758_v3 = vpop.f32.mrb[75].mxu0  ;;  %v4758_v2 = vadd.f32 %v4757_v58, %v13845_v5 }
0x14ea   :  { %v4689_v9 = vadd.f32 %v4688_v36, %v13797_v34 }
0x14eb   :  { %v4761_v32 = vadd.f32 %v4687_v12, %v13755_v26  ;;  %v15460_v26 = vld [vmem:[#allocation23_spill] sm:$0xff]  ;;  %v15461_v12 = vld [vmem:[#allocation20_spill] sm:$0xff] }
0x14ec   :  { %v4762_v35 = vadd.f32 %v4689_v9, %v15459_v23  ;;  %v15462_v36 = vsel %vm12437_vm6, %v15460_v26, %v15461_v12 }
0x14ed   :  { %v8566_v33 = vmul.f32 -1.442695, %v4761_v32 }
0x14ee   :  { %v8567_v22 = vmul.f32 -1.442695, %v4762_v35 }
0x14ef   :  { %11826 = vpow2.f32 %v8566_v33 }
0x14f0   :  { %11828 = vpow2.f32 %v8567_v22 }
0x14f9   :  { %v11827_v17 = vpop.eup %11826 }
0x14fa   :  { %v4769_v50 = vadd.f32 1.0, %v11827_v17  ;;  %v11829_v44 = vpop.eup %11828 }
0x14fb   :  { %v4770_v51 = vadd.f32 1.0, %v11829_v44 }
0x14fc   :  { %11830 = vrcp.f32 %v4769_v50 }
0x14fd   :  { %11832 = vrcp.f32 %v4770_v51 }
0x1506   :  { %v11831_v29 = vpop.eup %11830 }
0x1507   :  { %v4775_v28 = vmul.f32 %v11831_v29, %v4758_v2  ;;  %v11833_v9 = vpop.eup %11832 }
0x1508   :  { %v4778_v32 = vsub.f32 1.0, %v11833_v9  ;;  %v4780_v33 = vmul.f32 %v11833_v9, %v4605_v19 }
0x1509   :  { %v4776_v3 = vadd.f32 %v4775_v28, %v15462_v36  ;;  %v15464_v28 = vld [vmem:[#allocation22_spill] sm:$0xff] }
0x150b   :  { %11834 = vtanh.f32 %v4776_v3  ;;  %v15465_v3 = vsel %vm12379_vm5, %v13751_v57, %v13727_v47  ;;  %v15466_v47 = vsel %vm12437_vm6, %v15461_v12, %v15460_v26 }
0x1515   :  { %v11835_v23 = vpop.eup %11834 }
0x1516   :  { %v4779_v35 = vmul.f32 %v11835_v23, %v4778_v32 }
0x1518   :  { %v4781_v22 = vadd.f32 %v4780_v33, %v4779_v35 }
0x151a   :  { %v4782_v58 = vsel %vm115_vm13, %v4781_v22, %v4605_v19 }
0x151b   :  { %4783 = vst.msk [vmem:[#allocation3 + $0x18] sm:$0xff] %vm657_vm9, %v4782_v58  ;;  %8568 = vmatmul.mubr.msk.f32.vlgmr.msra.gmra.mrb[76].mxu1 %vm490_vm8, %v4782_v58  ;;  %9784 = vmatmul.mubr.msk.f32.vlgmr.msra.gmra.mrb[76].mxu0 %vm490_vm8, %v4782_v58 }
0x151c   :  { %4784 = vst.msk [vmem:[#allocation3 + $0x20] sm:$0xff] %vm659_vm10, %v4782_v58  ;;  %11100 = vmatpush1.bf16.msra.mxu1 %v13562_v1  ;;  %11123 = vmatpush3.bf16.msra.mxu0 %v13566_v55 }
0x151d   :  { %11102 = vmatprep.subr.bf16.mxu1 %v13564_v16  ;;  %11124 = vmatprep.subr.bf16.mxu0 %v15388_v63 }
0x151e   :  { %5038 = vmatprep.mubr.f32.mxu1 %v15389_v4  ;;  %9810 = vmatprep.mubr.msk.f32.mxu0 %vm12085_vm2, %v15389_v4 }
0x1520   :  { %11104 = vmatpush1.bf16.msra.mxu1 %v13574_v0  ;;  %11126 = vmatpush3.bf16.msra.mxu0 %v13580_v41 }
0x1521   :  { %11106 = vmatprep.subr.bf16.mxu1 %v13577_v18  ;;  %11127 = vmatprep.subr.bf16.mxu0 %v15388_v63 }
0x1524   :  { %11108 = vmatpush1.bf16.msra.mxu1 %v13588_v40  ;;  %11129 = vmatpush3.bf16.msra.mxu0 %v13594_v7 }
0x1525   :  { %11110 = vmatprep.subr.bf16.mxu1 %v13591_v49  ;;  %11130 = vmatprep.subr.bf16.mxu0 %v15388_v63 }
0x1528   :  { %11112 = vmatpush1.bf16.msra.mxu1 %v13602_v37  ;;  %11132 = vmatpush3.bf16.msra.mxu0 %v13608_v42 }
0x1529   :  { %11114 = vmatprep.subr.bf16.mxu1 %v13605_v25  ;;  %11133 = vmatprep.subr.bf16.mxu0 %v15388_v63 }
0x152c   :  { %11116 = vmatpush1.bf16.msra.mxu1 %v13615_v31  ;;  %11135 = vmatpush3.bf16.msra.mxu0 %v13622_v15 }
0x152d   :  { %11118 = vmatprep.subr.bf16.mxu1 %v13619_v56  ;;  %11136 = vmatprep.subr.bf16.mxu0 %v15388_v63 }
0x1530   :  { %11120 = vmatpush1.bf16.msra.mxu1 %v13628_v8  ;;  %11138 = vmatpush3.bf16.msra.mxu0 %v13632_v46 }
0x1531   :  { %11140 = vmatprep.subr.bf16.mxu1 %v13538_v20  ;;  %11163 = vmatprep.subr.bf16.mxu0 %v15388_v63 }
0x15ee   :  { %v4863_v19 = vpop.f32.mrb[76].mxu1  ;;  %v4934_v50 = vpop.f32.mrb[76].mxu0 }
0x15ef   :  { %v4864_v44 = vadd.f32 %v4863_v19, %v13785_v62  ;;  %v4865_v51 = vpop.f32.mrb[77].mxu1  ;;  %v9785_v2 = vpop.f32.mrb[77].mxu0 }
0x15f0   :  { %v4866_v29 = vadd.f32 %v4865_v51, %v13797_v34  ;;  %v4935_v2 = vadd.f32 %v4934_v50, %v13845_v5 }
0x15f1   :  { %v4938_v36 = vadd.f32 %v4864_v44, %v15464_v28 }
0x15f2   :  { %v4939_v9 = vadd.f32 %v4866_v29, %v15465_v3 }
0x15f3   :  { %v8570_v32 = vmul.f32 -1.442695, %v4938_v36 }
0x15f4   :  { %v8571_v23 = vmul.f32 -1.442695, %v4939_v9 }
0x15f5   :  { %11836 = vpow2.f32 %v8570_v32 }
0x15f6   :  { %11838 = vpow2.f32 %v8571_v23 }
0x15ff   :  { %v11837_v35 = vpop.eup %11836 }
0x1600   :  { %v4946_v33 = vadd.f32 1.0, %v11837_v35  ;;  %v11839_v22 = vpop.eup %11838 }
0x1601   :  { %v4947_v19 = vadd.f32 1.0, %v11839_v22 }
0x1602   :  { %11840 = vrcp.f32 %v4946_v33  ;;  %v15468_v33 = vld [vmem:[#allocation21_spill] sm:$0xff] }
0x1603   :  { %11842 = vrcp.f32 %v4947_v19  ;;  %v15469_v19 = vsel %vm12379_vm5, %v13774_v52, %v13701_v53  ;;  %v15470_v53 = vsel %vm12437_vm6, %v13703_v6, %v13697_v14 }
0x160c   :  { %v11841_v51 = vpop.eup %11840 }
0x160d   :  { %v4952_v45 = vmul.f32 %v11841_v51, %v4935_v2  ;;  %v11843_v44 = vpop.eup %11842 }
0x160e   :  { %v4955_v29 = vsub.f32 1.0, %v11843_v44  ;;  %v4957_v3 = vmul.f32 %v11843_v44, %v4782_v58 }
0x160f   :  { %v4953_v57 = vadd.f32 %v4952_v45, %v15466_v47 }
0x1611   :  { %11844 = vtanh.f32 %v4953_v57 }
0x161b   :  { %v11845_v28 = vpop.eup %11844 }
0x161c   :  { %v4956_v36 = vmul.f32 %v11845_v28, %v4955_v29 }
0x161e   :  { %v4958_v9 = vadd.f32 %v4957_v3, %v4956_v36 }
0x1620   :  { %v4959_v50 = vsel %vm117_vm14, %v4958_v9, %v4782_v58 }
0x1621   :  { %4960 = vst.msk [vmem:[#allocation3 + $0x20] sm:$0xff] %vm657_vm9, %v4959_v50  ;;  %8572 = vmatmul.mubr.msk.f32.vlgmr.msra.gmra.mrb[78].mxu1 %vm490_vm8, %v4959_v50  ;;  %9811 = vmatmul.mubr.msk.f32.vlgmr.msra.gmra.mrb[78].mxu0 %vm490_vm8, %v4959_v50 }
0x1622   :  { %4961 = vst.msk [vmem:[#allocation3 + $0x18] sm:$0xff] %vm659_vm10, %v4959_v50  ;;  %11142 = vmatpush1.bf16.msra.mxu1 %v13562_v1  ;;  %11165 = vmatpush3.bf16.msra.mxu0 %v13566_v55 }
0x1623   :  { %11144 = vmatprep.subr.bf16.mxu1 %v13564_v16  ;;  %11166 = vmatprep.subr.bf16.mxu0 %v15388_v63 }
0x1624   :  { %5215 = vmatprep.mubr.f32.mxu1 %v15389_v4  ;;  %9837 = vmatprep.mubr.msk.f32.mxu0 %vm12085_vm2, %v15389_v4 }
0x1626   :  { %11146 = vmatpush1.bf16.msra.mxu1 %v13574_v0  ;;  %11168 = vmatpush3.bf16.msra.mxu0 %v13580_v41 }
0x1627   :  { %11148 = vmatprep.subr.bf16.mxu1 %v13577_v18  ;;  %11169 = vmatprep.subr.bf16.mxu0 %v15388_v63 }
0x162a   :  { %11150 = vmatpush1.bf16.msra.mxu1 %v13588_v40  ;;  %11171 = vmatpush3.bf16.msra.mxu0 %v13594_v7 }
0x162b   :  { %11152 = vmatprep.subr.bf16.mxu1 %v13591_v49  ;;  %11172 = vmatprep.subr.bf16.mxu0 %v15388_v63 }
0x162e   :  { %11154 = vmatpush1.bf16.msra.mxu1 %v13602_v37  ;;  %11174 = vmatpush3.bf16.msra.mxu0 %v13608_v42 }
0x162f   :  { %11156 = vmatprep.subr.bf16.mxu1 %v13605_v25  ;;  %11175 = vmatprep.subr.bf16.mxu0 %v15388_v63 }
0x1632   :  { %11158 = vmatpush1.bf16.msra.mxu1 %v13615_v31  ;;  %11177 = vmatpush3.bf16.msra.mxu0 %v13622_v15 }
0x1633   :  { %11160 = vmatprep.subr.bf16.mxu1 %v13619_v56  ;;  %11178 = vmatprep.subr.bf16.mxu0 %v15388_v63 }
0x1636   :  { %11162 = vmatpush1.bf16.msra.mxu1 %v13628_v8  ;;  %11180 = vmatpush3.bf16.msra.mxu0 %v13632_v46 }
0x1637   :  { %11182 = vmatprep.subr.bf16.mxu1 %v13538_v20  ;;  %11205 = vmatprep.subr.bf16.mxu0 %v15388_v63 }
0x16f4   :  { %v5040_v45 = vpop.f32.mrb[78].mxu1  ;;  %v5111_v26 = vpop.f32.mrb[78].mxu0 }
0x16f5   :  { %v5041_v12 = vadd.f32 %v5040_v45, %v13785_v62  ;;  %v5042_v58 = vpop.f32.mrb[79].mxu1  ;;  %v9812_v23 = vpop.f32.mrb[79].mxu0  ;;  %v5112_v28 = vadd.f32 %v5111_v26, %v13845_v5 }
0x16f6   :  { %v5043_v35 = vadd.f32 %v5042_v58, %v13797_v34 }
0x16f7   :  { %v5115_v22 = vadd.f32 %v5041_v12, %v15468_v33 }
0x16f8   :  { %v5116_v2 = vadd.f32 %v5043_v35, %v15469_v19 }
0x16f9   :  { %v8574_v51 = vmul.f32 -1.442695, %v5115_v22 }
0x16fa   :  { %v8575_v20 = vmul.f32 -1.442695, %v5116_v2 }
0x16fb   :  { %11846 = vpow2.f32 %v8574_v51 }
0x16fc   :  { %11848 = vpow2.f32 %v8575_v20 }
0x1705   :  { %v11847_v47 = vpop.eup %11846 }
0x1706   :  { %v5123_v57 = vadd.f32 1.0, %v11847_v47  ;;  %v11849_v44 = vpop.eup %11848 }
0x1707   :  { %v5124_v29 = vadd.f32 1.0, %v11849_v44 }
0x1708   :  { %11850 = vrcp.f32 %v5123_v57 }
0x1709   :  { %11852 = vrcp.f32 %v5124_v29  ;;  %v5502_v29 = vld [vmem:[#allocation6 + $0x240] sm:$0xff] }
0x1712   :  { %v11851_v36 = vpop.eup %11850 }
0x1713   :  { %v5129_v3 = vmul.f32 %v11851_v36, %v5112_v28  ;;  %v11853_v9 = vpop.eup %11852  ;;  %v5505_v28 = vld [vmem:[#allocation6 + $0x258] sm:$0xff]  ;;  %v5504_v36 = vld [vmem:[#allocation6 + $0x250] sm:$0xff] }
0x1714   :  { %v5132_v45 = vsub.f32 1.0, %v11853_v9  ;;  %v5134_v23 = vmul.f32 %v11853_v9, %v4959_v50  ;;  %v5509_v9 = vld [vmem:[#allocation6 + $0x278] sm:$0xff] }
0x1715   :  { %v5130_v52 = vadd.f32 %v5129_v3, %v15470_v53  ;;  %v11225_v3 = vpack.c.bf16 %v5505_v28, %v5502_v29  ;;  %v5507_v53 = vld [vmem:[#allocation6 + $0x268] sm:$0xff]  ;;  %v5536_v29 = vld [vmem:[#allocation6 + $0x350] sm:$0xff] }
0x1716   :  { %v5532_v28 = vld [vmem:[#allocation6 + $0x330] sm:$0xff] }
0x1717   :  { %11854 = vtanh.f32 %v5130_v52  ;;  %v11247_v52 = vpack.c.bf16 %v5507_v53, %v5504_v36  ;;  %v5534_v53 = vld [vmem:[#allocation6 + $0x340] sm:$0xff] }
0x1721   :  { %v11855_v12 = vpop.eup %11854 }
0x1722   :  { %v5133_v58 = vmul.f32 %v11855_v12, %v5132_v45  ;;  %v5512_v45 = vld [vmem:[#allocation6 + $0x290] sm:$0xff] }
0x1723   :  { %v11227_v12 = vpack.c.bf16 %v5512_v45, %v5509_v9 }
0x1724   :  { %v5135_v35 = vadd.f32 %v5134_v23, %v5133_v58  ;;  %v5508_v58 = vld [vmem:[#allocation6 + $0x270] sm:$0xff]  ;;  %v5511_v23 = vld [vmem:[#allocation6 + $0x288] sm:$0xff] }
0x1726   :  { %v5136_v26 = vsel %vm119_vm15, %v5135_v35, %v4959_v50  ;;  %v5510_v35 = vld [vmem:[#allocation6 + $0x280] sm:$0xff] }
0x1727   :  { %5137 = vst.msk [vmem:[#allocation3 + $0x28] sm:$0xff] %vm657_vm9, %v5136_v26  ;;  %8576 = vmatmul.mubr.msk.f32.vlgmr.msra.gmra.mrb[80].mxu1 %vm490_vm8, %v5136_v26  ;;  %9838 = vmatmul.mubr.msk.f32.vlgmr.msra.gmra.mrb[80].mxu0 %vm490_vm8, %v5136_v26 }
0x1728   :  { %5138 = vst.msk [vmem:[#allocation3 + $0x10] sm:$0xff] %vm659_vm10, %v5136_v26  ;;  %11184 = vmatpush1.bf16.msra.mxu1 %v13562_v1  ;;  %11207 = vmatpush3.bf16.msra.mxu0 %v13566_v55 }
0x1729   :  { %11186 = vmatprep.subr.bf16.mxu1 %v13564_v16  ;;  %11208 = vmatprep.subr.bf16.mxu0 %v15388_v63 }
0x172a   :  { %5392 = vmatprep.mubr.f32.mxu1 %v15389_v4  ;;  %9864 = vmatprep.mubr.msk.f32.mxu0 %vm12085_vm2, %v15389_v4 }
0x172c   :  { %11188 = vmatpush1.bf16.msra.mxu1 %v13574_v0  ;;  %11210 = vmatpush3.bf16.msra.mxu0 %v13580_v41 }
0x172d   :  { %11190 = vmatprep.subr.bf16.mxu1 %v13577_v18  ;;  %11211 = vmatprep.subr.bf16.mxu0 %v15388_v63 }
0x1730   :  { %11192 = vmatpush1.bf16.msra.mxu1 %v13588_v40  ;;  %11213 = vmatpush3.bf16.msra.mxu0 %v13594_v7  ;;  %v15472_v40 = vld [vmem:[#allocation28_spill] sm:$0xff]  ;;  %v15473_v7 = vsel %vm12379_vm5, %v13800_v24, %v13693_v61  ;;  %v15474_v61 = vsel %vm12437_vm6, %v13731_v13, %v13683_v48  ;;  %v5506_v13 = vld [vmem:[#allocation6 + $0x260] sm:$0xff] }
0x1731   :  { %11194 = vmatprep.subr.bf16.mxu1 %v13591_v49  ;;  %11214 = vmatprep.subr.bf16.mxu0 %v15388_v63  ;;  %v5503_v48 = vld [vmem:[#allocation6 + $0x248] sm:$0xff] }
0x1732   :  { %v11223_v44 = vpack.c.bf16 %v5506_v13, %v5503_v48  ;;  %v5531_v48 = vld [vmem:[#allocation6 + $0x328] sm:$0xff] }
0x1734   :  { %11196 = vmatpush1.bf16.msra.mxu1 %v13602_v37  ;;  %11216 = vmatpush3.bf16.msra.mxu0 %v13608_v42 }
0x1735   :  { %11198 = vmatprep.subr.bf16.mxu1 %v13605_v25  ;;  %11217 = vmatprep.subr.bf16.mxu0 %v15388_v63 }
0x1738   :  { %11200 = vmatpush1.bf16.msra.mxu1 %v13615_v31  ;;  %11219 = vmatpush3.bf16.msra.mxu0 %v13622_v15 }
0x1739   :  { %11202 = vmatprep.subr.bf16.mxu1 %v13619_v56  ;;  %11220 = vmatprep.subr.bf16.mxu0 %v15388_v63 }
0x173c   :  { %11204 = vmatpush1.bf16.msra.mxu1 %v13628_v8  ;;  %11222 = vmatpush3.bf16.msra.mxu0 %v13632_v46 }
0x173d   :  { %11224 = vmatprep.subr.bf16.mxu1 %v11223_v44  ;;  %11248 = vmatprep.subr.bf16.mxu0 %v11247_v52  ;;  %v5533_v44 = vld [vmem:[#allocation6 + $0x338] sm:$0xff] }
0x173e   :  { %v11243_v36 = vpack.c.bf16 %v5536_v29, %v5533_v44 }
0x17fa   :  { %v5217_v1 = vpop.f32.mrb[80].mxu1  ;;  %v5288_v16 = vpop.f32.mrb[80].mxu0 }
0x17fb   :  { %v5218_v55 = vadd.f32 %v5217_v1, %v13785_v62  ;;  %v5219_v0 = vpop.f32.mrb[81].mxu1  ;;  %v9839_v18 = vpop.f32.mrb[81].mxu0  ;;  %v5289_v46 = vadd.f32 %v5288_v16, %v13845_v5  ;;  %v5513_v1 = vld [vmem:[#allocation6 + $0x298] sm:$0xff] }
0x17fc   :  { %v5220_v41 = vadd.f32 %v5219_v0, %v13797_v34  ;;  %v11251_v16 = vpack.c.bf16 %v5513_v1, %v5510_v35  ;;  %v5518_v0 = vld [vmem:[#allocation6 + $0x2c0] sm:$0xff] }
0x17fd   :  { %v5292_v49 = vadd.f32 %v5218_v55, %v15472_v40  ;;  %v5515_v55 = vld [vmem:[#allocation6 + $0x2a8] sm:$0xff]  ;;  %v5517_v40 = vld [vmem:[#allocation6 + $0x2b8] sm:$0xff] }
0x17fe   :  { %v5293_v37 = vadd.f32 %v5220_v41, %v15473_v7  ;;  %v11231_v18 = vpack.c.bf16 %v5518_v0, %v5515_v55  ;;  %v5514_v41 = vld [vmem:[#allocation6 + $0x2a0] sm:$0xff] }
0x17ff   :  { %v8578_v25 = vmul.f32 -1.442695, %v5292_v49  ;;  %v5516_v49 = vld [vmem:[#allocation6 + $0x2b0] sm:$0xff]  ;;  %v11233_v7 = vpack.c.bf16 %v5517_v40, %v5514_v41  ;;  %v15477_v40 = vsel %vm12379_vm5, %v13828_v21, %v13825_v54  ;;  %v15478_v21 = vsel %vm12437_vm6, %v13729_v27, %v13724_v39  ;;  %v5826_v39 = vld [vmem:[#allocation8 + $0x378] sm:$0xff] }
0x1800   :  { %v8579_v42 = vmul.f32 -1.442695, %v5293_v37  ;;  %v5519_v37 = vld [vmem:[#allocation6 + $0x2c8] sm:$0xff]  ;;  %v5830_v27 = vld [vmem:[#allocation8 + $0x398] sm:$0xff] }
0x1801   :  { %11856 = vpow2.f32 %v8578_v25  ;;  %v11255_v25 = vpack.c.bf16 %v5519_v37, %v5516_v49 }
0x1802   :  { %11858 = vpow2.f32 %v8579_v42  ;;  %v5521_v42 = vld [vmem:[#allocation6 + $0x2d8] sm:$0xff] }
0x180b   :  { %v11857_v31 = vpop.eup %11856 }
0x180c   :  { %v5300_v56 = vadd.f32 1.0, %v11857_v31  ;;  %v11859_v15 = vpop.eup %11858  ;;  %v5524_v31 = vld [vmem:[#allocation6 + $0x2f0] sm:$0xff] }
0x180d   :  { %v5301_v8 = vadd.f32 1.0, %v11859_v15  ;;  %v5520_v15 = vld [vmem:[#allocation6 + $0x2d0] sm:$0xff] }
0x180e   :  { %11860 = vrcp.f32 %v5300_v56  ;;  %v11235_v56 = vpack.c.bf16 %v5524_v31, %v5521_v42 }
0x180f   :  { %11862 = vrcp.f32 %v5301_v8  ;;  %v5523_v8 = vld [vmem:[#allocation6 + $0x2e8] sm:$0xff] }
0x1818   :  { %v11861_v14 = vpop.eup %11860 }
0x1819   :  { %v5306_v6 = vmul.f32 %v11861_v14, %v5289_v46  ;;  %v11863_v50 = vpop.eup %11862  ;;  %v5522_v46 = vld [vmem:[#allocation6 + $0x2e0] sm:$0xff]  ;;  %v11237_v14 = vpack.c.bf16 %v5523_v8, %v5520_v15 }
0x181a   :  { %v5309_v22 = vsub.f32 1.0, %v11863_v50  ;;  %v5311_v51 = vmul.f32 %v11863_v50, %v5136_v26  ;;  %v5530_v50 = vld [vmem:[#allocation6 + $0x320] sm:$0xff] }
0x181b   :  { %v5307_v24 = vadd.f32 %v5306_v6, %v15474_v61  ;;  %v5525_v6 = vld [vmem:[#allocation6 + $0x2f8] sm:$0xff] }
0x181c   :  { %v11259_v61 = vpack.c.bf16 %v5525_v6, %v5522_v46 }
0x181d   :  { %11864 = vtanh.f32 %v5307_v24  ;;  %v5527_v24 = vld [vmem:[#allocation6 + $0x308] sm:$0xff] }
0x1827   :  { %v11865_v19 = vpop.eup %11864 }
0x1828   :  { %v5310_v2 = vmul.f32 %v11865_v19, %v5309_v22  ;;  %v11239_v22 = vpack.c.bf16 %v5530_v50, %v5527_v24  ;;  %v5526_v19 = vld [vmem:[#allocation6 + $0x300] sm:$0xff] }
0x182a   :  { %v5312_v20 = vadd.f32 %v5311_v51, %v5310_v2  ;;  %v5529_v2 = vld [vmem:[#allocation6 + $0x318] sm:$0xff]  ;;  %v5528_v51 = vld [vmem:[#allocation6 + $0x310] sm:$0xff] }
0x182b   :  { %v11263_v13 = vpack.c.bf16 %v5531_v48, %v5528_v51  ;;  %v5828_v51 = vld [vmem:[#allocation8 + $0x388] sm:$0xff] }
0x182c   :  { %v14142_v57 = vsel %vm121_vm0, %v5312_v20, %v5136_v26  ;;  %v11229_v26 = vpack.c.bf16 %v5511_v23, %v5508_v58  ;;  %v11241_v20 = vpack.c.bf16 %v5529_v2, %v5526_v19  ;;  %v5827_v58 = vld [vmem:[#allocation8 + $0x380] sm:$0xff]  ;;  %v5833_v19 = vld [vmem:[#allocation8 + $0x3b0] sm:$0xff] }
0x182d   :  { %5314 = vst.msk [vmem:[#allocation3 + $0x30] sm:$0xff] %vm657_vm9, %v14142_v57  ;;  %8580 = vmatmul.mubr.msk.f32.vlgmr.msra.gmra.mrb[82].mxu1 %vm490_vm8, %v14142_v57  ;;  %9865 = vmatmul.mubr.msk.f32.vlgmr.msra.gmra.mrb[82].mxu0 %vm490_vm8, %v14142_v57  ;;  %v5825_v2 = vld [vmem:[#allocation8 + $0x370] sm:$0xff]  ;;  %v14180_v29 = vpack.c.bf16 %v5833_v19, %v5830_v27 }
0x182e   :  { %5315 = vst.msk [vmem:[#allocation3 + $0x8] sm:$0xff] %vm659_vm10, %v14142_v57  ;;  %5644 = vmatprep.mubr.f32.mxu1 %v15389_v4  ;;  %11226 = vmatpush1.bf16.msra.mxu1 %v11225_v3  ;;  %v5535_v3 = vld [vmem:[#allocation6 + $0x348] sm:$0xff]  ;;  %v5853_v19 = vld [vmem:[#allocation8 + $0x450] sm:$0xff] }
0x182f   :  { %11250 = vmatpush3.bf16.msra.mxu0 %v11247_v52  ;;  %11228 = vmatprep.subr.bf16.mxu1 %v11227_v12  ;;  %v5537_v52 = vld [vmem:[#allocation6 + $0x358] sm:$0xff]  ;;  %v11245_v9 = vpack.c.bf16 %v5535_v3, %v5532_v28  ;;  %v5824_v12 = vld [vmem:[#allocation8 + $0x368] sm:$0xff]  ;;  %v5839_v3 = vld [vmem:[#allocation8 + $0x3e0] sm:$0xff] }
0x1830   :  { %11252 = vmatprep.subr.bf16.mxu0 %v11251_v16  ;;  %v11267_v45 = vpack.c.bf16 %v5537_v52, %v5534_v53  ;;  %v14154_v23 = vpack.c.bf16 %v5827_v58, %v5824_v12  ;;  %v5832_v28 = vld [vmem:[#allocation8 + $0x3a8] sm:$0xff]  ;;  %v5831_v53 = vld [vmem:[#allocation8 + $0x3a0] sm:$0xff]  ;;  %v5834_v52 = vld [vmem:[#allocation8 + $0x3b8] sm:$0xff] }
0x1832   :  { %11230 = vmatpush1.bf16.msra.mxu1 %v11229_v26 }
0x1833   :  { %11254 = vmatpush3.bf16.msra.mxu0 %v11251_v16  ;;  %11232 = vmatprep.subr.bf16.mxu1 %v11231_v18  ;;  %v15476_v18 = vld [vmem:[#allocation29_spill] sm:$0xff] }
0x1834   :  { %11256 = vmatprep.subr.bf16.mxu0 %v11255_v25 }
0x1836   :  { %11234 = vmatpush1.bf16.msra.mxu1 %v11233_v7 }
0x1837   :  { %11258 = vmatpush3.bf16.msra.mxu0 %v11255_v25  ;;  %11236 = vmatprep.subr.bf16.mxu1 %v11235_v56 }
0x1838   :  { %11260 = vmatprep.subr.bf16.mxu0 %v11259_v61 }
0x183a   :  { %11238 = vmatpush1.bf16.msra.mxu1 %v11237_v14 }
0x183b   :  { %11262 = vmatpush3.bf16.msra.mxu0 %v11259_v61  ;;  %11240 = vmatprep.subr.bf16.mxu1 %v11239_v22  ;;  %v5823_v22 = vld [vmem:[#allocation8 + $0x360] sm:$0xff] }
0x183c   :  { %11264 = vmatprep.subr.bf16.mxu0 %v11263_v13  ;;  %v14178_v48 = vpack.c.bf16 %v5826_v39, %v5823_v22  ;;  %v5852_v22 = vld [vmem:[#allocation8 + $0x448] sm:$0xff] }
0x183e   :  { %11242 = vmatpush1.bf16.msra.mxu1 %v11241_v20  ;;  %v5494_v20 = vld [vmem:[#allocation3 + $0x8] sm:$0xff] }
0x183f   :  { %11266 = vmatpush3.bf16.msra.mxu0 %v11263_v13  ;;  %11244 = vmatprep.subr.bf16.mxu1 %v11243_v36  ;;  %v5829_v13 = vld [vmem:[#allocation8 + $0x390] sm:$0xff]  ;;  %v5836_v36 = vld [vmem:[#allocation8 + $0x3c8] sm:$0xff] }
0x1840   :  { %11268 = vmatprep.subr.bf16.mxu0 %v11267_v45  ;;  %v14190_v12 = vpack.c.bf16 %v5832_v28, %v5829_v13  ;;  %v14193_v58 = vpack.c.bf16 %v5839_v3, %v5836_v36  ;;  %v5858_v13 = vld [vmem:[#allocation8 + $0x478] sm:$0xff]  ;;  %v8584_v36 = vld [vmem:[%s15324_s5 + $0x9] sm:$0x7] }
0x1841   :  { %v5552_v3 = vrot.slane %v8584_v36, %v12368_v30 }
0x1842   :  { %11246 = vmatpush1.bf16.msra.mxu1 %v11245_v9  ;;  %v5495_v9 = vld [vmem:[#allocation3 + $0x10] sm:$0xff] }
0x1843   :  { %11295 = vmatprep.subr.bf16.mxu1 %v15388_v63  ;;  %11270 = vmatpush3.bf16.msra.mxu0 %v11267_v45  ;;  %v5496_v45 = vld [vmem:[#allocation3 + $0x18] sm:$0xff] }
0x1844   :  { %11272 = vmatprep.subr.bf16.mxu0 %v14154_v23 }
0x1900   :  { %v5394_v35 = vpop.f32.mrb[82].mxu1  ;;  %v5465_v26 = vpop.f32.mrb[82].mxu0 }
0x1901   :  { %v5395_v1 = vadd.f32 %v5394_v35, %v13785_v62  ;;  %v5396_v16 = vpop.f32.mrb[83].mxu1  ;;  %v9866_v55 = vpop.f32.mrb[83].mxu0  ;;  %v5466_v56 = vadd.f32 %v5465_v26, %v13845_v5  ;;  %v5835_v35 = vld [vmem:[#allocation8 + $0x3c0] sm:$0xff]  ;;  %v5838_v26 = vld [vmem:[#allocation8 + $0x3d8] sm:$0xff] }
0x1902   :  { %v5397_v0 = vadd.f32 %v5396_v16, %v13797_v34  ;;  %v14196_v16 = vpack.c.bf16 %v5834_v52, %v5831_v53  ;;  %v5845_v55 = vld [vmem:[#allocation8 + $0x410] sm:$0xff] }
0x1903   :  { %v5469_v41 = vadd.f32 %v5395_v1, %v15476_v18  ;;  %v5842_v1 = vld [vmem:[#allocation8 + $0x3f8] sm:$0xff]  ;;  %v5840_v18 = vld [vmem:[#allocation8 + $0x3e8] sm:$0xff] }
0x1904   :  { %v5470_v49 = vadd.f32 %v5397_v0, %v15477_v40  ;;  %v5837_v0 = vld [vmem:[#allocation8 + $0x3d0] sm:$0xff]  ;;  %v5498_v40 = vld [vmem:[#allocation3 + $0x28] sm:$0xff] }
0x1905   :  { %v8582_v7 = vmul.f32 -1.442695, %v5469_v41  ;;  %v5497_v41 = vld [vmem:[#allocation3 + $0x20] sm:$0xff] }
0x1906   :  { %v8583_v37 = vmul.f32 -1.442695, %v5470_v49  ;;  %v14204_v49 = vpack.c.bf16 %v5838_v26, %v5835_v35  ;;  %v15480_v26 = vld [vmem:[#allocation18_spill] sm:$0xff] }
0x1907   :  { %11866 = vpow2.f32 %v8582_v7  ;;  %v14207_v7 = vpack.c.bf16 %v5845_v55, %v5842_v1  ;;  %v14302_v1 = vrot.slane %v8584_v36, %v15480_v26  ;;  %v15481_v55 = vld [vmem:[#allocation19_spill] sm:$0xff] }
0x1908   :  { %11868 = vpow2.f32 %v8583_v37  ;;  %v5841_v37 = vld [vmem:[#allocation8 + $0x3f0] sm:$0xff] }
0x1911   :  { %v11867_v25 = vpop.eup %11866 }
0x1912   :  { %v5477_v42 = vadd.f32 1.0, %v11867_v25  ;;  %v11869_v62 = vpop.eup %11868  ;;  %v5844_v25 = vld [vmem:[#allocation8 + $0x408] sm:$0xff] }
0x1913   :  { %v5478_v31 = vadd.f32 1.0, %v11869_v62  ;;  %v14210_v62 = vpack.c.bf16 %v5840_v18, %v5837_v0  ;;  %v14305_v0 = vrot.slane %v8584_v36, %v15481_v55 }
0x1914   :  { %11870 = vrcp.f32 %v5477_v42  ;;  %v5848_v42 = vld [vmem:[#allocation8 + $0x428] sm:$0xff] }
0x1915   :  { %11872 = vrcp.f32 %v5478_v31  ;;  %v5851_v31 = vld [vmem:[#allocation8 + $0x440] sm:$0xff] }
0x191e   :  { %v11871_v34 = vpop.eup %11870 }
0x191f   :  { %v5483_v15 = vmul.f32 %v11871_v34, %v5466_v56  ;;  %v11873_v8 = vpop.eup %11872  ;;  %v5843_v56 = vld [vmem:[#allocation8 + $0x400] sm:$0xff]  ;;  %v5846_v34 = vld [vmem:[#allocation8 + $0x418] sm:$0xff] }
0x1920   :  { %v5486_v46 = vsub.f32 1.0, %v11873_v8  ;;  %v5488_v61 = vmul.f32 %v11873_v8, %v14142_v57  ;;  %v14221_v8 = vpack.c.bf16 %v5851_v31, %v5848_v42 }
0x1921   :  { %v5484_v54 = vadd.f32 %v5483_v15, %v15478_v21  ;;  %v5499_v15 = vld [vmem:[#allocation3 + $0x30] sm:$0xff]  ;;  %v14218_v21 = vpack.c.bf16 %v5844_v25, %v5841_v37 }
0x1923   :  { %11874 = vtanh.f32 %v5484_v54  ;;  %v5847_v54 = vld [vmem:[#allocation8 + $0x420] sm:$0xff] }
0x192d   :  { %v11875_v14 = vpop.eup %11874 }
0x192e   :  { %v5487_v6 = vmul.f32 %v11875_v14, %v5486_v46  ;;  %v5850_v46 = vld [vmem:[#allocation8 + $0x438] sm:$0xff] }
0x192f   :  { %v5854_v14 = vld [vmem:[#allocation8 + $0x458] sm:$0xff]  ;;  %v14231_v39 = vpack.c.bf16 %v5850_v46, %v5847_v54 }
0x1930   :  { %v5489_v24 = vadd.f32 %v5488_v61, %v5487_v6  ;;  %v5857_v6 = vld [vmem:[#allocation8 + $0x470] sm:$0xff]  ;;  %v14224_v61 = vpack.c.bf16 %v5846_v34, %v5843_v56 }
0x1931   :  { %v14235_v27 = vpack.c.bf16 %v5857_v6, %v5854_v14 }
0x1932   :  { %v5490_v50 = vsel %vm123_vm4, %v5489_v24, %v14142_v57  ;;  %v14182_v57 = vpack.c.bf16 %v5828_v51, %v5825_v2  ;;  %v5856_v2 = vld [vmem:[#allocation8 + $0x468] sm:$0xff] }
0x1933   :  { %5491 = vst.msk [vmem:[#allocation3 + $0x38] sm:$0xff] %vm657_vm9, %v5490_v50 }
0x1934   :  { %5492 = vst.msk [vmem:[#allocation3] sm:$0xff] %vm659_vm10, %v5490_v50  ;;  %v5849_v50 = vld [vmem:[#allocation8 + $0x430] sm:$0xff] }
0x1935   :  { %v14238_v51 = vpack.c.bf16 %v5852_v22, %v5849_v50 }
0x193a   :  { %v5500_v24 = vld [vmem:[#allocation3 + $0x38] sm:$0xff] }
0x193b   :  { %v5493_v44 = vld [vmem:[#allocation3] sm:$0xff] }
0x193c   :  { %8585 = vmatmul.mubr.msk.f32.vlgmr.msra.gmra.mrb[84].mxu1 %vm490_vm8, %v5493_v44  ;;  %9891 = vmatprep.mubr.msk.f32.mxu0 %vm490_vm8, %v5493_v44  ;;  %v14244_v44 = vpack.c.bf16 %v5856_v2, %v5853_v19 }
0x193d   :  { %9892 = vmatmul.mubr.msk.f32.vlgmr.msra.gmra.mrb[84].mxu0 %vm490_vm8, %v5494_v20  ;;  %5650 = vmatprep.mubr.f32.mxu1 %v15389_v4 }
0x193e   :  { %9894 = vmatprep.mubr.msk.f32.mxu0 %vm490_vm8, %v5495_v9  ;;  %11274 = vmatpush1.bf16.msra.mxu0 %v14178_v48 }
0x193f   :  { %11276 = vmatprep.subr.bf16.mxu0 %v14180_v29  ;;  %11297 = vmatpush3.bf16.msra.mxu1 %v14182_v57 }
0x1940   :  { %8586 = vmatmul.mubr.msk.f32.gmra.mrb[86].mxu1 %vm490_vm8, %v5494_v20  ;;  %11298 = vmatprep.subr.bf16.mxu1 %v15388_v63  ;;  %v5855_v20 = vld [vmem:[#allocation8 + $0x460] sm:$0xff] }
0x1941   :  { %9895 = vmatmul.mubr.msk.f32.gmra.mrb[86].mxu0 %vm490_vm8, %v5496_v45  ;;  %5656 = vmatprep.mubr.f32.mxu1 %v15389_v4  ;;  %v14248_v28 = vpack.c.bf16 %v5858_v13, %v5855_v20 }
0x1942   :  { %9897 = vmatprep.mubr.msk.f32.mxu0 %vm490_vm8, %v5497_v41  ;;  %11278 = vmatpush1.bf16.msra.mxu0 %v14190_v12 }
0x1943   :  { %11280 = vmatprep.subr.bf16.mxu0 %v14193_v58  ;;  %11300 = vmatpush3.bf16.msra.mxu1 %v14196_v16 }
0x1944   :  { %8587 = vmatmul.mubr.msk.f32.gmra.mrb[88].mxu1 %vm490_vm8, %v5495_v9  ;;  %11301 = vmatprep.subr.bf16.mxu1 %v15388_v63 }
0x1945   :  { %9898 = vmatmul.mubr.msk.f32.gmra.mrb[88].mxu0 %vm490_vm8, %v5498_v40  ;;  %5662 = vmatprep.mubr.f32.mxu1 %v15389_v4 }
0x1946   :  { %9900 = vmatprep.mubr.msk.f32.mxu0 %vm490_vm8, %v5499_v15  ;;  %11282 = vmatpush1.bf16.msra.mxu0 %v14204_v49 }
0x1947   :  { %11284 = vmatprep.subr.bf16.mxu0 %v14207_v7  ;;  %11303 = vmatpush3.bf16.msra.mxu1 %v14210_v62 }
0x1948   :  { %8588 = vmatmul.mubr.msk.f32.gmra.mrb[90].mxu1 %vm490_vm8, %v5496_v45  ;;  %11304 = vmatprep.subr.bf16.mxu1 %v15388_v63 }
0x1949   :  { %9901 = vmatmul.mubr.msk.f32.gmra.mrb[90].mxu0 %vm490_vm8, %v5500_v24  ;;  %5668 = vmatprep.mubr.f32.mxu1 %v15389_v4 }
0x194a   :  { %11286 = vmatpush1.bf16.msra.mxu0 %v14218_v21  ;;  %5950 = vmatprep.mubr.f32.mxu0 %v15389_v4 }
0x194b   :  { %11288 = vmatprep.subr.bf16.mxu0 %v14221_v8  ;;  %11306 = vmatpush3.bf16.msra.mxu1 %v14224_v61 }
0x194c   :  { %8589 = vmatmul.mubr.msk.f32.gmra.mrb[92].mxu1 %vm490_vm8, %v5497_v41  ;;  %11307 = vmatprep.subr.bf16.mxu1 %v15388_v63 }
0x194d   :  { %5674 = vmatprep.mubr.f32.mxu1 %v15389_v4 }
0x194e   :  { %11290 = vmatpush1.bf16.msra.mxu0 %v14231_v39 }
0x194f   :  { %11292 = vmatprep.subr.bf16.mxu0 %v14235_v27  ;;  %11309 = vmatpush3.bf16.msra.mxu1 %v14238_v51 }
0x1950   :  { %8590 = vmatmul.mubr.msk.f32.gmra.mrb[94].mxu1 %vm490_vm8, %v5498_v40  ;;  %11310 = vmatprep.subr.bf16.mxu1 %v15388_v63 }
0x1951   :  { %5680 = vmatprep.mubr.f32.mxu1 %v15389_v4 }
0x1952   :  { %11294 = vmatpush1.bf16.msra.mxu0 %v14244_v44 }
0x1953   :  { %11312 = vmatpush3.bf16.msra.mxu1 %v14248_v28  ;;  %11314 = vmatprep.subr.bf16.mxu0 %v14154_v23 }
0x1954   :  { %8591 = vmatmul.mubr.msk.f32.gmra.mrb[96].mxu1 %vm490_vm8, %v5499_v15  ;;  %11337 = vmatprep.subr.bf16.mxu1 %v15388_v63 }
0x1955   :  { %5686 = vmatprep.mubr.f32.mxu1 %v15389_v4  ;;  %5951 = vmatmul.mubr.f32.vlgmr.msra.gmra.mrb[92].mxu0 %v15389_v4 }
0x1956   :  { %11316 = vmatpush1.bf16.msra.mxu0 %v14178_v48  ;;  %6125 = vmatprep.mubr.f32.mxu0 %v15389_v4 }
0x1957   :  { %11318 = vmatprep.subr.bf16.mxu0 %v14180_v29 }
0x1958   :  { %8592 = vmatmul.mubr.msk.f32.gmra.mrb[98].mxu1 %vm490_vm8, %v5500_v24 }
0x1959   :  { %9927 = vmatprep.mubr.msk.f32.mxu1 %vm12085_vm2, %v15389_v4 }
0x195a   :  { %11320 = vmatpush1.bf16.msra.mxu0 %v14190_v12 }
0x195b   :  { %11322 = vmatprep.subr.bf16.mxu0 %v14193_v58 }
0x195c   :  { %9928 = vmatmul.mubr.f32.vlgmr.msra.gmra.mrb[100].mxu1 %v15389_v4 }
0x195d   :  { %11339 = vmatpush3.bf16.msra.mxu1 %v14182_v57  ;;  %9954 = vmatprep.mubr.msk.f32.mxu1 %vm12085_vm2, %v15389_v4 }
0x195e   :  { %11340 = vmatprep.subr.bf16.mxu1 %v15388_v63  ;;  %11324 = vmatpush1.bf16.msra.mxu0 %v14204_v49 }
0x195f   :  { %11326 = vmatprep.subr.bf16.mxu0 %v14207_v7 }
0x1961   :  { %11342 = vmatpush3.bf16.msra.mxu1 %v14196_v16 }
0x1962   :  { %11343 = vmatprep.subr.bf16.mxu1 %v15388_v63  ;;  %11328 = vmatpush1.bf16.msra.mxu0 %v14218_v21 }
0x1963   :  { %11330 = vmatprep.subr.bf16.mxu0 %v14221_v8 }
0x1965   :  { %11345 = vmatpush3.bf16.msra.mxu1 %v14210_v62 }
0x1966   :  { %11346 = vmatprep.subr.bf16.mxu1 %v15388_v63  ;;  %11332 = vmatpush1.bf16.msra.mxu0 %v14231_v39 }
0x1967   :  { %11334 = vmatprep.subr.bf16.mxu0 %v14235_v27 }
0x1969   :  { %11348 = vmatpush3.bf16.msra.mxu1 %v14224_v61 }
0x196a   :  { %11349 = vmatprep.subr.bf16.mxu1 %v15388_v63  ;;  %11336 = vmatpush1.bf16.msra.mxu0 %v14244_v44 }
0x196b   :  { %11356 = vmatprep.subr.bf16.mxu0 %v14154_v23 }
0x196d   :  { %11351 = vmatpush3.bf16.msra.mxu1 %v14238_v51 }
0x196e   :  { %11352 = vmatprep.subr.bf16.mxu1 %v15388_v63 }
0x1971   :  { %11354 = vmatpush3.bf16.msra.mxu1 %v14248_v28 }
0x1972   :  { %11379 = vmatprep.subr.bf16.mxu1 %v15388_v63 }
0x1a0f   :  { %v14295_v53 = vpop.f32.mrb[84].mxu1 }
0x1a10   :  { %v14297_v52 = vpop.f32.mrb[85].mxu1  ;;  %v9893_v9 = vpop.f32.mrb[84].mxu0  ;;  %v5647_v32 = vadd.f32 %v14295_v53, %v14302_v1 }
0x1a11   :  { %v14299_v45 = vadd.f32 %v9893_v9, %v5552_v3  ;;  %v5759_v35 = vpop.f32.mrb[85].mxu0 }
0x1a13   :  { %v5652_v18 = vpop.f32.mrb[86].mxu1 }
0x1a14   :  { %v5653_v41 = vadd.f32 %v5652_v18, %v14302_v1  ;;  %v5654_v40 = vpop.f32.mrb[87].mxu1  ;;  %v9896_v37 = vpop.f32.mrb[86].mxu0 }
0x1a15   :  { %v14309_v25 = vadd.f32 %v5654_v40, %v14305_v0  ;;  %v14311_v42 = vadd.f32 %v9896_v37, %v5552_v3  ;;  %v5769_v31 = vpop.f32.mrb[87].mxu0  ;;  %v14340_v40 = vadd.f32 %v5759_v35, %v5552_v3 }
0x1a16   :  { %v14313_v56 = vadd.f32 %v5769_v31, %v5552_v3 }
0x1a17   :  { %15482 = vst [vmem:[#allocation23_spill] sm:$0xff] %v14311_v42  ;;  %v5658_v34 = vpop.f32.mrb[88].mxu1 }
0x1a18   :  { %v5659_v15 = vadd.f32 %v5658_v34, %v14302_v1  ;;  %v5660_v54 = vpop.f32.mrb[89].mxu1  ;;  %v9899_v46 = vpop.f32.mrb[88].mxu0 }
0x1a19   :  { %v14317_v14 = vadd.f32 %v5660_v54, %v14305_v0  ;;  %v14319_v6 = vadd.f32 %v9899_v46, %v5552_v3  ;;  %v5779_v24 = vpop.f32.mrb[89].mxu0 }
0x1a1a   :  { %v14321_v50 = vadd.f32 %v5779_v24, %v5552_v3 }
0x1a1b   :  { %v5664_v2 = vpop.f32.mrb[90].mxu1 }
0x1a1c   :  { %15483 = vst [vmem:[#allocation20_spill] sm:$0xff] %v14321_v50  ;;  %v5665_v36 = vadd.f32 %v5664_v2, %v14302_v1  ;;  %v5666_v9 = vpop.f32.mrb[91].mxu1  ;;  %v9902_v18 = vpop.f32.mrb[90].mxu0  ;;  %v8601_v2 = vld [vmem:[%s15325_s6 + $0x9] sm:$0x7] }
0x1a1d   :  { %v14343_v37 = vadd.f32 %v5666_v9, %v14305_v0  ;;  %v14345_v31 = vadd.f32 %v9902_v18, %v5552_v3  ;;  %v5789_v34 = vpop.f32.mrb[91].mxu0 }
0x1a1e   :  { %v14347_v54 = vadd.f32 %v5789_v34, %v5552_v3 }
0x1a1f   :  { %v5670_v35 = vpop.f32.mrb[92].mxu1  ;;  %v15512_v43 = vsel %vm12437_vm6, %v14345_v31, %v14340_v40 }
0x1a20   :  { %v5671_v9 = vadd.f32 %v5670_v35, %v14302_v1  ;;  %v5672_v18 = vpop.f32.mrb[93].mxu1  ;;  %v14401_v35 = vrot.slane %v8601_v2, %v15480_v26 }
0x1a21   :  { %v14367_v34 = vadd.f32 %v5672_v18, %v14305_v0 }
0x1a22   :  { %v14371_v24 = vsel %vm102_vm3, %v5665_v36, %v5671_v9  ;;  %v14375_v13 = vsel %vm102_vm3, %v5671_v9, %v5665_v36 }
0x1a23   :  { %15485 = vst [vmem:[#allocation22_spill] sm:$0xff] %v14375_v13  ;;  %v5676_v20 = vpop.f32.mrb[94].mxu1 }
0x1a24   :  { %v5677_v18 = vadd.f32 %v5676_v20, %v14302_v1  ;;  %v5678_v22 = vpop.f32.mrb[95].mxu1 }
0x1a25   :  { %v14390_v36 = vadd.f32 %v5678_v22, %v14305_v0 }
0x1a26   :  { %v14394_v9 = vsel %vm102_vm3, %v5659_v15, %v5677_v18  ;;  %v14398_v3 = vsel %vm102_vm3, %v5677_v18, %v5659_v15  ;;  %v14413_v15 = vrot.slane %v8601_v2, %v15481_v55 }
0x1a27   :  { %15486 = vst [vmem:[#allocation21_spill] sm:$0xff] %v14398_v3  ;;  %v5682_v46 = vpop.f32.mrb[96].mxu1 }
0x1a28   :  { %v5683_v5 = vadd.f32 %v5682_v46, %v14302_v1  ;;  %v5684_v47 = vpop.f32.mrb[97].mxu1  ;;  %v5952_v33 = vpop.f32.mrb[92].mxu0 }
0x1a29   :  { %v14416_v18 = vadd.f32 %v5684_v47, %v14305_v0  ;;  %v5954_v26 = vpop.f32.mrb[93].mxu0  ;;  %v5953_v46 = vadd.f32 %v5952_v33, %v14401_v35  ;;  %v14441_v33 = vadd.f32 %v14297_v52, %v14305_v0 }
0x1a2a   :  { %v14420_v3 = vsel %vm102_vm3, %v5653_v41, %v5683_v5  ;;  %v14424_v20 = vsel %vm102_vm3, %v5683_v5, %v5653_v41  ;;  %v5955_v41 = vadd.f32 %v5954_v26, %v14413_v15 }
0x1a2b   :  { %15487 = vst [vmem:[#allocation28_spill] sm:$0xff] %v14424_v20  ;;  %v5688_v22 = vpop.f32.mrb[98].mxu1 }
0x1a2c   :  { %v5689_v13 = vadd.f32 %v5688_v22, %v14302_v1  ;;  %v5690_v5 = vpop.f32.mrb[99].mxu1 }
0x1a2d   :  { %v14444_v20 = vadd.f32 %v5690_v5, %v14305_v0 }
0x1a2e   :  { %v5867_v55 = vsel %vm102_vm3, %v5647_v32, %v5689_v13  ;;  %v14450_v47 = vsel %vm102_vm3, %v5689_v13, %v5647_v32 }
0x1a2f   :  { %15488 = vst [vmem:[#allocation29_spill] sm:$0xff] %v14450_v47  ;;  %v6027_v53 = vadd.f32 %v5953_v46, %v5867_v55  ;;  %v5868_v26 = vsel %vm12379_vm5, %v14441_v33, %v14444_v20  ;;  %v6023_v1 = vpop.f32.mrb[100].mxu1  ;;  %v7082_v52 = vsel %vm12379_vm5, %v14444_v20, %v14441_v33  ;;  %v14461_v55 = vrot.slane %v8601_v2, %v12368_v30 }
0x1a30   :  { %v6028_v0 = vadd.f32 %v5955_v41, %v5868_v26  ;;  %v9929_v22 = vpop.f32.mrb[101].mxu1  ;;  %v15489_v41 = vsel %vm12437_vm6, %v14340_v40, %v14345_v31 }
0x1a31   :  { %v8602_v5 = vmul.f32 -1.442695, %v6027_v53  ;;  %v6024_v47 = vadd.f32 %v6023_v1, %v14461_v55 }
0x1a32   :  { %v8603_v17 = vmul.f32 -1.442695, %v6028_v0 }
0x1a33   :  { %11876 = vpow2.f32 %v8602_v5 }
0x1a34   :  { %11878 = vpow2.f32 %v8603_v17 }
0x1a3d   :  { %v11877_v32 = vpop.eup %11876 }
0x1a3e   :  { %v6035_v19 = vadd.f32 1.0, %v11877_v32  ;;  %v11879_v13 = vpop.eup %11878 }
0x1a3f   :  { %v6036_v46 = vadd.f32 1.0, %v11879_v13 }
0x1a40   :  { %11880 = vrcp.f32 %v6035_v19 }
0x1a41   :  { %11882 = vrcp.f32 %v6036_v46  ;;  %v15490_v46 = vsel %vm12379_vm5, %v14309_v25, %v14416_v18 }
0x1a4a   :  { %v11881_v50 = vpop.eup %11880 }
0x1a4b   :  { %v6041_v42 = vmul.f32 %v11881_v50, %v6024_v47  ;;  %v11883_v17 = vpop.eup %11882 }
0x1a4c   :  { %v6044_v26 = vsub.f32 1.0, %v11883_v17  ;;  %v6046_v2 = vmul.f32 0.0, %v11883_v17 }
0x1a4d   :  { %v6042_v53 = vadd.f32 %v6041_v42, %v15489_v41 }
0x1a4f   :  { %11884 = vtanh.f32 %v6042_v53 }
0x1a59   :  { %v11885_v0 = vpop.eup %11884 }
0x1a5a   :  { %v6045_v22 = vmul.f32 %v11885_v0, %v6044_v26 }
0x1a5c   :  { %v6047_v5 = vadd.f32 %v6046_v2, %v6045_v22 }
0x1a5e   :  { %v6048_v1 = vsel %vm109_vm7, %v6047_v5, 0.0 }
0x1a5f   :  { %8604 = vmatmul.mubr.msk.f32.vlgmr.msra.gmra.mrb[94].mxu0 %vm490_vm8, %v6048_v1  ;;  %9955 = vmatmul.mubr.msk.f32.vlgmr.msra.gmra.mrb[102].mxu1 %vm490_vm8, %v6048_v1 }
0x1a60   :  { %11358 = vmatpush1.bf16.msra.mxu0 %v14178_v48  ;;  %11381 = vmatpush3.bf16.msra.mxu1 %v14182_v57 }
0x1a61   :  { %11360 = vmatprep.subr.bf16.mxu0 %v14180_v29  ;;  %11382 = vmatprep.subr.bf16.mxu1 %v15388_v63 }
0x1a62   :  { %6300 = vmatprep.mubr.f32.mxu0 %v15389_v4  ;;  %9981 = vmatprep.mubr.msk.f32.mxu1 %vm12085_vm2, %v15389_v4 }
0x1a64   :  { %11362 = vmatpush1.bf16.msra.mxu0 %v14190_v12  ;;  %11384 = vmatpush3.bf16.msra.mxu1 %v14196_v16 }
0x1a65   :  { %11364 = vmatprep.subr.bf16.mxu0 %v14193_v58  ;;  %11385 = vmatprep.subr.bf16.mxu1 %v15388_v63 }
0x1a68   :  { %11366 = vmatpush1.bf16.msra.mxu0 %v14204_v49  ;;  %11387 = vmatpush3.bf16.msra.mxu1 %v14210_v62 }
0x1a69   :  { %11368 = vmatprep.subr.bf16.mxu0 %v14207_v7  ;;  %11388 = vmatprep.subr.bf16.mxu1 %v15388_v63 }
0x1a6c   :  { %11370 = vmatpush1.bf16.msra.mxu0 %v14218_v21  ;;  %11390 = vmatpush3.bf16.msra.mxu1 %v14224_v61 }
0x1a6d   :  { %11372 = vmatprep.subr.bf16.mxu0 %v14221_v8  ;;  %11391 = vmatprep.subr.bf16.mxu1 %v15388_v63 }
0x1a70   :  { %11374 = vmatpush1.bf16.msra.mxu0 %v14231_v39  ;;  %11393 = vmatpush3.bf16.msra.mxu1 %v14238_v51 }
0x1a71   :  { %11376 = vmatprep.subr.bf16.mxu0 %v14235_v27  ;;  %11394 = vmatprep.subr.bf16.mxu1 %v15388_v63 }
0x1a74   :  { %11378 = vmatpush1.bf16.msra.mxu0 %v14244_v44  ;;  %11396 = vmatpush3.bf16.msra.mxu1 %v14248_v28 }
0x1a75   :  { %11398 = vmatprep.subr.bf16.mxu0 %v14154_v23  ;;  %11421 = vmatprep.subr.bf16.mxu1 %v15388_v63 }
0x1b32   :  { %v6127_v60 = vpop.f32.mrb[94].mxu0  ;;  %v6198_v42 = vpop.f32.mrb[102].mxu1 }
0x1b33   :  { %v6128_v50 = vadd.f32 %v6127_v60, %v14401_v35  ;;  %v6129_v47 = vpop.f32.mrb[95].mxu0  ;;  %v9956_v32 = vpop.f32.mrb[103].mxu1  ;;  %v6199_v5 = vadd.f32 %v6198_v42, %v14461_v55 }
0x1b34   :  { %v6130_v19 = vadd.f32 %v6129_v47, %v14413_v15 }
0x1b35   :  { %v6202_v13 = vadd.f32 %v6128_v50, %v14420_v3  ;;  %v15491_v3 = vsel %vm12437_vm6, %v14299_v45, %v14347_v54 }
0x1b36   :  { %v6203_v41 = vadd.f32 %v6130_v19, %v15490_v46 }
0x1b37   :  { %v8606_v53 = vmul.f32 -1.442695, %v6202_v13 }
0x1b38   :  { %v8607_v17 = vmul.f32 -1.442695, %v6203_v41 }
0x1b39   :  { %11886 = vpow2.f32 %v8606_v53 }
0x1b3a   :  { %11888 = vpow2.f32 %v8607_v17 }
0x1b43   :  { %v11887_v26 = vpop.eup %11886 }
0x1b44   :  { %v6210_v0 = vadd.f32 1.0, %v11887_v26  ;;  %v11889_v22 = vpop.eup %11888 }
0x1b45   :  { %v6211_v2 = vadd.f32 1.0, %v11889_v22 }
0x1b46   :  { %11890 = vrcp.f32 %v6210_v0 }
0x1b47   :  { %11892 = vrcp.f32 %v6211_v2 }
0x1b50   :  { %v11891_v60 = vpop.eup %11890 }
0x1b51   :  { %v6216_v47 = vmul.f32 %v11891_v60, %v6199_v5  ;;  %v11893_v32 = vpop.eup %11892  ;;  %v15492_v5 = vsel %vm12379_vm5, %v14317_v14, %v14390_v36 }
0x1b52   :  { %v6219_v19 = vsub.f32 1.0, %v11893_v32  ;;  %v6221_v41 = vmul.f32 %v11893_v32, %v6048_v1 }
0x1b53   :  { %v6217_v50 = vadd.f32 %v6216_v47, %v15491_v3 }
0x1b55   :  { %11894 = vtanh.f32 %v6217_v50 }
0x1b5f   :  { %v11895_v13 = vpop.eup %11894 }
0x1b60   :  { %v6220_v46 = vmul.f32 %v11895_v13, %v6219_v19 }
0x1b62   :  { %v6222_v53 = vadd.f32 %v6221_v41, %v6220_v46 }
0x1b64   :  { %v6223_v42 = vsel %vm111_vm11, %v6222_v53, %v6048_v1 }
0x1b65   :  { %8608 = vmatmul.mubr.msk.f32.vlgmr.msra.gmra.mrb[96].mxu0 %vm490_vm8, %v6223_v42  ;;  %9982 = vmatmul.mubr.msk.f32.vlgmr.msra.gmra.mrb[104].mxu1 %vm490_vm8, %v6223_v42 }
0x1b66   :  { %11400 = vmatpush1.bf16.msra.mxu0 %v14178_v48  ;;  %11423 = vmatpush3.bf16.msra.mxu1 %v14182_v57 }
0x1b67   :  { %11402 = vmatprep.subr.bf16.mxu0 %v14180_v29  ;;  %11424 = vmatprep.subr.bf16.mxu1 %v15388_v63 }
0x1b68   :  { %6475 = vmatprep.mubr.f32.mxu0 %v15389_v4  ;;  %10008 = vmatprep.mubr.msk.f32.mxu1 %vm12085_vm2, %v15389_v4 }
0x1b6a   :  { %11404 = vmatpush1.bf16.msra.mxu0 %v14190_v12  ;;  %11426 = vmatpush3.bf16.msra.mxu1 %v14196_v16 }
0x1b6b   :  { %11406 = vmatprep.subr.bf16.mxu0 %v14193_v58  ;;  %11427 = vmatprep.subr.bf16.mxu1 %v15388_v63 }
0x1b6e   :  { %11408 = vmatpush1.bf16.msra.mxu0 %v14204_v49  ;;  %11429 = vmatpush3.bf16.msra.mxu1 %v14210_v62 }
0x1b6f   :  { %11410 = vmatprep.subr.bf16.mxu0 %v14207_v7  ;;  %11430 = vmatprep.subr.bf16.mxu1 %v15388_v63 }
0x1b72   :  { %11412 = vmatpush1.bf16.msra.mxu0 %v14218_v21  ;;  %11432 = vmatpush3.bf16.msra.mxu1 %v14224_v61 }
0x1b73   :  { %11414 = vmatprep.subr.bf16.mxu0 %v14221_v8  ;;  %11433 = vmatprep.subr.bf16.mxu1 %v15388_v63 }
0x1b76   :  { %11416 = vmatpush1.bf16.msra.mxu0 %v14231_v39  ;;  %11435 = vmatpush3.bf16.msra.mxu1 %v14238_v51 }
0x1b77   :  { %11418 = vmatprep.subr.bf16.mxu0 %v14235_v27  ;;  %11436 = vmatprep.subr.bf16.mxu1 %v15388_v63 }
0x1b7a   :  { %11420 = vmatpush1.bf16.msra.mxu0 %v14244_v44  ;;  %11438 = vmatpush3.bf16.msra.mxu1 %v14248_v28 }
0x1b7b   :  { %11440 = vmatprep.subr.bf16.mxu0 %v14154_v23  ;;  %11463 = vmatprep.subr.bf16.mxu1 %v15388_v63 }
0x1c38   :  { %v6302_v10 = vpop.f32.mrb[96].mxu0  ;;  %v6373_v1 = vpop.f32.mrb[104].mxu1 }
0x1c39   :  { %v6303_v17 = vadd.f32 %v6302_v10, %v14401_v35  ;;  %v6304_v26 = vpop.f32.mrb[97].mxu0  ;;  %v9983_v0 = vpop.f32.mrb[105].mxu1  ;;  %v6374_v46 = vadd.f32 %v6373_v1, %v14461_v55 }
0x1c3a   :  { %v6305_v22 = vadd.f32 %v6304_v26, %v14413_v15 }
0x1c3b   :  { %v6377_v2 = vadd.f32 %v6303_v17, %v14394_v9  ;;  %v15493_v9 = vsel %vm12437_vm6, %v14313_v56, %v14319_v6 }
0x1c3c   :  { %v6378_v60 = vadd.f32 %v6305_v22, %v15492_v5 }
0x1c3d   :  { %v8610_v47 = vmul.f32 -1.442695, %v6377_v2 }
0x1c3e   :  { %v8611_v3 = vmul.f32 -1.442695, %v6378_v60 }
0x1c3f   :  { %11896 = vpow2.f32 %v8610_v47 }
0x1c40   :  { %11898 = vpow2.f32 %v8611_v3 }
0x1c49   :  { %v11897_v50 = vpop.eup %11896 }
0x1c4a   :  { %v6385_v32 = vadd.f32 1.0, %v11897_v50  ;;  %v11899_v19 = vpop.eup %11898 }
0x1c4b   :  { %v6386_v13 = vadd.f32 1.0, %v11899_v19  ;;  %v15494_v19 = vsel %vm12379_vm5, %v14343_v37, %v14367_v34 }
0x1c4c   :  { %11900 = vrcp.f32 %v6385_v32 }
0x1c4d   :  { %11902 = vrcp.f32 %v6386_v13 }
0x1c56   :  { %v11901_v41 = vpop.eup %11900 }
0x1c57   :  { %v6391_v53 = vmul.f32 %v11901_v41, %v6374_v46  ;;  %v11903_v17 = vpop.eup %11902 }
0x1c58   :  { %v6394_v26 = vsub.f32 1.0, %v11903_v17  ;;  %v6396_v2 = vmul.f32 %v11903_v17, %v6223_v42 }
0x1c59   :  { %v6392_v10 = vadd.f32 %v6391_v53, %v15493_v9 }
0x1c5b   :  { %11904 = vtanh.f32 %v6392_v10 }
0x1c65   :  { %v11905_v0 = vpop.eup %11904 }
0x1c66   :  { %v6395_v22 = vmul.f32 %v11905_v0, %v6394_v26 }
0x1c68   :  { %v6397_v5 = vadd.f32 %v6396_v2, %v6395_v22  ;;  %v15496_v2 = vld [vmem:[#allocation20_spill] sm:$0xff] }
0x1c6a   :  { %v6398_v1 = vsel %vm113_vm12, %v6397_v5, %v6223_v42 }
0x1c6b   :  { %8612 = vmatmul.mubr.msk.f32.vlgmr.msra.gmra.mrb[98].mxu0 %vm490_vm8, %v6398_v1  ;;  %10009 = vmatmul.mubr.msk.f32.vlgmr.msra.gmra.mrb[106].mxu1 %vm490_vm8, %v6398_v1 }
0x1c6c   :  { %11442 = vmatpush1.bf16.msra.mxu0 %v14178_v48  ;;  %11465 = vmatpush3.bf16.msra.mxu1 %v14182_v57 }
0x1c6d   :  { %11444 = vmatprep.subr.bf16.mxu0 %v14180_v29  ;;  %11466 = vmatprep.subr.bf16.mxu1 %v15388_v63 }
0x1c6e   :  { %6644 = vmatprep.mubr.f32.mxu0 %v15389_v4  ;;  %10035 = vmatprep.mubr.msk.f32.mxu1 %vm12085_vm2, %v15389_v4 }
0x1c70   :  { %11446 = vmatpush1.bf16.msra.mxu0 %v14190_v12  ;;  %11468 = vmatpush3.bf16.msra.mxu1 %v14196_v16 }
0x1c71   :  { %11448 = vmatprep.subr.bf16.mxu0 %v14193_v58  ;;  %11469 = vmatprep.subr.bf16.mxu1 %v15388_v63 }
0x1c74   :  { %11450 = vmatpush1.bf16.msra.mxu0 %v14204_v49  ;;  %11471 = vmatpush3.bf16.msra.mxu1 %v14210_v62 }
0x1c75   :  { %11452 = vmatprep.subr.bf16.mxu0 %v14207_v7  ;;  %11472 = vmatprep.subr.bf16.mxu1 %v15388_v63 }
0x1c78   :  { %11454 = vmatpush1.bf16.msra.mxu0 %v14218_v21  ;;  %11474 = vmatpush3.bf16.msra.mxu1 %v14224_v61 }
0x1c79   :  { %11456 = vmatprep.subr.bf16.mxu0 %v14221_v8  ;;  %11475 = vmatprep.subr.bf16.mxu1 %v15388_v63 }
0x1c7c   :  { %11458 = vmatpush1.bf16.msra.mxu0 %v14231_v39  ;;  %11477 = vmatpush3.bf16.msra.mxu1 %v14238_v51 }
0x1c7d   :  { %11460 = vmatprep.subr.bf16.mxu0 %v14235_v27  ;;  %11478 = vmatprep.subr.bf16.mxu1 %v15388_v63 }
0x1c80   :  { %11462 = vmatpush1.bf16.msra.mxu0 %v14244_v44  ;;  %11480 = vmatpush3.bf16.msra.mxu1 %v14248_v28 }
0x1c81   :  { %11482 = vmatprep.subr.bf16.mxu0 %v14154_v23  ;;  %11505 = vmatprep.subr.bf16.mxu1 %v15388_v63 }
0x1d3e   :  { %v6477_v59 = vpop.f32.mrb[98].mxu0  ;;  %v6548_v42 = vpop.f32.mrb[106].mxu1 }
0x1d3f   :  { %v6478_v60 = vadd.f32 %v6477_v59, %v14401_v35  ;;  %v6479_v47 = vpop.f32.mrb[99].mxu0  ;;  %v10010_v3 = vpop.f32.mrb[107].mxu1  ;;  %v6549_v26 = vadd.f32 %v6548_v42, %v14461_v55 }
0x1d40   :  { %v6480_v50 = vadd.f32 %v6479_v47, %v14413_v15 }
0x1d41   :  { %v6552_v32 = vadd.f32 %v6478_v60, %v14371_v24  ;;  %v15495_v24 = vld [vmem:[#allocation23_spill] sm:$0xff] }
0x1d42   :  { %v6553_v13 = vadd.f32 %v6480_v50, %v15494_v19  ;;  %v15497_v5 = vsel %vm12437_vm6, %v15495_v24, %v15496_v2 }
0x1d43   :  { %v8614_v46 = vmul.f32 -1.442695, %v6552_v32 }
0x1d44   :  { %v8615_v41 = vmul.f32 -1.442695, %v6553_v13 }
0x1d45   :  { %11906 = vpow2.f32 %v8614_v46 }
0x1d46   :  { %11908 = vpow2.f32 %v8615_v41 }
0x1d4f   :  { %v11907_v53 = vpop.eup %11906 }
0x1d50   :  { %v6560_v9 = vadd.f32 1.0, %v11907_v53  ;;  %v11909_v10 = vpop.eup %11908 }
0x1d51   :  { %v6561_v17 = vadd.f32 1.0, %v11909_v10 }
0x1d52   :  { %11910 = vrcp.f32 %v6560_v9 }
0x1d53   :  { %11912 = vrcp.f32 %v6561_v17  ;;  %v15499_v17 = vld [vmem:[#allocation22_spill] sm:$0xff] }
0x1d5c   :  { %v11911_v0 = vpop.eup %11910 }
0x1d5d   :  { %v6566_v22 = vmul.f32 %v11911_v0, %v6549_v26  ;;  %v11913_v60 = vpop.eup %11912  ;;  %v15500_v0 = vsel %vm12379_vm5, %v14367_v34, %v14343_v37  ;;  %v15501_v37 = vsel %vm12437_vm6, %v15496_v2, %v15495_v24 }
0x1d5e   :  { %v6569_v47 = vsub.f32 1.0, %v11913_v60  ;;  %v6571_v32 = vmul.f32 %v11913_v60, %v6398_v1 }
0x1d5f   :  { %v6567_v59 = vadd.f32 %v6566_v22, %v15497_v5 }
0x1d61   :  { %11914 = vtanh.f32 %v6567_v59 }
0x1d6b   :  { %v11915_v3 = vpop.eup %11914 }
0x1d6c   :  { %v6570_v50 = vmul.f32 %v11915_v3, %v6569_v47 }
0x1d6e   :  { %v6572_v19 = vadd.f32 %v6571_v32, %v6570_v50 }
0x1d70   :  { %v6573_v42 = vsel %vm115_vm13, %v6572_v19, %v6398_v1 }
0x1d71   :  { %8616 = vmatmul.mubr.msk.f32.vlgmr.msra.gmra.mrb[100].mxu0 %vm490_vm8, %v6573_v42  ;;  %10036 = vmatmul.mubr.msk.f32.vlgmr.msra.gmra.mrb[108].mxu1 %vm490_vm8, %v6573_v42 }
0x1d72   :  { %11484 = vmatpush1.bf16.msra.mxu0 %v14178_v48  ;;  %11507 = vmatpush3.bf16.msra.mxu1 %v14182_v57 }
0x1d73   :  { %11486 = vmatprep.subr.bf16.mxu0 %v14180_v29  ;;  %11508 = vmatprep.subr.bf16.mxu1 %v15388_v63 }
0x1d74   :  { %6813 = vmatprep.mubr.f32.mxu0 %v15389_v4  ;;  %10062 = vmatprep.mubr.msk.f32.mxu1 %vm12085_vm2, %v15389_v4 }
0x1d76   :  { %11488 = vmatpush1.bf16.msra.mxu0 %v14190_v12  ;;  %11510 = vmatpush3.bf16.msra.mxu1 %v14196_v16 }
0x1d77   :  { %11490 = vmatprep.subr.bf16.mxu0 %v14193_v58  ;;  %11511 = vmatprep.subr.bf16.mxu1 %v15388_v63 }
0x1d7a   :  { %11492 = vmatpush1.bf16.msra.mxu0 %v14204_v49  ;;  %11513 = vmatpush3.bf16.msra.mxu1 %v14210_v62 }
0x1d7b   :  { %11494 = vmatprep.subr.bf16.mxu0 %v14207_v7  ;;  %11514 = vmatprep.subr.bf16.mxu1 %v15388_v63 }
0x1d7e   :  { %11496 = vmatpush1.bf16.msra.mxu0 %v14218_v21  ;;  %11516 = vmatpush3.bf16.msra.mxu1 %v14224_v61 }
0x1d7f   :  { %11498 = vmatprep.subr.bf16.mxu0 %v14221_v8  ;;  %11517 = vmatprep.subr.bf16.mxu1 %v15388_v63 }
0x1d82   :  { %11500 = vmatpush1.bf16.msra.mxu0 %v14231_v39  ;;  %11519 = vmatpush3.bf16.msra.mxu1 %v14238_v51 }
0x1d83   :  { %11502 = vmatprep.subr.bf16.mxu0 %v14235_v27  ;;  %11520 = vmatprep.subr.bf16.mxu1 %v15388_v63 }
0x1d86   :  { %11504 = vmatpush1.bf16.msra.mxu0 %v14244_v44  ;;  %11522 = vmatpush3.bf16.msra.mxu1 %v14248_v28 }
0x1d87   :  { %11524 = vmatprep.subr.bf16.mxu0 %v14154_v23  ;;  %11547 = vmatprep.subr.bf16.mxu1 %v15388_v63 }
0x1e44   :  { %v6646_v1 = vpop.f32.mrb[100].mxu0  ;;  %v6717_v46 = vpop.f32.mrb[108].mxu1 }
0x1e45   :  { %v6647_v41 = vadd.f32 %v6646_v1, %v14401_v35  ;;  %v6648_v53 = vpop.f32.mrb[101].mxu0  ;;  %v10037_v9 = vpop.f32.mrb[109].mxu1  ;;  %v6718_v32 = vadd.f32 %v6717_v46, %v14461_v55 }
0x1e46   :  { %v6649_v10 = vadd.f32 %v6648_v53, %v14413_v15 }
0x1e47   :  { %v6721_v26 = vadd.f32 %v6647_v41, %v15499_v17 }
0x1e48   :  { %v6722_v22 = vadd.f32 %v6649_v10, %v15500_v0 }
0x1e49   :  { %v8618_v5 = vmul.f32 -1.442695, %v6721_v26 }
0x1e4a   :  { %v8619_v59 = vmul.f32 -1.442695, %v6722_v22 }
0x1e4b   :  { %11916 = vpow2.f32 %v8618_v5 }
0x1e4c   :  { %11918 = vpow2.f32 %v8619_v59  ;;  %v15503_v59 = vld [vmem:[#allocation21_spill] sm:$0xff] }
0x1e55   :  { %v11917_v60 = vpop.eup %11916 }
0x1e56   :  { %v6729_v47 = vadd.f32 1.0, %v11917_v60  ;;  %v11919_v3 = vpop.eup %11918 }
0x1e57   :  { %v6730_v50 = vadd.f32 1.0, %v11919_v3 }
0x1e58   :  { %11920 = vrcp.f32 %v6729_v47  ;;  %v15504_v47 = vsel %vm12379_vm5, %v14390_v36, %v14317_v14  ;;  %v15505_v14 = vsel %vm12437_vm6, %v14319_v6, %v14313_v56 }
0x1e59   :  { %11922 = vrcp.f32 %v6730_v50 }
0x1e62   :  { %v11921_v19 = vpop.eup %11920 }
0x1e63   :  { %v6735_v13 = vmul.f32 %v11921_v19, %v6718_v32  ;;  %v11923_v1 = vpop.eup %11922 }
0x1e64   :  { %v6738_v41 = vsub.f32 1.0, %v11923_v1  ;;  %v6740_v10 = vmul.f32 %v11923_v1, %v6573_v42 }
0x1e65   :  { %v6736_v34 = vadd.f32 %v6735_v13, %v15501_v37 }
0x1e67   :  { %11924 = vtanh.f32 %v6736_v34 }
0x1e71   :  { %v11925_v53 = vpop.eup %11924 }
0x1e72   :  { %v6739_v9 = vmul.f32 %v11925_v53, %v6738_v41 }
0x1e74   :  { %v6741_v17 = vadd.f32 %v6740_v10, %v6739_v9 }
0x1e76   :  { %v6742_v46 = vsel %vm117_vm14, %v6741_v17, %v6573_v42 }
0x1e77   :  { %8620 = vmatmul.mubr.msk.f32.vlgmr.msra.gmra.mrb[102].mxu0 %vm490_vm8, %v6742_v46  ;;  %10063 = vmatmul.mubr.msk.f32.vlgmr.msra.gmra.mrb[110].mxu1 %vm490_vm8, %v6742_v46 }
0x1e78   :  { %11526 = vmatpush1.bf16.msra.mxu0 %v14178_v48  ;;  %11549 = vmatpush3.bf16.msra.mxu1 %v14182_v57 }
0x1e79   :  { %11528 = vmatprep.subr.bf16.mxu0 %v14180_v29  ;;  %11550 = vmatprep.subr.bf16.mxu1 %v15388_v63 }
0x1e7a   :  { %6982 = vmatprep.mubr.f32.mxu0 %v15389_v4  ;;  %10089 = vmatprep.mubr.msk.f32.mxu1 %vm12085_vm2, %v15389_v4 }
0x1e7c   :  { %11530 = vmatpush1.bf16.msra.mxu0 %v14190_v12  ;;  %11552 = vmatpush3.bf16.msra.mxu1 %v14196_v16 }
0x1e7d   :  { %11532 = vmatprep.subr.bf16.mxu0 %v14193_v58  ;;  %11553 = vmatprep.subr.bf16.mxu1 %v15388_v63 }
0x1e80   :  { %11534 = vmatpush1.bf16.msra.mxu0 %v14204_v49  ;;  %11555 = vmatpush3.bf16.msra.mxu1 %v14210_v62 }
0x1e81   :  { %11536 = vmatprep.subr.bf16.mxu0 %v14207_v7  ;;  %11556 = vmatprep.subr.bf16.mxu1 %v15388_v63 }
0x1e84   :  { %11538 = vmatpush1.bf16.msra.mxu0 %v14218_v21  ;;  %11558 = vmatpush3.bf16.msra.mxu1 %v14224_v61 }
0x1e85   :  { %11540 = vmatprep.subr.bf16.mxu0 %v14221_v8  ;;  %11559 = vmatprep.subr.bf16.mxu1 %v15388_v63 }
0x1e88   :  { %11542 = vmatpush1.bf16.msra.mxu0 %v14231_v39  ;;  %11561 = vmatpush3.bf16.msra.mxu1 %v14238_v51 }
0x1e89   :  { %11544 = vmatprep.subr.bf16.mxu0 %v14235_v27  ;;  %11562 = vmatprep.subr.bf16.mxu1 %v15388_v63 }
0x1e8c   :  { %11546 = vmatpush1.bf16.msra.mxu0 %v14244_v44  ;;  %11564 = vmatpush3.bf16.msra.mxu1 %v14248_v28 }
0x1e8d   :  { %11566 = vmatprep.subr.bf16.mxu0 %v14154_v23  ;;  %11589 = vmatprep.subr.bf16.mxu1 %v15388_v63 }
0x1f4a   :  { %v6815_v24 = vpop.f32.mrb[102].mxu0  ;;  %v6886_v2 = vpop.f32.mrb[110].mxu1 }
0x1f4b   :  { %v6816_v42 = vadd.f32 %v6815_v24, %v14401_v35  ;;  %v6817_v0 = vpop.f32.mrb[103].mxu0  ;;  %v10064_v22 = vpop.f32.mrb[111].mxu1  ;;  %v6887_v34 = vadd.f32 %v6886_v2, %v14461_v55 }
0x1f4c   :  { %v6818_v5 = vadd.f32 %v6817_v0, %v14413_v15 }
0x1f4d   :  { %v6890_v60 = vadd.f32 %v6816_v42, %v15503_v59 }
0x1f4e   :  { %v6891_v3 = vadd.f32 %v6818_v5, %v15504_v47 }
0x1f4f   :  { %v8622_v50 = vmul.f32 -1.442695, %v6890_v60 }
0x1f50   :  { %v8623_v23 = vmul.f32 -1.442695, %v6891_v3 }
0x1f51   :  { %11926 = vpow2.f32 %v8622_v50 }
0x1f52   :  { %11928 = vpow2.f32 %v8623_v23 }
0x1f5b   :  { %v11927_v32 = vpop.eup %11926 }
0x1f5c   :  { %v6898_v19 = vadd.f32 1.0, %v11927_v32  ;;  %v11929_v13 = vpop.eup %11928  ;;  %v15511_v32 = vld [vmem:[#allocation29_spill] sm:$0xff] }
0x1f5d   :  { %v6899_v37 = vadd.f32 1.0, %v11929_v13 }
0x1f5e   :  { %11930 = vrcp.f32 %v6898_v19 }
0x1f5f   :  { %11932 = vrcp.f32 %v6899_v37 }
0x1f68   :  { %v11931_v1 = vpop.eup %11930 }
0x1f69   :  { %v6904_v41 = vmul.f32 %v11931_v1, %v6887_v34  ;;  %v11933_v53 = vpop.eup %11932 }
0x1f6a   :  { %v6907_v9 = vsub.f32 1.0, %v11933_v53  ;;  %v6909_v26 = vmul.f32 %v11933_v53, %v6742_v46 }
0x1f6b   :  { %v6905_v36 = vadd.f32 %v6904_v41, %v15505_v14 }
0x1f6d   :  { %11934 = vtanh.f32 %v6905_v36 }
0x1f77   :  { %v11935_v10 = vpop.eup %11934 }
0x1f78   :  { %v6908_v17 = vmul.f32 %v11935_v10, %v6907_v9 }
0x1f7a   :  { %v6910_v24 = vadd.f32 %v6909_v26, %v6908_v17 }
0x1f7c   :  { %v6911_v2 = vsel %vm119_vm15, %v6910_v24, %v6742_v46 }
0x1f7d   :  { %8624 = vmatmul.mubr.msk.f32.vlgmr.msra.gmra.mrb[104].mxu0 %vm490_vm8, %v6911_v2  ;;  %10090 = vmatmul.mubr.msk.f32.vlgmr.msra.gmra.mrb[112].mxu1 %vm490_vm8, %v6911_v2 }
0x1f7e   :  { %11568 = vmatpush1.bf16.msra.mxu0 %v14178_v48  ;;  %11591 = vmatpush3.bf16.msra.mxu1 %v14182_v57 }
0x1f7f   :  { %11570 = vmatprep.subr.bf16.mxu0 %v14180_v29  ;;  %11592 = vmatprep.subr.bf16.mxu1 %v15388_v63 }
0x1f80   :  { %7151 = vmatprep.mubr.f32.mxu0 %v15389_v4  ;;  %10116 = vmatprep.mubr.msk.f32.mxu1 %vm12085_vm2, %v15389_v4 }
0x1f82   :  { %11572 = vmatpush1.bf16.msra.mxu0 %v14190_v12  ;;  %11594 = vmatpush3.bf16.msra.mxu1 %v14196_v16  ;;  %v15507_v16 = vld [vmem:[#allocation28_spill] sm:$0xff] }
0x1f83   :  { %11574 = vmatprep.subr.bf16.mxu0 %v14193_v58  ;;  %11595 = vmatprep.subr.bf16.mxu1 %v15388_v63 }
0x1f86   :  { %11576 = vmatpush1.bf16.msra.mxu0 %v14204_v49  ;;  %11597 = vmatpush3.bf16.msra.mxu1 %v14210_v62 }
0x1f87   :  { %11578 = vmatprep.subr.bf16.mxu0 %v14207_v7  ;;  %11598 = vmatprep.subr.bf16.mxu1 %v15388_v63  ;;  %v15508_v7 = vsel %vm12379_vm5, %v14416_v18, %v14309_v25  ;;  %v15509_v25 = vsel %vm12437_vm6, %v14347_v54, %v14299_v45 }
0x1f8a   :  { %11580 = vmatpush1.bf16.msra.mxu0 %v14218_v21  ;;  %11600 = vmatpush3.bf16.msra.mxu1 %v14224_v61 }
0x1f8b   :  { %11582 = vmatprep.subr.bf16.mxu0 %v14221_v8  ;;  %11601 = vmatprep.subr.bf16.mxu1 %v15388_v63 }
0x1f8e   :  { %11584 = vmatpush1.bf16.msra.mxu0 %v14231_v39  ;;  %11603 = vmatpush3.bf16.msra.mxu1 %v14238_v51 }
0x1f8f   :  { %11586 = vmatprep.subr.bf16.mxu0 %v14235_v27  ;;  %11604 = vmatprep.subr.bf16.mxu1 %v15388_v63 }
0x1f92   :  { %11588 = vmatpush1.bf16.msra.mxu0 %v14244_v44  ;;  %11606 = vmatpush3.bf16.msra.mxu1 %v14248_v28 }
0x2050   :  { %v6984_v4 = vpop.f32.mrb[104].mxu0  ;;  %v7055_v48 = vpop.f32.mrb[112].mxu1 }
0x2051   :  { %v6985_v29 = vadd.f32 %v6984_v4, %v14401_v35  ;;  %v6986_v57 = vpop.f32.mrb[105].mxu0  ;;  %v10091_v12 = vpop.f32.mrb[113].mxu1  ;;  %v7056_v51 = vadd.f32 %v7055_v48, %v14461_v55 }
0x2052   :  { %v6987_v58 = vadd.f32 %v6986_v57, %v14413_v15 }
0x2053   :  { %v7059_v49 = vadd.f32 %v6985_v29, %v15507_v16 }
0x2054   :  { %v7060_v63 = vadd.f32 %v6987_v58, %v15508_v7 }
0x2055   :  { %v8626_v62 = vmul.f32 -1.442695, %v7059_v49 }
0x2056   :  { %v8627_v21 = vmul.f32 -1.442695, %v7060_v63 }
0x2057   :  { %11936 = vpow2.f32 %v8626_v62 }
0x2058   :  { %11938 = vpow2.f32 %v8627_v21 }
0x2061   :  { %v11937_v8 = vpop.eup %11936 }
0x2062   :  { %v7067_v61 = vadd.f32 1.0, %v11937_v8  ;;  %v11939_v39 = vpop.eup %11938 }
0x2063   :  { %v7068_v27 = vadd.f32 1.0, %v11939_v39 }
0x2064   :  { %11940 = vrcp.f32 %v7067_v61 }
0x2065   :  { %11942 = vrcp.f32 %v7068_v27 }
0x206e   :  { %v11941_v44 = vpop.eup %11940 }
0x206f   :  { %v7073_v28 = vmul.f32 %v11941_v44, %v7056_v51  ;;  %v11943_v6 = vpop.eup %11942 }
0x2070   :  { %v7076_v18 = vsub.f32 1.0, %v11943_v6  ;;  %v7078_v22 = vmul.f32 %v11943_v6, %v6911_v2 }
0x2071   :  { %v7074_v56 = vadd.f32 %v7073_v28, %v15509_v25 }
0x2073   :  { %11944 = vtanh.f32 %v7074_v56 }
0x207d   :  { %v11945_v46 = vpop.eup %11944 }
0x207e   :  { %v7077_v0 = vmul.f32 %v11945_v46, %v7076_v18 }
0x2080   :  { %v7079_v5 = vadd.f32 %v7078_v22, %v7077_v0 }
0x2082   :  { %v7080_v60 = vsel %vm121_vm0, %v7079_v5, %v6911_v2 }
0x2083   :  { %8628 = vmatmul.mubr.msk.f32.vlgmr.msra.gmra.mrb[106].mxu0 %vm490_vm8, %v7080_v60  ;;  %10117 = vmatmul.mubr.msk.f32.vlgmr.msra.gmra.mrb[114].mxu1 %vm490_vm8, %v7080_v60 }
0x2156   :  { %v7153_v47 = vpop.f32.mrb[106].mxu0  ;;  %v7224_v3 = vpop.f32.mrb[114].mxu1 }
0x2157   :  { %v7154_v45 = vadd.f32 %v7153_v47, %v14401_v35  ;;  %v7155_v54 = vpop.f32.mrb[107].mxu0  ;;  %v10118_v50 = vpop.f32.mrb[115].mxu1  ;;  %v7225_v36 = vadd.f32 %v7224_v3, %v14461_v55 }
0x2158   :  { %v7156_v23 = vadd.f32 %v7155_v54, %v14413_v15 }
0x2159   :  { %v7228_v19 = vadd.f32 %v7154_v45, %v15511_v32 }
0x215a   :  { %v7229_v13 = vadd.f32 %v7156_v23, %v7082_v52 }
0x215b   :  { %v8630_v37 = vmul.f32 -1.442695, %v7228_v19 }
0x215c   :  { %v8631_v34 = vmul.f32 -1.442695, %v7229_v13 }
0x215d   :  { %11946 = vpow2.f32 %v8630_v37 }
0x215e   :  { %11948 = vpow2.f32 %v8631_v34 }
0x2167   :  { %v11947_v1 = vpop.eup %11946 }
0x2168   :  { %v7236_v41 = vadd.f32 1.0, %v11947_v1  ;;  %v11949_v35 = vpop.eup %11948 }
0x2169   :  { %v7237_v14 = vadd.f32 1.0, %v11949_v35 }
0x216a   :  { %11950 = vrcp.f32 %v7236_v41 }
0x216b   :  { %11952 = vrcp.f32 %v7237_v14 }
0x2174   :  { %v11951_v15 = vpop.eup %11950 }
0x2175   :  { %v7242_v53 = vmul.f32 %v11951_v15, %v7225_v36  ;;  %v11953_v33 = vpop.eup %11952 }
0x2176   :  { %v7245_v52 = vsub.f32 1.0, %v11953_v33  ;;  %v7247_v17 = vmul.f32 %v11953_v33, %v7080_v60 }
0x2177   :  { %v7243_v20 = vadd.f32 %v7242_v53, %v15512_v43 }
0x2179   :  { %11954 = vtanh.f32 %v7243_v20 }
0x2183   :  { %v11955_v9 = vpop.eup %11954 }
0x2184   :  { %v7246_v10 = vmul.f32 %v11955_v9, %v7245_v52 }
0x2186   :  { %v7248_v26 = vadd.f32 %v7247_v17, %v7246_v10 }
0x2188   :  { %v7249_v55 = vsel %vm123_vm4, %v7248_v26, %v7080_v60 }
0x2189   :  { %12066 = dma.done.wait [#allocation5], 23040 }
0x218a   :  { %12067 = vsyncadd [#allocation5], 4294944256  ;;  %v15514_v42 = vmov 0   ;;  %v7256_v38 = vld [vmem:[#allocation4 + $0x8] sm:$0xff]  ;;  %v7258_v40 = vld [vmem:[#allocation4 + $0x18] sm:$0xff]  ;;  %v14767_v6 = vpack.c.bf16 %v7249_v55, %v7249_v55 }
0x218b   :  { %7628 = vmatprep.mubr.bf16.mxu0 %v15514_v42  ;;  %7669 = vmatprep.mubr.bf16.mxu1 %v15514_v42  ;;  %v7255_v31 = vld [vmem:[#allocation4] sm:$0xff]  ;;  %v7257_v2 = vld [vmem:[#allocation4 + $0x10] sm:$0xff]  ;;  %v7286_v4 = vld [vmem:[#allocation4 + $0xf8] sm:$0xff] }
0x218c   :  { %7596 = vmatprep.subr.bf16.mxu0 %v7256_v38  ;;  %7637 = vmatprep.subr.bf16.mxu1 %v7258_v40  ;;  %v7288_v48 = vld [vmem:[#allocation4 + $0x108] sm:$0xff]  ;;  %v7285_v11 = vld [vmem:[#allocation4 + $0xf0] sm:$0xff]  ;;  %v7287_v29 = vld [vmem:[#allocation4 + $0x100] sm:$0xff] }
0x218d   :  { %7597 = vmatpush1.bf16.msra.mxu0 %v7255_v31  ;;  %7638 = vmatpush1.bf16.msra.mxu1 %v7257_v2  ;;  %v7316_v57 = vld [vmem:[#allocation4 + $0x1e8] sm:$0xff]  ;;  %v7318_v12 = vld [vmem:[#allocation4 + $0x1f8] sm:$0xff]  ;;  %v7315_v58 = vld [vmem:[#allocation4 + $0x1e0] sm:$0xff] }
0x218e   :  { %7598 = vmatprep.subr.bf16.mxu0 %v7286_v4  ;;  %7639 = vmatprep.subr.bf16.mxu1 %v7288_v48  ;;  %v7317_v16 = vld [vmem:[#allocation4 + $0x1f0] sm:$0xff]  ;;  %v7346_v49 = vld [vmem:[#allocation4 + $0x2d8] sm:$0xff]  ;;  %v7348_v7 = vld [vmem:[#allocation4 + $0x2e8] sm:$0xff] }
0x218f   :  { %v7345_v63 = vld [vmem:[#allocation4 + $0x2d0] sm:$0xff]  ;;  %v7347_v62 = vld [vmem:[#allocation4 + $0x2e0] sm:$0xff]  ;;  %v7376_v21 = vld [vmem:[#allocation4 + $0x3c8] sm:$0xff] }
0x2190   :  { %v7378_v8 = vld [vmem:[#allocation4 + $0x3d8] sm:$0xff]  ;;  %v7375_v61 = vld [vmem:[#allocation4 + $0x3c0] sm:$0xff]  ;;  %v7377_v39 = vld [vmem:[#allocation4 + $0x3d0] sm:$0xff] }
0x2191   :  { %7599 = vmatpush1.bf16.msra.mxu0 %v7285_v11  ;;  %7640 = vmatpush1.bf16.msra.mxu1 %v7287_v29  ;;  %v7406_v27 = vld [vmem:[#allocation4 + $0x4b8] sm:$0xff]  ;;  %v7408_v51 = vld [vmem:[#allocation4 + $0x4c8] sm:$0xff]  ;;  %v7405_v44 = vld [vmem:[#allocation4 + $0x4b0] sm:$0xff] }
0x2192   :  { %7600 = vmatprep.subr.bf16.mxu0 %v7316_v57  ;;  %7641 = vmatprep.subr.bf16.mxu1 %v7318_v12  ;;  %v7407_v28 = vld [vmem:[#allocation4 + $0x4c0] sm:$0xff]  ;;  %v7260_v25 = vld [vmem:[#allocation4 + $0x28] sm:$0xff]  ;;  %v7262_v56 = vld [vmem:[#allocation4 + $0x38] sm:$0xff] }
0x2193   :  { %v7259_v18 = vld [vmem:[#allocation4 + $0x20] sm:$0xff]  ;;  %v7261_v46 = vld [vmem:[#allocation4 + $0x30] sm:$0xff]  ;;  %v7290_v0 = vld [vmem:[#allocation4 + $0x118] sm:$0xff] }
0x2194   :  { %v7292_v22 = vld [vmem:[#allocation4 + $0x128] sm:$0xff]  ;;  %v7289_v5 = vld [vmem:[#allocation4 + $0x110] sm:$0xff]  ;;  %v7291_v59 = vld [vmem:[#allocation4 + $0x120] sm:$0xff] }
0x2195   :  { %7601 = vmatpush1.bf16.msra.mxu0 %v7315_v58  ;;  %7642 = vmatpush1.bf16.msra.mxu1 %v7317_v16  ;;  %v7320_v60 = vld [vmem:[#allocation4 + $0x208] sm:$0xff]  ;;  %v7322_v47 = vld [vmem:[#allocation4 + $0x218] sm:$0xff]  ;;  %v7319_v3 = vld [vmem:[#allocation4 + $0x200] sm:$0xff] }
0x2196   :  { %7602 = vmatprep.subr.bf16.mxu0 %v7346_v49  ;;  %7643 = vmatprep.subr.bf16.mxu1 %v7348_v7  ;;  %v7321_v45 = vld [vmem:[#allocation4 + $0x210] sm:$0xff]  ;;  %v7350_v54 = vld [vmem:[#allocation4 + $0x2f8] sm:$0xff]  ;;  %v7352_v50 = vld [vmem:[#allocation4 + $0x308] sm:$0xff] }
0x2197   :  { %v7349_v23 = vld [vmem:[#allocation4 + $0x2f0] sm:$0xff]  ;;  %v7351_v32 = vld [vmem:[#allocation4 + $0x300] sm:$0xff]  ;;  %v7380_v19 = vld [vmem:[#allocation4 + $0x3e8] sm:$0xff] }
0x2198   :  { %v7382_v13 = vld [vmem:[#allocation4 + $0x3f8] sm:$0xff]  ;;  %v7379_v37 = vld [vmem:[#allocation4 + $0x3e0] sm:$0xff]  ;;  %v7381_v34 = vld [vmem:[#allocation4 + $0x3f0] sm:$0xff] }
0x2199   :  { %7603 = vmatpush1.bf16.msra.mxu0 %v7345_v63  ;;  %7644 = vmatpush1.bf16.msra.mxu1 %v7347_v62  ;;  %v7410_v1 = vld [vmem:[#allocation4 + $0x4d8] sm:$0xff]  ;;  %v7412_v41 = vld [vmem:[#allocation4 + $0x4e8] sm:$0xff]  ;;  %v7409_v35 = vld [vmem:[#allocation4 + $0x4d0] sm:$0xff] }
0x219a   :  { %7604 = vmatprep.subr.bf16.mxu0 %v7376_v21  ;;  %7645 = vmatprep.subr.bf16.mxu1 %v7378_v8  ;;  %v7411_v14 = vld [vmem:[#allocation4 + $0x4e0] sm:$0xff]  ;;  %v7264_v36 = vld [vmem:[#allocation4 + $0x48] sm:$0xff]  ;;  %v7266_v15 = vld [vmem:[#allocation4 + $0x58] sm:$0xff] }
0x219b   :  { %v7263_v53 = vld [vmem:[#allocation4 + $0x40] sm:$0xff]  ;;  %v7265_v43 = vld [vmem:[#allocation4 + $0x50] sm:$0xff]  ;;  %v7294_v20 = vld [vmem:[#allocation4 + $0x138] sm:$0xff] }
0x219c   :  { %v7296_v33 = vld [vmem:[#allocation4 + $0x148] sm:$0xff]  ;;  %v7293_v52 = vld [vmem:[#allocation4 + $0x130] sm:$0xff]  ;;  %v7295_v9 = vld [vmem:[#allocation4 + $0x140] sm:$0xff] }
0x219d   :  { %7605 = vmatpush1.bf16.msra.mxu0 %v7375_v61  ;;  %7646 = vmatpush1.bf16.msra.mxu1 %v7377_v39  ;;  %v7324_v10 = vld [vmem:[#allocation4 + $0x228] sm:$0xff]  ;;  %v7326_v17 = vld [vmem:[#allocation4 + $0x238] sm:$0xff]  ;;  %v7323_v26 = vld [vmem:[#allocation4 + $0x220] sm:$0xff] }
0x219e   :  { %7606 = vmatprep.subr.bf16.mxu0 %v7406_v27  ;;  %7647 = vmatprep.subr.bf16.mxu1 %v7408_v51  ;;  %v7325_v24 = vld [vmem:[#allocation4 + $0x230] sm:$0xff]  ;;  %v7354_v55 = vld [vmem:[#allocation4 + $0x318] sm:$0xff]  ;;  %v7356_v38 = vld [vmem:[#allocation4 + $0x328] sm:$0xff] }
0x219f   :  { %v7353_v40 = vld [vmem:[#allocation4 + $0x310] sm:$0xff]  ;;  %v7355_v31 = vld [vmem:[#allocation4 + $0x320] sm:$0xff]  ;;  %v7384_v2 = vld [vmem:[#allocation4 + $0x408] sm:$0xff] }
0x21a0   :  { %v7386_v4 = vld [vmem:[#allocation4 + $0x418] sm:$0xff]  ;;  %v7383_v48 = vld [vmem:[#allocation4 + $0x400] sm:$0xff]  ;;  %v7385_v11 = vld [vmem:[#allocation4 + $0x410] sm:$0xff] }
0x21a1   :  { %7607 = vmatpush1.bf16.msra.mxu0 %v7405_v44  ;;  %7648 = vmatpush1.bf16.msra.mxu1 %v7407_v28  ;;  %v7414_v29 = vld [vmem:[#allocation4 + $0x4f8] sm:$0xff]  ;;  %v7416_v57 = vld [vmem:[#allocation4 + $0x508] sm:$0xff]  ;;  %v7413_v12 = vld [vmem:[#allocation4 + $0x4f0] sm:$0xff] }
0x21a2   :  { %7678 = vmatprep.subr.bf16.mxu0 %v7260_v25  ;;  %7719 = vmatprep.subr.bf16.mxu1 %v7262_v56  ;;  %v7415_v58 = vld [vmem:[#allocation4 + $0x500] sm:$0xff]  ;;  %v7268_v16 = vld [vmem:[#allocation4 + $0x68] sm:$0xff]  ;;  %v7270_v49 = vld [vmem:[#allocation4 + $0x78] sm:$0xff] }
0x21a3   :  { %v7267_v7 = vld [vmem:[#allocation4 + $0x60] sm:$0xff]  ;;  %v7269_v63 = vld [vmem:[#allocation4 + $0x70] sm:$0xff]  ;;  %v7298_v62 = vld [vmem:[#allocation4 + $0x158] sm:$0xff] }
0x21a4   :  { %8632 = vmatmul.mubr.msk.bf16.vlgmr.msra.gmra.mrb[108].mxu0 %vm490_vm8, %v14767_v6  ;;  %8633 = vmatmul.mubr.msk.bf16.vlgmr.msra.gmra.mrb[116].mxu1 %vm490_vm8, %v14767_v6  ;;  %v7300_v21 = vld [vmem:[#allocation4 + $0x168] sm:$0xff]  ;;  %v7297_v8 = vld [vmem:[#allocation4 + $0x150] sm:$0xff]  ;;  %v7299_v61 = vld [vmem:[#allocation4 + $0x160] sm:$0xff] }
0x21a5   :  { %7679 = vmatpush1.bf16.msra.mxu0 %v7259_v18  ;;  %7720 = vmatpush1.bf16.msra.mxu1 %v7261_v46  ;;  %v7328_v39 = vld [vmem:[#allocation4 + $0x248] sm:$0xff]  ;;  %v7330_v27 = vld [vmem:[#allocation4 + $0x258] sm:$0xff]  ;;  %v7327_v51 = vld [vmem:[#allocation4 + $0x240] sm:$0xff] }
0x21a6   :  { %7680 = vmatprep.subr.bf16.mxu0 %v7290_v0  ;;  %7721 = vmatprep.subr.bf16.mxu1 %v7292_v22  ;;  %v7329_v44 = vld [vmem:[#allocation4 + $0x250] sm:$0xff]  ;;  %v7358_v28 = vld [vmem:[#allocation4 + $0x338] sm:$0xff]  ;;  %v7360_v25 = vld [vmem:[#allocation4 + $0x348] sm:$0xff] }
0x21a7   :  { %7710 = vmatprep.mubr.bf16.mxu0 %v15514_v42  ;;  %7751 = vmatprep.mubr.bf16.mxu1 %v15514_v42  ;;  %v7357_v56 = vld [vmem:[#allocation4 + $0x330] sm:$0xff]  ;;  %v7359_v18 = vld [vmem:[#allocation4 + $0x340] sm:$0xff]  ;;  %v7388_v46 = vld [vmem:[#allocation4 + $0x428] sm:$0xff] }
0x21a8   :  { %v7390_v0 = vld [vmem:[#allocation4 + $0x438] sm:$0xff]  ;;  %v7387_v22 = vld [vmem:[#allocation4 + $0x420] sm:$0xff] }
0x21a9   :  { %7681 = vmatpush1.bf16.msra.mxu0 %v7289_v5  ;;  %7722 = vmatpush1.bf16.msra.mxu1 %v7291_v59  ;;  %v7389_v5 = vld [vmem:[#allocation4 + $0x430] sm:$0xff]  ;;  %v7418_v59 = vld [vmem:[#allocation4 + $0x518] sm:$0xff] }
0x21aa   :  { %7682 = vmatprep.subr.bf16.mxu0 %v7320_v60  ;;  %7723 = vmatprep.subr.bf16.mxu1 %v7322_v47  ;;  %v7420_v60 = vld [vmem:[#allocation4 + $0x528] sm:$0xff]  ;;  %v7417_v47 = vld [vmem:[#allocation4 + $0x510] sm:$0xff] }
0x21ad   :  { %7683 = vmatpush1.bf16.msra.mxu0 %v7319_v3  ;;  %7724 = vmatpush1.bf16.msra.mxu1 %v7321_v45  ;;  %v7419_v3 = vld [vmem:[#allocation4 + $0x520] sm:$0xff]  ;;  %v7272_v45 = vld [vmem:[#allocation4 + $0x88] sm:$0xff] }
0x21ae   :  { %7684 = vmatprep.subr.bf16.mxu0 %v7350_v54  ;;  %7725 = vmatprep.subr.bf16.mxu1 %v7352_v50  ;;  %v7274_v54 = vld [vmem:[#allocation4 + $0x98] sm:$0xff]  ;;  %v7271_v50 = vld [vmem:[#allocation4 + $0x80] sm:$0xff] }
0x21b1   :  { %7685 = vmatpush1.bf16.msra.mxu0 %v7349_v23  ;;  %7726 = vmatpush1.bf16.msra.mxu1 %v7351_v32  ;;  %v7273_v23 = vld [vmem:[#allocation4 + $0x90] sm:$0xff]  ;;  %v7302_v32 = vld [vmem:[#allocation4 + $0x178] sm:$0xff] }
0x21b2   :  { %7686 = vmatprep.subr.bf16.mxu0 %v7380_v19  ;;  %7727 = vmatprep.subr.bf16.mxu1 %v7382_v13  ;;  %v7304_v19 = vld [vmem:[#allocation4 + $0x188] sm:$0xff]  ;;  %v7301_v13 = vld [vmem:[#allocation4 + $0x170] sm:$0xff] }
0x21b5   :  { %7687 = vmatpush1.bf16.msra.mxu0 %v7379_v37  ;;  %7728 = vmatpush1.bf16.msra.mxu1 %v7381_v34  ;;  %v7303_v37 = vld [vmem:[#allocation4 + $0x180] sm:$0xff]  ;;  %v7332_v34 = vld [vmem:[#allocation4 + $0x268] sm:$0xff] }
0x21b6   :  { %7688 = vmatprep.subr.bf16.mxu0 %v7410_v1  ;;  %7729 = vmatprep.subr.bf16.mxu1 %v7412_v41  ;;  %v7334_v1 = vld [vmem:[#allocation4 + $0x278] sm:$0xff]  ;;  %v7331_v41 = vld [vmem:[#allocation4 + $0x260] sm:$0xff] }
0x21b9   :  { %7689 = vmatpush1.bf16.msra.mxu0 %v7409_v35  ;;  %7730 = vmatpush1.bf16.msra.mxu1 %v7411_v14  ;;  %v7333_v35 = vld [vmem:[#allocation4 + $0x270] sm:$0xff]  ;;  %v7362_v14 = vld [vmem:[#allocation4 + $0x358] sm:$0xff] }
0x21ba   :  { %7760 = vmatprep.subr.bf16.mxu0 %v7264_v36  ;;  %7801 = vmatprep.subr.bf16.mxu1 %v7266_v15  ;;  %v7364_v36 = vld [vmem:[#allocation4 + $0x368] sm:$0xff]  ;;  %v7361_v15 = vld [vmem:[#allocation4 + $0x350] sm:$0xff] }
0x21bc   :  { %8634 = vmatmul.mubr.msk.bf16.vlgmr.msra.gmra.mrb[112].mxu0 %vm490_vm8, %v14767_v6  ;;  %8635 = vmatmul.mubr.msk.bf16.vlgmr.msra.gmra.mrb[120].mxu1 %vm490_vm8, %v14767_v6 }
0x21bd   :  { %7761 = vmatpush1.bf16.msra.mxu0 %v7263_v53  ;;  %7802 = vmatpush1.bf16.msra.mxu1 %v7265_v43  ;;  %v7363_v53 = vld [vmem:[#allocation4 + $0x360] sm:$0xff]  ;;  %v7392_v43 = vld [vmem:[#allocation4 + $0x448] sm:$0xff] }
0x21be   :  { %7762 = vmatprep.subr.bf16.mxu0 %v7294_v20  ;;  %7803 = vmatprep.subr.bf16.mxu1 %v7296_v33  ;;  %v7394_v20 = vld [vmem:[#allocation4 + $0x458] sm:$0xff]  ;;  %v7391_v33 = vld [vmem:[#allocation4 + $0x440] sm:$0xff] }
0x21bf   :  { %7792 = vmatprep.mubr.bf16.mxu0 %v15514_v42  ;;  %7833 = vmatprep.mubr.bf16.mxu1 %v15514_v42 }
0x21c1   :  { %7763 = vmatpush1.bf16.msra.mxu0 %v7293_v52  ;;  %7804 = vmatpush1.bf16.msra.mxu1 %v7295_v9  ;;  %v7393_v52 = vld [vmem:[#allocation4 + $0x450] sm:$0xff]  ;;  %v7422_v9 = vld [vmem:[#allocation4 + $0x538] sm:$0xff] }
0x21c2   :  { %7764 = vmatprep.subr.bf16.mxu0 %v7324_v10  ;;  %7805 = vmatprep.subr.bf16.mxu1 %v7326_v17  ;;  %v7424_v10 = vld [vmem:[#allocation4 + $0x548] sm:$0xff]  ;;  %v7421_v17 = vld [vmem:[#allocation4 + $0x530] sm:$0xff] }
0x21c5   :  { %7765 = vmatpush1.bf16.msra.mxu0 %v7323_v26  ;;  %7806 = vmatpush1.bf16.msra.mxu1 %v7325_v24  ;;  %v7423_v26 = vld [vmem:[#allocation4 + $0x540] sm:$0xff]  ;;  %v7276_v24 = vld [vmem:[#allocation4 + $0xa8] sm:$0xff] }
0x21c6   :  { %7766 = vmatprep.subr.bf16.mxu0 %v7354_v55  ;;  %7807 = vmatprep.subr.bf16.mxu1 %v7356_v38  ;;  %v7278_v55 = vld [vmem:[#allocation4 + $0xb8] sm:$0xff]  ;;  %v7275_v38 = vld [vmem:[#allocation4 + $0xa0] sm:$0xff] }
0x21c9   :  { %7767 = vmatpush1.bf16.msra.mxu0 %v7353_v40  ;;  %7808 = vmatpush1.bf16.msra.mxu1 %v7355_v31  ;;  %v7277_v40 = vld [vmem:[#allocation4 + $0xb0] sm:$0xff]  ;;  %v7306_v31 = vld [vmem:[#allocation4 + $0x198] sm:$0xff] }
0x21ca   :  { %7768 = vmatprep.subr.bf16.mxu0 %v7384_v2  ;;  %7809 = vmatprep.subr.bf16.mxu1 %v7386_v4  ;;  %v7308_v2 = vld [vmem:[#allocation4 + $0x1a8] sm:$0xff]  ;;  %v7305_v4 = vld [vmem:[#allocation4 + $0x190] sm:$0xff] }
0x21cd   :  { %7769 = vmatpush1.bf16.msra.mxu0 %v7383_v48  ;;  %7810 = vmatpush1.bf16.msra.mxu1 %v7385_v11  ;;  %v7307_v48 = vld [vmem:[#allocation4 + $0x1a0] sm:$0xff]  ;;  %v7336_v11 = vld [vmem:[#allocation4 + $0x288] sm:$0xff] }
0x21ce   :  { %7770 = vmatprep.subr.bf16.mxu0 %v7414_v29  ;;  %7811 = vmatprep.subr.bf16.mxu1 %v7416_v57  ;;  %v7338_v29 = vld [vmem:[#allocation4 + $0x298] sm:$0xff]  ;;  %v7335_v57 = vld [vmem:[#allocation4 + $0x280] sm:$0xff] }
0x21d1   :  { %7771 = vmatpush1.bf16.msra.mxu0 %v7413_v12  ;;  %7812 = vmatpush1.bf16.msra.mxu1 %v7415_v58  ;;  %v7337_v12 = vld [vmem:[#allocation4 + $0x290] sm:$0xff]  ;;  %v7366_v58 = vld [vmem:[#allocation4 + $0x378] sm:$0xff] }
0x21d2   :  { %7842 = vmatprep.subr.bf16.mxu0 %v7268_v16  ;;  %7883 = vmatprep.subr.bf16.mxu1 %v7270_v49  ;;  %v7368_v16 = vld [vmem:[#allocation4 + $0x388] sm:$0xff]  ;;  %v7365_v49 = vld [vmem:[#allocation4 + $0x370] sm:$0xff] }
0x21d4   :  { %8636 = vmatmul.mubr.msk.bf16.vlgmr.msra.gmra.mrb[116].mxu0 %vm490_vm8, %v14767_v6  ;;  %8637 = vmatmul.mubr.msk.bf16.vlgmr.msra.gmra.mrb[124].mxu1 %vm490_vm8, %v14767_v6 }
0x21d5   :  { %7843 = vmatpush1.bf16.msra.mxu0 %v7267_v7  ;;  %7884 = vmatpush1.bf16.msra.mxu1 %v7269_v63  ;;  %v7367_v7 = vld [vmem:[#allocation4 + $0x380] sm:$0xff]  ;;  %v7396_v63 = vld [vmem:[#allocation4 + $0x468] sm:$0xff] }
0x21d6   :  { %7844 = vmatprep.subr.bf16.mxu0 %v7298_v62  ;;  %7885 = vmatprep.subr.bf16.mxu1 %v7300_v21  ;;  %v7398_v62 = vld [vmem:[#allocation4 + $0x478] sm:$0xff]  ;;  %v7395_v21 = vld [vmem:[#allocation4 + $0x460] sm:$0xff] }
0x21d7   :  { %7874 = vmatprep.mubr.bf16.mxu0 %v15514_v42  ;;  %7915 = vmatprep.mubr.bf16.mxu1 %v15514_v42 }
0x21d9   :  { %7845 = vmatpush1.bf16.msra.mxu0 %v7297_v8  ;;  %7886 = vmatpush1.bf16.msra.mxu1 %v7299_v61  ;;  %v7397_v8 = vld [vmem:[#allocation4 + $0x470] sm:$0xff]  ;;  %v7426_v61 = vld [vmem:[#allocation4 + $0x558] sm:$0xff] }
0x21da   :  { %7846 = vmatprep.subr.bf16.mxu0 %v7328_v39  ;;  %7887 = vmatprep.subr.bf16.mxu1 %v7330_v27  ;;  %v7428_v39 = vld [vmem:[#allocation4 + $0x568] sm:$0xff]  ;;  %v7425_v27 = vld [vmem:[#allocation4 + $0x550] sm:$0xff] }
0x21dd   :  { %7847 = vmatpush1.bf16.msra.mxu0 %v7327_v51  ;;  %7888 = vmatpush1.bf16.msra.mxu1 %v7329_v44  ;;  %v7427_v51 = vld [vmem:[#allocation4 + $0x560] sm:$0xff]  ;;  %v7280_v44 = vld [vmem:[#allocation4 + $0xc8] sm:$0xff] }
0x21de   :  { %7848 = vmatprep.subr.bf16.mxu0 %v7358_v28  ;;  %7889 = vmatprep.subr.bf16.mxu1 %v7360_v25  ;;  %v7282_v28 = vld [vmem:[#allocation4 + $0xd8] sm:$0xff]  ;;  %v7279_v25 = vld [vmem:[#allocation4 + $0xc0] sm:$0xff] }
0x21e1   :  { %7849 = vmatpush1.bf16.msra.mxu0 %v7357_v56  ;;  %7890 = vmatpush1.bf16.msra.mxu1 %v7359_v18  ;;  %v7281_v56 = vld [vmem:[#allocation4 + $0xd0] sm:$0xff]  ;;  %v7310_v18 = vld [vmem:[#allocation4 + $0x1b8] sm:$0xff] }
0x21e2   :  { %7850 = vmatprep.subr.bf16.mxu0 %v7388_v46  ;;  %7891 = vmatprep.subr.bf16.mxu1 %v7390_v0  ;;  %v7312_v46 = vld [vmem:[#allocation4 + $0x1c8] sm:$0xff]  ;;  %v7309_v0 = vld [vmem:[#allocation4 + $0x1b0] sm:$0xff] }
0x21e5   :  { %7851 = vmatpush1.bf16.msra.mxu0 %v7387_v22  ;;  %7892 = vmatpush1.bf16.msra.mxu1 %v7389_v5  ;;  %v7311_v22 = vld [vmem:[#allocation4 + $0x1c0] sm:$0xff]  ;;  %v7340_v5 = vld [vmem:[#allocation4 + $0x2a8] sm:$0xff] }
0x21e6   :  { %7852 = vmatprep.subr.bf16.mxu0 %v7418_v59  ;;  %7893 = vmatprep.subr.bf16.mxu1 %v7420_v60  ;;  %v7342_v59 = vld [vmem:[#allocation4 + $0x2b8] sm:$0xff]  ;;  %v7339_v60 = vld [vmem:[#allocation4 + $0x2a0] sm:$0xff] }
0x21e9   :  { %7853 = vmatpush1.bf16.msra.mxu0 %v7417_v47  ;;  %7894 = vmatpush1.bf16.msra.mxu1 %v7419_v3  ;;  %v7341_v47 = vld [vmem:[#allocation4 + $0x2b0] sm:$0xff]  ;;  %v7370_v3 = vld [vmem:[#allocation4 + $0x398] sm:$0xff] }
0x21ea   :  { %7924 = vmatprep.subr.bf16.mxu0 %v7272_v45  ;;  %7965 = vmatprep.subr.bf16.mxu1 %v7274_v54  ;;  %v7372_v45 = vld [vmem:[#allocation4 + $0x3a8] sm:$0xff]  ;;  %v7369_v54 = vld [vmem:[#allocation4 + $0x390] sm:$0xff] }
0x21ec   :  { %8638 = vmatmul.mubr.msk.bf16.vlgmr.msra.gmra.mrb[120].mxu0 %vm490_vm8, %v14767_v6  ;;  %8639 = vmatmul.mubr.msk.bf16.vlgmr.msra.gmra.mrb[128].mxu1 %vm490_vm8, %v14767_v6 }
0x21ed   :  { %7925 = vmatpush1.bf16.msra.mxu0 %v7271_v50  ;;  %7966 = vmatpush1.bf16.msra.mxu1 %v7273_v23  ;;  %v7371_v50 = vld [vmem:[#allocation4 + $0x3a0] sm:$0xff]  ;;  %v7400_v23 = vld [vmem:[#allocation4 + $0x488] sm:$0xff] }
0x21ee   :  { %7926 = vmatprep.subr.bf16.mxu0 %v7302_v32  ;;  %7967 = vmatprep.subr.bf16.mxu1 %v7304_v19  ;;  %v7402_v32 = vld [vmem:[#allocation4 + $0x498] sm:$0xff]  ;;  %v7399_v19 = vld [vmem:[#allocation4 + $0x480] sm:$0xff] }
0x21ef   :  { %7956 = vmatprep.mubr.bf16.mxu0 %v15514_v42  ;;  %7997 = vmatprep.mubr.bf16.mxu1 %v15514_v42 }
0x21f1   :  { %7927 = vmatpush1.bf16.msra.mxu0 %v7301_v13  ;;  %7968 = vmatpush1.bf16.msra.mxu1 %v7303_v37  ;;  %v7401_v13 = vld [vmem:[#allocation4 + $0x490] sm:$0xff]  ;;  %v7430_v37 = vld [vmem:[#allocation4 + $0x578] sm:$0xff] }
0x21f2   :  { %7928 = vmatprep.subr.bf16.mxu0 %v7332_v34  ;;  %7969 = vmatprep.subr.bf16.mxu1 %v7334_v1  ;;  %v7432_v34 = vld [vmem:[#allocation4 + $0x588] sm:$0xff]  ;;  %v7429_v1 = vld [vmem:[#allocation4 + $0x570] sm:$0xff] }
0x21f5   :  { %7929 = vmatpush1.bf16.msra.mxu0 %v7331_v41  ;;  %7970 = vmatpush1.bf16.msra.mxu1 %v7333_v35  ;;  %v7431_v41 = vld [vmem:[#allocation4 + $0x580] sm:$0xff]  ;;  %v7284_v35 = vld [vmem:[#allocation4 + $0xe8] sm:$0xff] }
0x21f6   :  { %7930 = vmatprep.subr.bf16.mxu0 %v7362_v14  ;;  %7971 = vmatprep.subr.bf16.mxu1 %v7364_v36  ;;  %v7283_v14 = vld [vmem:[#allocation4 + $0xe0] sm:$0xff]  ;;  %v7314_v36 = vld [vmem:[#allocation4 + $0x1d8] sm:$0xff] }
0x21f9   :  { %7931 = vmatpush1.bf16.msra.mxu0 %v7361_v15  ;;  %7972 = vmatpush1.bf16.msra.mxu1 %v7363_v53  ;;  %v7313_v15 = vld [vmem:[#allocation4 + $0x1d0] sm:$0xff]  ;;  %v7344_v53 = vld [vmem:[#allocation4 + $0x2c8] sm:$0xff] }
0x21fa   :  { %7932 = vmatprep.subr.bf16.mxu0 %v7392_v43  ;;  %7973 = vmatprep.subr.bf16.mxu1 %v7394_v20  ;;  %v7343_v43 = vld [vmem:[#allocation4 + $0x2c0] sm:$0xff]  ;;  %v7374_v20 = vld [vmem:[#allocation4 + $0x3b8] sm:$0xff] }
0x21fd   :  { %7933 = vmatpush1.bf16.msra.mxu0 %v7391_v33  ;;  %7974 = vmatpush1.bf16.msra.mxu1 %v7393_v52  ;;  %v7373_v33 = vld [vmem:[#allocation4 + $0x3b0] sm:$0xff]  ;;  %v7404_v52 = vld [vmem:[#allocation4 + $0x4a8] sm:$0xff] }
0x21fe   :  { %7934 = vmatprep.subr.bf16.mxu0 %v7422_v9  ;;  %7975 = vmatprep.subr.bf16.mxu1 %v7424_v10  ;;  %v7403_v9 = vld [vmem:[#allocation4 + $0x4a0] sm:$0xff]  ;;  %v7434_v10 = vld [vmem:[#allocation4 + $0x598] sm:$0xff] }
0x2201   :  { %7935 = vmatpush1.bf16.msra.mxu0 %v7421_v17  ;;  %7976 = vmatpush1.bf16.msra.mxu1 %v7423_v26  ;;  %v7433_v17 = vld [vmem:[#allocation4 + $0x590] sm:$0xff] }
0x2202   :  { %8006 = vmatprep.subr.bf16.mxu0 %v7276_v24  ;;  %8047 = vmatprep.subr.bf16.mxu1 %v7278_v55 }
0x2204   :  { %8640 = vmatmul.mubr.msk.bf16.vlgmr.msra.gmra.mrb[124].mxu0 %vm490_vm8, %v14767_v6  ;;  %8641 = vmatmul.mubr.msk.bf16.vlgmr.msra.gmra.mrb[132].mxu1 %vm490_vm8, %v14767_v6 }
0x2205   :  { %8007 = vmatpush1.bf16.msra.mxu0 %v7275_v38  ;;  %8048 = vmatpush1.bf16.msra.mxu1 %v7277_v40 }
0x2206   :  { %8008 = vmatprep.subr.bf16.mxu0 %v7306_v31  ;;  %8049 = vmatprep.subr.bf16.mxu1 %v7308_v2 }
0x2207   :  { %8038 = vmatprep.mubr.bf16.mxu0 %v15514_v42  ;;  %8079 = vmatprep.mubr.bf16.mxu1 %v15514_v42 }
0x2209   :  { %8009 = vmatpush1.bf16.msra.mxu0 %v7305_v4  ;;  %8050 = vmatpush1.bf16.msra.mxu1 %v7307_v48 }
0x220a   :  { %8010 = vmatprep.subr.bf16.mxu0 %v7336_v11  ;;  %8051 = vmatprep.subr.bf16.mxu1 %v7338_v29 }
0x220d   :  { %8011 = vmatpush1.bf16.msra.mxu0 %v7335_v57  ;;  %8052 = vmatpush1.bf16.msra.mxu1 %v7337_v12 }
0x220e   :  { %8012 = vmatprep.subr.bf16.mxu0 %v7366_v58  ;;  %8053 = vmatprep.subr.bf16.mxu1 %v7368_v16 }
0x2211   :  { %8013 = vmatpush1.bf16.msra.mxu0 %v7365_v49  ;;  %8054 = vmatpush1.bf16.msra.mxu1 %v7367_v7 }
0x2212   :  { %8014 = vmatprep.subr.bf16.mxu0 %v7396_v63  ;;  %8055 = vmatprep.subr.bf16.mxu1 %v7398_v62 }
0x2215   :  { %8015 = vmatpush1.bf16.msra.mxu0 %v7395_v21  ;;  %8056 = vmatpush1.bf16.msra.mxu1 %v7397_v8 }
0x2216   :  { %8016 = vmatprep.subr.bf16.mxu0 %v7426_v61  ;;  %8057 = vmatprep.subr.bf16.mxu1 %v7428_v39 }
0x2219   :  { %8017 = vmatpush1.bf16.msra.mxu0 %v7425_v27  ;;  %8058 = vmatpush1.bf16.msra.mxu1 %v7427_v51 }
0x221a   :  { %8088 = vmatprep.subr.bf16.mxu0 %v7280_v44  ;;  %8129 = vmatprep.subr.bf16.mxu1 %v7282_v28 }
0x221c   :  { %8642 = vmatmul.mubr.msk.bf16.vlgmr.msra.gmra.mrb[128].mxu0 %vm490_vm8, %v14767_v6  ;;  %8643 = vmatmul.mubr.msk.bf16.vlgmr.msra.gmra.mrb[136].mxu1 %vm490_vm8, %v14767_v6 }
0x221d   :  { %8089 = vmatpush1.bf16.msra.mxu0 %v7279_v25  ;;  %8130 = vmatpush1.bf16.msra.mxu1 %v7281_v56 }
0x221e   :  { %8090 = vmatprep.subr.bf16.mxu0 %v7310_v18  ;;  %8131 = vmatprep.subr.bf16.mxu1 %v7312_v46 }
0x221f   :  { %8120 = vmatprep.mubr.bf16.mxu0 %v15514_v42  ;;  %8161 = vmatprep.mubr.bf16.mxu1 %v15514_v42 }
0x2221   :  { %8091 = vmatpush1.bf16.msra.mxu0 %v7309_v0  ;;  %8132 = vmatpush1.bf16.msra.mxu1 %v7311_v22 }
0x2222   :  { %8092 = vmatprep.subr.bf16.mxu0 %v7340_v5  ;;  %8133 = vmatprep.subr.bf16.mxu1 %v7342_v59 }
0x2225   :  { %8093 = vmatpush1.bf16.msra.mxu0 %v7339_v60  ;;  %8134 = vmatpush1.bf16.msra.mxu1 %v7341_v47 }
0x2226   :  { %8094 = vmatprep.subr.bf16.mxu0 %v7370_v3  ;;  %8135 = vmatprep.subr.bf16.mxu1 %v7372_v45 }
0x2229   :  { %8095 = vmatpush1.bf16.msra.mxu0 %v7369_v54  ;;  %8136 = vmatpush1.bf16.msra.mxu1 %v7371_v50 }
0x222a   :  { %8096 = vmatprep.subr.bf16.mxu0 %v7400_v23  ;;  %8137 = vmatprep.subr.bf16.mxu1 %v7402_v32 }
0x222d   :  { %8097 = vmatpush1.bf16.msra.mxu0 %v7399_v19  ;;  %8138 = vmatpush1.bf16.msra.mxu1 %v7401_v13 }
0x222e   :  { %8098 = vmatprep.subr.bf16.mxu0 %v7430_v37  ;;  %8139 = vmatprep.subr.bf16.mxu1 %v7432_v34 }
0x2231   :  { %8099 = vmatpush1.bf16.msra.mxu0 %v7429_v1  ;;  %8140 = vmatpush1.bf16.msra.mxu1 %v7431_v41  ;;  %v7435_v41 = vld [vmem:[%s15327_s8] sm:$0xff] }
0x2232   :  { %8170 = vmatprep.subr.bf16.mxu0 %v7284_v35  ;;  %v15516_v35 = vld [vmem:[#allocation17_spill] sm:$0xff] }
0x2234   :  { %8644 = vmatmul.mubr.msk.bf16.vlgmr.msra.gmra.mrb[132].mxu0 %vm490_vm8, %v14767_v6  ;;  %8645 = vmatmul.mubr.msk.bf16.vlgmr.msra.gmra.mrb[140].mxu1 %vm490_vm8, %v14767_v6 }
0x2235   :  { %8171 = vmatpush1.bf16.msra.mxu0 %v7283_v14  ;;  %8202 = vmatprep.mubr.bf16.mxu0 %v15514_v42  ;;  %v14868_v14 = vsub.s32 3, %v15516_v35 }
0x2236   :  { %8172 = vmatprep.subr.bf16.mxu0 %v7314_v36  ;;  %v14871_v36 = vsub.s32 4, %v15516_v35 }
0x2239   :  { %8173 = vmatpush1.bf16.msra.mxu0 %v7313_v15  ;;  %v14874_v15 = vsub.s32 6, %v15516_v35 }
0x223a   :  { %8174 = vmatprep.subr.bf16.mxu0 %v7344_v53 }
0x223d   :  { %8175 = vmatpush1.bf16.msra.mxu0 %v7343_v43 }
0x223e   :  { %8176 = vmatprep.subr.bf16.mxu0 %v7374_v20  ;;  %v14881_v20 = vsub.s32 5, %v15516_v35 }
0x2241   :  { %8177 = vmatpush1.bf16.msra.mxu0 %v7373_v33  ;;  %v14884_v33 = vsub.s32 7, %v15516_v35 }
0x2242   :  { %8178 = vmatprep.subr.bf16.mxu0 %v7404_v52 }
0x2245   :  { %8179 = vmatpush1.bf16.msra.mxu0 %v7403_v9 }
0x2246   :  { %8180 = vmatprep.subr.bf16.mxu0 %v7434_v10  ;;  %v7436_v10 = vld [vmem:[%s15327_s8 + $0x8] sm:$0xff] }
0x2249   :  { %8181 = vmatpush1.bf16.msra.mxu0 %v7433_v17 }
0x224c   :  { %8646 = vmatmul.mubr.msk.bf16.vlgmr.msra.gmra.mrb[136].mxu0 %vm490_vm8, %v14767_v6 }
0x2277   :  { %v14812_v42 = vpop.f32.mrb[108].mxu0  ;;  %v14814_v26 = vpop.f32.mrb[116].mxu1 }
0x2278   :  { %v14816_v24 = vpop.f32.mrb[109].mxu0  ;;  %v14818_v55 = vpop.f32.mrb[117].mxu1 }
0x2279   :  { %v7634_v38 = vpop.f32.mrb[110].mxu0  ;;  %v7675_v40 = vpop.f32.mrb[118].mxu1 }
0x227a   :  { %v7635_v31 = vpop.f32.mrb[111].mxu0  ;;  %v7676_v2 = vpop.f32.mrb[119].mxu1  ;;  %v15519_v40 = vld [vmem:[#allocation18_spill] sm:$0xff] }
0x227b   :  { %v7446_v31 = vrot.slane %v7435_v41, %v15519_v40  ;;  %v15520_v2 = vld [vmem:[#allocation19_spill] sm:$0xff] }
0x228f   :  { %v14820_v4 = vpop.f32.mrb[112].mxu0  ;;  %v14822_v48 = vpop.f32.mrb[120].mxu1 }
0x2290   :  { %v14824_v11 = vpop.f32.mrb[113].mxu0  ;;  %v14826_v29 = vpop.f32.mrb[121].mxu1 }
0x2291   :  { %v7716_v6 = vpop.f32.mrb[114].mxu0  ;;  %v7757_v57 = vpop.f32.mrb[122].mxu1 }
0x2292   :  { %v7717_v12 = vpop.f32.mrb[115].mxu0  ;;  %v7758_v58 = vpop.f32.mrb[123].mxu1  ;;  %v7450_v6 = vrot.slane %v7435_v41, %v15520_v2  ;;  %v7454_v57 = vrot.slane %v7435_v41, %v12368_v30 }
0x2293   :  { %v7458_v12 = vrot.slane %v7435_v41, %v14868_v14  ;;  %v7462_v58 = vrot.slane %v7435_v41, %v14871_v36 }
0x22a7   :  { %v14828_v16 = vpop.f32.mrb[116].mxu0  ;;  %v14830_v49 = vpop.f32.mrb[124].mxu1 }
0x22a8   :  { %v14832_v7 = vpop.f32.mrb[117].mxu0  ;;  %v14834_v63 = vpop.f32.mrb[125].mxu1 }
0x22a9   :  { %v7798_v62 = vpop.f32.mrb[118].mxu0  ;;  %v7839_v21 = vpop.f32.mrb[126].mxu1 }
0x22aa   :  { %v7799_v8 = vpop.f32.mrb[119].mxu0  ;;  %v7840_v61 = vpop.f32.mrb[127].mxu1  ;;  %v7470_v62 = vrot.slane %v7435_v41, %v14874_v15  ;;  %v7437_v21 = vld [vmem:[%s15327_s8 + $0x10] sm:$0xff] }
0x22ab   :  { %v7466_v8 = vrot.slane %v7435_v41, %v14881_v20  ;;  %v7474_v61 = vrot.slane %v7435_v41, %v14884_v33  ;;  %v7522_v41 = vrot.slane %v7437_v21, %v14868_v14  ;;  %v7526_v35 = vrot.slane %v7437_v21, %v14871_v36 }
0x22bf   :  { %v14836_v39 = vpop.f32.mrb[120].mxu0  ;;  %v14838_v27 = vpop.f32.mrb[128].mxu1 }
0x22c0   :  { %v14840_v51 = vpop.f32.mrb[121].mxu0  ;;  %v14842_v44 = vpop.f32.mrb[129].mxu1 }
0x22c1   :  { %v7880_v28 = vpop.f32.mrb[122].mxu0  ;;  %v7921_v25 = vpop.f32.mrb[130].mxu1 }
0x22c2   :  { %v7881_v56 = vpop.f32.mrb[123].mxu0  ;;  %v7922_v18 = vpop.f32.mrb[131].mxu1  ;;  %v7478_v28 = vrot.slane %v7436_v10, %v15519_v40  ;;  %v7486_v25 = vrot.slane %v7436_v10, %v12368_v30 }
0x22c3   :  { %v7482_v56 = vrot.slane %v7436_v10, %v15520_v2  ;;  %v7490_v18 = vrot.slane %v7436_v10, %v14868_v14 }
0x22d7   :  { %v14844_v46 = vpop.f32.mrb[124].mxu0  ;;  %v14846_v0 = vpop.f32.mrb[132].mxu1 }
0x22d8   :  { %v14848_v22 = vpop.f32.mrb[125].mxu0  ;;  %v14850_v5 = vpop.f32.mrb[133].mxu1 }
0x22d9   :  { %v7962_v59 = vpop.f32.mrb[126].mxu0  ;;  %v8003_v60 = vpop.f32.mrb[134].mxu1 }
0x22da   :  { %v7963_v47 = vpop.f32.mrb[127].mxu0  ;;  %v8004_v3 = vpop.f32.mrb[135].mxu1  ;;  %v7494_v59 = vrot.slane %v7436_v10, %v14871_v36  ;;  %v7502_v60 = vrot.slane %v7436_v10, %v14874_v15 }
0x22db   :  { %v7498_v47 = vrot.slane %v7436_v10, %v14881_v20  ;;  %v7506_v3 = vrot.slane %v7436_v10, %v14884_v33  ;;  %v14923_v10 = vadd.f32 %v14820_v4, %v7462_v58  ;;  %v14942_v4 = vadd.f32 %v14826_v29, %v7474_v61 }
0x22ef   :  { %v14852_v45 = vpop.f32.mrb[128].mxu0  ;;  %v14854_v54 = vpop.f32.mrb[136].mxu1 }
0x22f0   :  { %v14856_v50 = vpop.f32.mrb[129].mxu0  ;;  %v14858_v23 = vpop.f32.mrb[137].mxu1 }
0x22f1   :  { %v8044_v32 = vpop.f32.mrb[130].mxu0  ;;  %v8085_v19 = vpop.f32.mrb[138].mxu1 }
0x22f2   :  { %v8045_v13 = vpop.f32.mrb[131].mxu0  ;;  %v8086_v37 = vpop.f32.mrb[139].mxu1  ;;  %v7510_v32 = vrot.slane %v7437_v21, %v15519_v40  ;;  %v7518_v19 = vrot.slane %v7437_v21, %v12368_v30 }
0x22f3   :  { %v14913_v13 = vld [vmem:[%s15327_s8 + $0x18] sm:$0x3f]  ;;  %v7514_v37 = vrot.slane %v7437_v21, %v15520_v2 }
0x2307   :  { %v14860_v34 = vpop.f32.mrb[132].mxu0  ;;  %v14862_v1 = vpop.f32.mrb[140].mxu1 }
0x2308   :  { %15515 = vst [vmem:[#allocation15_spill] sm:$0xff] %v14862_v1  ;;  %v14876_v53 = vpop.f32.mrb[133].mxu0  ;;  %v14878_v43 = vpop.f32.mrb[141].mxu1  ;;  %v7538_v1 = vrot.slane %v7437_v21, %v14884_v33  ;;  %v7550_v33 = vrot.slane %v14913_v13, %v12368_v30  ;;  %v14972_v30 = vadd.f32 %v14838_v27, %v7502_v60  ;;  %v14989_v27 = vadd.f32 %v14846_v0, %v7518_v19 }
0x2309   :  { %15517 = vst [vmem:[#allocation23_spill] sm:$0xff] %v14876_v53  ;;  %15518 = vst [vmem:[#allocation20_spill] sm:$0xff] %v14878_v43  ;;  %v8126_v52 = vpop.f32.mrb[134].mxu0  ;;  %v8167_v9 = vpop.f32.mrb[142].mxu1  ;;  %v14930_v43 = vadd.f32 %v14812_v42, %v7446_v31  ;;  %v14933_v53 = vadd.f32 %v14824_v11, %v7466_v8  ;;  %v14948_v42 = vadd.f32 %v14830_v49, %v7486_v25 }
0x230a   :  { %v8127_v17 = vpop.f32.mrb[135].mxu0  ;;  %v8168_v38 = vpop.f32.mrb[143].mxu1  ;;  %v7534_v52 = vrot.slane %v7437_v21, %v14874_v15  ;;  %v14920_v9 = vadd.f32 %v14814_v26, %v7454_v57  ;;  %v7542_v26 = vrot.slane %v14913_v13, %v15519_v40  ;;  %v14939_v15 = vadd.f32 %v14818_v55, %v7458_v12 }
0x230b   :  { %v14926_v17 = vadd.f32 %v14822_v48, %v7470_v62  ;;  %v7530_v38 = vrot.slane %v7437_v21, %v14881_v20  ;;  %v14945_v48 = vadd.f32 %v14828_v16, %v7478_v28  ;;  %v7633_v11 = vadd.f32 %v14816_v24, %v7450_v6 }
0x230c   :  { %v14952_v31 = vadd.f32 %v14832_v7, %v7482_v56  ;;  %v7546_v55 = vrot.slane %v14913_v13, %v15520_v2  ;;  %v8211_v29 = vmax.f32 %v14930_v43, %v14923_v10  ;;  %v14963_v49 = vadd.f32 %v14834_v63, %v7490_v18 }
0x230d   :  { %v8213_v16 = vmax.f32 %v14920_v9, %v14926_v17  ;;  %v7554_v24 = vrot.slane %v14913_v13, %v14868_v14  ;;  %v8212_v7 = vmax.f32 %v7633_v11, %v14933_v53  ;;  %v14969_v40 = vadd.f32 %v14836_v39, %v7494_v59 }
0x230e   :  { %v14975_v2 = vadd.f32 %v14840_v51, %v7498_v47  ;;  %v8214_v6 = vmax.f32 %v14939_v15, %v14942_v4  ;;  %v8215_v63 = vmax.f32 %v8211_v29, %v14945_v48  ;;  %v14982_v14 = vadd.f32 %v14842_v44, %v7506_v3 }
0x230f   :  { %v8217_v57 = vmax.f32 %v8213_v16, %v14948_v42  ;;  %v8216_v12 = vmax.f32 %v8212_v7, %v14952_v31  ;;  %v14986_v39 = vadd.f32 %v14844_v46, %v7510_v32  ;;  %v14992_v51 = vadd.f32 %v14848_v22, %v7514_v37  ;;  %v15521_v59 = vld [vmem:[#allocation15_spill] sm:$0xff] }
0x2310   :  { %v8218_v58 = vmax.f32 %v8214_v6, %v14963_v49  ;;  %v14996_v62 = vadd.f32 %v14850_v5, %v7522_v41  ;;  %v7558_v44 = vrot.slane %v14913_v13, %v14871_v36  ;;  %v7562_v21 = vrot.slane %v14913_v13, %v14881_v20  ;;  %v15522_v60 = vld [vmem:[#allocation23_spill] sm:$0xff]  ;;  %v15523_v47 = vld [vmem:[#allocation20_spill] sm:$0xff] }
0x2311   :  { %v8219_v46 = vmax.f32 %v8215_v63, %v14969_v40  ;;  %v8221_v8 = vmax.f32 %v8217_v57, %v14972_v30  ;;  %v8220_v0 = vmax.f32 %v8216_v12, %v14975_v2  ;;  %v15006_v22 = vadd.f32 %v14852_v45, %v7526_v35 }
0x2312   :  { %v8222_v61 = vmax.f32 %v8218_v58, %v14982_v14  ;;  %v15010_v5 = vadd.f32 %v14854_v54, %v7534_v52  ;;  %v15013_v28 = vadd.f32 %v14856_v50, %v7530_v38  ;;  %v15016_v36 = vadd.f32 %v14858_v23, %v7538_v1 }
0x2313   :  { %v8223_v20 = vmax.f32 %v8219_v46, %v14986_v39  ;;  %v8225_v25 = vmax.f32 %v8221_v8, %v14989_v27  ;;  %v8224_v56 = vmax.f32 %v8220_v0, %v14992_v51  ;;  %v15022_v45 = vadd.f32 %v14860_v34, %v7542_v26 }
0x2314   :  { %v8226_v18 = vmax.f32 %v8222_v61, %v14996_v62  ;;  %v15026_v54 = vadd.f32 %v15521_v59, %v7550_v33  ;;  %v15029_v50 = vadd.f32 %v15522_v60, %v7546_v55  ;;  %v15032_v23 = vadd.f32 %v15523_v47, %v7554_v24 }
0x2315   :  { %v8227_v1 = vmax.f32 %v8223_v20, %v15006_v22  ;;  %v8229_v3 = vmax.f32 %v8225_v25, %v15010_v5  ;;  %v8228_v32 = vmax.f32 %v8224_v56, %v15013_v28 }
0x2316   :  { %v8230_v34 = vmax.f32 %v8226_v18, %v15016_v36 }
0x2317   :  { %v8231_v13 = vmax.f32 %v8227_v1, %v15022_v45  ;;  %v8233_v35 = vmax.f32 %v8229_v3, %v15026_v54  ;;  %v8232_v52 = vmax.f32 %v8228_v32, %v15029_v50 }
0x2318   :  { %v8234_v38 = vmax.f32 %v8230_v34, %v15032_v23 }
0x231a   :  { %v8238_v7 = vmax.f32 %v8233_v35, %v8234_v38 }
0x231f   :  { %v8204_v19 = vpop.f32.mrb[136].mxu0 }
0x2320   :  { %v15039_v37 = vadd.f32 %v8204_v19, %v7558_v44  ;;  %v8206_v41 = vpop.f32.mrb[137].mxu0 }
0x2321   :  { %v15044_v26 = vadd.f32 %v8206_v41, %v7562_v21  ;;  %v8208_v33 = vpop.f32.mrb[138].mxu0 }
0x2322   :  { %v8235_v55 = vmax.f32 %v8231_v13, %v15039_v37  ;;  %v8209_v29 = vpop.f32.mrb[139].mxu0 }
0x2323   :  { %v8236_v16 = vmax.f32 %v8232_v52, %v15044_v26 }
0x2325   :  { %v8237_v24 = vmax.f32 %v8235_v55, %v8236_v16 }
0x2327   :  { %v8239_v6 = vmax.f32 %v8237_v24, %v8238_v7 }
0x2329   :  { %8240 = vmax.xlane.f32.xlu0 %v8239_v6 }
0x23b6   :  { %v15048_v63 = vpop.xlane.xlu0 %8240 }
0x23b7   :  { %v15052_v57 = vsub.f32 %v14930_v43, %v15048_v63  ;;  %v15055_v12 = vsub.f32 %v7633_v11, %v15048_v63  ;;  %v15059_v58 = vsub.f32 %v14920_v9, %v15048_v63  ;;  %v15063_v44 = vsub.f32 %v14939_v15, %v15048_v63 }
0x23b8   :  { %v15069_v8 = vsub.f32 %v14923_v10, %v15048_v63  ;;  %v15074_v11 = vsub.f32 %v14933_v53, %v15048_v63  ;;  %v15079_v15 = vsub.f32 %v14926_v17, %v15048_v63  ;;  %v15084_v10 = vsub.f32 %v14942_v4, %v15048_v63 }
0x23b9   :  { %v8272_v21 = vmul.f32 1.442695, %v15052_v57  ;;  %v8274_v46 = vmul.f32 1.442695, %v15055_v12  ;;  %v8276_v43 = vmul.f32 1.442695, %v15059_v58  ;;  %v15089_v53 = vsub.f32 %v14945_v48, %v15048_v63 }
0x23ba   :  { %v8278_v9 = vmul.f32 1.442695, %v15063_v44  ;;  %v8280_v0 = vmul.f32 1.442695, %v15069_v8  ;;  %v8282_v61 = vmul.f32 1.442695, %v15074_v11  ;;  %v15094_v17 = vsub.f32 %v14952_v31, %v15048_v63 }
0x23bb   :  { %11956 = vpow2.f32 %v8272_v21  ;;  %v8284_v20 = vmul.f32 1.442695, %v15079_v15  ;;  %v8286_v25 = vmul.f32 1.442695, %v15084_v10  ;;  %v15099_v18 = vsub.f32 %v14948_v42, %v15048_v63 }
0x23bc   :  { %11958 = vpow2.f32 %v8274_v46  ;;  %v8288_v48 = vmul.f32 1.442695, %v15089_v53  ;;  %v15104_v47 = vsub.f32 %v14963_v49, %v15048_v63  ;;  %v8290_v31 = vmul.f32 1.442695, %v15094_v17 }
0x23bd   :  { %11960 = vpow2.f32 %v8276_v43  ;;  %v15109_v32 = vsub.f32 %v14969_v40, %v15048_v63  ;;  %v8292_v42 = vmul.f32 1.442695, %v15099_v18  ;;  %v15114_v13 = vsub.f32 %v14975_v2, %v15048_v63 }
0x23be   :  { %11962 = vpow2.f32 %v8278_v9  ;;  %v8294_v49 = vmul.f32 1.442695, %v15104_v47  ;;  %v15119_v52 = vsub.f32 %v14972_v30, %v15048_v63  ;;  %v15124_v55 = vsub.f32 %v14982_v14, %v15048_v63 }
0x23bf   :  { %11964 = vpow2.f32 %v8280_v0  ;;  %v8296_v40 = vmul.f32 1.442695, %v15109_v32  ;;  %v8298_v2 = vmul.f32 1.442695, %v15114_v13  ;;  %v15129_v24 = vsub.f32 %v14986_v39, %v15048_v63 }
0x23c0   :  { %11966 = vpow2.f32 %v8282_v61  ;;  %v8300_v30 = vmul.f32 1.442695, %v15119_v52  ;;  %v15134_v21 = vsub.f32 %v14992_v51, %v15048_v63  ;;  %v8302_v14 = vmul.f32 1.442695, %v15124_v55 }
0x23c1   :  { %11968 = vpow2.f32 %v8284_v20  ;;  %v15139_v9 = vsub.f32 %v14989_v27, %v15048_v63  ;;  %v8304_v39 = vmul.f32 1.442695, %v15129_v24  ;;  %v15144_v20 = vsub.f32 %v14996_v62, %v15048_v63 }
0x23c2   :  { %11970 = vpow2.f32 %v8286_v25  ;;  %v8306_v51 = vmul.f32 1.442695, %v15134_v21 }
0x23c3   :  { %11972 = vpow2.f32 %v8288_v48  ;;  %v8308_v27 = vmul.f32 1.442695, %v15139_v9  ;;  %v8310_v62 = vmul.f32 1.442695, %v15144_v20 }
0x23c4   :  { %11974 = vpow2.f32 %v8290_v31 }
0x23c5   :  { %v11957_v56 = vpop.eup %11956  ;;  %11976 = vpow2.f32 %v8292_v42 }
0x23c6   :  { %v11959_v4 = vpop.eup %11958  ;;  %11978 = vpow2.f32 %v8294_v49 }
0x23c7   :  { %v8332_v59 = vadd.f32 %v11959_v4, %v11957_v56  ;;  %v11961_v60 = vpop.eup %11960  ;;  %11980 = vpow2.f32 %v8296_v40  ;;  %v15149_v4 = vsub.f32 %v15006_v22, %v15048_v63 }
0x23c8   :  { %v11963_v3 = vpop.eup %11962  ;;  %11982 = vpow2.f32 %v8298_v2 }
0x23c9   :  { %v8333_v1 = vadd.f32 %v11961_v60, %v8332_v59  ;;  %v11965_v19 = vpop.eup %11964  ;;  %11984 = vpow2.f32 %v8300_v30  ;;  %v15154_v60 = vsub.f32 %v15013_v28, %v15048_v63  ;;  %v8312_v22 = vmul.f32 1.442695, %v15149_v4 }
0x23ca   :  { %v11967_v35 = vpop.eup %11966  ;;  %11986 = vpow2.f32 %v8302_v14 }
0x23cb   :  { %v8334_v34 = vadd.f32 %v11963_v3, %v8333_v1  ;;  %v11969_v33 = vpop.eup %11968  ;;  %11988 = vpow2.f32 %v8304_v39  ;;  %v15159_v3 = vsub.f32 %v15010_v5, %v15048_v63  ;;  %v8314_v28 = vmul.f32 1.442695, %v15154_v60 }
0x23cc   :  { %v11971_v16 = vpop.eup %11970  ;;  %11990 = vpow2.f32 %v8306_v51 }
0x23cd   :  { %v8335_v41 = vadd.f32 %v11965_v19, %v8334_v34  ;;  %v11973_v6 = vpop.eup %11972  ;;  %11992 = vpow2.f32 %v8308_v27  ;;  %v15164_v19 = vsub.f32 %v15016_v36, %v15048_v63  ;;  %v8316_v5 = vmul.f32 1.442695, %v15159_v3 }
0x23ce   :  { %v11975_v43 = vpop.eup %11974  ;;  %11994 = vpow2.f32 %v8310_v62 }
0x23cf   :  { %v8336_v38 = vadd.f32 %v11967_v35, %v8335_v41  ;;  %v11977_v61 = vpop.eup %11976  ;;  %v15169_v35 = vsub.f32 %v15022_v45, %v15048_v63  ;;  %11996 = vpow2.f32 %v8312_v22  ;;  %v8318_v36 = vmul.f32 1.442695, %v15164_v19 }
0x23d0   :  { %v11979_v56 = vpop.eup %11978  ;;  %11998 = vpow2.f32 %v8314_v28 }
0x23d1   :  { %v8337_v29 = vadd.f32 %v11969_v33, %v8336_v38  ;;  %v11981_v59 = vpop.eup %11980  ;;  %v15174_v33 = vsub.f32 %v15029_v50, %v15048_v63  ;;  %12000 = vpow2.f32 %v8316_v5  ;;  %v8320_v45 = vmul.f32 1.442695, %v15169_v35 }
0x23d2   :  { %v11983_v1 = vpop.eup %11982  ;;  %12002 = vpow2.f32 %v8318_v36 }
0x23d3   :  { %v8338_v7 = vadd.f32 %v11971_v16, %v8337_v29  ;;  %v11985_v34 = vpop.eup %11984  ;;  %v15179_v16 = vsub.f32 %v15026_v54, %v15048_v63  ;;  %v8322_v50 = vmul.f32 1.442695, %v15174_v33  ;;  %12004 = vpow2.f32 %v8320_v45 }
0x23d4   :  { %v11987_v41 = vpop.eup %11986 }
0x23d5   :  { %v8339_v46 = vadd.f32 %v11973_v6, %v8338_v7  ;;  %v11989_v38 = vpop.eup %11988  ;;  %v15184_v6 = vsub.f32 %v15032_v23, %v15048_v63  ;;  %v8324_v54 = vmul.f32 1.442695, %v15179_v16  ;;  %12006 = vpow2.f32 %v8322_v50 }
0x23d6   :  { %v11991_v29 = vpop.eup %11990 }
0x23d7   :  { %v8340_v0 = vadd.f32 %v11975_v43, %v8339_v46  ;;  %v11993_v7 = vpop.eup %11992  ;;  %v15189_v43 = vsub.f32 %v15039_v37, %v15048_v63  ;;  %v8326_v23 = vmul.f32 1.442695, %v15184_v6  ;;  %12008 = vpow2.f32 %v8324_v54 }
0x23d8   :  { %v11995_v46 = vpop.eup %11994 }
0x23d9   :  { %v8341_v25 = vadd.f32 %v11977_v61, %v8340_v0  ;;  %v11997_v0 = vpop.eup %11996  ;;  %v15194_v61 = vsub.f32 %v15044_v26, %v15048_v63  ;;  %12010 = vpow2.f32 %v8326_v23 }
0x23db   :  { %v8342_v48 = vadd.f32 %v11979_v56, %v8341_v25  ;;  %v11999_v25 = vpop.eup %11998  ;;  %v8328_v56 = vmul.f32 1.442695, %v15189_v43 }
0x23dc   :  { %v12001_v37 = vpop.eup %12000 }
0x23dd   :  { %v8343_v31 = vadd.f32 %v11981_v59, %v8342_v48  ;;  %v8330_v48 = vmul.f32 1.442695, %v15194_v61  ;;  %v12003_v62 = vpop.eup %12002  ;;  %12012 = vpow2.f32 %v8328_v56 }
0x23df   :  { %v8344_v42 = vadd.f32 %v11983_v1, %v8343_v31  ;;  %v12005_v1 = vpop.eup %12004  ;;  %12014 = vpow2.f32 %v8330_v48 }
0x23e0   :  { %v12007_v63 = vpop.eup %12006 }
0x23e1   :  { %v8345_v49 = vadd.f32 %v11985_v34, %v8344_v42  ;;  %v12009_v42 = vpop.eup %12008 }
0x23e3   :  { %v8346_v40 = vadd.f32 %v11987_v41, %v8345_v49  ;;  %v12011_v28 = vpop.eup %12010 }
0x23e5   :  { %v8347_v2 = vadd.f32 %v11989_v38, %v8346_v40 }
0x23e7   :  { %v8348_v30 = vadd.f32 %v11991_v29, %v8347_v2  ;;  %v12013_v41 = vpop.eup %12012 }
0x23e9   :  { %v8349_v14 = vadd.f32 %v11993_v7, %v8348_v30  ;;  %v12015_v40 = vpop.eup %12014 }
0x23eb   :  { %v8350_v39 = vadd.f32 %v11995_v46, %v8349_v14 }
0x23ed   :  { %v8351_v51 = vadd.f32 %v11997_v0, %v8350_v39 }
0x23ef   :  { %v8352_v27 = vadd.f32 %v11999_v25, %v8351_v51 }
0x23f1   :  { %v8353_v59 = vadd.f32 %v12001_v37, %v8352_v27 }
0x23f3   :  { %v8354_v31 = vadd.f32 %v12003_v62, %v8353_v59 }
0x23f5   :  { %v8355_v26 = vadd.f32 %v12005_v1, %v8354_v31 }
0x23f7   :  { %v8356_v22 = vadd.f32 %v12007_v63, %v8355_v26 }
0x23f9   :  { %v8357_v34 = vadd.f32 %v12009_v42, %v8356_v22 }
0x23fb   :  { %v8358_v49 = vadd.f32 %v12011_v28, %v8357_v34 }
0x23fd   :  { %v8359_v5 = vadd.f32 %v12013_v41, %v8358_v49 }
0x23ff   :  { %v8360_v38 = vadd.f32 %v12015_v40, %v8359_v5 }
0x2401   :  { %8361 = vadd.xlane.f32.xlu0 %v8360_v38 }
0x248e   :  { %v8362_v36 = vpop.xlane.xlu0 %8361 }
0x248f   :  { %12016 = vlog2.f32 %v8362_v36 }
0x2499   :  { %v12017_v2 = vpop.eup %12016 }
0x249a   :  { %v8364_v29 = vmul.f32 0.6931472, %v12017_v2 }
0x249c   :  { %v8365_v45 = vsub.f32 %v15052_v57, %v8364_v29  ;;  %v8366_v30 = vsub.f32 %v15055_v12, %v8364_v29  ;;  %v8367_v7 = vsub.f32 %v15059_v58, %v8364_v29  ;;  %v8368_v50 = vsub.f32 %v15063_v44, %v8364_v29 }
0x249d   :  { %v8369_v14 = vsub.f32 %v15069_v8, %v8364_v29  ;;  %v8370_v46 = vsub.f32 %v15074_v11, %v8364_v29  ;;  %v8371_v54 = vsub.f32 %v15079_v15, %v8364_v29  ;;  %v8372_v39 = vsub.f32 %v15084_v10, %v8364_v29 }
0x249e   :  { %v8373_v0 = vsub.f32 %v15089_v53, %v8364_v29  ;;  %v8374_v23 = vsub.f32 %v15094_v17, %v8364_v29  ;;  %v8375_v57 = vsub.f32 %v15099_v18, %v8364_v29  ;;  %v8376_v12 = vsub.f32 %v15104_v47, %v8364_v29  ;;  %8395 = vst [vmem:[%s15328_s9] sm:$0xff] %v8365_v45 }
0x249f   :  { %8396 = vst [vmem:[%s15328_s9 + $0x8] sm:$0xff] %v8366_v30  ;;  %8397 = vst [vmem:[%s15328_s9 + $0x10] sm:$0xff] %v8367_v7  ;;  %v8377_v58 = vsub.f32 %v15109_v32, %v8364_v29  ;;  %v8378_v44 = vsub.f32 %v15114_v13, %v8364_v29  ;;  %v8379_v8 = vsub.f32 %v15119_v52, %v8364_v29 }
0x24a0   :  { %8398 = vst [vmem:[%s15328_s9 + $0x18] sm:$0xff] %v8368_v50  ;;  %v8380_v11 = vsub.f32 %v15124_v55, %v8364_v29  ;;  %8399 = vst [vmem:[%s15328_s9 + $0x20] sm:$0xff] %v8369_v14  ;;  %v8381_v15 = vsub.f32 %v15129_v24, %v8364_v29  ;;  %v8382_v10 = vsub.f32 %v15134_v21, %v8364_v29 }
0x24a1   :  { %8400 = vst [vmem:[%s15328_s9 + $0x28] sm:$0xff] %v8370_v46  ;;  %8401 = vst [vmem:[%s15328_s9 + $0x30] sm:$0xff] %v8371_v54  ;;  %v8383_v53 = vsub.f32 %v15139_v9, %v8364_v29  ;;  %v8384_v17 = vsub.f32 %v15144_v20, %v8364_v29  ;;  %v8385_v18 = vsub.f32 %v15149_v4, %v8364_v29 }
0x24a2   :  { %8402 = vst [vmem:[%s15328_s9 + $0x38] sm:$0xff] %v8372_v39  ;;  %8403 = vst [vmem:[%s15328_s9 + $0x40] sm:$0xff] %v8373_v0  ;;  %v8386_v47 = vsub.f32 %v15154_v60, %v8364_v29  ;;  %v8387_v32 = vsub.f32 %v15159_v3, %v8364_v29  ;;  %v8388_v13 = vsub.f32 %v15164_v19, %v8364_v29 }
0x24a3   :  { %8404 = vst [vmem:[%s15328_s9 + $0x48] sm:$0xff] %v8374_v23  ;;  %8405 = vst [vmem:[%s15328_s9 + $0x50] sm:$0xff] %v8375_v57  ;;  %v8389_v52 = vsub.f32 %v15169_v35, %v8364_v29  ;;  %v8390_v55 = vsub.f32 %v15174_v33, %v8364_v29  ;;  %v8391_v24 = vsub.f32 %v15179_v16, %v8364_v29 }
0x24a4   :  { %8406 = vst [vmem:[%s15328_s9 + $0x58] sm:$0xff] %v8376_v12  ;;  %8407 = vst [vmem:[%s15328_s9 + $0x60] sm:$0xff] %v8377_v58  ;;  %v8392_v21 = vsub.f32 %v15184_v6, %v8364_v29  ;;  %v8393_v9 = vsub.f32 %v15189_v43, %v8364_v29  ;;  %v8394_v20 = vsub.f32 %v15194_v61, %v8364_v29 }
0x24a5   :  { %8408 = vst [vmem:[%s15328_s9 + $0x68] sm:$0xff] %v8378_v44  ;;  %8409 = vst [vmem:[%s15328_s9 + $0x70] sm:$0xff] %v8379_v8 }
0x24a6   :  { %8410 = vst [vmem:[%s15328_s9 + $0x78] sm:$0xff] %v8380_v11  ;;  %8411 = vst [vmem:[%s15328_s9 + $0x80] sm:$0xff] %v8381_v15 }
0x24a7   :  { %8412 = vst [vmem:[%s15328_s9 + $0x88] sm:$0xff] %v8382_v10  ;;  %8413 = vst [vmem:[%s15328_s9 + $0x90] sm:$0xff] %v8383_v53 }
0x24a8   :  { %8414 = vst [vmem:[%s15328_s9 + $0x98] sm:$0xff] %v8384_v17  ;;  %8415 = vst [vmem:[%s15328_s9 + $0xa0] sm:$0xff] %v8385_v18 }
0x24a9   :  { %8416 = vst [vmem:[%s15328_s9 + $0xa8] sm:$0xff] %v8386_v47  ;;  %8417 = vst [vmem:[%s15328_s9 + $0xb0] sm:$0xff] %v8387_v32 }
0x24aa   :  { %8418 = vst [vmem:[%s15328_s9 + $0xb8] sm:$0xff] %v8388_v13  ;;  %8419 = vst [vmem:[%s15328_s9 + $0xc0] sm:$0xff] %v8389_v52 }
0x24ab   :  { %8420 = vst [vmem:[%s15328_s9 + $0xc8] sm:$0xff] %v8390_v55  ;;  %8421 = vst [vmem:[%s15328_s9 + $0xd0] sm:$0xff] %v8391_v24 }
0x24ac   :  { %8422 = vst [vmem:[%s15328_s9 + $0xd8] sm:$0xff] %v8392_v21  ;;  %8423 = vst [vmem:[%s15328_s9 + $0xe0] sm:$0xff] %v8393_v9 }
0x24ad   :  { %8424 = vst [vmem:[%s15328_s9 + $0xe8] sm:$0xff] %v8394_v20 }
0x24ae   :  { %8429 = vsyncpa [#allocation7], 1 }
0x24af   :  { %8430 = vsyncpa [#allocation9], 1 }
0x24b0   :  { %8431 = vsyncmov [#allocation5] }
0x24b3   :  { %s8432_s8 = vpop.sfrf %8431 }
0x24b4   :  { %p8647_p2 = scmp.ne.s32.totalorder %s8432_s8, 0 }
0x24b6   :  { %8436 = shalt.err (%p8647_p2)  }

</bundles_post_ra>
